<compile_context>
chip_gen: v6e
topology: v6e:2x2x1
jax: 0.10.0
libtpu: 0.0.40
codegen_flags: <defaults>
</compile_context>

<pallas_src>
import functools
import math

import numpy as np
import jax
import jax.numpy as jnp
from jax import lax
from jax.experimental import pallas as pl
from jax.experimental.pallas import tpu as pltpu


def _round_up(a, b):
    return -(-a // b) * b


def _partwise_dp_kernel(x_ref, w_ref, t_ref, ph_ref, idm_ref, wp_ref, tp_ref,
                        enc_ref, proj_ref, *, n_chunks, chunk, k_pack):
    """One tile of TR "group rows"; each row packs k_pack points.

    x_ref    : (TR, 3K)     packed world-space points
    w_ref    : (3K, K*F)    block-diag (rotation * 2^freq) weights, F = n_out*D
    t_ref    : (1, K*F)     matching translations
    ph_ref   : (1, K*F)     phase (0 on identity/sin cols, pi/2 on cos cols)
    idm_ref  : (1, K*F)     1.0 on identity columns else 0.0
    wp_ref   : (3K, K*P)    block-diag rotation for the raw projection, P = n_out*3
    tp_ref   : (1, K*P)     matching translations
    enc_ref  : (TR, K*F)    encoding, already in final (bone, block, comp) order
    proj_ref : (TR, K*P)    bone-space coordinates, (bone, comp) order
    """

    def body(c, carry):
        r0 = pl.multiple_of(c * chunk, chunk)
        xc = x_ref[pl.ds(r0, chunk), :]                       # (CH, 3K)
        w = w_ref[...]
        t = t_ref[...]
        wp = wp_ref[...]
        tp = tp_ref[...]

        if k_pack >= 2:
            # Block-diagonal projection of all K packed points at once (MXU,
            # otherwise idle).  HIGHEST precision keeps f32 accuracy.
            z = jnp.dot(xc, w, preferred_element_type=jnp.float32,
                        precision=lax.Precision.HIGHEST) + t
            pr = jnp.dot(xc, wp, preferred_element_type=jnp.float32,
                         precision=lax.Precision.HIGHEST) + tp
        else:
            # K == 1 fallback: plain VPU broadcast FMAs (x has only 3 columns).
            z = (xc[:, 0:1] * w[0:1, :] + xc[:, 1:2] * w[1:2, :]
                 + xc[:, 2:3] * w[2:3, :] + t)
            pr = (xc[:, 0:1] * wp[0:1, :] + xc[:, 1:2] * wp[1:2, :]
                  + xc[:, 2:3] * wp[2:3, :] + tp)

        s = jnp.sin(z + ph_ref[...])                          # cos == sin(x + pi/2)
        enc = jnp.where(idm_ref[...] > 0.5, z, s)             # identity cols keep z
        enc_ref[pl.ds(r0, chunk), :] = enc.astype(enc_ref.dtype)
        proj_ref[pl.ds(r0, chunk), :] = pr
        return carry

    lax.fori_loop(0, n_chunks, body, 0)


def _pick_tile_rows(n_rows, bytes_per_row, requested_rows):
    """Tile rows: large enough to amortize the ~0.35us/step overhead, small
    enough that double-buffered I/O tiles + sin temporaries fit the 32 MiB
    scoped-VMEM limit we request (safe on v5e/v6e/v7x)."""
    budget = 16 * 1024 * 1024                       # double-buffered I/O budget
    max_rows = max(8, budget // (2 * bytes_per_row))
    tr = max(8, min(int(requested_rows), int(max_rows)))
    if n_rows >= 512:                               # >=2 grid steps -> both v7x cores
        tr = min(tr, -(-n_rows // 2))
    tr = min(tr, _round_up(n_rows, 8))              # don't allocate far past input
    if tr >= 256:
        tr = (tr // 256) * 256
        chunk = 256
    else:
        tr = _round_up(tr, 8)
        chunk = tr
    return tr, chunk


def partwise_dp_encode(x, rot_inv, trans_inv, *, min_deg=0, max_deg=4,
                       with_bkgd=True, rigid_clusters=None, block_n=8192,
                       out_dtype=jnp.float32):
    """JAX wrapper reproducing _PartWiseDPEncoder.forward (x_cov=None).

    x         : [..., 3] world-space points
    rot_inv   : [J, 3, 3] inverse bone rotations (R_b^{-1})
    trans_inv : [J, 3]    inverse bone translations (t_b^{-1})
    returns (x_enc [..., J(+1), D], x_proj [..., J(+1), 3]),  D = 3*(1+2L)
    """
    rot_inv = jnp.asarray(rot_inv, jnp.float32)
    trans_inv = jnp.asarray(trans_inv, jnp.float32)

    # rigid-cluster averaging is affine, so it commutes with the projection.
    if rigid_clusters is not None:
        rc = np.asarray(rigid_clusters)
        uniq = np.unique(rc)
        rot_inv = jnp.stack([rot_inv[rc == c].mean(axis=0) for c in uniq], axis=0)
        trans_inv = jnp.stack([trans_inv[rc == c].mean(axis=0) for c in uniq], axis=0)

    # with_bkgd -> append identity transform (reproduces x exactly).
    if with_bkgd:
        rot_inv = jnp.concatenate(
            [rot_inv, jnp.eye(3, dtype=jnp.float32)[None]], axis=0)
        trans_inv = jnp.concatenate(
            [trans_inv, jnp.zeros((1, 3), jnp.float32)], axis=0)

    n_out = rot_inv.shape[0]
    n_freqs = max_deg - min_deg
    enc_blocks = 1 + 2 * n_freqs
    d = 3 * enc_blocks
    f_cols = n_out * d                        # encoding features per point
    p_cols = n_out * 3                        # projection values per point

    batch_shape = x.shape[:-1]
    xf = jnp.asarray(x, jnp.float32).reshape(-1, 3)
    n_points = xf.shape[0]

    # ---- per-point column tables, column order = (bone, block, component)
    freqs = 2.0 ** jnp.arange(min_deg, max_deg, dtype=jnp.float32)          # (L,)
    scale = jnp.concatenate([jnp.ones((1,), jnp.float32), freqs, freqs])    # (1+2L,)
    w4 = rot_inv[:, None, :, :] * scale[None, :, None, None]    # (n_out, EB, comp, j)
    w_cols = jnp.transpose(w4, (3, 0, 1, 2)).reshape(3, f_cols)             # (3, F)
    t_cols = (trans_inv[:, None, :] * scale[None, :, None]).reshape(1, f_cols)
    phase_blk = jnp.concatenate(
        [jnp.zeros((1 + n_freqs,), jnp.float32),
         jnp.full((n_freqs,), 0.5 * math.pi, jnp.float32)])
    phase_cols = jnp.broadcast_to(
        phase_blk[None, :, None], (n_out, enc_blocks, 3)).reshape(1, f_cols)
    idm_blk = jnp.concatenate(
        [jnp.ones((1,), jnp.float32), jnp.zeros((2 * n_freqs,), jnp.float32)])
    idm_cols = jnp.broadcast_to(
        idm_blk[None, :, None], (n_out, enc_blocks, 3)).reshape(1, f_cols)
    wp_cols = jnp.transpose(rot_inv, (2, 0, 1)).reshape(3, p_cols)          # (3, P)
    tp_cols = trans_inv.reshape(1, p_cols)

    # ---- pack K points per row so the lane axis is ~dense (K*F mod 128 small)
    k_pack = 1
    for cand in (8, 4, 2):
        if n_points % cand == 0:
            k_pack = cand
            break
    kf = k_pack * f_cols
    kp = k_pack * p_cols
    n_rows = n_points // k_pack

    x2 = xf.reshape(n_rows, 3 * k_pack)                      # free reshape
    eye_k = jnp.eye(k_pack, dtype=jnp.float32)
    w_big = jnp.kron(eye_k, w_cols)                          # (3K, K*F) block-diag
    wp_big = jnp.kron(eye_k, wp_cols)                        # (3K, K*P) block-diag
    t_big = jnp.tile(t_cols, (1, k_pack))
    ph_big = jnp.tile(phase_cols, (1, k_pack))
    idm_big = jnp.tile(idm_cols, (1, k_pack))
    tp_big = jnp.tile(tp_cols, (1, k_pack))

    esize = jnp.dtype(out_dtype).itemsize
    bytes_per_row = 4 * 3 * k_pack + esize * kf + 4 * kp
    requested_rows = max(1, int(block_n) // k_pack)
    tr, chunk = _pick_tile_rows(n_rows, bytes_per_row, requested_rows)
    n_chunks = tr // chunk
    grid = (pl.cdiv(n_rows, tr),)

    kernel = functools.partial(_partwise_dp_kernel, n_chunks=n_chunks,
                               chunk=chunk, k_pack=k_pack)

    enc2d, proj2d = pl.pallas_call(
        kernel,
        out_shape=(jax.ShapeDtypeStruct((n_rows, kf), out_dtype),
                   jax.ShapeDtypeStruct((n_rows, kp), jnp.float32)),
        grid_spec=pltpu.PrefetchScalarGridSpec(
            num_scalar_prefetch=0,
            grid=grid,
            in_specs=[
                pl.BlockSpec((tr, 3 * k_pack), lambda i: (i, 0)),
                pl.BlockSpec((3 * k_pack, kf), lambda i: (0, 0)),
                pl.BlockSpec((1, kf), lambda i: (0, 0)),
                pl.BlockSpec((1, kf), lambda i: (0, 0)),
                pl.BlockSpec((1, kf), lambda i: (0, 0)),
                pl.BlockSpec((3 * k_pack, kp), lambda i: (0, 0)),
                pl.BlockSpec((1, kp), lambda i: (0, 0)),
            ],
            out_specs=[
                pl.BlockSpec((tr, kf), lambda i: (i, 0)),
                pl.BlockSpec((tr, kp), lambda i: (i, 0)),
            ],
        ),
        compiler_params=pltpu.CompilerParams(
            dimension_semantics=("parallel",),
            vmem_limit_bytes=32 * 1024 * 1024),
    )(x2, w_big, t_big, ph_big, idm_big, wp_big, tp_big)

    # Column order already is (bone, [id|sin|cos] block, component) and rows are
    # point-major, so these reshapes are free -- no XLA transpose anywhere.
    x_enc = enc2d.reshape(*batch_shape, n_out, d)
    x_proj = proj2d.reshape(*batch_shape, n_out, 3)
    return x_enc, x_proj


def _reference(x, rot_inv, trans_inv, min_deg, max_deg, with_bkgd):
    """Pure-JAX reference mirroring the PyTorch forward (x_cov=None)."""
    proj = jnp.einsum("bij,...j->...bi", rot_inv, x) + trans_inv          # [..., J, 3]
    if with_bkgd:
        proj = jnp.concatenate([proj, x[..., None, :]], axis=-2)          # [..., J+1, 3]
    scales = jnp.array([2.0 ** i for i in range(min_deg, max_deg)], jnp.float32)
    xb = (proj[..., None, :] * scales[:, None]).reshape(*proj.shape[:-1], -1)
    latent = jnp.sin(jnp.concatenate([xb, xb + 0.5 * jnp.pi], axis=-1))
    latent = jnp.concatenate([proj, latent], axis=-1)                     # use_identity
    return latent, proj


if __name__ == "__main__":
    key = jax.random.PRNGKey(0)
    k1, k2, k3, k4 = jax.random.split(key, 4)

    batch, n_rays = 2, 128            # N = 256 points (divisible by 8 -> packed path)
    n_transforms = 4                  # J bones
    min_deg, max_deg = 0, 4           # L = 4 -> D = 3 * (1 + 8) = 27

    x = jax.random.normal(k1, (batch, n_rays, 3), dtype=jnp.float32)

    # Deterministic synthetic inverse bone transforms: x'_b = R_b^T (x - t_b).
    a = jax.random.normal(k2, (n_transforms, 3, 3), dtype=jnp.float32)
    rot, _ = jnp.linalg.qr(a)
    trans = jax.random.normal(k3, (n_transforms, 3), dtype=jnp.float32)
    rot_inv = jnp.swapaxes(rot, -1, -2)
    trans_inv = -jnp.einsum("bij,bj->bi", rot_inv, trans)

    d = 3 * (1 + 2 * (max_deg - min_deg))

    # ---- f32, packed (K=8) main path --------------------------------------
    x_enc, x_proj = partwise_dp_encode(
        x, rot_inv, trans_inv, min_deg=min_deg, max_deg=max_deg,
        with_bkgd=True, rigid_clusters=None)
    jax.block_until_ready((x_enc, x_proj))

    ref_enc, ref_proj = _reference(x, rot_inv, trans_inv, min_deg, max_deg, True)
    assert x_proj.shape == (batch, n_rays, n_transforms + 1, 3), x_proj.shape
    assert x_enc.shape == (batch, n_rays, n_transforms + 1, d), x_enc.shape
    assert jnp.allclose(x_proj, ref_proj, atol=1e-4, rtol=1e-4), \
        float(jnp.max(jnp.abs(x_proj - ref_proj)))
    assert jnp.allclose(x_enc, ref_enc, atol=1e-4, rtol=1e-4), \
        float(jnp.max(jnp.abs(x_enc - ref_enc)))

    # ---- odd point count exercises the K=1 fallback + boundary block -------
    x_odd = jax.random.normal(k4, (77, 3), dtype=jnp.float32)
    enc_o, proj_o = partwise_dp_encode(
        x_odd, rot_inv, trans_inv, min_deg=min_deg, max_deg=max_deg, with_bkgd=True)
    jax.block_until_ready((enc_o, proj_o))
    ref_enc_o, ref_proj_o = _reference(x_odd, rot_inv, trans_inv, min_deg, max_deg, True)
    assert jnp.allclose(proj_o, ref_proj_o, atol=1e-4, rtol=1e-4)
    assert jnp.allclose(enc_o, ref_enc_o, atol=1e-4, rtol=1e-4)

    # ---- bf16 encoding output (halves dominant HBM write traffic) ----------
    enc_bf, proj_bf = partwise_dp_encode(
        x, rot_inv, trans_inv, min_deg=min_deg, max_deg=max_deg,
        with_bkgd=True, out_dtype=jnp.bfloat16)
    jax.block_until_ready((enc_bf, proj_bf))
    assert enc_bf.dtype == jnp.bfloat16
    assert jnp.allclose(enc_bf.astype(jnp.float32), ref_enc, atol=6e-2, rtol=3e-2)

    print("KERNEL_OK")
</pallas_src>

<mosaic_0001>
module attributes {stable_mosaic.version = 11 : i64} {
  func.func @_partwise_dp_kernel(%arg0: i32, %arg1: memref<32x24xf32, #tpu.memory_space<vmem>>, %arg2: memref<24x1080xf32, #tpu.memory_space<vmem>>, %arg3: memref<1x1080xf32, #tpu.memory_space<vmem>>, %arg4: memref<1x1080xf32, #tpu.memory_space<vmem>>, %arg5: memref<1x1080xf32, #tpu.memory_space<vmem>>, %arg6: memref<24x120xf32, #tpu.memory_space<vmem>>, %arg7: memref<1x120xf32, #tpu.memory_space<vmem>>, %arg8: memref<32x1080xf32, #tpu.memory_space<vmem>>, %arg9: memref<32x120xf32, #tpu.memory_space<vmem>>) attributes {dimension_semantics = [#tpu.dimension_semantics<parallel>], iteration_bounds = array<i64: 1>, scalar_prefetch = 0 : i64, scratch_operands = 0 : i64, tpu.core_type = #tpu.core_type<tc>, window_params = [{transform_indices = @transform_0, window_bounds = array<i64: 32, 24>}, {pipeline_mode = #tpu.pipeline_mode<synchronous>, transform_indices = @transform_1, window_bounds = array<i64: 24, 1080>}, {pipeline_mode = #tpu.pipeline_mode<synchronous>, transform_indices = @transform_2, window_bounds = array<i64: 1, 1080>}, {pipeline_mode = #tpu.pipeline_mode<synchronous>, transform_indices = @transform_3, window_bounds = array<i64: 1, 1080>}, {pipeline_mode = #tpu.pipeline_mode<synchronous>, transform_indices = @transform_4, window_bounds = array<i64: 1, 1080>}, {pipeline_mode = #tpu.pipeline_mode<synchronous>, transform_indices = @transform_5, window_bounds = array<i64: 24, 120>}, {pipeline_mode = #tpu.pipeline_mode<synchronous>, transform_indices = @transform_6, window_bounds = array<i64: 1, 120>}, {transform_indices = @transform_7, window_bounds = array<i64: 32, 1080>}, {transform_indices = @transform_8, window_bounds = array<i64: 32, 120>}]} {
    %c0_i32 = arith.constant 0 : i32
    %c32_i32 = arith.constant 32 : i32
    %0 = arith.muli %c0_i32, %c32_i32 : i32
    %1 = tpu.assume_multiple %0, 32 : i32
    %2 = arith.index_cast %1 : i32 to index
    %c0 = arith.constant 0 : index
    %3 = vector.load %arg1[%2, %c0] : memref<32x24xf32, #tpu.memory_space<vmem>>, vector<32x24xf32>
    %c0_0 = arith.constant 0 : index
    %c0_1 = arith.constant 0 : index
    %4 = vector.load %arg2[%c0_0, %c0_1] : memref<24x1080xf32, #tpu.memory_space<vmem>>, vector<24x1080xf32>
    %c0_2 = arith.constant 0 : index
    %c0_3 = arith.constant 0 : index
    %5 = vector.load %arg3[%c0_2, %c0_3] : memref<1x1080xf32, #tpu.memory_space<vmem>>, vector<1x1080xf32>
    %c0_4 = arith.constant 0 : index
    %c0_5 = arith.constant 0 : index
    %6 = vector.load %arg6[%c0_4, %c0_5] : memref<24x120xf32, #tpu.memory_space<vmem>>, vector<24x120xf32>
    %c0_6 = arith.constant 0 : index
    %c0_7 = arith.constant 0 : index
    %7 = vector.load %arg7[%c0_6, %c0_7] : memref<1x120xf32, #tpu.memory_space<vmem>>, vector<1x120xf32>
    %cst = arith.constant dense<0.000000e+00> : vector<32x1080xf32>
    %8 = tpu.matmul %3, %4, %cst {dimension_numbers = #tpu.dot_dimension_numbers<[1], [0], [0], [1], [0, 0, 1, 1], [], []>, precision = #tpu.contract_precision<fp32>} : vector<32x24xf32>, vector<24x1080xf32>, vector<32x1080xf32> -> vector<32x1080xf32>
    %9 = vector.broadcast %5 : vector<1x1080xf32> to vector<32x1080xf32>
    %10 = arith.addf %8, %9 : vector<32x1080xf32>
    %cst_8 = arith.constant dense<0.000000e+00> : vector<32x120xf32>
    %11 = tpu.matmul %3, %6, %cst_8 {dimension_numbers = #tpu.dot_dimension_numbers<[1], [0], [0], [1], [0, 0, 1, 1], [], []>, precision = #tpu.contract_precision<fp32>} : vector<32x24xf32>, vector<24x120xf32>, vector<32x120xf32> -> vector<32x120xf32>
    %12 = vector.broadcast %7 : vector<1x120xf32> to vector<32x120xf32>
    %13 = arith.addf %11, %12 : vector<32x120xf32>
    %c0_9 = arith.constant 0 : index
    %c0_10 = arith.constant 0 : index
    %14 = vector.load %arg4[%c0_9, %c0_10] : memref<1x1080xf32, #tpu.memory_space<vmem>>, vector<1x1080xf32>
    %15 = vector.broadcast %14 : vector<1x1080xf32> to vector<32x1080xf32>
    %16 = arith.addf %10, %15 : vector<32x1080xf32>
    %17 = math.sin %16 : vector<32x1080xf32>
    %c0_11 = arith.constant 0 : index
    %c0_12 = arith.constant 0 : index
    %18 = vector.load %arg5[%c0_11, %c0_12] : memref<1x1080xf32, #tpu.memory_space<vmem>>, vector<1x1080xf32>
    %cst_13 = arith.constant 5.000000e-01 : f32
    %19 = vector.broadcast %cst_13 : f32 to vector<1x1080xf32>
    %20 = arith.cmpf ogt, %18, %19 : vector<1x1080xf32>
    %21 = vector.shape_cast %20 : vector<1x1080xi1> to vector<1x1080xi1>
    %22 = vector.broadcast %21 : vector<1x1080xi1> to vector<32x1080xi1>
    %23 = arith.select %22, %10, %17 : vector<32x1080xi1>, vector<32x1080xf32>
    %24 = arith.index_cast %1 : i32 to index
    %c0_14 = arith.constant 0 : index
    %25 = vector.load %arg8[%24, %c0_14] : memref<32x1080xf32, #tpu.memory_space<vmem>>, vector<32x1080xf32>
    tpu.vector_store %arg8[%24, %c0_14], %23 {strides = array<i32>} : memref<32x1080xf32, #tpu.memory_space<vmem>>, vector<32x1080xf32>,
    %26 = arith.index_cast %1 : i32 to index
    %c0_15 = arith.constant 0 : index
    %27 = vector.load %arg9[%26, %c0_15] : memref<32x120xf32, #tpu.memory_space<vmem>>, vector<32x120xf32>
    tpu.vector_store %arg9[%26, %c0_15], %13 {strides = array<i32>} : memref<32x120xf32, #tpu.memory_space<vmem>>, vector<32x120xf32>,
    %c1_i32 = arith.constant 1 : i32
    return
  }
  func.func @transform_0(%arg0: i32) -> (i32, i32) {
    %c0_i32 = arith.constant 0 : i32
    %c0_i32_0 = arith.constant 0 : i32
    return %arg0, %c0_i32 : i32, i32
  }
  func.func @transform_1(%arg0: i32) -> (i32, i32) {
    %c0_i32 = arith.constant 0 : i32
    %c0_i32_0 = arith.constant 0 : i32
    %c0_i32_1 = arith.constant 0 : i32
    return %c0_i32, %c0_i32_0 : i32, i32
  }
  func.func @transform_2(%arg0: i32) -> (i32, i32) {
    %c0_i32 = arith.constant 0 : i32
    %c0_i32_0 = arith.constant 0 : i32
    %c0_i32_1 = arith.constant 0 : i32
    return %c0_i32, %c0_i32_0 : i32, i32
  }
  func.func @transform_3(%arg0: i32) -> (i32, i32) {
    %c0_i32 = arith.constant 0 : i32
    %c0_i32_0 = arith.constant 0 : i32
    %c0_i32_1 = arith.constant 0 : i32
    return %c0_i32, %c0_i32_0 : i32, i32
  }
  func.func @transform_4(%arg0: i32) -> (i32, i32) {
    %c0_i32 = arith.constant 0 : i32
    %c0_i32_0 = arith.constant 0 : i32
    %c0_i32_1 = arith.constant 0 : i32
    return %c0_i32, %c0_i32_0 : i32, i32
  }
  func.func @transform_5(%arg0: i32) -> (i32, i32) {
    %c0_i32 = arith.constant 0 : i32
    %c0_i32_0 = arith.constant 0 : i32
    %c0_i32_1 = arith.constant 0 : i32
    return %c0_i32, %c0_i32_0 : i32, i32
  }
  func.func @transform_6(%arg0: i32) -> (i32, i32) {
    %c0_i32 = arith.constant 0 : i32
    %c0_i32_0 = arith.constant 0 : i32
    %c0_i32_1 = arith.constant 0 : i32
    return %c0_i32, %c0_i32_0 : i32, i32
  }
  func.func @transform_7(%arg0: i32) -> (i32, i32) {
    %c0_i32 = arith.constant 0 : i32
    %c0_i32_0 = arith.constant 0 : i32
    return %arg0, %c0_i32 : i32, i32
  }
  func.func @transform_8(%arg0: i32) -> (i32, i32) {
    %c0_i32 = arith.constant 0 : i32
    %c0_i32_0 = arith.constant 0 : i32
    return %arg0, %c0_i32 : i32, i32
  }
}

</mosaic_0001>

<bundles_post_ra>
// kernel: tpu_custom_call.1
= control target key start
LH: loop header
LB: loop body
LE: loop exit
PB: predicated region body
PF: predicated region fallthrough
CT: control target
= control target key end

     0   :  { %14 = vsyncpa [#allocation3], 0  ;;  %s13605_s0 = inlined_call_operand.vmem [shape: f32[32,24], index: 0, kind: input, shape index: {}]   ;;  %s13606_s1 = inlined_call_operand.hbm [shape: f32[24,1080], index: 1, kind: input, shape index: {}]   ;;  %s13607_s2 = inlined_call_operand.vmem [shape: f32[1,1080], index: 2, kind: input, shape index: {}]   ;;  %s13608_s3 = inlined_call_operand.vmem [shape: f32[1,1080], index: 3, kind: input, shape index: {}]   ;;  %s13609_s4 = inlined_call_operand.vmem [shape: f32[1,1080], index: 4, kind: input, shape index: {}]   ;;  %s13610_s5 = inlined_call_operand.vmem [shape: f32[24,120], index: 5, kind: input, shape index: {}]   ;;  %s13611_s6 = inlined_call_operand.vmem [shape: f32[1,120], index: 6, kind: input, shape index: {}]   ;;  %s13612_s7 = inlined_call_operand.hbm [shape: f32[32,1080], index: 7, kind: output, shape index: {0}]   ;;  %s13613_s8 = inlined_call_operand.hbm [shape: f32[32,120], index: 8, kind: output, shape index: {1}]  }
   0x1   :  { %15 = vsyncpa [#allocation4], 0 }
   0x2   :  { %16 = vsyncpa [#allocation7], 0  ;;  %s8749_s27 = smov [#allocation2]  }
   0x3   :  { %s24_s28 = sshll.u32 %s8749_s27, 4  ;;  %s25_s28 = int_to_ptr.vmem [resolvable:$true] %s24_s28 }
   0x4   :  { %s8691_s29 = scalar_lea.vmem %s25_s28, 3456  ;;  %p8696_p1 = scmp.lt.s32.totalorder %s25_s28, %s25_s28 }
   0x5   :  { %p8692_p0 = scmp.ne.s32.totalorder %s25_s28, %s8691_s29  ;;  %p8697_p2 = scmp.lt.s32.totalorder %s8691_s29, %s8691_s29 }
   0x7   :  { %p8698_p3 = por %p8697_p2, %p8696_p1 }
   0x9   :  { %p8699_p4 = pnand %p8698_p3, %p8692_p0 }
   0xb   :  { %8702 = shalt.err (!%p8699_p4)
}
   0xc   :  { %s8750_s30 = smov 1152   ;;  %s8751_s9 = smov 72  }
   0xd   :  { %30 = dma.hbm_to_vmem [thread:$0]  %s13606_s1, 3456, %s25_s28, [#allocation3], %s8750_s30, %s8750_s30, %s8751_s9  }
   0xe   :  { %8743 = dma.done.wait [#allocation3], 3456  }
   0xf   :  { %8744 = vsyncadd [#allocation3], 4294963840  ;;  %v8752_v0 = vmov 0.0   ;;  %v67_v1 = vld [vmem:[#allocation2 + $0x98] sm:$0xff]  ;;  %v66_v2 = vld [vmem:[#allocation2 + $0x90] sm:$0xff]  ;;  %vm128_vm0 = vcmask 195584  }
  0x10   :  { %211 = vmatprep.mubr.f32.mxu0 %v8752_v0  ;;  %350 = vmatprep.mubr.f32.mxu1 %v8752_v0  ;;  %v58_v3 = vld [vmem:[#allocation2 + $0x50] sm:$0xff]  ;;  %v8817_v4 = vand.u32 4294901760, %v67_v1  ;;  %v8819_v5 = vand.u32 4294901760, %v66_v2  ;;  %v57_v7 = vld [vmem:[#allocation2 + $0x48] sm:$0xff]  ;;  %v48_v9 = vld [vmem:[#allocation2] sm:$0xff] }
  0x11   :  { %v8821_v6 = vand.u32 4294901760, %v58_v3  ;;  %v49_v8 = vld [vmem:[#allocation2 + $0x8] sm:$0xff]  ;;  %v8823_v10 = vand.u32 4294901760, %v57_v7  ;;  %v8827_v12 = vand.u32 4294901760, %v48_v9  ;;  %v44_v13 = vld [vmem:[%s13605_s0] sm:$0xff]  ;;  %v46_v39 = vld [vmem:[%s13605_s0 + $0x10] sm:$0xff] }
  0x12   :  { %v8825_v11 = vand.u32 4294901760, %v49_v8  ;;  %v45_v14 = vld [vmem:[%s13605_s0 + $0x8] sm:$0xff]  ;;  %168 = vmatprep.subr.mxu0 %v8817_v4  ;;  %v8837_v15 = vsub.f32 %v67_v1, %v8817_v4  ;;  %v130_v16 = vsel %vm128_vm0, %v44_v13, 0  ;;  %v8841_v17 = vsub.f32 %v66_v2, %v8819_v5  ;;  %v47_v40 = vld [vmem:[%s13605_s0 + $0x18] sm:$0xff] }
  0x13   :  { %v8844_v18 = vsub.f32 %v58_v3, %v8821_v6  ;;  %170 = vmatpush1.msra.mxu0 %v8819_v5  ;;  %v8847_v19 = vand.u32 4294901760, %v130_v16  ;;  %v8850_v20 = vsub.f32 %v57_v7, %v8823_v10  ;;  %v133_v22 = vsel %vm128_vm0, %v45_v14, 0  ;;  %v69_v1 = vld [vmem:[#allocation2 + $0xa8] sm:$0xff]  ;;  %v68_v7 = vld [vmem:[#allocation2 + $0xa0] sm:$0xff] }
  0x14   :  { %v8853_v21 = vsub.f32 %v49_v8, %v8825_v11  ;;  %172 = vmatprep.subr.mxu0 %v8821_v6  ;;  %v284_v23 = vand.u32 4294901760, %v8837_v15  ;;  %v290_v24 = vand.u32 4294901760, %v8841_v17  ;;  %v8860_v26 = vand.u32 4294901760, %v133_v22 }
  0x15   :  { %13672 = vst [vmem:[#allocation11_spill] sm:$0xff] %v8847_v19  ;;  %v296_v25 = vand.u32 4294901760, %v8844_v18  ;;  %174 = vmatpush1.msra.mxu0 %v8823_v10  ;;  %v8864_v27 = vsub.f32 %v130_v16, %v8847_v19  ;;  %v302_v28 = vand.u32 4294901760, %v8850_v20  ;;  %v8869_v30 = vsub.f32 %v48_v9, %v8827_v12  ;;  %v60_v9 = vld [vmem:[#allocation2 + $0x60] sm:$0xff]  ;;  %v51_v16 = vld [vmem:[#allocation2 + $0x18] sm:$0xff] }
  0x16   :  { %v308_v29 = vand.u32 4294901760, %v8853_v21  ;;  %176 = vmatprep.subr.mxu0 %v8825_v11  ;;  %v285_v31 = vsub.f32 %v8837_v15, %v284_v23  ;;  %v291_v32 = vsub.f32 %v8841_v17, %v290_v24  ;;  %v8882_v34 = vsub.f32 %v133_v22, %v8860_v26 }
  0x17   :  { %v297_v33 = vsub.f32 %v8844_v18, %v296_v25  ;;  %178 = vmatpush1.msra.mxu0 %v8827_v12  ;;  %v8886_v35 = vand.u32 4294901760, %v8864_v27  ;;  %v303_v36 = vsub.f32 %v8850_v20, %v302_v28  ;;  %v314_v38 = vand.u32 4294901760, %v8869_v30 }
  0x18   :  { %13673 = vst [vmem:[#allocation12_spill] sm:$0xff] %v8882_v34  ;;  %v309_v37 = vsub.f32 %v8853_v21, %v308_v29  ;;  %v286_v41 = vand.u32 4294901760, %v285_v31  ;;  %v292_v42 = vand.u32 4294901760, %v291_v32  ;;  %407 = vmatprep.subr.mxu0 %v8837_v15  ;;  %v8903_v44 = vand.u32 4294901760, %v8882_v34  ;;  %v59_v15 = vld [vmem:[#allocation2 + $0x58] sm:$0xff] }
  0x19   :  { %13674 = vst [vmem:[#allocation13_spill] sm:$0xff] %v8886_v35  ;;  %v298_v43 = vand.u32 4294901760, %v297_v33  ;;  %v215_v45 = vsub.f32 %v8864_v27, %v8886_v35  ;;  %v304_v46 = vand.u32 4294901760, %v303_v36  ;;  %v315_v47 = vsub.f32 %v8869_v30, %v314_v38 }
  0x1a   :  { %13675 = vst [vmem:[#allocation14_spill] sm:$0xff] %v8903_v44  ;;  %287 = vmatprep.subr.mxu1 %v286_v41  ;;  %v310_v48 = vand.u32 4294901760, %v309_v37  ;;  %v226_v49 = vsub.f32 %v8882_v34, %v8903_v44  ;;  %v136_v50 = vsel %vm128_vm0, %v46_v39, 0  ;;  %v139_v51 = vsel %vm128_vm0, %v47_v40, 0 }
  0x1b   :  { %v8914_v52 = vand.u32 4294901760, %v215_v45  ;;  %293 = vmatpush1.msra.mxu1 %v292_v42  ;;  %v316_v53 = vand.u32 4294901760, %v315_v47  ;;  %v8916_v54 = vand.u32 4294901760, %v136_v50  ;;  %v8918_v55 = vand.u32 4294901760, %v139_v51 }
  0x1c   :  { %299 = vmatprep.subr.mxu1 %v298_v43  ;;  %v8921_v56 = vand.u32 4294901760, %v226_v49  ;;  %v8961_v3 = vand.u32 4294901760, %v69_v1  ;;  %v8978_v13 = vand.u32 4294901760, %v68_v7  ;;  %v8986_v14 = vand.u32 4294901760, %v60_v9  ;;  %v71_v43 = vld [vmem:[#allocation2 + $0xb8] sm:$0xff] }
  0x1d   :  { %13676 = vst [vmem:[#allocation15_spill] sm:$0xff] %v8916_v54  ;;  %13677 = vst [vmem:[#allocation16_spill] sm:$0xff] %v8918_v55  ;;  %217 = vmatmul.mubr.f32.vlgmr.msra.gmra.mxu0 %v8914_v52  ;;  %305 = vmatpush1.msra.mxu1 %v304_v46  ;;  %v8924_v57 = vsub.f32 %v136_v50, %v8916_v54  ;;  %v8927_v58 = vsub.f32 %v139_v51, %v8918_v55  ;;  %v9009_v22 = vand.u32 4294901760, %v51_v16  ;;  %v70_v46 = vld [vmem:[#allocation2 + $0xb0] sm:$0xff] }
  0x1e   :  { %222 = vmatprep.mubr.f32.mxu0 %v8752_v0  ;;  %311 = vmatprep.subr.mxu1 %v310_v48  ;;  %v8973_v8 = vsub.f32 %v69_v1, %v8961_v3  ;;  %v9102_v45 = vand.u32 4294901760, %v71_v43  ;;  %v62_v48 = vld [vmem:[#allocation2 + $0x70] sm:$0xff]  ;;  %v9116_v49 = vand.u32 4294901760, %v70_v46 }
  0x1f   :  { %13678 = vst [vmem:[#allocation17_spill] sm:$0xff] %v8924_v57  ;;  %13679 = vst [vmem:[#allocation18_spill] sm:$0xff] %v8927_v58  ;;  %317 = vmatpush1.msra.mxu1 %v316_v53  ;;  %410 = vmatpush1.msra.mxu0 %v8841_v17  ;;  %v8932_v59 = vand.u32 4294901760, %v8924_v57  ;;  %v8935_v60 = vand.u32 4294901760, %v8927_v58  ;;  %v8994_v17 = vsub.f32 %v68_v7, %v8978_v13  ;;  %v9124_v51 = vand.u32 4294901760, %v62_v48  ;;  %v61_v53 = vld [vmem:[#allocation2 + $0x68] sm:$0xff] }
  0x20   :  { %352 = vmatmul.mubr.f32.vlgmr.msra.gmra.mxu1 %v8847_v19  ;;  %515 = vmatprep.subr.mxu1 %v8817_v4  ;;  %v9111_v47 = vsub.f32 %v71_v43, %v9102_v45  ;;  %v9136_v1 = vand.u32 4294901760, %v61_v53 }
  0x21   :  { %13680 = vst [vmem:[#allocation19_spill] sm:$0xff] %v8932_v59  ;;  %13681 = vst [vmem:[#allocation20_spill] sm:$0xff] %v8935_v60  ;;  %228 = vmatmul.mubr.f32.gmra.mxu0 %v8921_v56  ;;  %517 = vmatpush1.msra.mxu1 %v8819_v5  ;;  %v237_v61 = vsub.f32 %v8924_v57, %v8932_v59  ;;  %v248_v62 = vsub.f32 %v8927_v58, %v8935_v60 }
  0x22   :  { %233 = vmatprep.mubr.f32.mxu0 %v8752_v0  ;;  %357 = vmatprep.mubr.f32.mxu1 %v8752_v0  ;;  %v1612_v50 = vand.u32 4294901760, %v9111_v47  ;;  %v9145_v7 = vsub.f32 %v62_v48, %v9124_v51  ;;  %v54_v48 = vld [vmem:[#allocation2 + $0x30] sm:$0xff] }
  0x23   :  { %v8947_v63 = vand.u32 4294901760, %v237_v61  ;;  %413 = vmatprep.subr.mxu0 %v8844_v18  ;;  %519 = vmatprep.subr.mxu1 %v8821_v6  ;;  %v8954_v2 = vand.u32 4294901760, %v248_v62  ;;  %v8998_v18 = vand.u32 4294901760, %v59_v15  ;;  %v53_v61 = vld [vmem:[#allocation2 + $0x28] sm:$0xff]  ;;  %v9132_v62 = vsub.f32 %v70_v46, %v9116_v49 }
  0x24   :  { %359 = vmatmul.mubr.f32.gmra.mxu1 %v8860_v26  ;;  %416 = vmatpush1.msra.mxu0 %v8850_v20 }
  0x25   :  { %239 = vmatmul.mubr.f32.gmra.mxu0 %v8947_v63  ;;  %364 = vmatprep.mubr.f32.mxu1 %v8752_v0 }
  0x26   :  { %244 = vmatprep.mubr.f32.mxu0 %v8752_v0  ;;  %521 = vmatpush1.msra.mxu1 %v8823_v10 }
  0x27   :  { %419 = vmatprep.subr.mxu0 %v8853_v21  ;;  %523 = vmatprep.subr.mxu1 %v8825_v11  ;;  %v9020_v21 = vsub.f32 %v59_v15, %v8998_v18 }
  0x28   :  { %366 = vmatmul.mubr.f32.gmra.mxu1 %v8916_v54  ;;  %422 = vmatpush1.msra.mxu0 %v8869_v30 }
  0x29   :  { %250 = vmatmul.mubr.f32.gmra.mxu0 %v8954_v2  ;;  %371 = vmatprep.mubr.f32.mxu1 %v8752_v0 }
  0x2a   :  { %455 = vmatprep.mubr.f32.mxu0 %v8752_v0  ;;  %525 = vmatpush1.msra.mxu1 %v8827_v12 }
  0x2b   :  { %624 = vmatprep.subr.mxu0 %v284_v23  ;;  %733 = vmatprep.subr.mxu1 %v8817_v4  ;;  %v948_v4 = vand.u32 4294901760, %v8973_v8  ;;  %v50_v23 = vld [vmem:[#allocation2 + $0x10] sm:$0xff] }
  0x2c   :  { %373 = vmatmul.mubr.f32.gmra.mxu1 %v8918_v55 }
  0x2d   :  { %458 = vmatmul.mubr.f32.vlgmr.msra.gmra.mxu0 %v8864_v27  ;;  %558 = vmatprep.mubr.f32.mxu1 %v8752_v0  ;;  %v949_v20 = vsub.f32 %v8973_v8, %v948_v4 }
  0x2e   :  { %463 = vmatprep.mubr.f32.mxu0 %v8752_v0  ;;  %628 = vmatpush1.msra.mxu0 %v290_v24  ;;  %v9022_v24 = vand.u32 4294901760, %v50_v23 }
  0x2f   :  { %632 = vmatprep.subr.mxu0 %v296_v25  ;;  %v950_v25 = vand.u32 4294901760, %v949_v20 }
  0x30   :  { %562 = vmatmul.mubr.f32.vlgmr.msra.gmra.mxu1 %v8886_v35  ;;  %636 = vmatpush1.msra.mxu0 %v302_v28  ;;  %v9040_v30 = vsub.f32 %v50_v23, %v9022_v24 }
  0x31   :  { %466 = vmatmul.mubr.f32.gmra.mxu0 %v8882_v34  ;;  %735 = vmatpush1.msra.mxu1 %v8819_v5  ;;  %v9007_v5 = vsub.f32 %v60_v9, %v8986_v14  ;;  %v52_v9 = vld [vmem:[#allocation2 + $0x20] sm:$0xff] }
  0x32   :  { %471 = vmatprep.mubr.f32.mxu0 %v8752_v0  ;;  %567 = vmatprep.mubr.f32.mxu1 %v8752_v0  ;;  %v978_v36 = vand.u32 4294901760, %v9040_v30 }
  0x33   :  { %737 = vmatprep.subr.mxu1 %v8821_v6  ;;  %640 = vmatprep.subr.mxu0 %v308_v29  ;;  %v954_v6 = vand.u32 4294901760, %v8994_v17  ;;  %v960_v28 = vand.u32 4294901760, %v9007_v5  ;;  %v9028_v29 = vsub.f32 %v51_v16, %v9009_v22  ;;  %v1624_v16 = vand.u32 4294901760, %v9145_v7 }
  0x34   :  { %571 = vmatmul.mubr.f32.gmra.mxu1 %v8903_v44  ;;  %644 = vmatpush1.msra.mxu0 %v314_v38  ;;  %v979_v40 = vsub.f32 %v9040_v30, %v978_v36 }
  0x35   :  { %474 = vmatmul.mubr.f32.gmra.mxu0 %v8924_v57  ;;  %576 = vmatprep.mubr.f32.mxu1 %v8752_v0  ;;  %v961_v31 = vsub.f32 %v9007_v5, %v960_v28  ;;  %v972_v32 = vand.u32 4294901760, %v9028_v29 }
  0x36   :  { %479 = vmatprep.mubr.f32.mxu0 %v8752_v0  ;;  %739 = vmatpush1.msra.mxu1 %v8823_v10  ;;  %v955_v10 = vsub.f32 %v8994_v17, %v954_v6  ;;  %v980_v42 = vand.u32 4294901760, %v979_v40  ;;  %v63_v40 = vld [vmem:[#allocation2 + $0x78] sm:$0xff] }
  0x37   :  { %741 = vmatprep.subr.mxu1 %v8825_v11  ;;  %832 = vmatprep.subr.mxu0 %v8961_v3  ;;  %v966_v11 = vand.u32 4294901760, %v9020_v21  ;;  %v962_v37 = vand.u32 4294901760, %v961_v31  ;;  %v973_v38 = vsub.f32 %v9028_v29, %v972_v32  ;;  %v73_v31 = vld [vmem:[#allocation2 + $0xc8] sm:$0xff]  ;;  %v9274_v43 = vand.u32 4294901760, %v63_v40 }
  0x38   :  { %580 = vmatmul.mubr.f32.gmra.mxu1 %v8932_v59  ;;  %v956_v33 = vand.u32 4294901760, %v955_v10 }
  0x39   :  { %482 = vmatmul.mubr.f32.gmra.mxu0 %v8927_v58  ;;  %585 = vmatprep.mubr.f32.mxu1 %v8752_v0  ;;  %v974_v41 = vand.u32 4294901760, %v973_v38 }
  0x3a   :  { %677 = vmatprep.mubr.f32.mxu0 %v8752_v0  ;;  %743 = vmatpush1.msra.mxu1 %v8827_v12  ;;  %v967_v12 = vsub.f32 %v9020_v21, %v966_v11 }
  0x3b   :  { %951 = vmatprep.subr.mxu1 %v950_v25 }
  0x3c   :  { %589 = vmatmul.mubr.f32.gmra.mxu1 %v8935_v60  ;;  %v968_v39 = vand.u32 4294901760, %v967_v12 }
  0x3d   :  { %679 = vmatmul.mubr.f32.vlgmr.msra.gmra.mxu0 %v8847_v19  ;;  %776 = vmatprep.mubr.f32.mxu1 %v8752_v0 }
  0x3e   :  { %684 = vmatprep.mubr.f32.mxu0 %v8752_v0  ;;  %834 = vmatpush1.msra.mxu0 %v8978_v13 }
  0x3f   :  { %836 = vmatprep.subr.mxu0 %v8986_v14 }
  0x40   :  { %778 = vmatmul.mubr.f32.vlgmr.msra.gmra.mxu1 %v8847_v19  ;;  %838 = vmatpush1.msra.mxu0 %v8998_v18 }
  0x41   :  { %686 = vmatmul.mubr.f32.gmra.mxu0 %v8860_v26  ;;  %957 = vmatpush1.msra.mxu1 %v956_v33  ;;  %v72_v33 = vld [vmem:[#allocation2 + $0xc0] sm:$0xff] }
  0x42   :  { %691 = vmatprep.mubr.f32.mxu0 %v8752_v0  ;;  %783 = vmatprep.mubr.f32.mxu1 %v8752_v0 }
  0x43   :  { %963 = vmatprep.subr.mxu1 %v962_v37  ;;  %840 = vmatprep.subr.mxu0 %v9009_v22  ;;  %v9254_v37 = vand.u32 4294901760, %v72_v33 }
  0x44   :  { %785 = vmatmul.mubr.f32.gmra.mxu1 %v8860_v26  ;;  %842 = vmatpush1.msra.mxu0 %v9022_v24 }
  0x45   :  { %693 = vmatmul.mubr.f32.gmra.mxu0 %v8916_v54  ;;  %790 = vmatprep.mubr.f32.mxu1 %v8752_v0 }
  0x46   :  { %698 = vmatprep.mubr.f32.mxu0 %v8752_v0  ;;  %969 = vmatpush1.msra.mxu1 %v968_v39 }
  0x47   :  { %975 = vmatprep.subr.mxu1 %v974_v41  ;;  %1071 = vmatprep.subr.mxu0 %v8973_v8  ;;  %v9147_v8 = vand.u32 4294901760, %v53_v61  ;;  %v55_v41 = vld [vmem:[#allocation2 + $0x38] sm:$0xff] }
  0x48   :  { %792 = vmatmul.mubr.f32.gmra.mxu1 %v8916_v54 }
  0x49   :  { %700 = vmatmul.mubr.f32.gmra.mxu0 %v8918_v55  ;;  %797 = vmatprep.mubr.f32.mxu1 %v8752_v0 }
  0x4a   :  { %875 = vmatprep.mubr.f32.mxu0 %v8752_v0  ;;  %981 = vmatpush1.msra.mxu1 %v980_v42  ;;  %v9270_v42 = vsub.f32 %v72_v33, %v9254_v37 }
  0x4b   :  { %1179 = vmatprep.subr.mxu1 %v8961_v3 }
  0x4c   :  { %799 = vmatmul.mubr.f32.gmra.mxu1 %v8918_v55 }
  0x4d   :  { %881 = vmatmul.mubr.f32.vlgmr.msra.gmra.mxu0 %v8914_v52  ;;  %1014 = vmatprep.mubr.f32.mxu1 %v8752_v0 }
  0x4e   :  { %886 = vmatprep.mubr.f32.mxu0 %v8752_v0  ;;  %1074 = vmatpush1.msra.mxu0 %v8994_v17  ;;  %v9166_v17 = vsub.f32 %v53_v61, %v9147_v8 }
  0x4f   :  { %1077 = vmatprep.subr.mxu0 %v9007_v5 }
  0x50   :  { %1016 = vmatmul.mubr.f32.vlgmr.msra.gmra.mxu1 %v8847_v19  ;;  %1080 = vmatpush1.msra.mxu0 %v9020_v21  ;;  %v1636_v23 = vand.u32 4294901760, %v9166_v17 }
  0x51   :  { %892 = vmatmul.mubr.f32.gmra.mxu0 %v8921_v56  ;;  %1181 = vmatpush1.msra.mxu1 %v8978_v13 }
  0x52   :  { %897 = vmatprep.mubr.f32.mxu0 %v8752_v0  ;;  %1021 = vmatprep.mubr.f32.mxu1 %v8752_v0 }
  0x53   :  { %1183 = vmatprep.subr.mxu1 %v8986_v14  ;;  %1083 = vmatprep.subr.mxu0 %v9028_v29 }
  0x54   :  { %1023 = vmatmul.mubr.f32.gmra.mxu1 %v8860_v26  ;;  %1086 = vmatpush1.msra.mxu0 %v9040_v30 }
  0x55   :  { %903 = vmatmul.mubr.f32.gmra.mxu0 %v8947_v63  ;;  %1028 = vmatprep.mubr.f32.mxu1 %v8752_v0 }
  0x56   :  { %908 = vmatprep.mubr.f32.mxu0 %v8752_v0  ;;  %1185 = vmatpush1.msra.mxu1 %v8998_v18 }
  0x57   :  { %1187 = vmatprep.subr.mxu1 %v9009_v22  ;;  %1288 = vmatprep.subr.mxu0 %v948_v4  ;;  %v9158_v4 = vsub.f32 %v61_v53, %v9136_v1 }
  0x58   :  { %1030 = vmatmul.mubr.f32.gmra.mxu1 %v8916_v54 }
  0x59   :  { %914 = vmatmul.mubr.f32.gmra.mxu0 %v8954_v2  ;;  %1035 = vmatprep.mubr.f32.mxu1 %v8752_v0  ;;  %v1630_v20 = vand.u32 4294901760, %v9158_v4 }
  0x5a   :  { %1119 = vmatprep.mubr.f32.mxu0 %v8752_v0  ;;  %1189 = vmatpush1.msra.mxu1 %v9022_v24 }
  0x5b   :  { %1397 = vmatprep.subr.mxu1 %v8961_v3  ;;  %v1613_v3 = vsub.f32 %v9111_v47, %v1612_v50  ;;  %v1631_v21 = vsub.f32 %v9158_v4, %v1630_v20 }
  0x5c   :  { %1037 = vmatmul.mubr.f32.gmra.mxu1 %v8918_v55 }
  0x5d   :  { %1122 = vmatmul.mubr.f32.vlgmr.msra.gmra.mxu0 %v8864_v27  ;;  %1222 = vmatprep.mubr.f32.mxu1 %v8752_v0  ;;  %v1614_v15 = vand.u32 4294901760, %v1613_v3  ;;  %v1632_v29 = vand.u32 4294901760, %v1631_v21  ;;  %v65_v21 = vld [vmem:[#allocation2 + $0x88] sm:$0xff] }
  0x5e   :  { %1127 = vmatprep.mubr.f32.mxu0 %v8752_v0  ;;  %1292 = vmatpush1.msra.mxu0 %v954_v6 }
  0x5f   :  { %1296 = vmatprep.subr.mxu0 %v960_v28  ;;  %v1637_v28 = vsub.f32 %v9166_v17, %v1636_v23 }
  0x60   :  { %1226 = vmatmul.mubr.f32.vlgmr.msra.gmra.mxu1 %v8886_v35  ;;  %1300 = vmatpush1.msra.mxu0 %v966_v11 }
  0x61   :  { %1130 = vmatmul.mubr.f32.gmra.mxu0 %v8882_v34  ;;  %1399 = vmatpush1.msra.mxu1 %v8978_v13  ;;  %v1618_v13 = vand.u32 4294901760, %v9132_v62  ;;  %v1638_v11 = vand.u32 4294901760, %v1637_v28  ;;  %v56_v28 = vld [vmem:[#allocation2 + $0x40] sm:$0xff] }
  0x62   :  { %1135 = vmatprep.mubr.f32.mxu0 %v8752_v0  ;;  %1231 = vmatprep.mubr.f32.mxu1 %v8752_v0 }
  0x63   :  { %1401 = vmatprep.subr.mxu1 %v8986_v14  ;;  %1304 = vmatprep.subr.mxu0 %v972_v32  ;;  %v9160_v14 = vand.u32 4294901760, %v52_v9  ;;  %v9240_v32 = vand.u32 4294901760, %v73_v31 }
  0x64   :  { %1235 = vmatmul.mubr.f32.gmra.mxu1 %v8903_v44  ;;  %1308 = vmatpush1.msra.mxu0 %v978_v36  ;;  %v64_v36 = vld [vmem:[#allocation2 + $0x80] sm:$0xff] }
  0x65   :  { %1138 = vmatmul.mubr.f32.gmra.mxu0 %v8924_v57  ;;  %1240 = vmatprep.mubr.f32.mxu1 %v8752_v0  ;;  %v9178_v5 = vsub.f32 %v52_v9, %v9160_v14  ;;  %v9249_v12 = vsub.f32 %v73_v31, %v9240_v32  ;;  %v9262_v39 = vand.u32 4294901760, %v64_v36 }
  0x66   :  { %1143 = vmatprep.mubr.f32.mxu0 %v8752_v0  ;;  %1403 = vmatpush1.msra.mxu1 %v8998_v18  ;;  %v1619_v18 = vsub.f32 %v9132_v62, %v1618_v13 }
  0x67   :  { %1405 = vmatprep.subr.mxu1 %v9009_v22  ;;  %1496 = vmatprep.subr.mxu0 %v9102_v45  ;;  %v1625_v22 = vsub.f32 %v9145_v7, %v1624_v16  ;;  %v2276_v38 = vand.u32 4294901760, %v9249_v12  ;;  %v9283_v46 = vsub.f32 %v64_v36, %v9262_v39 }
  0x68   :  { %1244 = vmatmul.mubr.f32.gmra.mxu1 %v8932_v59  ;;  %v1620_v6 = vand.u32 4294901760, %v1619_v18 }
  0x69   :  { %1146 = vmatmul.mubr.f32.gmra.mxu0 %v8927_v58  ;;  %1249 = vmatprep.mubr.f32.mxu1 %v8752_v0  ;;  %v1626_v25 = vand.u32 4294901760, %v1625_v22  ;;  %v2288_v61 = vand.u32 4294901760, %v9283_v46  ;;  %v74_v22 = vld [vmem:[#allocation2 + $0xd0] sm:$0xff] }
  0x6a   :  { %1341 = vmatprep.mubr.f32.mxu0 %v8752_v0  ;;  %1407 = vmatpush1.msra.mxu1 %v9022_v24  ;;  %v1642_v24 = vand.u32 4294901760, %v9178_v5 }
  0x6b   :  { %1615 = vmatprep.subr.mxu1 %v1614_v15 }
  0x6c   :  { %1253 = vmatmul.mubr.f32.gmra.mxu1 %v8935_v60  ;;  %v1643_v10 = vsub.f32 %v9178_v5, %v1642_v24 }
  0x6d   :  { %1343 = vmatmul.mubr.f32.vlgmr.msra.gmra.mxu0 %v8847_v19  ;;  %1440 = vmatprep.mubr.f32.mxu1 %v8752_v0 }
  0x6e   :  { %1348 = vmatprep.mubr.f32.mxu0 %v8752_v0  ;;  %1498 = vmatpush1.msra.mxu0 %v9116_v49  ;;  %v1644_v30 = vand.u32 4294901760, %v1643_v10 }
  0x6f   :  { %1500 = vmatprep.subr.mxu0 %v9124_v51 }
  0x70   :  { %1442 = vmatmul.mubr.f32.vlgmr.msra.gmra.mxu1 %v8847_v19  ;;  %1502 = vmatpush1.msra.mxu0 %v9136_v1 }
  0x71   :  { %1350 = vmatmul.mubr.f32.gmra.mxu0 %v8860_v26  ;;  %1621 = vmatpush1.msra.mxu1 %v1620_v6 }
  0x72   :  { %1355 = vmatprep.mubr.f32.mxu0 %v8752_v0  ;;  %1447 = vmatprep.mubr.f32.mxu1 %v8752_v0 }
  0x73   :  { %1627 = vmatprep.subr.mxu1 %v1626_v25  ;;  %1504 = vmatprep.subr.mxu0 %v9147_v8  ;;  %v9400_v25 = vand.u32 4294901760, %v65_v21 }
  0x74   :  { %1449 = vmatmul.mubr.f32.gmra.mxu1 %v8860_v26  ;;  %1506 = vmatpush1.msra.mxu0 %v9160_v14 }
  0x75   :  { %1357 = vmatmul.mubr.f32.gmra.mxu0 %v8916_v54  ;;  %1454 = vmatprep.mubr.f32.mxu1 %v8752_v0  ;;  %v9415_v10 = vsub.f32 %v65_v21, %v9400_v25 }
  0x76   :  { %1362 = vmatprep.mubr.f32.mxu0 %v8752_v0  ;;  %1633 = vmatpush1.msra.mxu1 %v1632_v29 }
  0x77   :  { %1639 = vmatprep.subr.mxu1 %v1638_v11  ;;  %1735 = vmatprep.subr.mxu0 %v9111_v47  ;;  %v9285_v47 = vand.u32 4294901760, %v55_v41  ;;  %v9417_v11 = vand.u32 4294901760, %v56_v28  ;;  %v9429_v31 = vand.u32 4294901760, %v9415_v10 }
  0x78   :  { %1456 = vmatmul.mubr.f32.gmra.mxu1 %v8916_v54 }
  0x79   :  { %1364 = vmatmul.mubr.f32.gmra.mxu0 %v8918_v55  ;;  %1461 = vmatprep.mubr.f32.mxu1 %v8752_v0  ;;  %v2942_v33 = vsub.f32 %v9415_v10, %v9429_v31 }
  0x7a   :  { %1539 = vmatprep.mubr.f32.mxu0 %v8752_v0  ;;  %1645 = vmatpush1.msra.mxu1 %v1644_v30 }
  0x7b   :  { %1843 = vmatprep.subr.mxu1 %v9102_v45  ;;  %v2943_v36 = vand.u32 4294901760, %v2942_v33 }
  0x7c   :  { %1463 = vmatmul.mubr.f32.gmra.mxu1 %v8918_v55 }
  0x7d   :  { %1545 = vmatmul.mubr.f32.vlgmr.msra.gmra.mxu0 %v8914_v52  ;;  %1678 = vmatprep.mubr.f32.mxu1 %v8752_v0 }
  0x7e   :  { %1550 = vmatprep.mubr.f32.mxu0 %v8752_v0  ;;  %1738 = vmatpush1.msra.mxu0 %v9132_v62  ;;  %v9304_v62 = vsub.f32 %v55_v41, %v9285_v47 }
  0x7f   :  { %1741 = vmatprep.subr.mxu0 %v9145_v7 }
  0x80   :  { %1680 = vmatmul.mubr.f32.vlgmr.msra.gmra.mxu1 %v8847_v19  ;;  %1744 = vmatpush1.msra.mxu0 %v9158_v4  ;;  %v2300_v9 = vand.u32 4294901760, %v9304_v62 }
  0x81   :  { %1556 = vmatmul.mubr.f32.gmra.mxu0 %v8921_v56  ;;  %1845 = vmatpush1.msra.mxu1 %v9116_v49 }
  0x82   :  { %1561 = vmatprep.mubr.f32.mxu0 %v8752_v0  ;;  %1685 = vmatprep.mubr.f32.mxu1 %v8752_v0 }
  0x83   :  { %1847 = vmatprep.subr.mxu1 %v9124_v51  ;;  %1747 = vmatprep.subr.mxu0 %v9166_v17 }
  0x84   :  { %1687 = vmatmul.mubr.f32.gmra.mxu1 %v8860_v26  ;;  %1750 = vmatpush1.msra.mxu0 %v9178_v5 }
  0x85   :  { %1567 = vmatmul.mubr.f32.gmra.mxu0 %v8947_v63  ;;  %1692 = vmatprep.mubr.f32.mxu1 %v8752_v0 }
  0x86   :  { %1572 = vmatprep.mubr.f32.mxu0 %v8752_v0  ;;  %1849 = vmatpush1.msra.mxu1 %v9136_v1 }
  0x87   :  { %1851 = vmatprep.subr.mxu1 %v9147_v8  ;;  %1952 = vmatprep.subr.mxu0 %v1612_v50  ;;  %v9296_v50 = vsub.f32 %v63_v40, %v9274_v43 }
  0x88   :  { %1694 = vmatmul.mubr.f32.gmra.mxu1 %v8916_v54 }
  0x89   :  { %1578 = vmatmul.mubr.f32.gmra.mxu0 %v8954_v2  ;;  %1699 = vmatprep.mubr.f32.mxu1 %v8752_v0  ;;  %v2294_v3 = vand.u32 4294901760, %v9296_v50 }
  0x8a   :  { %1783 = vmatprep.mubr.f32.mxu0 %v8752_v0  ;;  %1853 = vmatpush1.msra.mxu1 %v9160_v14 }
  0x8b   :  { %2061 = vmatprep.subr.mxu1 %v9102_v45  ;;  %v2277_v45 = vsub.f32 %v9249_v12, %v2276_v38  ;;  %v2295_v4 = vsub.f32 %v9296_v50, %v2294_v3 }
  0x8c   :  { %1701 = vmatmul.mubr.f32.gmra.mxu1 %v8918_v55 }
  0x8d   :  { %1786 = vmatmul.mubr.f32.vlgmr.msra.gmra.mxu0 %v8864_v27  ;;  %1886 = vmatprep.mubr.f32.mxu1 %v8752_v0  ;;  %v2278_v53 = vand.u32 4294901760, %v2277_v45  ;;  %v2296_v17 = vand.u32 4294901760, %v2295_v4  ;;  %v75_v45 = vld [vmem:[%s13607_s2] sm:$0xff] }
  0x8e   :  { %1791 = vmatprep.mubr.f32.mxu0 %v8752_v0  ;;  %1956 = vmatpush1.msra.mxu0 %v1618_v13 }
  0x8f   :  { %1960 = vmatprep.subr.mxu0 %v1624_v16  ;;  %v2301_v16 = vsub.f32 %v9304_v62, %v2300_v9 }
  0x90   :  { %1890 = vmatmul.mubr.f32.vlgmr.msra.gmra.mxu1 %v8886_v35  ;;  %1964 = vmatpush1.msra.mxu0 %v1630_v20 }
  0x91   :  { %1794 = vmatmul.mubr.f32.gmra.mxu0 %v8882_v34  ;;  %2063 = vmatpush1.msra.mxu1 %v9116_v49  ;;  %v2282_v49 = vand.u32 4294901760, %v9270_v42  ;;  %v2302_v20 = vand.u32 4294901760, %v2301_v16 }
  0x92   :  { %1799 = vmatprep.mubr.f32.mxu0 %v8752_v0  ;;  %1895 = vmatprep.mubr.f32.mxu1 %v8752_v0 }
  0x93   :  { %2065 = vmatprep.subr.mxu1 %v9124_v51  ;;  %1968 = vmatprep.subr.mxu0 %v1636_v23  ;;  %v9298_v51 = vand.u32 4294901760, %v54_v48  ;;  %v9378_v23 = vand.u32 4294901760, %v74_v22 }
  0x94   :  { %1899 = vmatmul.mubr.f32.gmra.mxu1 %v8903_v44  ;;  %1972 = vmatpush1.msra.mxu0 %v1642_v24 }
  0x95   :  { %1802 = vmatmul.mubr.f32.gmra.mxu0 %v8924_v57  ;;  %1904 = vmatprep.mubr.f32.mxu1 %v8752_v0  ;;  %v9316_v7 = vsub.f32 %v54_v48, %v9298_v51  ;;  %v9387_v6 = vsub.f32 %v74_v22, %v9378_v23 }
  0x96   :  { %1807 = vmatprep.mubr.f32.mxu0 %v8752_v0  ;;  %2067 = vmatpush1.msra.mxu1 %v9136_v1  ;;  %v2283_v1 = vsub.f32 %v9270_v42, %v2282_v49 }
  0x97   :  { %2069 = vmatprep.subr.mxu1 %v9147_v8  ;;  %2160 = vmatprep.subr.mxu0 %v9240_v32  ;;  %v2289_v8 = vsub.f32 %v9283_v46, %v2288_v61  ;;  %v9398_v24 = vand.u32 4294901760, %v9387_v6 }
  0x98   :  { %1908 = vmatmul.mubr.f32.gmra.mxu1 %v8932_v59  ;;  %v2284_v13 = vand.u32 4294901760, %v2283_v1 }
  0x99   :  { %1810 = vmatmul.mubr.f32.gmra.mxu0 %v8927_v58  ;;  %1913 = vmatprep.mubr.f32.mxu1 %v8752_v0  ;;  %v2290_v15 = vand.u32 4294901760, %v2289_v8  ;;  %v2935_v29 = vsub.f32 %v9387_v6, %v9398_v24 }
  0x9a   :  { %2005 = vmatprep.mubr.f32.mxu0 %v8752_v0  ;;  %2071 = vmatpush1.msra.mxu1 %v9160_v14  ;;  %v2306_v14 = vand.u32 4294901760, %v9316_v7 }
  0x9b   :  { %2279 = vmatprep.subr.mxu1 %v2278_v53  ;;  %v2936_v30 = vand.u32 4294901760, %v2935_v29 }
  0x9c   :  { %1917 = vmatmul.mubr.f32.gmra.mxu1 %v8935_v60  ;;  %v2307_v18 = vsub.f32 %v9316_v7, %v2306_v14 }
  0x9d   :  { %2007 = vmatmul.mubr.f32.vlgmr.msra.gmra.mxu0 %v8847_v19  ;;  %2104 = vmatprep.mubr.f32.mxu1 %v8752_v0 }
  0x9e   :  { %2012 = vmatprep.mubr.f32.mxu0 %v8752_v0  ;;  %2162 = vmatpush1.msra.mxu0 %v9254_v37  ;;  %v2308_v5 = vand.u32 4294901760, %v2307_v18 }
  0x9f   :  { %2164 = vmatprep.subr.mxu0 %v9262_v39 }
  0xa0   :  { %2106 = vmatmul.mubr.f32.vlgmr.msra.gmra.mxu1 %v8847_v19  ;;  %2166 = vmatpush1.msra.mxu0 %v9274_v43 }
  0xa1   :  { %2014 = vmatmul.mubr.f32.gmra.mxu0 %v8860_v26  ;;  %2285 = vmatpush1.msra.mxu1 %v2284_v13 }
  0xa2   :  { %2019 = vmatprep.mubr.f32.mxu0 %v8752_v0  ;;  %2111 = vmatprep.mubr.f32.mxu1 %v8752_v0 }
  0xa3   :  { %2291 = vmatprep.subr.mxu1 %v2290_v15  ;;  %2168 = vmatprep.subr.mxu0 %v9285_v47 }
  0xa4   :  { %2113 = vmatmul.mubr.f32.gmra.mxu1 %v8860_v26  ;;  %2170 = vmatpush1.msra.mxu0 %v9298_v51 }
  0xa5   :  { %2021 = vmatmul.mubr.f32.gmra.mxu0 %v8916_v54  ;;  %2118 = vmatprep.mubr.f32.mxu1 %v8752_v0 }
  0xa6   :  { %2026 = vmatprep.mubr.f32.mxu0 %v8752_v0  ;;  %2297 = vmatpush1.msra.mxu1 %v2296_v17 }
  0xa7   :  { %2303 = vmatprep.subr.mxu1 %v2302_v20  ;;  %2399 = vmatprep.subr.mxu0 %v9249_v12 }
  0xa8   :  { %2120 = vmatmul.mubr.f32.gmra.mxu1 %v8916_v54 }
  0xa9   :  { %2028 = vmatmul.mubr.f32.gmra.mxu0 %v8918_v55  ;;  %2125 = vmatprep.mubr.f32.mxu1 %v8752_v0 }
  0xaa   :  { %2203 = vmatprep.mubr.f32.mxu0 %v8752_v0  ;;  %2309 = vmatpush1.msra.mxu1 %v2308_v5 }
  0xab   :  { %2507 = vmatprep.subr.mxu1 %v9240_v32 }
  0xac   :  { %2127 = vmatmul.mubr.f32.gmra.mxu1 %v8918_v55 }
  0xad   :  { %2209 = vmatmul.mubr.f32.vlgmr.msra.gmra.mxu0 %v8914_v52  ;;  %2342 = vmatprep.mubr.f32.mxu1 %v8752_v0 }
  0xae   :  { %2214 = vmatprep.mubr.f32.mxu0 %v8752_v0  ;;  %2402 = vmatpush1.msra.mxu0 %v9270_v42 }
  0xaf   :  { %2405 = vmatprep.subr.mxu0 %v9283_v46 }
  0xb0   :  { %2344 = vmatmul.mubr.f32.vlgmr.msra.gmra.mxu1 %v8847_v19  ;;  %2408 = vmatpush1.msra.mxu0 %v9296_v50 }
  0xb1   :  { %2220 = vmatmul.mubr.f32.gmra.mxu0 %v8921_v56  ;;  %2509 = vmatpush1.msra.mxu1 %v9254_v37 }
  0xb2   :  { %2225 = vmatprep.mubr.f32.mxu0 %v8752_v0  ;;  %2349 = vmatprep.mubr.f32.mxu1 %v8752_v0 }
  0xb3   :  { %2511 = vmatprep.subr.mxu1 %v9262_v39  ;;  %2411 = vmatprep.subr.mxu0 %v9304_v62 }
  0xb4   :  { %2351 = vmatmul.mubr.f32.gmra.mxu1 %v8860_v26  ;;  %2414 = vmatpush1.msra.mxu0 %v9316_v7 }
  0xb5   :  { %2231 = vmatmul.mubr.f32.gmra.mxu0 %v8947_v63  ;;  %2356 = vmatprep.mubr.f32.mxu1 %v8752_v0 }
  0xb6   :  { %2236 = vmatprep.mubr.f32.mxu0 %v8752_v0  ;;  %2513 = vmatpush1.msra.mxu1 %v9274_v43 }
  0xb7   :  { %2515 = vmatprep.subr.mxu1 %v9285_v47  ;;  %2616 = vmatprep.subr.mxu0 %v2276_v38 }
  0xb8   :  { %2358 = vmatmul.mubr.f32.gmra.mxu1 %v8916_v54 }
  0xb9   :  { %2242 = vmatmul.mubr.f32.gmra.mxu0 %v8954_v2  ;;  %2363 = vmatprep.mubr.f32.mxu1 %v8752_v0 }
  0xba   :  { %2447 = vmatprep.mubr.f32.mxu0 %v8752_v0  ;;  %2517 = vmatpush1.msra.mxu1 %v9298_v51 }
  0xbb   :  { %2725 = vmatprep.subr.mxu1 %v9240_v32  ;;  %v2947_v32 = vsub.f32 %v56_v28, %v9417_v11 }
  0xbc   :  { %2365 = vmatmul.mubr.f32.gmra.mxu1 %v8918_v55 }
  0xbd   :  { %2450 = vmatmul.mubr.f32.vlgmr.msra.gmra.mxu0 %v8864_v27  ;;  %2550 = vmatprep.mubr.f32.mxu1 %v8752_v0  ;;  %v9439_v12 = vand.u32 4294901760, %v2947_v32 }
  0xbe   :  { %2455 = vmatprep.mubr.f32.mxu0 %v8752_v0  ;;  %2620 = vmatpush1.msra.mxu0 %v2282_v49 }
  0xbf   :  { %2624 = vmatprep.subr.mxu0 %v2288_v61 }
  0xc0   :  { %2554 = vmatmul.mubr.f32.vlgmr.msra.gmra.mxu1 %v8886_v35  ;;  %2628 = vmatpush1.msra.mxu0 %v2294_v3 }
  0xc1   :  { %2458 = vmatmul.mubr.f32.gmra.mxu0 %v8882_v34  ;;  %2727 = vmatpush1.msra.mxu1 %v9254_v37  ;;  %v2949_v37 = vsub.f32 %v2947_v32, %v9439_v12 }
  0xc2   :  { %2463 = vmatprep.mubr.f32.mxu0 %v8752_v0  ;;  %2559 = vmatprep.mubr.f32.mxu1 %v8752_v0 }
  0xc3   :  { %2729 = vmatprep.subr.mxu1 %v9262_v39  ;;  %2632 = vmatprep.subr.mxu0 %v2300_v9  ;;  %v2950_v38 = vand.u32 4294901760, %v2949_v37  ;;  %v83_v39 = vlaneseq }
  0xc4   :  { %2563 = vmatmul.mubr.f32.gmra.mxu1 %v8903_v44  ;;  %2636 = vmatpush1.msra.mxu0 %v2306_v14 }
  0xc5   :  { %2466 = vmatmul.mubr.f32.gmra.mxu0 %v8924_v57  ;;  %2568 = vmatprep.mubr.f32.mxu1 %v8752_v0  ;;  %v9465_v40 = vshrl.u32 %v83_v39, 7 }
  0xc6   :  { %2471 = vmatprep.mubr.f32.mxu0 %v8752_v0  ;;  %2731 = vmatpush1.msra.mxu1 %v9274_v43 }
  0xc7   :  { %2733 = vmatprep.subr.mxu1 %v9285_v47  ;;  %8230 = vmatprep.subr.mxu0 %v9378_v23  ;;  %13682 = vst [vmem:[#allocation21_spill] sm:$0xff] %v9465_v40  ;;  %v9478_v42 = vsub.s32 0, %v9465_v40  ;;  %v9517_v13 = vsub.s32 1, %v9465_v40 }
  0xc8   :  { %2572 = vmatmul.mubr.f32.gmra.mxu1 %v8932_v59 }
  0xc9   :  { %2474 = vmatmul.mubr.f32.gmra.mxu0 %v8927_v58  ;;  %2577 = vmatprep.mubr.f32.mxu1 %v8752_v0  ;;  %13683 = vst [vmem:[#allocation22_spill] sm:$0xff] %v9478_v42  ;;  %v9496_v49 = vrot.slane %v75_v45, %v9478_v42  ;;  %v90_v18 = vrot.slane %v75_v45, %v9517_v13 }
  0xca   :  { %2669 = vmatprep.mubr.f32.mxu0 %v8752_v0  ;;  %2735 = vmatpush1.msra.mxu1 %v9298_v51 }
  0xcb   :  { %8242 = vmatprep.subr.mxu1 %v2936_v30 }
  0xcc   :  { %2581 = vmatmul.mubr.f32.gmra.mxu1 %v8935_v60 }
  0xcd   :  { %2671 = vmatmul.mubr.f32.vlgmr.msra.gmra.mxu0 %v8847_v19  ;;  %2768 = vmatprep.mubr.f32.mxu1 %v8752_v0 }
  0xce   :  { %2676 = vmatprep.mubr.f32.mxu0 %v8752_v0  ;;  %8231 = vmatpush3.msra.mxu0 %v9378_v23 }
  0xcf   :  { %8232 = vmatprep.subr.mxu0 %v9400_v25 }
  0xd0   :  { %2770 = vmatmul.mubr.f32.vlgmr.msra.gmra.mxu1 %v8847_v19  ;;  %8233 = vmatpush3.msra.mxu0 %v9400_v25 }
  0xd1   :  { %2678 = vmatmul.mubr.f32.gmra.mxu0 %v8860_v26  ;;  %8243 = vmatpush3.msra.mxu1 %v2936_v30 }
  0xd2   :  { %2683 = vmatprep.mubr.f32.mxu0 %v8752_v0  ;;  %2775 = vmatprep.mubr.f32.mxu1 %v8752_v0 }
  0xd3   :  { %8244 = vmatprep.subr.mxu1 %v2943_v36  ;;  %8234 = vmatprep.subr.mxu0 %v9417_v11 }
  0xd4   :  { %2777 = vmatmul.mubr.f32.gmra.mxu1 %v8860_v26  ;;  %8235 = vmatpush3.msra.mxu0 %v9417_v11 }
  0xd5   :  { %2685 = vmatmul.mubr.f32.gmra.mxu0 %v8916_v54  ;;  %2782 = vmatprep.mubr.f32.mxu1 %v8752_v0 }
  0xd6   :  { %2690 = vmatprep.mubr.f32.mxu0 %v8752_v0  ;;  %8245 = vmatpush3.msra.mxu1 %v2943_v36 }
  0xd7   :  { %8246 = vmatprep.subr.mxu1 %v2950_v38  ;;  %8254 = vmatprep.subr.mxu0 %v9387_v6 }
  0xd8   :  { %2784 = vmatmul.mubr.f32.gmra.mxu1 %v8916_v54 }
  0xd9   :  { %2692 = vmatmul.mubr.f32.gmra.mxu0 %v8918_v55  ;;  %2789 = vmatprep.mubr.f32.mxu1 %v8752_v0 }
  0xda   :  { %8236 = vmatprep.mubr.f32.mxu0 %v8914_v52  ;;  %8247 = vmatpush3.msra.mxu1 %v2950_v38 }
  0xdb   :  { %8266 = vmatprep.subr.mxu1 %v9378_v23 }
  0xdc   :  { %2791 = vmatmul.mubr.f32.gmra.mxu1 %v8918_v55 }
  0xdd   :  { %v9468_v41 = vpop.f32.mrf.mxu0  ;;  %8237 = vmatmul.mubr.f32.vlgmr.msra.gmra.mxu0 %v8921_v56  ;;  %8248 = vmatprep.mubr.f32.mxu1 %v8847_v19 }
  0xde   :  { %8239 = vmatprep.mubr.f32.mxu0 %v8947_v63  ;;  %8255 = vmatpush3.msra.mxu0 %v9387_v6  ;;  %v219_v29 = vadd.f32 %v9468_v41, %v9496_v49 }
  0xdf   :  { %v9474_v0 = vpop.f32.mrf.mxu0  ;;  %8256 = vmatprep.subr.mxu0 %v9415_v10 }
  0xe0   :  { %v9480_v43 = vpop.f32.mrf.mxu1  ;;  %8249 = vmatmul.mubr.f32.vlgmr.msra.gmra.mxu1 %v8860_v26  ;;  %8257 = vmatpush3.msra.mxu0 %v9415_v10 }
  0xe1   :  { %v9487_v46 = vpop.f32.mrf.mxu0  ;;  %8240 = vmatmul.mubr.f32.gmra.mxu0 %v8954_v2  ;;  %8258 = vmatprep.subr.mxu0 %v2947_v32  ;;  %v354_v39 = vadd.f32 %v9480_v43, %v219_v29 }
  0xe2   :  { %8267 = vmatpush3.msra.mxu1 %v9378_v23  ;;  %v9491_v47 = vpop.f32.mrf.mxu1  ;;  %8259 = vmatpush3.msra.mxu0 %v2947_v32 }
  0xe3   :  { %v231_v48 = vpop.f32.mrf.mxu0  ;;  %8260 = vmatprep.mubr.f32.mxu0 %v8864_v27  ;;  %8251 = vmatprep.mubr.f32.mxu1 %v8916_v54 }
  0xe4   :  { %8268 = vmatprep.subr.mxu1 %v9400_v25  ;;  %v9499_v50 = vpop.f32.mrf.mxu1  ;;  %8252 = vmatmul.mubr.f32.gmra.mxu1 %v8918_v55  ;;  %v232_v22 = vadd.f32 %v231_v48, %v90_v18  ;;  %v230_v48 = vadd.f32 %v9487_v46, %v9496_v49 }
  0xe5   :  { %v240_v51 = vpop.f32.mrf.mxu0  ;;  %8261 = vmatmul.mubr.f32.vlgmr.msra.gmra.mxu0 %v8882_v34  ;;  %8269 = vmatpush3.msra.mxu1 %v9400_v25 }
  0xe6   :  { %v241_v53 = vadd.f32 %v240_v51, %v9496_v49  ;;  %8278 = vmatprep.subr.mxu0 %v9398_v24  ;;  %v362_v61 = vpop.f32.mrf.mxu1  ;;  %8263 = vmatprep.mubr.f32.mxu0 %v8924_v57  ;;  %v361_v46 = vadd.f32 %v9499_v50, %v230_v48 }
  0xe7   :  { %v242_v62 = vpop.f32.mrf.mxu0  ;;  %8270 = vmatprep.subr.mxu1 %v9417_v11  ;;  %8279 = vmatpush3.msra.mxu0 %v9398_v24  ;;  %v363_v21 = vadd.f32 %v362_v61, %v232_v22 }
  0xe8   :  { %8271 = vmatpush3.msra.mxu1 %v9417_v11  ;;  %8272 = vmatprep.mubr.f32.mxu1 %v8886_v35  ;;  %v367_v1 = vpop.f32.mrf.mxu1  ;;  %v243_v28 = vadd.f32 %v242_v62, %v90_v18 }
  0xe9   :  { %v251_v3 = vpop.f32.mrf.mxu0  ;;  %8264 = vmatmul.mubr.f32.gmra.mxu0 %v8927_v58  ;;  %8280 = vmatprep.subr.mxu0 %v9429_v31  ;;  %v368_v7 = vadd.f32 %v367_v1, %v241_v53 }
  0xea   :  { %v252_v8 = vadd.f32 %v251_v3, %v9496_v49  ;;  %8273 = vmatmul.mubr.f32.vlgmr.msra.gmra.mxu1 %v8903_v44  ;;  %8281 = vmatpush3.msra.mxu0 %v9429_v31  ;;  %v369_v9 = vpop.f32.mrf.mxu1 }
  0xeb   :  { %8290 = vmatprep.subr.mxu1 %v9378_v23  ;;  %v253_v4 = vpop.f32.mrf.mxu0  ;;  %8282 = vmatprep.subr.mxu0 %v9439_v12  ;;  %v370_v31 = vadd.f32 %v369_v9, %v243_v28 }
  0xec   :  { %8291 = vmatpush3.msra.mxu1 %v9378_v23  ;;  %8283 = vmatpush3.msra.mxu0 %v9439_v12  ;;  %v374_v14 = vpop.f32.mrf.mxu1  ;;  %v254_v36 = vadd.f32 %v253_v4, %v90_v18 }
  0xed   :  { %8284 = vmatprep.mubr.f32.mxu0 %v8847_v19  ;;  %v459_v15 = vpop.f32.mrf.mxu0  ;;  %8275 = vmatprep.mubr.f32.mxu1 %v8932_v59  ;;  %v375_v16 = vadd.f32 %v374_v14, %v252_v8 }
  0xee   :  { %8285 = vmatmul.mubr.f32.vlgmr.msra.gmra.mxu0 %v8860_v26  ;;  %8292 = vmatprep.subr.mxu1 %v9400_v25  ;;  %v376_v17 = vpop.f32.mrf.mxu1  ;;  %v460_v1 = vadd.f32 %v459_v15, %v354_v39 }
  0xef   :  { %8276 = vmatmul.mubr.f32.gmra.mxu1 %v8935_v60  ;;  %v461_v20 = vpop.f32.mrf.mxu0  ;;  %8287 = vmatprep.mubr.f32.mxu0 %v8916_v54  ;;  %v377_v51 = vadd.f32 %v376_v17, %v254_v36 }
  0xf0   :  { %8293 = vmatpush3.msra.mxu1 %v9400_v25  ;;  %8296 = vmatprep.mubr.f32.mxu1 %v8847_v19  ;;  %v563_v5 = vpop.f32.mrf.mxu1 }
  0xf1   :  { %8294 = vmatprep.subr.mxu1 %v9417_v11  ;;  %v467_v23 = vpop.f32.mrf.mxu0  ;;  %v564_v4 = vadd.f32 %v563_v5, %v460_v1 }
  0xf2   :  { %8288 = vmatmul.mubr.f32.gmra.mxu0 %v8918_v55  ;;  %8295 = vmatpush3.msra.mxu1 %v9417_v11  ;;  %v565_v6 = vpop.f32.mrf.mxu1 }
  0xf3   :  { %8297 = vmatmul.mubr.f32.vlgmr.msra.gmra.mxu1 %v8860_v26  ;;  %v469_v24 = vpop.f32.mrf.mxu0  ;;  %8308 = vmatprep.mubr.f32.mxu0 %v8914_v52  ;;  %v221_v52 = vadd.f32 %v9474_v0, %v90_v18  ;;  %v4005_v0 = vld [vmem:[%s13608_s3] sm:$0xff] }
  0xf4   :  { %8299 = vmatprep.mubr.f32.mxu1 %v8916_v54  ;;  %v572_v25 = vpop.f32.mrf.mxu1  ;;  %v470_v10 = vadd.f32 %v469_v24, %v363_v21  ;;  %v9560_v22 = vrot.slane %v4005_v0, %v9478_v42  ;;  %v468_v21 = vadd.f32 %v467_v23, %v361_v46 }
  0xf5   :  { %v475_v30 = vpop.f32.mrf.mxu0  ;;  %v356_v62 = vadd.f32 %v9491_v47, %v221_v52 }
  0xf6   :  { %v476_v32 = vadd.f32 %v475_v30, %v368_v7  ;;  %v574_v33 = vpop.f32.mrf.mxu1  ;;  %v573_v5 = vadd.f32 %v572_v25, %v468_v21  ;;  %v9565_v30 = vrot.slane %v4005_v0, %v9517_v13 }
  0xf7   :  { %8300 = vmatmul.mubr.f32.gmra.mxu1 %v8918_v55  ;;  %v477_v11 = vpop.f32.mrf.mxu0  ;;  %v575_v12 = vadd.f32 %v574_v33, %v470_v10  ;;  %v462_v43 = vadd.f32 %v461_v20, %v356_v62 }
  0xf8   :  { %v478_v37 = vadd.f32 %v477_v11, %v370_v31  ;;  %v581_v38 = vpop.f32.mrf.mxu1  ;;  %8320 = vmatprep.mubr.f32.mxu1 %v8847_v19 }
  0xf9   :  { %v483_v45 = vpop.f32.mrf.mxu0  ;;  %v9544_v41 = vadd.f32 %v581_v38, %v476_v32 }
  0xfa   :  { %v484_v53 = vadd.f32 %v483_v45, %v375_v16  ;;  %v583_v61 = vpop.f32.mrf.mxu1  ;;  %v566_v16 = vadd.f32 %v565_v6, %v462_v43 }
  0xfb   :  { %v485_v3 = vpop.f32.mrf.mxu0  ;;  %v9549_v7 = vadd.f32 %v583_v61, %v478_v37 }
  0xfc   :  { %v486_v8 = vadd.f32 %v485_v3, %v377_v51  ;;  %v590_v9 = vpop.f32.mrf.mxu1 }
  0xfd   :  { %v680_v14 = vpop.f32.mrf.mxu0  ;;  %v9554_v18 = vadd.f32 %v590_v9, %v484_v53 }
  0xfe   :  { %v592_v49 = vpop.f32.mrf.mxu1  ;;  %v681_v47 = vadd.f32 %v680_v14, %v564_v4 }
  0xff   :  { %v682_v15 = vpop.f32.mrf.mxu0  ;;  %v9557_v17 = vadd.f32 %v592_v49, %v486_v8 }
 0x100   :  { %v779_v24 = vpop.f32.mrf.mxu1  ;;  %v683_v28 = vadd.f32 %v682_v15, %v566_v16 }
 0x101   :  { %v687_v29 = vpop.f32.mrf.mxu0  ;;  %v9562_v20 = vadd.f32 %v779_v24, %v681_v47  ;;  %v13635_v24 = vmov 683565275  }
 0x102   :  { %v781_v10 = vpop.f32.mrf.mxu1  ;;  %v688_v31 = vadd.f32 %v687_v29, %v573_v5  ;;  %v13624_v29 = vmov 2475754826  }
 0x103   :  { %v9569_v50 = vadd.f32 %v9560_v22, %v9562_v20  ;;  %v9571_v6 = vadd.f32 %v781_v10, %v683_v28  ;;  %v689_v11 = vpop.f32.mrf.mxu0  ;;  %v13620_v10 = vmov 2131351028  }
 0x104   :  { %v786_v32 = vpop.f32.mrf.mxu1  ;;  %v690_v51 = vadd.f32 %v689_v11, %v575_v12  ;;  %v13618_v11 = vmov 920167782  }
 0x105   :  { %v13615_v23 = vand.u32 2147483647, %v9569_v50  ;;  %v4093_v33 = vand.u32 2139095040, %v9569_v50  ;;  %v9577_v25 = vadd.f32 %v9565_v30, %v9571_v6  ;;  %v9579_v36 = vadd.f32 %v786_v32, %v688_v31 }
 0x106   :  { %v788_v45 = vpop.f32.mrf.mxu1  ;;  %v13616_v32 = vmov 2102212464   ;;  %vm4092_vm15 = vcmp.lt.s32.totalorder %v9569_v50, 0 }
 0x107   :  { %v4094_v37 = vshrl.u32 %v4093_v33, 23  ;;  %v4097_v38 = vand.u32 8388607, %v13615_v23  ;;  %v13614_v52 = vand.u32 2147483647, %v9577_v25  ;;  %v4197_v39 = vand.u32 2139095040, %v9577_v25 }
 0x108   :  { %v9587_v53 = vadd.f32 %v9560_v22, %v9579_v36  ;;  %v9591_v3 = vadd.f32 %v788_v45, %v690_v51 }
 0x109   :  { %v8002_v48 = vadd.s32 4294967169, %v4094_v37  ;;  %v4198_v61 = vshrl.u32 %v4197_v39, 23  ;;  %v4201_v62 = vand.u32 8388607, %v13614_v52  ;;  %v4098_v8 = vor.u32 8388608, %v4097_v38 }
 0x10a   :  { %v5029_v43 = vand.u32 2139095040, %v9587_v53  ;;  %v9600_v15 = vadd.f32 %v9565_v30, %v9591_v3 }
 0x10b   :  { %v4100_v1 = vadd.s32 1, %v8002_v48  ;;  %v8006_v9 = vadd.s32 4294967169, %v4198_v61  ;;  %v4202_v0 = vor.u32 8388608, %v4201_v62  ;;  %v9594_v49 = vshll.u32 %v4098_v8, 8 }
 0x10c   :  { %v5030_v47 = vshrl.u32 %v5029_v43, 23  ;;  %v13622_v61 = vmov 1326507024  }
 0x10d   :  { %vm4101_vm1 = vcmp.gt.s32.totalorder %v4100_v1, 0  ;;  %v4204_v14 = vadd.s32 1, %v8006_v9  ;;  %v9596_v16 = vshll.u32 %v4202_v0, 8 }
 0x10e   :  { %v4102_v4 = vsel %vm4101_vm1, %v4100_v1, 0 }
 0x10f   :  { %v4103_v12 = vshrl.u32 %v4102_v4, 5  ;;  %v4104_v46 = vand.u32 31, %v4102_v4  ;;  %vm4205_vm2 = vcmp.gt.s32.totalorder %v4204_v14, 0 }
 0x110   :  { %v4206_v0 = vsel %vm4205_vm2, %v4204_v14, 0 }
 0x111   :  { %v4105_v21 = vsub.s32 32, %v4104_v46  ;;  %v4107_v28 = vshll.u32 %v13635_v24, %v4104_v46  ;;  %v4110_v5 = vshll.u32 %v13624_v29, %v4104_v46  ;;  %v4113_v31 = vshll.u32 %v13620_v10, %v4104_v46 }
 0x112   :  { %v4116_v33 = vshll.u32 %v13616_v32, %v4104_v46  ;;  %v4119_v37 = vshll.u32 %v13618_v11, %v4104_v46  ;;  %vm4122_vm3 = vcmp.lt.s32.totalorder %v4103_v12, 1  ;;  %vm4123_vm4 = vcmp.lt.s32.totalorder %v4103_v12, 2 }
 0x113   :  { %v4108_v38 = vshrl.u32 %v13624_v29, %v4105_v21  ;;  %v4111_v39 = vshrl.u32 %v13620_v10, %v4105_v21  ;;  %v4114_v45 = vshrl.u32 %v13616_v32, %v4105_v21  ;;  %v4106_v48 = vshrl.u32 %v13635_v24, %v4105_v21 }
 0x114   :  { %v4117_v51 = vshrl.u32 %v13618_v11, %v4105_v21  ;;  %v4120_v62 = vshrl.u32 %v13622_v61, %v4105_v21  ;;  %vm4124_vm5 = vcmp.lt.s32.totalorder %v4103_v12, 3  ;;  %vm4125_vm6 = vcmp.lt.s32.totalorder %v4103_v12, 4 }
 0x115   :  { %v4109_v1 = vor.u32 %v4108_v38, %v4107_v28  ;;  %v4112_v8 = vor.u32 %v4111_v39, %v4110_v5  ;;  %v4115_v9 = vor.u32 %v4114_v45, %v4113_v31  ;;  %v4208_v46 = vand.u32 31, %v4206_v0 }
 0x116   :  { %v4118_v43 = vor.u32 %v4117_v51, %v4116_v33  ;;  %v4121_v4 = vor.u32 %v4120_v62, %v4119_v37  ;;  %v8038_v33 = vadd.s32 4294967169, %v5030_v47  ;;  %v4207_v39 = vshrl.u32 %v4206_v0, 5 }
 0x117   :  { %v4126_v52 = vsel %vm4122_vm3, %v4106_v48, %v4109_v1  ;;  %v4127_v23 = vsel %vm4125_vm6, %v4115_v9, 2102212464  ;;  %v4130_v32 = vsel %vm4122_vm3, %v4109_v1, %v4112_v8  ;;  %v4134_v11 = vsel %vm4122_vm3, %v4112_v8, %v4115_v9 }
 0x118   :  { %v4128_v10 = vsel %vm4124_vm5, %v4112_v8, %v4127_v23  ;;  %v4131_v21 = vsel %vm4125_vm6, %v4118_v43, 920167782  ;;  %v4135_v61 = vsel %vm4125_vm6, %v4121_v4, 1326507024  ;;  %v4209_v28 = vsub.s32 32, %v4208_v46 }
 0x119   :  { %v4129_v5 = vsel %vm4123_vm4, %v4126_v52, %v4128_v10  ;;  %v4132_v14 = vsel %vm4124_vm5, %v4115_v9, %v4131_v21  ;;  %v4136_v31 = vsel %vm4124_vm5, %v4118_v43, %v4135_v61  ;;  %v4211_v45 = vshll.u32 %v13635_v24, %v4208_v46  ;;  %v7834_v52 = vld [vmem:[%s13609_s4] sm:$0xff] }
 0x11a   :  { %v4133_v37 = vsel %vm4123_vm4, %v4130_v32, %v4132_v14  ;;  %v4137_v38 = vsel %vm4123_vm4, %v4134_v11, %v4136_v31  ;;  %v4145_v47 = vmul.u32 %v9594_v49, %v4129_v5  ;;  %v4212_v12 = vshrl.u32 %v13624_v29, %v4209_v28 }
 0x11b   :  { %v9625_v48 = vmul.u32.u64.low %v9594_v49, %v4137_v38  ;;  %v9626_v23 = vmul.u32.u64.high %v9594_v49, %v4137_v38, %v9625_v48  ;;  %v9629_v51 = vmul.u32.u64.low %v9594_v49, %v4133_v37  ;;  %v9630_v62 = vmul.u32.u64.high %v9594_v49, %v4133_v37, %v9629_v51 }
 0x11c   :  { %v4214_v10 = vshll.u32 %v13624_v29, %v4208_v46  ;;  %v13684_v32 = vmov 2131351028   ;;  %v13685_v1 = vmov 2102212464   ;;  %v13686_v0 = vmov 920167782  }
 0x11d   :  { %v4215_v11 = vshrl.u32 %v13684_v32, %v4209_v28  ;;  %v4217_v61 = vshll.u32 %v13684_v32, %v4208_v46  ;;  %v4218_v8 = vshrl.u32 %v13685_v1, %v4209_v28  ;;  %v4220_v9 = vshll.u32 %v13685_v1, %v4208_v46 }
 0x11e   :  { %v4221_v43 = vshrl.u32 %v13686_v0, %v4209_v28  ;;  %vm7836_vm7 = vcmp.gt.f32.partialorder %v7834_v52, 0.5  ;;  %v4213_v4 = vor.u32 %v4212_v12, %v4211_v45  ;;  %v4223_v14 = vshll.u32 %v13686_v0, %v4208_v46 }
 0x11f   :  { %v4216_v21 = vor.u32 %v4215_v11, %v4214_v10  ;;  %v13687_v49 = vmov 1326507024   ;;  %vm4147_vm8 = vc.u32 %v9626_v23, %v9629_v51  ;;  %v4148_v31 = vadd.s32 1, %v9630_v62 }
 0x120   :  { %v4224_v5 = vshrl.u32 %v13687_v49, %v4209_v28  ;;  %v4210_v37 = vshrl.u32 %v13635_v24, %v4209_v28  ;;  %v4219_v38 = vor.u32 %v4218_v8, %v4217_v61  ;;  %v4222_v48 = vor.u32 %v4221_v43, %v4220_v9 }
 0x121   :  { %vm4226_vm9 = vcmp.lt.s32.totalorder %v4207_v39, 1  ;;  %vm4227_vm10 = vcmp.lt.s32.totalorder %v4207_v39, 2  ;;  %v4149_v19 = vsel %vm4147_vm8, %v4148_v31, %v9630_v62  ;;  %vm4228_vm11 = vcmp.lt.s32.totalorder %v4207_v39, 3 }
 0x122   :  { %v4225_v29 = vor.u32 %v4224_v5, %v4223_v14  ;;  %vm4229_vm12 = vcmp.lt.s32.totalorder %v4207_v39, 4  ;;  %v4234_v45 = vsel %vm4226_vm9, %v4213_v4, %v4216_v21  ;;  %v4150_v46 = vadd.s32 %v4149_v19, %v4145_v47 }
 0x123   :  { %v4231_v12 = vsel %vm4229_vm12, %v4219_v38, 2102212464  ;;  %v4235_v10 = vsel %vm4229_vm12, %v4222_v48, 920167782  ;;  %v4238_v11 = vsel %vm4226_vm9, %v4216_v21, %v4219_v38  ;;  %v4230_v60 = vsel %vm4226_vm9, %v4210_v37, %v4213_v4 }
 0x124   :  { %v4236_v59 = vsel %vm4228_vm11, %v4219_v38, %v4235_v10  ;;  %v4239_v44 = vsel %vm4229_vm12, %v4225_v29, 1326507024  ;;  %v5036_v58 = vadd.s32 1, %v8038_v33  ;;  %v4151_v57 = vadd.s32 536870912, %v4150_v46 }
 0x125   :  { %v4232_v28 = vsel %vm4228_vm11, %v4216_v21, %v4231_v12  ;;  %v4237_v61 = vsel %vm4227_vm10, %v4234_v45, %v4236_v59  ;;  %v4240_v8 = vsel %vm4228_vm11, %v4222_v48, %v4239_v44  ;;  %v13634_v19 = vand.u32 2147483647, %v9587_v53 }
 0x126   :  { %v4241_v9 = vsel %vm4227_vm10, %v4238_v11, %v4240_v8  ;;  %v9654_v62 = vmul.u32.u64.low %v9596_v16, %v4237_v61  ;;  %v9655_v43 = vmul.u32.u64.high %v9596_v16, %v4237_v61, %v9654_v62  ;;  %v4152_v47 = vshrl.u32 %v4151_v57, 30 }
 0x127   :  { %v9660_v4 = vmul.u32.u64.low %v9596_v16, %v4241_v9  ;;  %v9661_v14 = vmul.u32.u64.high %v9596_v16, %v4241_v9, %v9660_v4  ;;  %vm5037_vm13 = vcmp.gt.s32.totalorder %v5036_v58, 0  ;;  %v4233_v29 = vsel %vm4227_vm10, %v4230_v60, %v4232_v28 }
 0x128   :  { %v5038_v33 = vsel %vm5037_vm13, %v5036_v58, 0  ;;  %v4153_v59 = vshll.u32 %v4152_v47, 30  ;;  %v13633_v21 = vmov 0   ;;  %v4252_v31 = vadd.s32 1, %v9655_v43 }
 0x129   :  { %v5040_v44 = vand.u32 31, %v5038_v33  ;;  %v9666_v5 = vsel %vm7836_vm7, 1, %v13633_v21  ;;  %v9671_v57 = vand.u32 8388607, %v13634_v19  ;;  %v5133_v37 = vand.u32 2139095040, %v9600_v15 }
 0x12a   :  { %13688 = vst [vmem:[#allocation23_spill] sm:$0xff] %v9666_v5  ;;  %v9674_v38 = vsub.s32 %v4150_v46, %v4153_v59  ;;  %v4249_v60 = vmul.u32 %v9596_v16, %v4233_v29  ;;  %vm4251_vm14 = vc.u32 %v9661_v14, %v9654_v62  ;;  %v13689_v28 = vmov 2475754826  }
 0x12b   :  { %v4253_v58 = vsel %vm4251_vm14, %v4252_v31, %v9655_v43  ;;  %v5041_v39 = vsub.s32 32, %v5040_v44  ;;  %v5034_v12 = vor.u32 8388608, %v9671_v57  ;;  %v5134_v16 = vshrl.u32 %v5133_v37, 23 }
 0x12c   :  { %v4156_v52 = vsub.s32 0, %v9674_v38  ;;  %v4254_v45 = vadd.s32 %v4253_v58, %v4249_v60  ;;  %v4146_v9 = vadd.s32 %v9629_v51, %v9626_v23  ;;  %v5039_v43 = vshrl.u32 %v5038_v33, 5 }
 0x12d   :  { %v5044_v61 = vshrl.u32 %v13689_v28, %v5041_v39  ;;  %v5050_v8 = vshrl.u32 %v13685_v1, %v5041_v39  ;;  %v5047_v4 = vshrl.u32 %v13684_v32, %v5041_v39  ;;  %v5049_v29 = vshll.u32 %v13684_v32, %v5040_v44 }
 0x12e   :  { %v8003_v10 = vmin.u32 %v4156_v52, %v9674_v38  ;;  %v4255_v11 = vadd.s32 536870912, %v4254_v45  ;;  %v4176_v31 = vsub.s32 4, %v4152_v47  ;;  %v5043_v57 = vshll.u32 %v13635_v24, %v5040_v44 }
 0x12f   :  { %v5053_v37 = vshrl.u32 %v13686_v0, %v5041_v39  ;;  %v5046_v58 = vshll.u32 %v13689_v28, %v5040_v44  ;;  %v5051_v52 = vor.u32 %v5050_v8, %v5049_v29  ;;  %v8042_v21 = vadd.s32 4294967169, %v5134_v16 }
 0x130   :  { %v4158_v59 = vclz %v8003_v10  ;;  %v9696_v60 = vshrl.u32 %v4255_v11, 30  ;;  %v13690_v19 = vand.u32 2147483647, %v9569_v50  ;;  %v5045_v33 = vor.u32 %v5044_v61, %v5043_v57 }
 0x131   :  { %v5052_v10 = vshll.u32 %v13685_v1, %v5040_v44  ;;  %v5056_v46 = vshrl.u32 %v13687_v49, %v5041_v39  ;;  %v5048_v11 = vor.u32 %v5047_v4, %v5046_v58  ;;  %v5055_v24 = vshll.u32 %v13686_v0, %v5040_v44 }
 0x132   :  { %vm9701_vm0 = vcmp.le.f32.partialorder %v13690_v19, 0.7853982  ;;  %v8004_v51 = vadd.s32 4294967294, %v4158_v59  ;;  %v4257_v48 = vshll.u32 %v9696_v60, 30  ;;  %vm5061_vm1 = vcmp.lt.s32.totalorder %v5039_v43, 4 }
 0x133   :  { %v4177_v16 = vsel %vm4092_vm15, %v4176_v31, %v4152_v47  ;;  %v5054_v19 = vor.u32 %v5053_v37, %v5052_v10  ;;  %v5063_v8 = vsel %vm5061_vm1, %v5051_v52, 2102212464  ;;  %v13693_v61 = vmov 683565275  }
 0x134   :  { %vm8005_vm2 = vcmp.lt.s32.totalorder %v8004_v51, 0  ;;  %v9712_v59 = vsub.s32 %v4254_v45, %v4257_v48  ;;  %v5042_v57 = vshrl.u32 %v13693_v61, %v5041_v39  ;;  %v5057_v35 = vor.u32 %v5056_v46, %v5055_v24 }
 0x135   :  { %v4161_v29 = vsel %vm8005_vm2, 0, %v8004_v51  ;;  %vm5058_vm3 = vcmp.lt.s32.totalorder %v5039_v43, 1  ;;  %vm5060_vm4 = vcmp.lt.s32.totalorder %v5039_v43, 3  ;;  %vm4196_vm5 = vcmp.lt.s32.totalorder %v9577_v25, 0 }
 0x136   :  { %v4162_v55 = vsub.s32 32, %v4161_v29  ;;  %v4166_v34 = vsub.s32 4294967266, %v4161_v29  ;;  %v4163_v44 = vshll.u32 %v9674_v38, %v4161_v29  ;;  %v4260_v4 = vsub.s32 0, %v9712_v59 }
 0x137   :  { %v5062_v58 = vsel %vm5058_vm3, %v5042_v57, %v5045_v33  ;;  %v5064_v47 = vsel %vm5060_vm4, %v5048_v11, %v5063_v8  ;;  %v5066_v48 = vsel %vm5058_vm3, %v5045_v33, %v5048_v11  ;;  %v5067_v45 = vsel %vm5061_vm1, %v5054_v19, 920167782 }
 0x138   :  { %v4164_v31 = vshrl.u32 %v4146_v9, %v4162_v55  ;;  %v4167_v37 = vadd.s32 127, %v4166_v34  ;;  %v8007_v24 = vmin.u32 %v4260_v4, %v9712_v59  ;;  %v5068_v39 = vsel %vm5060_vm4, %v5051_v52, %v5067_v45 }
 0x139   :  { %v5070_v46 = vsel %vm5058_vm3, %v5048_v11, %v5051_v52  ;;  %v5071_v51 = vsel %vm5061_vm1, %v5057_v35, 1326507024  ;;  %vm5059_vm6 = vcmp.lt.s32.totalorder %v5039_v43, 2  ;;  %v4179_v34 = vsel %vm9701_vm0, 0, %v4177_v16 }
 0x13a   :  { %v4165_v38 = vor.u32 %v4164_v31, %v4163_v44  ;;  %v4168_v10 = vshll.u32 %v4167_v37, 23  ;;  %v5072_v29 = vsel %vm5060_vm4, %v5054_v19, %v5071_v51  ;;  %v4262_v55 = vclz %v8007_v24 }
 0x13b   :  { %v5069_v9 = vsel %vm5059_vm6, %v5066_v48, %v5068_v39  ;;  %v5074_v33 = vshll.u32 %v5034_v12, 8  ;;  %v4280_v57 = vsub.s32 4, %v9696_v60  ;;  %v5065_v4 = vsel %vm5059_vm6, %v5062_v58, %v5064_v47  ;;  %v694_v47 = vpop.f32.mrf.mxu0 }
 0x13c   :  { %v4169_v8 = vor.u32 4788187, %v4168_v10  ;;  %v5073_v54 = vsel %vm5059_vm6, %v5070_v46, %v5072_v29  ;;  %v4172_v45 = vcvt.s32.f32 %v4165_v38  ;;  %v8008_v52 = vadd.s32 4294967294, %v4262_v55 }
 0x13d   :  { %v9727_v11 = vmul.u32.u64.low %v5074_v33, %v5073_v54  ;;  %v9728_v35 = vmul.u32.u64.high %v5074_v33, %v5073_v54, %v9727_v11  ;;  %v9730_v31 = vmul.u32.u64.low %v5074_v33, %v5069_v9  ;;  %v9731_v43 = vmul.u32.u64.high %v5074_v33, %v5069_v9, %v9730_v31  ;;  %v696_v55 = vpop.f32.mrf.mxu0 }
 0x13e   :  { %v4170_v44 = vand.u32 2147483647, %v4169_v8  ;;  %v5140_v19 = vadd.s32 1, %v8042_v21  ;;  %v13694_v16 = vand.u32 2147483647, %v9577_v25  ;;  %v4250_v58 = vadd.s32 %v9654_v62, %v9661_v14  ;;  %v793_v11 = vpop.f32.mrf.mxu1 }
 0x13f   :  { %vm8009_vm8 = vcmp.lt.s32.totalorder %v8008_v52, 0  ;;  %v5130_v54 = vand.u32 2147483647, %v9600_v15  ;;  %v4183_v48 = vadd.s32 3, %v4179_v34  ;;  %v4281_v21 = vsel %vm4196_vm5, %v4280_v57, %v9696_v60 }
 0x140   :  { %vm9736_vm7 = vcmp.le.f32.partialorder %v13694_v16, 0.7853982  ;;  %v4173_v37 = vmul.f32 %v4172_v45, %v4170_v44  ;;  %v4265_v24 = vsel %vm8009_vm8, 0, %v8008_v52  ;;  %vm5141_vm9 = vcmp.gt.s32.totalorder %v5140_v19, 0 }
 0x141   :  { %v4266_v39 = vsub.s32 32, %v4265_v24  ;;  %v4270_v46 = vsub.s32 4294967266, %v4265_v24  ;;  %v5081_v51 = vmul.u32 %v5074_v33, %v5065_v4  ;;  %vm5083_vm10 = vc.u32 %v9728_v35, %v9730_v31 }
 0x142   :  { %v4174_v38 = vxor.u32 2147483648, %v4173_v37  ;;  %v5084_v62 = vadd.s32 1, %v9731_v43  ;;  %v5142_v14 = vsel %vm5141_vm9, %v5140_v19, 0  ;;  %v4267_v10 = vshll.u32 %v9712_v59, %v4265_v24 }
 0x143   :  { %v4268_v29 = vshrl.u32 %v4250_v58, %v4266_v39  ;;  %v4271_v34 = vadd.s32 127, %v4270_v46  ;;  %v5144_v9 = vand.u32 31, %v5142_v14  ;;  %v4283_v60 = vsel %vm9736_vm7, 0, %v4281_v21 }
 0x144   :  { %v4175_v8 = vsel %vm4092_vm15, %v4174_v38, %v4173_v37  ;;  %v5085_v33 = vsel %vm5083_vm10, %v5084_v62, %v9731_v43  ;;  %v5137_v57 = vand.u32 8388607, %v5130_v54  ;;  %v695_v44 = vadd.f32 %v694_v47, %v9544_v41 }
 0x145   :  { %v4178_v4 = vsel %vm9701_vm0, %v9569_v50, %v4175_v8  ;;  %v4269_v59 = vor.u32 %v4268_v29, %v4267_v10  ;;  %v4272_v45 = vshll.u32 %v4271_v34, 23  ;;  %v5086_v52 = vadd.s32 %v5085_v33, %v5081_v51 }
 0x146   :  { %8533 = vcosq.f32 %v4178_v4  ;;  %v697_v19 = vadd.f32 %v696_v55, %v9549_v7  ;;  %v5145_v16 = vsub.s32 32, %v5144_v9  ;;  %v9762_v58 = vand.u32 3, %v4183_v48 }
 0x147   :  { %8535 = vsinq.f32 %v4178_v4  ;;  %v4273_v43 = vor.u32 4788187, %v4272_v45  ;;  %v5087_v37 = vadd.s32 536870912, %v5086_v52  ;;  %v4276_v24 = vcvt.s32.f32 %v4269_v59 }
 0x148   :  { %v4287_v39 = vadd.s32 3, %v4283_v60  ;;  %v5138_v46 = vor.u32 8388608, %v5137_v57  ;;  %v9764_v23 = vadd.f32 %v793_v11, %v695_v44  ;;  %v5148_v51 = vshrl.u32 %v13689_v28, %v5145_v16  ;;  %v795_v57 = vpop.f32.mrf.mxu1 }
 0x149   :  { %v4274_v21 = vand.u32 2147483647, %v4273_v43  ;;  %v9766_v38 = vshrl.u32 %v5087_v37, 30  ;;  %v5151_v41 = vshrl.u32 %v13684_v32, %v5145_v16  ;;  %v9770_v47 = vshrl.u32 %v5142_v14, 5 }
 0x14a   :  { %v5154_v7 = vshrl.u32 %v13685_v1, %v5145_v16  ;;  %v5156_v48 = vshll.u32 %v13685_v1, %v5144_v9  ;;  %v5157_v62 = vshrl.u32 %v13686_v0, %v5145_v16  ;;  %v5147_v34 = vshll.u32 %v13693_v61, %v5144_v9 }
 0x14b   :  { %v4277_v10 = vmul.f32 %v4276_v24, %v4274_v21  ;;  %v5089_v29 = vshll.u32 %v9766_v38, 30  ;;  %v5150_v55 = vshll.u32 %v13689_v28, %v5144_v9  ;;  %v5153_v8 = vshll.u32 %v13684_v32, %v5144_v9 }
 0x14c   :  { %v5158_v60 = vor.u32 %v5157_v62, %v5156_v48  ;;  %v5159_v33 = vshll.u32 %v13686_v0, %v5144_v9  ;;  %v5160_v14 = vshrl.u32 %v13687_v49, %v5145_v16  ;;  %vm4189_vm11 = vcmp.eq.s32.totalorder %v9762_v58, 2 }
 0x14d   :  { %v4278_v4 = vxor.u32 2147483648, %v4277_v10  ;;  %v9782_v59 = vsub.s32 %v5086_v52, %v5089_v29  ;;  %v5149_v45 = vor.u32 %v5148_v51, %v5147_v34  ;;  %v5152_v11 = vor.u32 %v5151_v41, %v5150_v55 }
 0x14e   :  { %vm4186_vm12 = vcmp.eq.s32.totalorder %v9762_v58, 0  ;;  %v9785_v44 = vand.u32 3, %v4287_v39  ;;  %v5155_v43 = vor.u32 %v5154_v7, %v5153_v8  ;;  %v5161_v37 = vor.u32 %v5160_v14, %v5159_v33 }
 0x14f   :  { %v9787_v24 = vshll.u32 %v5138_v46, 8  ;;  %vm4185_vm13 = vcmp.lt.s32.totalorder %v9762_v58, 2  ;;  %v13697_v9 = vrot.slane %v9666_v5, %v9478_v42  ;;  %v13698_v21 = vmov 0 }
 0x150   :  { %v4279_v52 = vsel %vm4196_vm5, %v4278_v4, %v4277_v10  ;;  %v5092_v51 = vsub.s32 0, %v9782_v59  ;;  %vm5165_vm15 = vcmp.lt.s32.totalorder %v9770_v47, 4  ;;  %v9801_v39 = vadd.f32 %v795_v57, %v697_v19 }
 0x151   :  { %vm9793_vm14 = vcmp.eq.s32.totalorder %v13697_v9, 1  ;;  %vm4182_vm0 = vweird.f32 %v9569_v50  ;;  %v4282_v46 = vsel %vm9736_vm7, %v9577_v25, %v4279_v52  ;;  %vm5162_vm1 = vcmp.lt.s32.totalorder %v9770_v47, 1 }
 0x152   :  { %v13699_v21 = vsel %vm9793_vm14, 4294967295, %v13698_v21  ;;  %v5171_v41 = vsel %vm5165_vm15, %v5158_v60, 920167782  ;;  %v9812_v7 = vadd.f32 %v9560_v22, %v9764_v23  ;;  %8537 = vcosq.f32 %v4282_v46 }
 0x153   :  { %13700 = vst [vmem:[#allocation24_spill] sm:$0xff] %v13699_v21  ;;  %vm5028_vm2 = vcmp.lt.s32.totalorder %v9587_v53, 0  ;;  %v8039_v19 = vmin.u32 %v5092_v51, %v9782_v59  ;;  %vm5164_vm3 = vcmp.lt.s32.totalorder %v9770_v47, 3  ;;  %v5170_v12 = vsel %vm5162_vm1, %v5149_v45, %v5152_v11  ;;  %v8534_v29 = vpop.eup %8533 }
 0x154   :  { %8539 = vsinq.f32 %v4282_v46  ;;  %v5172_v48 = vsel %vm5164_vm3, %v5155_v43, %v5171_v41  ;;  %v5174_v62 = vsel %vm5162_vm1, %v5152_v11, %v5155_v43  ;;  %v5175_v10 = vsel %vm5165_vm15, %v5161_v37, 1326507024  ;;  %v8536_v33 = vpop.eup %8535 }
 0x155   :  { %v5094_v34 = vclz %v8039_v19  ;;  %v5146_v55 = vshrl.u32 %v13693_v61, %v5145_v16  ;;  %vm5163_vm4 = vcmp.lt.s32.totalorder %v9770_v47, 2  ;;  %v5167_v8 = vsel %vm5165_vm15, %v5155_v43, 2102212464 }
 0x156   :  { %v4190_v14 = vxor.u32 2147483648, %v8534_v29  ;;  %v5112_v57 = vsub.s32 4, %v9766_v38  ;;  %v5173_v4 = vsel %vm5163_vm4, %v5170_v12, %v5172_v48  ;;  %v5176_v9 = vsel %vm5164_vm3, %v5158_v60, %v5175_v10 }
 0x157   :  { %v4187_v37 = vxor.u32 2147483648, %v8536_v33  ;;  %v8040_v52 = vadd.s32 4294967294, %v5094_v34  ;;  %v5166_v16 = vsel %vm5162_vm1, %v5146_v55, %v5149_v45  ;;  %v5177_v51 = vsel %vm5163_vm4, %v5174_v62, %v5176_v9 }
 0x158   :  { %v4191_v43 = vsel %vm4189_vm11, %v4190_v14, %v8536_v33  ;;  %v5168_v46 = vsel %vm5164_vm3, %v5152_v11, %v5167_v8  ;;  %v9843_v41 = vmul.u32.u64.low %v9787_v24, %v5177_v51  ;;  %v9844_v19 = vmul.u32.u64.high %v9787_v24, %v5177_v51, %v9843_v41 }
 0x159   :  { %v4188_v60 = vsel %vm4186_vm12, %v8534_v29, %v4187_v37  ;;  %vm8041_vm5 = vcmp.lt.s32.totalorder %v8040_v52, 0  ;;  %v9849_v12 = vmul.u32.u64.low %v9787_v24, %v5173_v4  ;;  %v9850_v45 = vmul.u32.u64.high %v9787_v24, %v5173_v4, %v9849_v12 }
 0x15a   :  { %v4192_v48 = vsel %vm4185_vm13, %v4188_v60, %v4191_v43  ;;  %v5082_v62 = vadd.s32 %v9730_v31, %v9728_v35  ;;  %v5097_v10 = vsel %vm8041_vm5, 0, %v8040_v52  ;;  %v5965_v11 = vand.u32 2139095040, %v9812_v7 }
 0x15b   :  { %v4193_v34 = vsel %vm4182_vm0, nan, %v4192_v48  ;;  %v5098_v55 = vsub.s32 32, %v5097_v10  ;;  %v5102_v8 = vsub.s32 4294967266, %v5097_v10  ;;  %v5169_v29 = vsel %vm5163_vm4, %v5166_v16, %v5168_v46 }
 0x15c   :  { %v7885_v33 = vsel %vm9793_vm14, %v9562_v20, %v4193_v34  ;;  %v13701_v58 = vrot.slane %v9666_v5, %v9517_v13  ;;  %v5113_v50 = vsel %vm5028_vm2, %v5112_v57, %v9766_v38  ;;  %vm5187_vm7 = vc.u32 %v9844_v19, %v9849_v12 }
 0x15d   :  { %v5966_v31 = vshrl.u32 %v5965_v11, 23  ;;  %7924 = vst [vmem:[#allocation5] sm:$0xff] %v7885_v33  ;;  %v5099_v47 = vshll.u32 %v9782_v59, %v5097_v10  ;;  %v5100_v14 = vshrl.u32 %v5082_v62, %v5098_v55  ;;  %v5103_v4 = vadd.s32 127, %v5102_v8 }
 0x15e   :  { %vm9867_vm6 = vcmp.eq.s32.totalorder %v13701_v58, 1  ;;  %v5188_v20 = vadd.s32 1, %v9850_v45  ;;  %vm4289_vm8 = vcmp.lt.s32.totalorder %v9785_v44, 2  ;;  %v13704_v13 = vand.u32 2147483647, %v9587_v53 }
 0x15f   :  { %v5185_v38 = vmul.u32 %v9787_v24, %v5169_v29  ;;  %v8074_v57 = vadd.s32 4294967169, %v5966_v31  ;;  %v5101_v37 = vor.u32 %v5100_v14, %v5099_v47  ;;  %v5104_v52 = vshll.u32 %v5103_v4, 23  ;;  %v8538_v51 = vpop.eup %8537 }
 0x160   :  { %vm9880_vm9 = vcmp.le.f32.partialorder %v13704_v13, 0.7853982  ;;  %v5189_v16 = vsel %vm5187_vm7, %v5188_v20, %v9850_v45  ;;  %vm4290_vm10 = vcmp.eq.s32.totalorder %v9785_v44, 0  ;;  %v5962_v46 = vand.u32 2147483647, %v9812_v7 }
 0x161   :  { %v5115_v59 = vsel %vm9880_vm9, 0, %v5113_v50  ;;  %v5190_v43 = vadd.s32 %v5189_v16, %v5185_v38  ;;  %v5972_v41 = vadd.s32 1, %v8074_v57  ;;  %v8540_v60 = vpop.eup %8539  ;;  %vm4293_vm11 = vcmp.eq.s32.totalorder %v9785_v44, 2 }
 0x162   :  { %v4294_v48 = vxor.u32 2147483648, %v8538_v51  ;;  %v5105_v24 = vor.u32 4788187, %v5104_v52  ;;  %v9893_v62 = vadd.f32 %v9565_v30, %v9801_v39  ;;  %v4291_v10 = vxor.u32 2147483648, %v8540_v60 }
 0x163   :  { %v5119_v11 = vadd.s32 3, %v5115_v59  ;;  %v5191_v34 = vadd.s32 536870912, %v5190_v43  ;;  %vm5973_vm12 = vcmp.gt.s32.totalorder %v5972_v41, 0  ;;  %v5108_v8 = vcvt.s32.f32 %v5101_v37 }
 0x164   :  { %v4295_v45 = vsel %vm4293_vm11, %v4294_v48, %v8540_v60  ;;  %v5106_v55 = vand.u32 2147483647, %v5105_v24  ;;  %v5974_v29 = vsel %vm5973_vm12, %v5972_v41, 0  ;;  %v4292_v33 = vsel %vm4290_vm10, %v8538_v51, %v4291_v10 }
 0x165   :  { %v9897_v58 = vshrl.u32 %v5191_v34, 30  ;;  %v5969_v50 = vand.u32 8388607, %v5962_v46  ;;  %v5976_v31 = vand.u32 31, %v5974_v29  ;;  %vm4286_vm13 = vweird.f32 %v9577_v25 }
 0x166   :  { %v4296_v47 = vsel %vm4289_vm8, %v4292_v33, %v4295_v45  ;;  %v5109_v14 = vmul.f32 %v5108_v8, %v5106_v55  ;;  %v6069_v4 = vand.u32 2139095040, %v9893_v62  ;;  %v9909_v52 = vand.u32 3, %v5119_v11 }
 0x167   :  { %v4297_v20 = vsel %vm4286_vm13, nan, %v4296_v47  ;;  %v5193_v13 = vshll.u32 %v9897_v58, 30  ;;  %v5977_v38 = vsub.s32 32, %v5976_v31  ;;  %v5186_v25 = vadd.s32 %v9849_v12, %v9844_v19 }
 0x168   :  { %v7886_v57 = vsel %vm9867_vm6, %v9571_v6, %v4297_v20  ;;  %v5110_v37 = vxor.u32 2147483648, %v5109_v14  ;;  %v5970_v44 = vor.u32 8388608, %v5969_v50  ;;  %v5979_v41 = vshll.u32 %v13693_v61, %v5976_v31 }
 0x169   :  { %7925 = vst [vmem:[#allocation5 + $0x8] sm:$0xff] %v7886_v57  ;;  %v9912_v59 = vsub.s32 %v5190_v43, %v5193_v13  ;;  %v5980_v16 = vshrl.u32 %v13689_v28, %v5977_v38  ;;  %v5983_v60 = vshrl.u32 %v13684_v32, %v5977_v38  ;;  %v6070_v48 = vshrl.u32 %v6069_v4, 23 }
 0x16a   :  { %v5111_v51 = vsel %vm5028_vm2, %v5110_v37, %v5109_v14  ;;  %v5975_v19 = vshrl.u32 %v5974_v29, 5  ;;  %v5982_v12 = vshll.u32 %v13689_v28, %v5976_v31  ;;  %v5985_v10 = vshll.u32 %v13684_v32, %v5976_v31 }
 0x16b   :  { %v5114_v6 = vsel %vm9880_vm9, %v9587_v53, %v5111_v51  ;;  %v5196_v24 = vsub.s32 0, %v9912_v59  ;;  %v5981_v43 = vor.u32 %v5980_v16, %v5979_v41  ;;  %v5986_v11 = vshrl.u32 %v13685_v1, %v5977_v38 }
 0x16c   :  { %8541 = vcosq.f32 %v5114_v6  ;;  %v5984_v45 = vor.u32 %v5983_v60, %v5982_v12  ;;  %v5989_v55 = vshrl.u32 %v13686_v0, %v5977_v38  ;;  %v5988_v9 = vshll.u32 %v13685_v1, %v5976_v31 }
 0x16d   :  { %8543 = vsinq.f32 %v5114_v6  ;;  %v8043_v34 = vmin.u32 %v5196_v24, %v9912_v59  ;;  %v5987_v8 = vor.u32 %v5986_v11, %v5985_v10  ;;  %v5991_v33 = vshll.u32 %v13686_v0, %v5976_v31 }
 0x16e   :  { %v5992_v29 = vshrl.u32 %v13687_v49, %v5977_v38  ;;  %v9931_v47 = vshll.u32 %v5970_v44, 8  ;;  %v13644_v14 = vand.u32 2147483647, %v9893_v62  ;;  %v8078_v4 = vadd.s32 4294967169, %v6070_v48 }
 0x16f   :  { %v5198_v50 = vclz %v8043_v34  ;;  %v5978_v20 = vshrl.u32 %v13693_v61, %v5977_v38  ;;  %v5990_v13 = vor.u32 %v5989_v55, %v5988_v9  ;;  %vm5994_vm15 = vcmp.lt.s32.totalorder %v5975_v19, 1  ;;  %v701_v55 = vpop.f32.mrf.mxu0 }
 0x170   :  { %v5993_v57 = vor.u32 %v5992_v29, %v5991_v33  ;;  %vm5132_vm0 = vcmp.lt.s32.totalorder %v9600_v15, 0  ;;  %vm5996_vm1 = vcmp.lt.s32.totalorder %v5975_v19, 3  ;;  %vm5997_vm2 = vcmp.lt.s32.totalorder %v5975_v19, 4 }
 0x171   :  { %v8044_v37 = vadd.s32 4294967294, %v5198_v50  ;;  %v6002_v31 = vsel %vm5994_vm15, %v5981_v43, %v5984_v45  ;;  %v5999_v16 = vsel %vm5997_vm2, %v5987_v8, 2102212464  ;;  %v6003_v51 = vsel %vm5997_vm2, %v5990_v13, 920167782 }
 0x172   :  { %v6006_v44 = vsel %vm5994_vm15, %v5984_v45, %v5987_v8  ;;  %v6007_v41 = vsel %vm5997_vm2, %v5993_v57, 1326507024  ;;  %vm5995_vm4 = vcmp.lt.s32.totalorder %v5975_v19, 2  ;;  %v6004_v60 = vsel %vm5996_vm1, %v5987_v8, %v6003_v51 }
 0x173   :  { %vm8045_vm3 = vcmp.lt.s32.totalorder %v8044_v37, 0  ;;  %v6008_v38 = vsel %vm5996_vm1, %v5990_v13, %v6007_v41  ;;  %v5216_v6 = vsub.s32 4, %v9897_v58  ;;  %v6005_v24 = vsel %vm5995_vm4, %v6002_v31, %v6004_v60 }
 0x174   :  { %v5201_v48 = vsel %vm8045_vm3, 0, %v8044_v37  ;;  %v6009_v12 = vsel %vm5995_vm4, %v6006_v44, %v6008_v38  ;;  %vm9945_vm5 = vcmp.le.f32.partialorder %v5130_v54, 0.7853982  ;;  %v5998_v8 = vsel %vm5994_vm15, %v5978_v20, %v5981_v43 }
 0x175   :  { %v5202_v11 = vsub.s32 32, %v5201_v48  ;;  %v5206_v34 = vsub.s32 4294967266, %v5201_v48  ;;  %v6000_v9 = vsel %vm5996_vm1, %v5984_v45, %v5999_v16  ;;  %vm5118_vm7 = vweird.f32 %v9587_v53 }
 0x176   :  { %v9953_v33 = vmul.u32.u64.low %v9931_v47, %v6009_v12  ;;  %v9954_v29 = vmul.u32.u64.high %v9931_v47, %v6009_v12, %v9953_v33  ;;  %v9957_v50 = vmul.u32.u64.low %v9931_v47, %v6005_v24  ;;  %v9958_v13 = vmul.u32.u64.high %v9931_v47, %v6005_v24, %v9957_v50 }
 0x177   :  { %v5203_v54 = vshll.u32 %v9912_v59, %v5201_v48  ;;  %v5204_v57 = vshrl.u32 %v5186_v25, %v5202_v11  ;;  %v5207_v37 = vadd.s32 127, %v5206_v34  ;;  %v6076_v31 = vadd.s32 1, %v8078_v4  ;;  %v800_v11 = vpop.f32.mrf.mxu1 }
 0x178   :  { %vm5121_vm8 = vcmp.lt.s32.totalorder %v9909_v52, 2  ;;  %vm5125_vm9 = vcmp.eq.s32.totalorder %v9909_v52, 2  ;;  %v702_v43 = vadd.f32 %v701_v55, %v9554_v18  ;;  %v6001_v45 = vsel %vm5995_vm4, %v5998_v8, %v6000_v9 }
 0x179   :  { %v8542_v20 = vpop.eup %8541  ;;  %v5205_v16 = vor.u32 %v5204_v57, %v5203_v54  ;;  %v5208_v51 = vshll.u32 %v5207_v37, 23  ;;  %v6073_v44 = vand.u32 8388607, %v13644_v14  ;;  %vm6077_vm10 = vcmp.gt.s32.totalorder %v6076_v31, 0 }
 0x17a   :  { %v8544_v41 = vpop.eup %8543  ;;  %v5126_v59 = vxor.u32 2147483648, %v8542_v20  ;;  %v5217_v25 = vsel %vm5132_vm0, %v5216_v6, %v9897_v58  ;;  %vm6019_vm11 = vc.u32 %v9954_v29, %v9957_v50  ;;  %v6020_v18 = vadd.s32 1, %v9958_v13 }
 0x17b   :  { %v5123_v19 = vxor.u32 2147483648, %v8544_v41  ;;  %v5209_v4 = vor.u32 4788187, %v5208_v51  ;;  %v6017_v60 = vmul.u32 %v9931_v47, %v6001_v45  ;;  %v6078_v38 = vsel %vm6077_vm10, %v6076_v31, 0 }
 0x17c   :  { %vm5122_vm12 = vcmp.eq.s32.totalorder %v9909_v52, 0  ;;  %v5127_v48 = vsel %vm5125_vm9, %v5126_v59, %v8544_v41  ;;  %v6021_v24 = vsel %vm6019_vm11, %v6020_v18, %v9958_v13  ;;  %v6080_v12 = vand.u32 31, %v6078_v38 }
 0x17d   :  { %v5124_v58 = vsel %vm5122_vm12, %v8542_v20, %v5123_v19  ;;  %v5210_v6 = vand.u32 2147483647, %v5209_v4  ;;  %v5212_v34 = vcvt.s32.f32 %v5205_v16  ;;  %v6022_v55 = vadd.s32 %v6021_v24, %v6017_v60 }
 0x17e   :  { %v5128_v8 = vsel %vm5121_vm8, %v5124_v58, %v5127_v48  ;;  %v5219_v47 = vsel %vm9945_vm5, 0, %v5217_v25  ;;  %v6074_v9 = vor.u32 8388608, %v6073_v44  ;;  %v6081_v33 = vsub.s32 32, %v6080_v12 }
 0x17f   :  { %v5129_v54 = vsel %vm5118_vm7, nan, %v5128_v8  ;;  %v5213_v57 = vmul.f32 %v5212_v34, %v5210_v6  ;;  %v6023_v37 = vadd.s32 536870912, %v6022_v55  ;;  %v9985_v13 = vadd.f32 %v800_v11, %v702_v43 }
 0x180   :  { %v7894_v31 = vsel %vm9793_vm14, %v9579_v36, %v5129_v54  ;;  %v6083_v45 = vshll.u32 %v13693_v61, %v6080_v12  ;;  %v6084_v52 = vshrl.u32 %v13689_v28, %v6081_v33  ;;  %v6087_v20 = vshrl.u32 %v13684_v32, %v6081_v33 }
 0x181   :  { %7934 = vst [vmem:[#allocation5 + $0x48] sm:$0xff] %v7894_v31  ;;  %v5214_v16 = vxor.u32 2147483648, %v5213_v57  ;;  %v6024_v51 = vshrl.u32 %v6023_v37, 30  ;;  %v6086_v53 = vshll.u32 %v13689_v28, %v6080_v12  ;;  %v6090_v44 = vshrl.u32 %v13685_v1, %v6081_v33 }
 0x182   :  { %v6079_v41 = vshrl.u32 %v6078_v38, 5  ;;  %v6089_v43 = vshll.u32 %v13684_v32, %v6080_v12  ;;  %v6092_v59 = vshll.u32 %v13685_v1, %v6080_v12  ;;  %v6093_v36 = vshrl.u32 %v13686_v0, %v6081_v33 }
 0x183   :  { %v5215_v25 = vsel %vm5132_vm0, %v5214_v16, %v5213_v57  ;;  %v6025_v18 = vshll.u32 %v6024_v51, 30  ;;  %v6085_v19 = vor.u32 %v6084_v52, %v6083_v45  ;;  %v6088_v4 = vor.u32 %v6087_v20, %v6086_v53  ;;  %v703_v45 = vpop.f32.mrf.mxu0 }
 0x184   :  { %v5218_v60 = vsel %vm9945_vm5, %v9600_v15, %v5215_v25  ;;  %v6094_v48 = vor.u32 %v6093_v36, %v6092_v59  ;;  %v6095_v24 = vshll.u32 %v13686_v0, %v6080_v12  ;;  %v6096_v38 = vshrl.u32 %v13687_v49, %v6081_v33 }
 0x185   :  { %8545 = vcosq.f32 %v5218_v60  ;;  %v10005_v11 = vsub.s32 %v6022_v55, %v6025_v18  ;;  %v6091_v58 = vor.u32 %v6090_v44, %v6089_v43  ;;  %v5223_v6 = vadd.s32 3, %v5219_v47 }
 0x186   :  { %8547 = vsinq.f32 %v5218_v60  ;;  %v6097_v34 = vor.u32 %v6096_v38, %v6095_v24  ;;  %v10007_v8 = vshll.u32 %v6074_v9, 8  ;;  %vm6098_vm13 = vcmp.lt.s32.totalorder %v6079_v41, 1 }
 0x187   :  { %v6028_v54 = vsub.s32 0, %v10005_v11  ;;  %vm6101_vm15 = vcmp.lt.s32.totalorder %v6079_v41, 4  ;;  %v10012_v10 = vadd.f32 %v9560_v22, %v9985_v13  ;;  %v6082_v12 = vshrl.u32 %v13693_v61, %v6081_v33 }
 0x188   :  { %vm6100_vm0 = vcmp.lt.s32.totalorder %v6079_v41, 3  ;;  %v6106_v55 = vsel %vm6098_vm13, %v6085_v19, %v6088_v4  ;;  %v6107_v57 = vsel %vm6101_vm15, %v6094_v48, 920167782  ;;  %vm6099_vm1 = vcmp.lt.s32.totalorder %v6079_v41, 2 }
 0x189   :  { %v8075_v37 = vmin.u32 %v6028_v54, %v10005_v11  ;;  %v6103_v47 = vsel %vm6101_vm15, %v6091_v58, 2102212464  ;;  %v6108_v9 = vsel %vm6100_vm0, %v6091_v58, %v6107_v57  ;;  %v6048_v31 = vsub.s32 4, %v6024_v51 }
 0x18a   :  { %v6109_v52 = vsel %vm6099_vm1, %v6106_v55, %v6108_v9  ;;  %v6110_v20 = vsel %vm6098_vm13, %v6088_v4, %v6091_v58  ;;  %v6111_v22 = vsel %vm6101_vm15, %v6097_v34, 1326507024  ;;  %v5224_v16 = vand.u32 3, %v5223_v6  ;;  %v10049_v34 = vpop.f32.mrf.mxu0 }
 0x18b   :  { %v6030_v53 = vclz %v8075_v37  ;;  %v6102_v33 = vsel %vm6098_vm13, %v6082_v12, %v6085_v19  ;;  %v10022_v44 = vsub.s32 2, %v9465_v40  ;;  %v6104_v43 = vsel %vm6100_vm0, %v6088_v4, %v6103_v47  ;;  %v802_v19 = vpop.f32.mrf.mxu1 }
 0x18c   :  { %v6112_v59 = vsel %vm6100_vm0, %v6094_v48, %v6111_v22  ;;  %v10027_v36 = vmul.u32.u64.low %v10007_v8, %v6109_v52  ;;  %v10028_v25 = vmul.u32.u64.high %v10007_v8, %v6109_v52, %v10027_v36  ;;  %vm5964_vm2 = vcmp.lt.s32.totalorder %v9812_v7, 0 }
 0x18d   :  { %v8076_v18 = vadd.s32 4294967294, %v6030_v53  ;;  %v704_v60 = vadd.f32 %v703_v45, %v9557_v17  ;;  %v6113_v24 = vsel %vm6099_vm1, %v6110_v20, %v6112_v59  ;;  %v6049_v38 = vsel %vm5964_vm2, %v6048_v31, %v6024_v51  ;;  %v10056_v47 = vpop.f32.mrf.mxu1  ;;  %v10063_v53 = vpop.f32.mrf.mxu0 }
 0x18e   :  { %v10037_v4 = vmul.u32.u64.low %v10007_v8, %v6113_v24  ;;  %v10038_v58 = vmul.u32.u64.high %v10007_v8, %v6113_v24, %v10037_v4  ;;  %v6901_v48 = vand.u32 2139095040, %v10012_v10  ;;  %vm5222_vm3 = vweird.f32 %v9600_v15 }
 0x18f   :  { %vm5225_vm4 = vcmp.lt.s32.totalorder %v5224_v16, 2  ;;  %vm10044_vm5 = vcmp.le.f32.partialorder %v5962_v46, 0.7853982  ;;  %vm8077_vm7 = vcmp.lt.s32.totalorder %v8076_v18, 0  ;;  %v6105_v17 = vsel %vm6099_vm1, %v6102_v33, %v6104_v43 }
 0x190   :  { %vm5229_vm8 = vcmp.eq.s32.totalorder %v5224_v16, 2  ;;  %v6033_v51 = vsel %vm8077_vm7, 0, %v8076_v18  ;;  %v6124_v54 = vadd.s32 1, %v10028_v25  ;;  %v6902_v12 = vshrl.u32 %v6901_v48, 23 }
 0x191   :  { %v6018_v55 = vadd.s32 %v9957_v50, %v9954_v29  ;;  %v6034_v57 = vsub.s32 32, %v6033_v51  ;;  %v6038_v37 = vsub.s32 4294967266, %v6033_v51  ;;  %v6051_v46 = vsel %vm10044_vm5, 0, %v6049_v38  ;;  %v10067_v38 = vpop.f32.mrf.mxu1 }
 0x192   :  { %v8546_v9 = vpop.eup %8545  ;;  %v6035_v41 = vshll.u32 %v10005_v11, %v6033_v51  ;;  %v6121_v31 = vmul.u32 %v10007_v8, %v6105_v17  ;;  %vm6123_vm9 = vc.u32 %v10038_v58, %v10027_v36  ;;  %v8110_v45 = vadd.s32 4294967169, %v6902_v12 }
 0x193   :  { %v8548_v52 = vpop.eup %8547  ;;  %v5230_v20 = vxor.u32 2147483648, %v8546_v9  ;;  %v6036_v22 = vshrl.u32 %v6018_v55, %v6034_v57  ;;  %v6039_v29 = vadd.s32 127, %v6038_v37  ;;  %v6125_v50 = vsel %vm6123_vm9, %v6124_v54, %v10028_v25  ;;  %v10072_v55 = vpop.f32.mrf.mxu0 }
 0x194   :  { %v5227_v33 = vxor.u32 2147483648, %v8548_v52  ;;  %v6126_v43 = vadd.s32 %v6125_v50, %v6121_v31  ;;  %v13643_v59 = vand.u32 2147483647, %v10012_v10  ;;  %v6908_v18 = vadd.s32 1, %v8110_v45  ;;  %v10083_v31 = vpop.f32.mrf.mxu1 }
 0x195   :  { %vm5226_vm10 = vcmp.eq.s32.totalorder %v5224_v16, 0  ;;  %v5231_v11 = vsel %vm5229_vm8, %v5230_v20, %v8548_v52  ;;  %v6037_v8 = vor.u32 %v6036_v22, %v6035_v41  ;;  %v6040_v24 = vshll.u32 %v6039_v29, 23  ;;  %v10091_v20 = vld [vmem:[%s13607_s2] sm:$0xff] }
 0x196   :  { %v5228_v4 = vsel %vm5226_vm10, %v8546_v9, %v5227_v33  ;;  %v6127_v48 = vadd.s32 536870912, %v6126_v43  ;;  %vm6909_vm11 = vcmp.gt.s32.totalorder %v6908_v18, 0  ;;  %v10069_v17 = vadd.f32 %v802_v19, %v704_v60 }
 0x197   :  { %v5232_v25 = vsel %vm5225_vm4, %v5228_v4, %v5231_v11  ;;  %v6041_v51 = vor.u32 4788187, %v6040_v24  ;;  %v6055_v54 = vadd.s32 3, %v6051_v46  ;;  %v6910_v12 = vsel %vm6909_vm11, %v6908_v18, 0 }
 0x198   :  { %13711 = vst [vmem:[#allocation25_spill] sm:$0xff] %v10069_v17  ;;  %v5233_v57 = vsel %vm5222_vm3, nan, %v5232_v25  ;;  %v10076_v37 = vshrl.u32 %v6127_v48, 30  ;;  %v6905_v41 = vand.u32 8388607, %v13643_v59  ;;  %v6912_v9 = vand.u32 31, %v6910_v12  ;;  %v10109_v48 = vpop.f32.mrf.mxu1 }
 0x199   :  { %v7895_v60 = vsel %vm9867_vm6, %v9591_v3, %v5233_v57  ;;  %v6042_v16 = vand.u32 2147483647, %v6041_v51  ;;  %v6044_v19 = vcvt.s32.f32 %v6037_v8  ;;  %v10086_v52 = vand.u32 3, %v6055_v54  ;;  %v10097_v3 = vpop.f32.mrf.mxu0 }
 0x19a   :  { %7935 = vst [vmem:[#allocation5 + $0x50] sm:$0xff] %v7895_v60  ;;  %v6129_v46 = vshll.u32 %v10076_v37, 30  ;;  %v6913_v45 = vsub.s32 32, %v6912_v9  ;;  %v10095_v22 = vrot.slane %v10091_v20, %v10022_v44  ;;  %v6906_v50 = vor.u32 8388608, %v6905_v41 }
 0x19b   :  { %v6045_v15 = vmul.f32 %v6044_v19, %v6042_v16  ;;  %v10104_v18 = vadd.f32 %v9565_v30, %v10069_v17  ;;  %v6915_v8 = vshll.u32 %v13693_v61, %v6912_v9  ;;  %v6921_v51 = vshll.u32 %v13684_v32, %v6912_v9  ;;  %v10118_v16 = vpop.f32.mrf.mxu0 }
 0x19c   :  { %v10099_v29 = vsub.s32 %v6126_v43, %v6129_v46  ;;  %v6916_v33 = vshrl.u32 %v13689_v28, %v6913_v45  ;;  %v6919_v24 = vshrl.u32 %v13684_v32, %v6913_v45  ;;  %v6922_v4 = vshrl.u32 %v13685_v1, %v6913_v45  ;;  %13712 = vst [vmem:[#allocation26_spill] sm:$0xff] %v10118_v16 }
 0x19d   :  { %v6046_v11 = vxor.u32 2147483648, %v6045_v15  ;;  %v6918_v43 = vshll.u32 %v13689_v28, %v6912_v9  ;;  %v6925_v54 = vshrl.u32 %v13686_v0, %v6913_v45  ;;  %v6911_v57 = vshrl.u32 %v6910_v12, 5  ;;  %v10126_v12 = vpop.f32.mrf.mxu1 }
 0x19e   :  { %v6132_v25 = vsub.s32 0, %v10099_v29  ;;  %v6917_v41 = vor.u32 %v6916_v33, %v6915_v8  ;;  %v6924_v60 = vshll.u32 %v13685_v1, %v6912_v9  ;;  %v6923_v14 = vor.u32 %v6922_v4, %v6921_v51  ;;  %13713 = vst [vmem:[#allocation27_spill] sm:$0xff] %v10126_v12  ;;  %v10134_v4 = vpop.f32.mrf.mxu0 }
 0x19f   :  { %v6047_v30 = vsel %vm5964_vm2, %v6046_v11, %v6045_v15  ;;  %v6920_v59 = vor.u32 %v6919_v24, %v6918_v43  ;;  %v6927_v5 = vshll.u32 %v13686_v0, %v6912_v9  ;;  %v6928_v15 = vshrl.u32 %v13687_v49, %v6913_v45  ;;  %13714 = vst [vmem:[#allocation28_spill] sm:$0xff] %v10134_v4 }
 0x1a0   :  { %v6050_v19 = vsel %vm10044_vm5, %v9812_v7, %v6047_v30  ;;  %v8079_v46 = vmin.u32 %v6132_v25, %v10099_v29  ;;  %v6926_v42 = vor.u32 %v6925_v54, %v6924_v60  ;;  %v6122_v33 = vadd.s32 %v10027_v36, %v10038_v58 }
 0x1a1   :  { %8549 = vcosq.f32 %v6050_v19  ;;  %v10130_v8 = vshll.u32 %v6906_v50, 8  ;;  %v6914_v6 = vshrl.u32 %v13693_v61, %v6913_v45  ;;  %v6929_v25 = vor.u32 %v6928_v15, %v6927_v5  ;;  %v10138_v50 = vpop.f32.mrf.mxu1  ;;  %v10145_v15 = vpop.f32.mrf.mxu0 }
 0x1a2   :  { %8551 = vsinq.f32 %v6050_v19  ;;  %v6134_v11 = vclz %v8079_v46  ;;  %vm6930_vm12 = vcmp.lt.s32.totalorder %v6911_v57, 1  ;;  %v7005_v24 = vand.u32 2139095040, %v10104_v18  ;;  %13715 = vst [vmem:[#allocation29_spill] sm:$0xff] %v10138_v50  ;;  %13716 = vst [vmem:[#allocation30_spill] sm:$0xff] %v10145_v15 }
 0x1a3   :  { %vm6932_vm13 = vcmp.lt.s32.totalorder %v6911_v57, 3  ;;  %vm6933_vm15 = vcmp.lt.s32.totalorder %v6911_v57, 4  ;;  %v6938_v43 = vsel %vm6930_vm12, %v6917_v41, %v6920_v59  ;;  %v6942_v36 = vsel %vm6930_vm12, %v6920_v59, %v6923_v14 }
 0x1a4   :  { %v8080_v9 = vadd.s32 4294967294, %v6134_v11  ;;  %v6935_v51 = vsel %vm6933_vm15, %v6923_v14, 2102212464  ;;  %v6939_v54 = vsel %vm6933_vm15, %v6926_v42, 920167782  ;;  %vm6931_vm1 = vcmp.lt.s32.totalorder %v6911_v57, 2 }
 0x1a5   :  { %v6943_v58 = vsel %vm6933_vm15, %v6929_v25, 1326507024  ;;  %v6940_v5 = vsel %vm6932_vm13, %v6923_v14, %v6939_v54  ;;  %v6934_v60 = vsel %vm6930_vm12, %v6914_v6, %v6917_v41  ;;  %v6936_v25 = vsel %vm6932_vm13, %v6920_v59, %v6935_v51  ;;  %v10157_v41 = vpop.f32.mrf.mxu1 }
 0x1a6   :  { %vm8081_vm0 = vcmp.lt.s32.totalorder %v8080_v9, 0  ;;  %v6944_v45 = vsel %vm6932_vm13, %v6926_v42, %v6943_v58  ;;  %v6941_v19 = vsel %vm6931_vm1, %v6938_v43, %v6940_v5  ;;  %v7006_v50 = vshrl.u32 %v7005_v24, 23  ;;  %13717 = vst [vmem:[#allocation31_spill] sm:$0xff] %v10157_v41  ;;  %v10163_v24 = vpop.f32.mrf.mxu0 }
 0x1a7   :  { %v6137_v30 = vsel %vm8081_vm0, 0, %v8080_v9  ;;  %v6945_v46 = vsel %vm6931_vm1, %v6942_v36, %v6944_v45  ;;  %v10153_v42 = vmul.u32.u64.low %v10130_v8, %v6941_v19  ;;  %v10154_v14 = vmul.u32.u64.high %v10130_v8, %v6941_v19, %v10153_v42  ;;  %13718 = vst [vmem:[#allocation32_spill] sm:$0xff] %v10163_v24  ;;  %v10171_v57 = vpop.f32.mrf.mxu1 }
 0x1a8   :  { %v6138_v11 = vsub.s32 32, %v6137_v30  ;;  %v6142_v4 = vsub.s32 4294967266, %v6137_v30  ;;  %v10149_v12 = vmul.u32.u64.low %v10130_v8, %v6945_v46  ;;  %v10150_v17 = vmul.u32.u64.high %v10130_v8, %v6945_v46, %v10149_v12  ;;  %13719 = vst [vmem:[#allocation33_spill] sm:$0xff] %v10171_v57  ;;  %v10179_v46 = vpop.f32.mrf.mxu0 }
 0x1a9   :  { %v6139_v6 = vshll.u32 %v10099_v29, %v6137_v30  ;;  %v8114_v54 = vadd.s32 4294967169, %v7006_v50  ;;  %v6937_v36 = vsel %vm6931_vm1, %v6934_v60, %v6936_v25  ;;  %v894_v59 = vadd.f32 %v10072_v55, %v10095_v22 }
 0x1aa   :  { %v6140_v9 = vshrl.u32 %v6122_v33, %v6138_v11  ;;  %v6143_v43 = vadd.s32 127, %v6142_v4  ;;  %vm6068_vm2 = vcmp.lt.s32.totalorder %v9893_v62, 0  ;;  %vm6058_vm3 = vcmp.eq.s32.totalorder %v10086_v52, 0 }
 0x1ab   :  { %v7012_v58 = vadd.s32 1, %v8114_v54  ;;  %v6152_v5 = vsub.s32 4, %v10076_v37  ;;  %vm6955_vm4 = vc.u32 %v10150_v17, %v10153_v42  ;;  %v6956_v29 = vadd.s32 1, %v10154_v14 }
 0x1ac   :  { %v6141_v12 = vor.u32 %v6140_v9, %v6139_v6  ;;  %v6144_v51 = vshll.u32 %v6143_v43, 23  ;;  %vm6061_vm5 = vcmp.eq.s32.totalorder %v10086_v52, 2  ;;  %v6953_v4 = vmul.u32 %v10130_v8, %v6937_v36 }
 0x1ad   :  { %vm7013_vm7 = vcmp.gt.s32.totalorder %v7012_v58, 0  ;;  %v6957_v30 = vsel %vm6955_vm4, %v6956_v29, %v10154_v14  ;;  %v10177_v19 = vadd.f32 %v10083_v31, %v894_v59  ;;  %v6153_v8 = vsel %vm6068_vm2, %v6152_v5, %v10076_v37  ;;  %v10197_v5 = vpop.f32.mrf.mxu0 }
 0x1ae   :  { %v8550_v33 = vpop.eup %8549  ;;  %v6145_v55 = vor.u32 4788187, %v6144_v51  ;;  %v7014_v60 = vsel %vm7013_vm7, %v7012_v58, 0  ;;  %v6148_v6 = vcvt.s32.f32 %v6141_v12  ;;  %v6958_v9 = vadd.s32 %v6957_v30, %v6953_v4  ;;  %v10185_v51 = vpop.f32.mrf.mxu1 }
 0x1af   :  { %v8552_v50 = vpop.eup %8551  ;;  %v6062_v45 = vxor.u32 2147483648, %v8550_v33  ;;  %v13649_v54 = vand.u32 2147483647, %v10104_v18  ;;  %v7016_v36 = vand.u32 31, %v7014_v60  ;;  %vm6057_vm8 = vcmp.lt.s32.totalorder %v10086_v52, 2 }
 0x1b0   :  { %v6059_v11 = vxor.u32 2147483648, %v8552_v50  ;;  %v6146_v25 = vand.u32 2147483647, %v6145_v55  ;;  %v6959_v59 = vadd.s32 536870912, %v6958_v9  ;;  %vm6054_vm9 = vweird.f32 %v9812_v7 }
 0x1b1   :  { %v6063_v43 = vsel %vm6061_vm5, %v6062_v45, %v8552_v50  ;;  %v13720_v58 = vand.u32 2147483647, %v9893_v62  ;;  %v7017_v37 = vsub.s32 32, %v7016_v36  ;;  %v7009_v50 = vand.u32 8388607, %v13649_v54 }
 0x1b2   :  { %v6060_v31 = vsel %vm6058_vm3, %v8550_v33, %v6059_v11  ;;  %v6149_v14 = vmul.f32 %v6148_v6, %v6146_v25  ;;  %v10201_v33 = vshrl.u32 %v6959_v59, 30  ;;  %v10210_v11 = vpop.f32.mrf.mxu1  ;;  %v7015_v59 = vshrl.u32 %v7014_v60, 5 }
 0x1b3   :  { %v6064_v12 = vsel %vm6057_vm8, %v6060_v31, %v6063_v43  ;;  %vm10193_vm10 = vcmp.le.f32.partialorder %v13720_v58, 0.7853982  ;;  %v7020_v45 = vshrl.u32 %v13689_v28, %v7017_v37  ;;  %v7023_v30 = vshrl.u32 %v13684_v32, %v7017_v37  ;;  %v10221_v58 = vpop.f32.mrf.mxu0 }
 0x1b4   :  { %v6065_v55 = vsel %vm6054_vm9, nan, %v6064_v12  ;;  %v6150_v4 = vxor.u32 2147483648, %v6149_v14  ;;  %v6155_v52 = vsel %vm10193_vm10, 0, %v6153_v8  ;;  %v6961_v6 = vshll.u32 %v10201_v33, 30  ;;  %v10228_v29 = vpop.f32.mrf.mxu1 }
 0x1b5   :  { %v7903_v7 = vsel %vm9793_vm14, %v9764_v23, %v6065_v55  ;;  %v7019_v43 = vshll.u32 %v13693_v61, %v7016_v36  ;;  %v7026_v8 = vshrl.u32 %v13685_v1, %v7017_v37  ;;  %v6159_v31 = vadd.s32 3, %v6155_v52 }
 0x1b6   :  { %7943 = vst [vmem:[#allocation5 + $0x90] sm:$0xff] %v7903_v7  ;;  %v6151_v25 = vsel %vm6068_vm2, %v6150_v4, %v6149_v14  ;;  %v7022_v12 = vshll.u32 %v13689_v28, %v7016_v36  ;;  %v10223_v55 = vsub.s32 %v6958_v9, %v6961_v6  ;;  %v7025_v4 = vshll.u32 %v13684_v32, %v7016_v36 }
 0x1b7   :  { %v6154_v23 = vsel %vm10193_vm10, %v9893_v62, %v6151_v25  ;;  %v7021_v14 = vor.u32 %v7020_v45, %v7019_v43  ;;  %v7028_v54 = vshll.u32 %v13685_v1, %v7016_v36  ;;  %v7029_v57 = vshrl.u32 %v13686_v0, %v7017_v37  ;;  %v10236_v43 = vpop.f32.mrf.mxu0 }
 0x1b8   :  { %8553 = vcosq.f32 %v6154_v23  ;;  %v7024_v7 = vor.u32 %v7023_v30, %v7022_v12  ;;  %v6964_v60 = vsub.s32 0, %v10223_v55  ;;  %v7027_v52 = vor.u32 %v7026_v8, %v7025_v4  ;;  %v10241_v4 = vpop.f32.mrf.mxu1 }
 0x1b9   :  { %8555 = vsinq.f32 %v6154_v23  ;;  %v7031_v25 = vshll.u32 %v13686_v0, %v7016_v36  ;;  %v7032_v41 = vshrl.u32 %v13687_v49, %v7017_v37  ;;  %v10234_v9 = vsub.s32 3, %v9465_v40  ;;  %13723 = vst [vmem:[#allocation34_spill] sm:$0xff] %v10241_v4 }
 0x1ba   :  { %v7010_v45 = vor.u32 8388608, %v7009_v50  ;;  %v7030_v6 = vor.u32 %v7029_v57, %v7028_v54  ;;  %v8111_v30 = vmin.u32 %v6964_v60, %v10223_v55  ;;  %vm7034_vm11 = vcmp.lt.s32.totalorder %v7015_v59, 1  ;;  %v10253_v21 = vpop.f32.mrf.mxu1 }
 0x1bb   :  { %v7033_v23 = vor.u32 %v7032_v41, %v7031_v25  ;;  %vm7037_vm12 = vcmp.lt.s32.totalorder %v7015_v59, 4  ;;  %v6160_v12 = vand.u32 3, %v6159_v31  ;;  %v7018_v24 = vshrl.u32 %v13693_v61, %v7017_v37  ;;  %v10244_v41 = vpop.f32.mrf.mxu0 }
 0x1bc   :  { %v7042_v8 = vsel %vm7034_vm11, %v7021_v14, %v7024_v7  ;;  %v7043_v36 = vsel %vm7037_vm12, %v7030_v6, 920167782  ;;  %v6966_v15 = vclz %v8111_v30  ;;  %vm7036_vm13 = vcmp.lt.s32.totalorder %v7015_v59, 3 }
 0x1bd   :  { %v7039_v40 = vsel %vm7037_vm12, %v7027_v52, 2102212464  ;;  %v7046_v57 = vsel %vm7034_vm11, %v7024_v7, %v7027_v52  ;;  %vm7035_vm15 = vcmp.lt.s32.totalorder %v7015_v59, 2  ;;  %v7044_v54 = vsel %vm7036_vm13, %v7027_v52, %v7043_v36  ;;  %v10269_v36 = vpop.f32.mrf.mxu1 }
 0x1be   :  { %v7047_v50 = vsel %vm7037_vm12, %v7033_v23, 1326507024  ;;  %v7050_v60 = vshll.u32 %v7010_v45, 8  ;;  %v8112_v25 = vadd.s32 4294967294, %v6966_v15  ;;  %v7038_v31 = vsel %vm7034_vm11, %v7018_v24, %v7021_v14  ;;  %v10258_v15 = vpop.f32.mrf.mxu0 }
 0x1bf   :  { %v7045_v37 = vsel %vm7035_vm15, %v7042_v8, %v7044_v54  ;;  %v7048_v16 = vsel %vm7036_vm13, %v7030_v6, %v7047_v50  ;;  %v7040_v49 = vsel %vm7036_vm13, %v7024_v7, %v7039_v40  ;;  %v6954_v24 = vadd.s32 %v10153_v42, %v10150_v17 }
 0x1c0   :  { %v7049_v4 = vsel %vm7035_vm15, %v7046_v57, %v7048_v16  ;;  %v10249_v30 = vmul.u32.u64.low %v7050_v60, %v7045_v37  ;;  %v10250_v0 = vmul.u32.u64.high %v7050_v60, %v7045_v37, %v10249_v30  ;;  %vm8113_vm0 = vcmp.lt.s32.totalorder %v8112_v25, 0  ;;  %v10274_v50 = vpop.f32.mrf.mxu0 }
 0x1c1   :  { %v10255_v52 = vmul.u32.u64.low %v7050_v60, %v7049_v4  ;;  %v10256_v45 = vmul.u32.u64.high %v7050_v60, %v7049_v4, %v10255_v52  ;;  %v6969_v23 = vsel %vm8113_vm0, 0, %v8112_v25  ;;  %v7041_v16 = vsel %vm7035_vm15, %v7038_v31, %v7040_v49 }
 0x1c2   :  { %v6970_v14 = vsub.s32 32, %v6969_v23  ;;  %v6974_v40 = vsub.s32 4294967266, %v6969_v23  ;;  %vm6158_vm1 = vweird.f32 %v9893_v62  ;;  %vm6162_vm2 = vcmp.eq.s32.totalorder %v6160_v12, 0  ;;  %v79_v52 = vld [vmem:[%s13610_s5 + $0x10] sm:$0xff] }
 0x1c3   :  { %v10266_v6 = vrot.slane %v10091_v20, %v10234_v9  ;;  %v7060_v8 = vadd.s32 1, %v10250_v0  ;;  %v6971_v17 = vshll.u32 %v10223_v55, %v6969_v23  ;;  %vm6165_vm3 = vcmp.eq.s32.totalorder %v6160_v12, 2 }
 0x1c4   :  { %v6972_v42 = vshrl.u32 %v6954_v24, %v6970_v14  ;;  %v6975_v54 = vadd.s32 127, %v6974_v40  ;;  %v7057_v49 = vmul.u32 %v7050_v60, %v7041_v16  ;;  %vm7059_vm4 = vc.u32 %v10256_v45, %v10249_v30  ;;  %v78_v24 = vld [vmem:[%s13610_s5 + $0x8] sm:$0xff]  ;;  %v10286_v14 = vpop.f32.mrf.mxu1 }
 0x1c5   :  { %v8554_v7 = vpop.eup %8553  ;;  %v7061_v37 = vsel %vm7059_vm4, %v7060_v8, %v10250_v0  ;;  %vm6161_vm5 = vcmp.lt.s32.totalorder %v6160_v12, 2  ;;  %v883_v60 = vadd.f32 %v10049_v34, %v10095_v22  ;;  %vm6900_vm7 = vcmp.lt.s32.totalorder %v10012_v10, 0 }
 0x1c6   :  { %v8556_v4 = vpop.eup %8555  ;;  %v6166_v57 = vxor.u32 2147483648, %v8554_v7  ;;  %v6973_v25 = vor.u32 %v6972_v42, %v6971_v17  ;;  %v6976_v31 = vshll.u32 %v6975_v54, 23  ;;  %v7062_v23 = vadd.s32 %v7061_v37, %v7057_v49 }
 0x1c7   :  { %v6163_v59 = vxor.u32 2147483648, %v8556_v4  ;;  %v6984_v16 = vsub.s32 4, %v10201_v33  ;;  %v10294_v8 = vand.u32 4294901760, %v79_v52  ;;  %v10304_v62 = vand.u32 4294901760, %v78_v24 }
 0x1c8   :  { %v6167_v20 = vsel %vm6165_vm3, %v6166_v57, %v8556_v4  ;;  %v6977_v0 = vor.u32 4788187, %v6976_v31  ;;  %v7063_v34 = vadd.s32 536870912, %v7062_v23  ;;  %v10296_v4 = vpop.f32.mrf.mxu0  ;;  %v77_v57 = vld [vmem:[%s13610_s5] sm:$0xff]  ;;  %v6980_v54 = vcvt.s32.f32 %v6973_v25  ;;  %v10310_v31 = vpop.f32.mrf.mxu1 }
 0x1c9   :  { %v6164_v55 = vsel %vm6162_vm2, %v8554_v7, %v6163_v59  ;;  %v885_v7 = vadd.f32 %v10063_v53, %v10266_v6  ;;  %v1018_v53 = vadd.f32 %v10056_v47, %v883_v60  ;;  %8302 = vmatprep.subr.mxu0 %v10294_v8  ;;  %v10316_v25 = vand.u32 4294901760, %v77_v57 }
 0x1ca   :  { %v6168_v40 = vsel %vm6161_vm5, %v6164_v55, %v6167_v20  ;;  %v6978_v42 = vand.u32 2147483647, %v6977_v0  ;;  %v7064_v59 = vshrl.u32 %v7063_v34, 30  ;;  %v3540_v20 = vsub.f32 %v79_v52, %v10294_v8  ;;  %8303 = vmatpush3.msra.mxu0 %v10294_v8 }
 0x1cb   :  { %v6169_v12 = vsel %vm6158_vm1, nan, %v6168_v40  ;;  %v1020_v49 = vadd.f32 %v10067_v38, %v885_v7  ;;  %v3547_v55 = vsub.f32 %v78_v24, %v10304_v62  ;;  %v13724_v47 = vand.u32 2147483647, %v10012_v10  ;;  %8304 = vmatprep.subr.mxu0 %v10304_v62 }
 0x1cc   :  { %v7904_v17 = vsel %vm9867_vm6, %v9801_v39, %v6169_v12  ;;  %v6981_v37 = vmul.f32 %v6980_v54, %v6978_v42  ;;  %v6985_v39 = vsel %vm6900_vm7, %v6984_v16, %v10201_v33  ;;  %v7065_v52 = vshll.u32 %v7064_v59, 30  ;;  %v1344_v33 = vpop.f32.mrf.mxu0  ;;  %8305 = vmatpush3.msra.mxu0 %v10304_v62  ;;  %v1443_v42 = vpop.f32.mrf.mxu1 }
 0x1cd   :  { %7944 = vst [vmem:[#allocation5 + $0x98] sm:$0xff] %v7904_v17  ;;  %vm10321_vm8 = vcmp.le.f32.partialorder %v13724_v47, 0.7853982  ;;  %v1124_v60 = vadd.f32 %v10179_v46, %v1018_v53  ;;  %v10327_v40 = vand.u32 4294901760, %v3540_v20  ;;  %v1126_v16 = vadd.f32 %v10197_v5, %v1020_v49  ;;  %8306 = vmatprep.subr.mxu0 %v10316_v25 }
 0x1ce   :  { %v6982_v0 = vxor.u32 2147483648, %v6981_v37  ;;  %v10331_v24 = vand.u32 4294901760, %v3547_v55  ;;  %v3554_v12 = vsub.f32 %v77_v57, %v10316_v25  ;;  %v6987_v7 = vsel %vm10321_vm8, 0, %v6985_v39  ;;  %8307 = vmatpush3.msra.mxu0 %v10316_v25  ;;  %v1346_v47 = vpop.f32.mrf.mxu0 }
 0x1cf   :  { %v10336_v34 = vsub.s32 %v7062_v23, %v7065_v52  ;;  %v1228_v46 = vadd.f32 %v10185_v51, %v1124_v60  ;;  %v3542_v17 = vsub.f32 %v3540_v20, %v10327_v40  ;;  %v1230_v54 = vadd.f32 %v10210_v11, %v1126_v16  ;;  %8309 = vmatmul.mubr.f32.vlgmr.msra.gmra.mxu0 %v8921_v56 }
 0x1d0   :  { %v6983_v5 = vsel %vm6900_vm7, %v6982_v0, %v6981_v37  ;;  %v3549_v53 = vsub.f32 %v3547_v55, %v10331_v24  ;;  %v10346_v57 = vand.u32 4294901760, %v3554_v12  ;;  %v7088_v49 = vsub.s32 4, %v7064_v59  ;;  %8326 = vmatprep.subr.mxu0 %v3540_v20  ;;  %8311 = vmatprep.mubr.f32.mxu0 %v8947_v63  ;;  %v1445_v0 = vpop.f32.mrf.mxu1 }
 0x1d1   :  { %v6986_v51 = vsel %vm10321_vm8, %v10012_v10, %v6983_v5  ;;  %v7068_v23 = vsub.s32 0, %v10336_v34  ;;  %v3543_v39 = vand.u32 4294901760, %v3542_v17  ;;  %v1345_v37 = vadd.f32 %v1344_v33, %v1228_v46  ;;  %8327 = vmatpush3.msra.mxu0 %v3540_v20  ;;  %v8678_v33 = vld [vmem:[%s13608_s3] sm:$0xff] }
 0x1d2   :  { %8557 = vcosq.f32 %v6986_v51  ;;  %v3550_v11 = vand.u32 4294901760, %v3549_v53  ;;  %v3556_v52 = vsub.f32 %v3554_v12, %v10346_v57  ;;  %v6991_v60 = vadd.s32 3, %v6987_v7  ;;  %8328 = vmatprep.subr.mxu0 %v3547_v55 }
 0x1d3   :  { %8559 = vsinq.f32 %v6986_v51  ;;  %vm7004_vm9 = vcmp.lt.s32.totalorder %v10104_v18, 0  ;;  %v8115_v38 = vmin.u32 %v7068_v23, %v10336_v34  ;;  %8314 = vmatprep.subr.mxu1 %v3543_v39  ;;  %v1347_v16 = vadd.f32 %v1346_v47, %v1230_v54  ;;  %8329 = vmatpush3.msra.mxu0 %v3547_v55 }
 0x1d4   :  { %8315 = vmatpush3.msra.mxu1 %v3543_v39  ;;  %v3557_v56 = vand.u32 4294901760, %v3556_v52  ;;  %v10357_v17 = vadd.f32 %v1443_v42, %v1345_v37  ;;  %v10363_v63 = vrot.slane %v8678_v33, %v10022_v44  ;;  %v7089_v7 = vsel %vm7004_vm9, %v7088_v49, %v7064_v59  ;;  %8312 = vmatmul.mubr.f32.gmra.mxu0 %v8954_v2 }
 0x1d5   :  { %v7070_v20 = vclz %v8115_v38  ;;  %8316 = vmatprep.subr.mxu1 %v3550_v11  ;;  %v13727_v46 = vand.u32 2147483647, %v10104_v18  ;;  %8330 = vmatprep.subr.mxu0 %v3554_v12  ;;  %v10378_v55 = vadd.f32 %v1445_v0, %v1347_v16  ;;  %v10380_v54 = vand.u32 3, %v6991_v60  ;;  %v13731_v38 = vld [vmem:[#allocation12_spill] sm:$0xff] }
 0x1d6   :  { %8317 = vmatpush3.msra.mxu1 %v3550_v11  ;;  %v10376_v5 = vadd.f32 %v10363_v63, %v10357_v17  ;;  %v896_v2 = vadd.f32 %v10097_v3, %v10266_v6  ;;  %v10385_v53 = vrot.slane %v8678_v33, %v10234_v9  ;;  %8331 = vmatpush3.msra.mxu0 %v3554_v12  ;;  %v1351_v12 = vpop.f32.mrf.mxu0  ;;  %vm6990_vm13 = vweird.f32 %v10012_v10 }
 0x1d7   :  { %vm10370_vm10 = vcmp.le.f32.partialorder %v13727_v46, 0.7853982  ;;  %v8116_v59 = vadd.s32 4294967294, %v7070_v20  ;;  %8318 = vmatprep.subr.mxu1 %v3557_v56  ;;  %v1132_v23 = vadd.f32 %v10221_v58, %v10177_v19  ;;  %8332 = vmatprep.mubr.f32.mxu0 %v8864_v27  ;;  %v7058_v3 = vadd.s32 %v10249_v30, %v10256_v45  ;;  %v13730_v30 = vld [vmem:[#allocation15_spill] sm:$0xff] }
 0x1d8   :  { %v7091_v51 = vsel %vm10370_vm10, 0, %v7089_v7  ;;  %8319 = vmatpush3.msra.mxu1 %v3557_v56  ;;  %v4298_v49 = vand.u32 2147483647, %v10376_v5  ;;  %v4301_v39 = vand.u32 2139095040, %v10376_v5  ;;  %v1027_v47 = vadd.f32 %v10109_v48, %v896_v2  ;;  %8333 = vmatmul.mubr.f32.vlgmr.msra.gmra.mxu0 %v13731_v38 }
 0x1d9   :  { %vm8117_vm11 = vcmp.lt.s32.totalorder %v8116_v59, 0  ;;  %8321 = vmatmul.mubr.f32.vlgmr.msra.gmra.mxu1 %v8860_v26  ;;  %8338 = vmatprep.subr.mxu1 %v10294_v8  ;;  %v10401_v19 = vadd.f32 %v10385_v53, %v10378_v55  ;;  %v1237_v11 = vadd.f32 %v10228_v29, %v1132_v23  ;;  %vm6993_vm12 = vcmp.lt.s32.totalorder %v10380_v54, 2  ;;  %v1450_v29 = vpop.f32.mrf.mxu1 }
 0x1da   :  { %v7073_v58 = vsel %vm8117_vm11, 0, %v8116_v59  ;;  %v4302_v37 = vshrl.u32 %v4301_v39, 23  ;;  %v4305_v27 = vand.u32 8388607, %v4298_v49  ;;  %8323 = vmatprep.mubr.f32.mxu1 %v13730_v30  ;;  %8339 = vmatpush3.msra.mxu1 %v10294_v8  ;;  %v7095_v52 = vadd.s32 3, %v7091_v51  ;;  %v13732_v59 = vld [vmem:[#allocation16_spill] sm:$0xff] }
 0x1db   :  { %v7074_v48 = vsub.s32 32, %v7073_v58  ;;  %v7078_v45 = vsub.s32 4294967266, %v7073_v58  ;;  %8340 = vmatprep.subr.mxu1 %v10304_v62  ;;  %v4402_v60 = vand.u32 2147483647, %v10401_v19  ;;  %v1352_v0 = vadd.f32 %v1351_v12, %v1237_v11  ;;  %8350 = vmatprep.subr.mxu0 %v10327_v40  ;;  %v13733_v12 = vld [vmem:[#allocation13_spill] sm:$0xff] }
 0x1dc   :  { %v8010_v56 = vadd.s32 4294967169, %v4302_v37  ;;  %v4306_v16 = vor.u32 8388608, %v4305_v27  ;;  %v4405_v33 = vand.u32 2139095040, %v10401_v19  ;;  %8341 = vmatpush3.msra.mxu1 %v10304_v62  ;;  %v7075_v20 = vshll.u32 %v10336_v34, %v7073_v58  ;;  %v13734_v37 = vld [vmem:[#allocation17_spill] sm:$0xff]  ;;  %8351 = vmatpush3.msra.mxu0 %v10327_v40 }
 0x1dd   :  { %v7076_v7 = vshrl.u32 %v7058_v3, %v7074_v48  ;;  %v7079_v46 = vadd.s32 127, %v7078_v45  ;;  %8324 = vmatmul.mubr.f32.gmra.mxu1 %v13732_v59  ;;  %v10420_v2 = vand.u32 8388607, %v4402_v60  ;;  %8342 = vmatprep.subr.mxu1 %v10316_v25  ;;  %vm6994_vm15 = vcmp.eq.s32.totalorder %v10380_v54, 0 }
 0x1de   :  { %v4308_v51 = vadd.s32 1, %v8010_v56  ;;  %v4406_v23 = vshrl.u32 %v4405_v33, 23  ;;  %v10424_v39 = vadd.f32 %v1450_v29, %v1352_v0  ;;  %8343 = vmatpush3.msra.mxu1 %v10316_v25  ;;  %8344 = vmatprep.mubr.f32.mxu1 %v13733_v12  ;;  %vm6997_vm0 = vcmp.eq.s32.totalorder %v10380_v54, 2  ;;  %v13735_v29 = vld [vmem:[#allocation18_spill] sm:$0xff]  ;;  %v13739_v54 = vld [vmem:[#allocation11_spill] sm:$0xff] }
 0x1df   :  { %v8558_v34 = vpop.eup %8557  ;;  %v7077_v3 = vor.u32 %v7076_v7, %v7075_v20  ;;  %v7080_v58 = vshll.u32 %v7079_v46, 23  ;;  %v10430_v11 = vadd.f32 %v10236_v43, %v1027_v47  ;;  %8335 = vmatprep.mubr.f32.mxu0 %v13734_v37  ;;  %v10434_v45 = vand.u32 3, %v7095_v52  ;;  %8352 = vmatprep.subr.mxu0 %v10331_v24  ;;  %v13736_v47 = vld [vmem:[#allocation14_spill] sm:$0xff]  ;;  %v13737_v7 = vld [vmem:[#allocation19_spill] sm:$0xff] }
 0x1e0   :  { %v8560_v27 = vpop.eup %8559  ;;  %v6998_v48 = vxor.u32 2147483648, %v8558_v34  ;;  %vm4309_vm1 = vcmp.gt.s32.totalorder %v4308_v51, 0  ;;  %v10436_v38 = vshll.u32 %v4306_v16, 8  ;;  %8336 = vmatmul.mubr.f32.gmra.mxu0 %v13735_v29  ;;  %v4410_v43 = vor.u32 8388608, %v10420_v2  ;;  %8362 = vmatprep.subr.mxu1 %v10294_v8  ;;  %v13738_v29 = vld [vmem:[#allocation20_spill] sm:$0xff] }
 0x1e1   :  { %v6995_v0 = vxor.u32 2147483648, %v8560_v27  ;;  %v7081_v56 = vor.u32 4788187, %v7080_v58  ;;  %v4310_v33 = vsel %vm4309_vm1, %v4308_v51, 0  ;;  %8345 = vmatmul.mubr.f32.vlgmr.msra.gmra.mxu1 %v13736_v47  ;;  %v8014_v20 = vadd.s32 4294967169, %v4406_v23  ;;  %8353 = vmatpush3.msra.mxu0 %v10331_v24 }
 0x1e2   :  { %v6999_v40 = vsel %vm6997_vm0, %v6998_v48, %v8560_v27  ;;  %v4312_v52 = vand.u32 31, %v4310_v33  ;;  %v10447_v16 = vadd.f32 %v10363_v63, %v10424_v39  ;;  %8347 = vmatprep.mubr.f32.mxu1 %v13737_v7  ;;  %v7084_v12 = vcvt.s32.f32 %v7077_v3  ;;  %8363 = vmatpush3.msra.mxu1 %v10294_v8 }
 0x1e3   :  { %v6996_v46 = vsel %vm6994_vm15, %v8558_v34, %v6995_v0  ;;  %v7082_v51 = vand.u32 2147483647, %v7081_v56  ;;  %v10453_v58 = vshrl.u32 %v4310_v33, 5  ;;  %8354 = vmatprep.subr.mxu0 %v10346_v57  ;;  %8364 = vmatprep.subr.mxu1 %v10304_v62  ;;  %v13741_v7 = vmov 920167782  }
 0x1e4   :  { %v7000_v23 = vsel %vm6993_vm12, %v6996_v46, %v6999_v40  ;;  %v4313_v37 = vsub.s32 32, %v4312_v52  ;;  %v4315_v27 = vshll.u32 %v13693_v61, %v4312_v52  ;;  %v4318_v48 = vshll.u32 %v13689_v28, %v4312_v52  ;;  %8355 = vmatpush3.msra.mxu0 %v10346_v57  ;;  %8356 = vmatprep.mubr.f32.mxu0 %v13739_v54 }
 0x1e5   :  { %v7001_v24 = vsel %vm6990_vm13, nan, %v7000_v23  ;;  %v7085_v34 = vmul.f32 %v7084_v12, %v7082_v51  ;;  %v4321_v8 = vshll.u32 %v13684_v32, %v4312_v52  ;;  %v4324_v3 = vshll.u32 %v13685_v1, %v4312_v52  ;;  %8348 = vmatmul.mubr.f32.gmra.mxu1 %v13738_v29  ;;  %8357 = vmatmul.mubr.f32.vlgmr.msra.gmra.mxu0 %v8860_v26 }
 0x1e6   :  { %v7912_v56 = vsel %vm9793_vm14, %v9985_v13, %v7001_v24  ;;  %v4314_v33 = vshrl.u32 %v13693_v61, %v4313_v37  ;;  %v4316_v57 = vshrl.u32 %v13689_v28, %v4313_v37  ;;  %v4319_v10 = vshrl.u32 %v13684_v32, %v4313_v37  ;;  %8365 = vmatpush3.msra.mxu1 %v10304_v62 }
 0x1e7   :  { %7952 = vst [vmem:[#allocation5 + $0xd8] sm:$0xff] %v7912_v56  ;;  %v7086_v47 = vxor.u32 2147483648, %v7085_v34  ;;  %v4322_v40 = vshrl.u32 %v13685_v1, %v4313_v37  ;;  %v4325_v46 = vshrl.u32 %v13741_v7, %v4313_v37  ;;  %v4327_v51 = vshll.u32 %v13741_v7, %v4312_v52  ;;  %8366 = vmatprep.subr.mxu1 %v10316_v25 }
 0x1e8   :  { %v4317_v13 = vor.u32 %v4316_v57, %v4315_v27  ;;  %v4320_v12 = vor.u32 %v4319_v10, %v4318_v48  ;;  %v13742_v23 = vmov 1326507024   ;;  %v4412_v29 = vadd.s32 1, %v8014_v20  ;;  %8367 = vmatpush3.msra.mxu1 %v10316_v25  ;;  %8368 = vmatprep.mubr.f32.mxu1 %v13739_v54 }
 0x1e9   :  { %v4328_v24 = vshrl.u32 %v13742_v23, %v4313_v37  ;;  %v7087_v62 = vsel %vm7004_vm9, %v7086_v47, %v7085_v34  ;;  %v4323_v0 = vor.u32 %v4322_v40, %v4321_v8  ;;  %v4326_v56 = vor.u32 %v4325_v46, %v4324_v3  ;;  %8369 = vmatmul.mubr.f32.vlgmr.msra.gmra.mxu1 %v8860_v26 }
 0x1ea   :  { %vm4330_vm14 = vcmp.lt.s32.totalorder %v10453_v58, 1  ;;  %8359 = vmatprep.mubr.f32.mxu0 %v13730_v30  ;;  %v7090_v52 = vsel %vm10370_vm10, %v10104_v18, %v7087_v62  ;;  %vm4332_vm2 = vcmp.lt.s32.totalorder %v10453_v58, 3  ;;  %vm4333_vm3 = vcmp.lt.s32.totalorder %v10453_v58, 4  ;;  %8371 = vmatprep.mubr.f32.mxu1 %v13730_v30 }
 0x1eb   :  { %v4329_v20 = vor.u32 %v4328_v24, %v4327_v51  ;;  %8561 = vcosq.f32 %v7090_v52  ;;  %v4334_v25 = vsel %vm4330_vm14, %v4314_v33, %v4317_v13  ;;  %v4335_v37 = vsel %vm4333_vm3, %v4323_v0, 2102212464  ;;  %8360 = vmatmul.mubr.f32.gmra.mxu0 %v13732_v59 }
 0x1ec   :  { %v4338_v26 = vsel %vm4330_vm14, %v4317_v13, %v4320_v12  ;;  %8563 = vsinq.f32 %v7090_v52  ;;  %v4336_v42 = vsel %vm4332_vm2, %v4320_v12, %v4335_v37  ;;  %v4339_v27 = vsel %vm4333_vm3, %v4326_v56, 920167782 }
 0x1ed   :  { %v4342_v48 = vsel %vm4330_vm14, %v4320_v12, %v4323_v0  ;;  %vm4331_vm4 = vcmp.lt.s32.totalorder %v10453_v58, 2  ;;  %v4340_v30 = vsel %vm4332_vm2, %v4323_v0, %v4339_v27  ;;  %v4343_v34 = vsel %vm4333_vm3, %v4329_v20, 1326507024  ;;  %8372 = vmatmul.mubr.f32.gmra.mxu1 %v13732_v59  ;;  %v13743_v59 = vld [vmem:[#allocation26_spill] sm:$0xff] }
 0x1ee   :  { %vm4413_vm5 = vcmp.gt.s32.totalorder %v4412_v29, 0  ;;  %v4337_v8 = vsel %vm4331_vm4, %v4334_v25, %v4336_v42  ;;  %v4341_v3 = vsel %vm4331_vm4, %v4338_v26, %v4340_v30  ;;  %v4344_v54 = vsel %vm4332_vm2, %v4326_v56, %v4343_v34  ;;  %v13744_v58 = vld [vmem:[#allocation34_spill] sm:$0xff] }
 0x1ef   :  { %v4414_v33 = vsel %vm4413_vm5, %v4412_v29, 0  ;;  %v4345_v57 = vsel %vm4331_vm4, %v4342_v48, %v4344_v54  ;;  %v10511_v10 = vmul.u32.u64.low %v10436_v38, %v4341_v3  ;;  %v10512_v47 = vmul.u32.u64.high %v10436_v38, %v4341_v3, %v10511_v10 }
 0x1f0   :  { %v10515_v40 = vshrl.u32 %v4414_v33, 5  ;;  %v10518_v46 = vmul.u32.u64.low %v10436_v38, %v4345_v57  ;;  %v10519_v51 = vmul.u32.u64.high %v10436_v38, %v4345_v57, %v10518_v46  ;;  %v4416_v13 = vand.u32 31, %v4414_v33 }
 0x1f1   :  { %v10523_v12 = vadd.f32 %v13743_v59, %v10095_v22  ;;  %v10527_v24 = vadd.f32 %v13744_v58, %v10430_v11  ;;  %v10531_v29 = vshll.u32 %v4410_v43, 8  ;;  %vm7101_vm7 = vcmp.eq.s32.totalorder %v10434_v45, 2 }
 0x1f2   :  { %v4353_v62 = vmul.u32 %v10436_v38, %v4337_v8  ;;  %v4417_v0 = vsub.s32 32, %v4416_v13  ;;  %vm4434_vm8 = vcmp.lt.s32.totalorder %v10515_v40, 1  ;;  %v13656_v56 = vand.u32 2147483647, %v10447_v16 }
 0x1f3   :  { %vm7098_vm9 = vcmp.eq.s32.totalorder %v10434_v45, 0  ;;  %v4356_v52 = vadd.s32 1, %v10512_v47  ;;  %v4419_v11 = vshll.u32 %v13693_v61, %v4416_v13  ;;  %v4422_v20 = vshll.u32 %v13689_v28, %v4416_v13 }
 0x1f4   :  { %vm4435_vm10 = vcmp.lt.s32.totalorder %v10515_v40, 2  ;;  %vm7097_vm11 = vcmp.lt.s32.totalorder %v10434_v45, 2  ;;  %vm4355_vm12 = vc.u32 %v10519_v51, %v10511_v10  ;;  %v4420_v2 = vshrl.u32 %v13689_v28, %v4417_v0 }
 0x1f5   :  { %v4425_v38 = vshll.u32 %v13684_v32, %v4416_v13  ;;  %v4428_v43 = vshll.u32 %v13685_v1, %v4416_v13  ;;  %vm7094_vm13 = vweird.f32 %v10104_v18  ;;  %v4357_v25 = vsel %vm4355_vm12, %v4356_v52, %v10512_v47  ;;  %v13746_v18 = vld [vmem:[#allocation27_spill] sm:$0xff] }
 0x1f6   :  { %v4423_v37 = vshrl.u32 %v13684_v32, %v4417_v0  ;;  %v4426_v26 = vshrl.u32 %v13685_v1, %v4417_v0  ;;  %v4429_v42 = vshrl.u32 %v13741_v7, %v4417_v0  ;;  %v4358_v27 = vadd.s32 %v4357_v25, %v4353_v62 }
 0x1f7   :  { %v4421_v48 = vor.u32 %v4420_v2, %v4419_v11  ;;  %v4431_v30 = vshll.u32 %v13741_v7, %v4416_v13  ;;  %v4432_v34 = vshrl.u32 %v13742_v23, %v4417_v0  ;;  %vm4437_vm15 = vcmp.lt.s32.totalorder %v10515_v40, 4 }
 0x1f8   :  { %v4424_v8 = vor.u32 %v4423_v37, %v4422_v20  ;;  %v4427_v3 = vor.u32 %v4426_v26, %v4425_v38  ;;  %v4430_v54 = vor.u32 %v4429_v42, %v4428_v43  ;;  %v8562_v33 = vpop.eup %8561  ;;  %v4359_v57 = vadd.s32 536870912, %v4358_v27 }
 0x1f9   :  { %v4418_v47 = vshrl.u32 %v13693_v61, %v4417_v0  ;;  %v4433_v46 = vor.u32 %v4432_v34, %v4431_v30  ;;  %v5237_v59 = vand.u32 2139095040, %v10447_v16  ;;  %v8564_v58 = vpop.eup %8563  ;;  %v7102_v52 = vxor.u32 2147483648, %v8562_v33 }
 0x1fa   :  { %vm4436_vm0 = vcmp.lt.s32.totalorder %v10515_v40, 3  ;;  %v4442_v13 = vsel %vm4434_vm8, %v4421_v48, %v4424_v8  ;;  %v4443_v62 = vsel %vm4437_vm15, %v4430_v54, 920167782  ;;  %v7099_v11 = vxor.u32 2147483648, %v8564_v58  ;;  %v13748_v40 = vld [vmem:[#allocation30_spill] sm:$0xff] }
 0x1fb   :  { %v4360_v20 = vshrl.u32 %v4359_v57, 30  ;;  %v4438_v2 = vsel %vm4434_vm8, %v4418_v47, %v4421_v48  ;;  %v4444_v0 = vsel %vm4436_vm0, %v4427_v3, %v4443_v62  ;;  %v7103_v38 = vsel %vm7101_vm7, %v7102_v52, %v8564_v58 }
 0x1fc   :  { %v4439_v43 = vsel %vm4437_vm15, %v4427_v3, 2102212464  ;;  %v4445_v25 = vsel %vm4435_vm10, %v4442_v13, %v4444_v0  ;;  %v4446_v37 = vsel %vm4434_vm8, %v4424_v8, %v4427_v3  ;;  %v7100_v26 = vsel %vm7098_vm9, %v8562_v33, %v7099_v11  ;;  %v1353_v33 = vpop.f32.mrf.mxu0 }
 0x1fd   :  { %v4361_v42 = vshll.u32 %v4360_v20, 30  ;;  %v4447_v48 = vsel %vm4437_vm15, %v4433_v46, 1326507024  ;;  %v5238_v30 = vshrl.u32 %v5237_v59, 23  ;;  %v7104_v34 = vsel %vm7097_vm11, %v7100_v26, %v7103_v38  ;;  %v13745_v59 = vld [vmem:[#allocation25_spill] sm:$0xff] }
 0x1fe   :  { %v4448_v57 = vsel %vm4436_vm0, %v4430_v54, %v4447_v48  ;;  %v10584_v47 = vmul.u32.u64.low %v10531_v29, %v4445_v25  ;;  %v10585_v58 = vmul.u32.u64.high %v10531_v29, %v4445_v25, %v10584_v47  ;;  %v7105_v3 = vsel %vm7094_vm13, nan, %v7104_v34 }
 0x1ff   :  { %v10589_v52 = vsub.s32 %v4358_v27, %v4361_v42  ;;  %v4440_v46 = vsel %vm4436_vm0, %v4424_v8, %v4439_v43  ;;  %v4449_v45 = vsel %vm4435_vm10, %v4446_v37, %v4448_v57  ;;  %v7913_v54 = vsel %vm9867_vm6, %v13745_v59, %v7105_v3  ;;  %v1452_v8 = vpop.f32.mrf.mxu1  ;;  %v13747_v43 = vld [vmem:[#allocation28_spill] sm:$0xff]  ;;  %v1358_v59 = vpop.f32.mrf.mxu0 }
 0x200   :  { %v4384_v13 = vsub.s32 4, %v4360_v20  ;;  %v10599_v62 = vmul.u32.u64.low %v10531_v29, %v4449_v45  ;;  %v10600_v11 = vmul.u32.u64.high %v10531_v29, %v4449_v45, %v10599_v62  ;;  %7953 = vst [vmem:[#allocation5 + $0xe0] sm:$0xff] %v7913_v54  ;;  %v1032_v27 = vadd.f32 %v13746_v18, %v10523_v12 }
 0x201   :  { %v4364_v0 = vsub.s32 0, %v10589_v52  ;;  %v8046_v38 = vadd.s32 4294967169, %v5238_v30  ;;  %v907_v25 = vadd.f32 %v13747_v43, %v10266_v6  ;;  %v1354_v37 = vadd.f32 %v1353_v33, %v10527_v24  ;;  %v13752_v62 = vld [vmem:[#allocation29_spill] sm:$0xff] }
 0x202   :  { %v4441_v35 = vsel %vm4435_vm10, %v4438_v2, %v4440_v46  ;;  %v4460_v26 = vadd.s32 1, %v10585_v58  ;;  %v1140_v42 = vadd.f32 %v10244_v41, %v1032_v27  ;;  %vm4300_vm6 = vcmp.lt.s32.totalorder %v10376_v5, 0  ;;  %v13749_v41 = vld [vmem:[#allocation32_spill] sm:$0xff]  ;;  %v13753_v27 = vld [vmem:[#allocation31_spill] sm:$0xff] }
 0x203   :  { %v8011_v12 = vmin.u32 %v4364_v0, %v10589_v52  ;;  %v5244_v48 = vadd.s32 1, %v8046_v38  ;;  %v4385_v30 = vsel %vm4300_vm6, %v4384_v13, %v4360_v20  ;;  %vm4459_vm1 = vc.u32 %v10600_v11, %v10584_v47 }
 0x204   :  { %v5241_v24 = vand.u32 8388607, %v13656_v56  ;;  %v10619_v34 = vadd.f32 %v1452_v8, %v1354_v37  ;;  %v916_v2 = vadd.f32 %v13748_v40, %v10095_v22  ;;  %v10625_v57 = vadd.f32 %v13749_v41, %v10266_v6 }
 0x205   :  { %v4366_v3 = vclz %v8011_v12  ;;  %v4457_v33 = vmul.u32 %v10531_v29, %v4441_v35  ;;  %v1246_v46 = vadd.f32 %v10253_v21, %v1140_v42  ;;  %vm10631_vm14 = vcmp.le.f32.partialorder %v4298_v49, 0.7853982 }
 0x206   :  { %v4461_v45 = vsel %vm4459_vm1, %v4460_v26, %v10585_v58  ;;  %vm5245_vm2 = vcmp.gt.s32.totalorder %v5244_v48, 0  ;;  %v4387_v6 = vsel %vm10631_vm14, 0, %v4385_v30  ;;  %v10639_v29 = vadd.f32 %v13752_v62, %v907_v25 }
 0x207   :  { %v8012_v22 = vadd.s32 4294967294, %v4366_v3  ;;  %v4462_v54 = vadd.s32 %v4461_v45, %v4457_v33  ;;  %v5246_v13 = vsel %vm5245_vm2, %v5244_v48, 0  ;;  %v5242_v21 = vor.u32 8388608, %v5241_v24 }
 0x208   :  { %v5248_v18 = vand.u32 31, %v5246_v13  ;;  %v10643_v49 = vadd.f32 %v10385_v53, %v10619_v34  ;;  %v10646_v0 = vadd.f32 %v13753_v27, %v916_v2  ;;  %v10648_v38 = vadd.f32 %v1358_v59, %v1246_v46 }
 0x209   :  { %vm8013_vm3 = vcmp.lt.s32.totalorder %v8012_v22, 0  ;;  %v4463_v58 = vadd.s32 536870912, %v4462_v54  ;;  %v4354_v8 = vadd.s32 %v10511_v10, %v10519_v51  ;;  %v10652_v37 = vadd.s32 3, %v4387_v6 }
 0x20a   :  { %v4369_v43 = vsel %vm8013_vm3, 0, %v8012_v22  ;;  %v5249_v25 = vsub.s32 32, %v5248_v18  ;;  %vm4404_vm4 = vcmp.lt.s32.totalorder %v10401_v19, 0  ;;  %v10656_v42 = vadd.s32 %v10584_v47, %v10600_v11 }
 0x20b   :  { %v4370_v35 = vsub.s32 32, %v4369_v43  ;;  %v4374_v26 = vsub.s32 4294967266, %v4369_v43  ;;  %v4464_v12 = vshrl.u32 %v4463_v58, 30  ;;  %v4371_v48 = vshll.u32 %v10589_v52, %v4369_v43 }
 0x20c   :  { %v5252_v30 = vshrl.u32 %v13689_v28, %v5249_v25  ;;  %v10660_v24 = vshll.u32 %v5242_v21, 8  ;;  %v13655_v10 = vand.u32 2147483647, %v10643_v49  ;;  %v5255_v41 = vshrl.u32 %v13684_v32, %v5249_v25 }
 0x20d   :  { %v4372_v51 = vshrl.u32 %v4354_v8, %v4370_v35  ;;  %v4375_v40 = vadd.s32 127, %v4374_v26  ;;  %v4465_v2 = vshll.u32 %v4464_v12, 30  ;;  %v10664_v3 = vshrl.u32 %v5246_v13, 5 }
 0x20e   :  { %v5251_v33 = vshll.u32 %v13693_v61, %v5248_v18  ;;  %v5258_v47 = vshrl.u32 %v13685_v1, %v5249_v25  ;;  %v5341_v11 = vand.u32 2139095040, %v10643_v49  ;;  %v5254_v59 = vshll.u32 %v13689_v28, %v5248_v18 }
 0x20f   :  { %v4373_v52 = vor.u32 %v4372_v51, %v4371_v48  ;;  %v4376_v46 = vshll.u32 %v4375_v40, 23  ;;  %v10669_v45 = vsub.s32 %v4462_v54, %v4465_v2  ;;  %v4488_v22 = vsub.s32 4, %v4464_v12 }
 0x210   :  { %v5257_v6 = vshll.u32 %v13684_v32, %v5248_v18  ;;  %v5260_v62 = vshll.u32 %v13685_v1, %v5248_v18  ;;  %v5261_v13 = vshrl.u32 %v13741_v7, %v5249_v25  ;;  %v5253_v58 = vor.u32 %v5252_v30, %v5251_v33 }
 0x211   :  { %v4377_v21 = vor.u32 4788187, %v4376_v46  ;;  %v4468_v27 = vsub.s32 0, %v10669_v45  ;;  %v5256_v8 = vor.u32 %v5255_v41, %v5254_v59  ;;  %v5263_v26 = vshll.u32 %v13741_v7, %v5248_v18 }
 0x212   :  { %v5259_v43 = vor.u32 %v5258_v47, %v5257_v6  ;;  %v5262_v35 = vor.u32 %v5261_v13, %v5260_v62  ;;  %v5264_v54 = vshrl.u32 %v13742_v23, %v5249_v25  ;;  %v4380_v51 = vcvt.s32.f32 %v4373_v52 }
 0x213   :  { %v4378_v48 = vand.u32 2147483647, %v4377_v21  ;;  %v8015_v40 = vmin.u32 %v4468_v27, %v10669_v45  ;;  %v10681_v2 = vand.u32 8388607, %v13655_v10  ;;  %v4489_v46 = vsel %vm4404_vm4, %v4488_v22, %v4464_v12 }
 0x214   :  { %v5250_v30 = vshrl.u32 %v13693_v61, %v5249_v25  ;;  %v5265_v41 = vor.u32 %v5264_v54, %v5263_v26  ;;  %v5342_v33 = vshrl.u32 %v5341_v11, 23  ;;  %vm10688_vm5 = vcmp.le.f32.partialorder %v4402_v60, 0.7853982 }
 0x215   :  { %v4381_v47 = vmul.f32 %v4380_v51, %v4378_v48  ;;  %v4470_v52 = vclz %v8015_v40  ;;  %vm5266_vm7 = vcmp.lt.s32.totalorder %v10664_v3, 1  ;;  %vm5269_vm8 = vcmp.lt.s32.totalorder %v10664_v3, 4 }
 0x216   :  { %vm5268_vm9 = vcmp.lt.s32.totalorder %v10664_v3, 3  ;;  %v5271_v59 = vsel %vm5269_vm8, %v5259_v43, 2102212464  ;;  %v5274_v12 = vsel %vm5266_vm7, %v5253_v58, %v5256_v8  ;;  %v5275_v22 = vsel %vm5269_vm8, %v5262_v35, 920167782 }
 0x217   :  { %v4382_v25 = vxor.u32 2147483648, %v4381_v47  ;;  %v8016_v6 = vadd.s32 4294967294, %v4470_v52  ;;  %v5276_v11 = vsel %vm5268_vm9, %v5259_v43, %v5275_v22  ;;  %v5278_v62 = vsel %vm5266_vm7, %v5256_v8, %v5259_v43 }
 0x218   :  { %vm5267_vm10 = vcmp.lt.s32.totalorder %v10664_v3, 2  ;;  %v5270_v60 = vsel %vm5266_vm7, %v5250_v30, %v5253_v58  ;;  %v5279_v13 = vsel %vm5269_vm8, %v5265_v41, 1326507024  ;;  %v8050_v21 = vadd.s32 4294967169, %v5342_v33 }
 0x219   :  { %v4383_v27 = vsel %vm4300_vm6, %v4382_v25, %v4381_v47  ;;  %vm8017_vm11 = vcmp.lt.s32.totalorder %v8016_v6, 0  ;;  %v5272_v26 = vsel %vm5268_vm9, %v5256_v8, %v5271_v59  ;;  %v5280_v54 = vsel %vm5268_vm9, %v5262_v35, %v5279_v13  ;;  %v1457_v25 = vpop.f32.mrf.mxu1 }
 0x21a   :  { %v4386_v48 = vsel %vm10631_vm14, %v10376_v5, %v4383_v27  ;;  %v4473_v51 = vsel %vm8017_vm11, 0, %v8016_v6  ;;  %v5277_v40 = vsel %vm5267_vm10, %v5274_v12, %v5276_v11  ;;  %v5281_v43 = vsel %vm5267_vm10, %v5278_v62, %v5280_v54 }
 0x21b   :  { %8565 = vcosq.f32 %v4386_v48  ;;  %v4474_v58 = vsub.s32 32, %v4473_v51  ;;  %v4475_v30 = vshll.u32 %v10669_v45, %v4473_v51  ;;  %v4478_v41 = vsub.s32 4294967266, %v4473_v51 }
 0x21c   :  { %8567 = vsinq.f32 %v4386_v48  ;;  %v10707_v8 = vmul.u32.u64.low %v10660_v24, %v5281_v43  ;;  %v10708_v35 = vmul.u32.u64.high %v10660_v24, %v5281_v43, %v10707_v8  ;;  %v5348_v33 = vadd.s32 1, %v8050_v21 }
 0x21d   :  { %v4476_v20 = vshrl.u32 %v10656_v42, %v4474_v58  ;;  %v4479_v47 = vadd.s32 127, %v4478_v41  ;;  %v10712_v52 = vmul.u32.u64.low %v10660_v24, %v5277_v40  ;;  %v10713_v59 = vmul.u32.u64.high %v10660_v24, %v5277_v40, %v10712_v52 }
 0x21e   :  { %v10717_v12 = vand.u32 3, %v10652_v37  ;;  %v4491_v45 = vsel %vm10688_vm5, 0, %v4489_v46  ;;  %v5273_v22 = vsel %vm5267_vm10, %v5270_v60, %v5272_v26  ;;  %vm5349_vm12 = vcmp.gt.s32.totalorder %v5348_v33, 0  ;;  %v13756_v37 = vld [vmem:[#allocation23_spill] sm:$0xff] }
 0x21f   :  { %v4477_v6 = vor.u32 %v4476_v20, %v4475_v30  ;;  %v4480_v11 = vshll.u32 %v4479_v47, 23  ;;  %v5346_v42 = vor.u32 8388608, %v10681_v2  ;;  %v5350_v62 = vsel %vm5349_vm12, %v5348_v33, 0 }
 0x220   :  { %v10726_v13 = vadd.f32 %v10258_v15, %v10639_v29  ;;  %v7851_v21 = vrot.slane %v13756_v37, %v10022_v44  ;;  %vm5291_vm13 = vc.u32 %v10708_v35, %v10712_v52  ;;  %v5352_v46 = vand.u32 31, %v5350_v62 }
 0x221   :  { %v4481_v3 = vor.u32 4788187, %v4480_v11  ;;  %v5292_v27 = vadd.s32 1, %v10713_v59  ;;  %v10736_v2 = vadd.f32 %v1457_v25, %v10648_v38  ;;  %vm4397_vm15 = vcmp.eq.s32.totalorder %v10717_v12, 2 }
 0x222   :  { %v10739_v15 = vadd.s32 3, %v4491_v45  ;;  %v5289_v29 = vmul.u32 %v10660_v24, %v5273_v22  ;;  %v5353_v44 = vsub.s32 32, %v5352_v46  ;;  %vm4394_vm0 = vcmp.eq.s32.totalorder %v10717_v12, 0 }
 0x223   :  { %v4482_v26 = vand.u32 2147483647, %v4481_v3  ;;  %v4484_v54 = vcvt.s32.f32 %v4477_v6  ;;  %v5293_v48 = vsel %vm5291_vm13, %v5292_v27, %v10713_v59  ;;  %v10744_v51 = vshll.u32 %v5346_v42, 8 }
 0x224   :  { %vm4393_vm6 = vcmp.lt.s32.totalorder %v10717_v12, 2  ;;  %vm10747_vm1 = vcmp.eq.s32.totalorder %v7851_v21, 1  ;;  %v13757_v38 = vmov 0  ;;  %v5294_v40 = vadd.s32 %v5293_v48, %v5289_v29 }
 0x225   :  { %v13758_v38 = vsel %vm10747_vm1, 4294967295, %v13757_v38  ;;  %v10751_v43 = vshrl.u32 %v5350_v62, 5  ;;  %v5356_v24 = vshrl.u32 %v13689_v28, %v5353_v44  ;;  %v5359_v58 = vshrl.u32 %v13684_v32, %v5353_v44 }
 0x226   :  { %13759 = vst [vmem:[#allocation15_spill] sm:$0xff] %v13758_v38  ;;  %vm4390_vm14 = vweird.f32 %v10376_v5  ;;  %v4485_v30 = vmul.f32 %v4484_v54, %v4482_v26  ;;  %v5355_v41 = vshll.u32 %v13693_v61, %v5352_v46  ;;  %v5365_v8 = vshrl.u32 %v13741_v7, %v5353_v44 }
 0x227   :  { %v10760_v33 = vadd.f32 %v10363_v63, %v10736_v2  ;;  %v5295_v20 = vadd.s32 536870912, %v5294_v40  ;;  %v5358_v47 = vshll.u32 %v13689_v28, %v5352_v46  ;;  %v5361_v59 = vshll.u32 %v13684_v32, %v5352_v46 }
 0x228   :  { %v5362_v45 = vshrl.u32 %v13685_v1, %v5353_v44  ;;  %v4486_v22 = vxor.u32 2147483648, %v4485_v30  ;;  %v5364_v25 = vshll.u32 %v13685_v1, %v5352_v46  ;;  %v5367_v6 = vshll.u32 %v13741_v7, %v5352_v46  ;;  %v8566_v42 = vpop.eup %8565 }
 0x229   :  { %v5368_v11 = vshrl.u32 %v13742_v23, %v5353_v44  ;;  %v5296_v62 = vshrl.u32 %v5295_v20, 30  ;;  %v5354_v21 = vshrl.u32 %v13693_v61, %v5353_v44  ;;  %v5357_v3 = vor.u32 %v5356_v24, %v5355_v41  ;;  %v8568_v29 = vpop.eup %8567 }
 0x22a   :  { %v5360_v27 = vor.u32 %v5359_v58, %v5358_v47  ;;  %v4398_v26 = vxor.u32 2147483648, %v8566_v42  ;;  %v4487_v54 = vsel %vm4404_vm4, %v4486_v22, %v4485_v30  ;;  %v5366_v48 = vor.u32 %v5365_v8, %v5364_v25 }
 0x22b   :  { %vm5370_vm2 = vcmp.lt.s32.totalorder %v10751_v43, 1  ;;  %v4395_v10 = vxor.u32 2147483648, %v8568_v29  ;;  %v4490_v46 = vsel %vm10688_vm5, %v10401_v19, %v4487_v54  ;;  %v5297_v56 = vshll.u32 %v5296_v62, 30 }
 0x22c   :  { %v5363_v60 = vor.u32 %v5362_v45, %v5361_v59  ;;  %v4399_v44 = vsel %vm4397_vm15, %v4398_v26, %v8568_v29  ;;  %8569 = vcosq.f32 %v4490_v46  ;;  %v5369_v24 = vor.u32 %v5368_v11, %v5367_v6 }
 0x22d   :  { %vm5373_vm3 = vcmp.lt.s32.totalorder %v10751_v43, 4  ;;  %v4396_v58 = vsel %vm4394_vm0, %v8566_v42, %v4395_v10  ;;  %8571 = vsinq.f32 %v4490_v46  ;;  %v10780_v30 = vsub.s32 %v5294_v40, %v5297_v56 }
 0x22e   :  { %v5378_v41 = vsel %vm5370_vm2, %v5357_v3, %v5360_v27  ;;  %v4400_v18 = vsel %vm4393_vm6, %v4396_v58, %v4399_v44  ;;  %vm5371_vm4 = vcmp.lt.s32.totalorder %v10751_v43, 2  ;;  %vm5372_vm5 = vcmp.lt.s32.totalorder %v10751_v43, 3  ;;  %v1360_v44 = vpop.f32.mrf.mxu0 }
 0x22f   :  { %v5379_v8 = vsel %vm5373_vm3, %v5366_v48, 920167782  ;;  %v4401_v20 = vsel %vm4390_vm14, nan, %v4400_v18  ;;  %v5300_v10 = vsub.s32 0, %v10780_v30  ;;  %v5375_v56 = vsel %vm5373_vm3, %v5363_v60, 2102212464 }
 0x230   :  { %v5380_v40 = vsel %vm5372_vm5, %v5363_v60, %v5379_v8  ;;  %v7887_v12 = vsel %vm10747_vm1, %v10357_v17, %v4401_v20  ;;  %v5382_v59 = vsel %vm5370_vm2, %v5360_v27, %v5363_v60  ;;  %v5383_v5 = vsel %vm5373_vm3, %v5369_v24, 1326507024  ;;  %v13760_v60 = vld [vmem:[#allocation33_spill] sm:$0xff] }
 0x231   :  { %v5381_v47 = vsel %vm5371_vm4, %v5378_v41, %v5380_v40  ;;  %7926 = vst [vmem:[#allocation5 + $0x10] sm:$0xff] %v7887_v12  ;;  %v8047_v45 = vmin.u32 %v5300_v10, %v10780_v30  ;;  %v5320_v22 = vsub.s32 4, %v5296_v62  ;;  %v5374_v25 = vsel %vm5370_vm2, %v5354_v21, %v5357_v3 }
 0x232   :  { %v5384_v6 = vsel %vm5372_vm5, %v5366_v48, %v5383_v5  ;;  %v5376_v11 = vsel %vm5372_vm5, %v5360_v27, %v5375_v56  ;;  %v10810_v42 = vmul.u32.u64.low %v10744_v51, %v5381_v47  ;;  %v10811_v29 = vmul.u32.u64.high %v10744_v51, %v5381_v47, %v10810_v42  ;;  %v1459_v47 = vpop.f32.mrf.mxu1 }
 0x233   :  { %v5385_v17 = vsel %vm5371_vm4, %v5382_v59, %v5384_v6  ;;  %v10816_v26 = vadd.f32 %v13760_v60, %v10625_v57  ;;  %v4496_v54 = vand.u32 3, %v10739_v15  ;;  %v5302_v46 = vclz %v8047_v45 }
 0x234   :  { %v1148_v21 = vadd.f32 %v10274_v50, %v10646_v0  ;;  %v1248_v3 = vadd.f32 %v10269_v36, %v10726_v13  ;;  %v10824_v27 = vmul.u32.u64.low %v10744_v51, %v5385_v17  ;;  %v10825_v48 = vmul.u32.u64.high %v10744_v51, %v5385_v17, %v10824_v27 }
 0x235   :  { %v13761_v24 = vrot.slane %v13756_v37, %v10234_v9  ;;  %vm5236_vm8 = vcmp.lt.s32.totalorder %v10447_v16, 0  ;;  %v8048_v15 = vadd.s32 4294967294, %v5302_v46  ;;  %v5377_v50 = vsel %vm5371_vm4, %v5374_v25, %v5376_v11 }
 0x236   :  { %v6173_v0 = vand.u32 2139095040, %v10760_v33  ;;  %vm4494_vm9 = vweird.f32 %v10401_v19  ;;  %v13764_v36 = vand.u32 2147483647, %v10447_v16  ;;  %v5321_v9 = vsel %vm5236_vm8, %v5320_v22, %v5296_v62 }
 0x237   :  { %vm10830_vm7 = vcmp.eq.s32.totalorder %v13761_v24, 1  ;;  %v1361_v58 = vadd.f32 %v1360_v44, %v1248_v3  ;;  %v5396_v41 = vadd.s32 1, %v10811_v29  ;;  %vm4498_vm11 = vcmp.eq.s32.totalorder %v4496_v54, 0 }
 0x238   :  { %vm10841_vm10 = vcmp.le.f32.partialorder %v13764_v36, 0.7853982  ;;  %vm4501_vm12 = vcmp.eq.s32.totalorder %v4496_v54, 2  ;;  %vm8049_vm13 = vcmp.lt.s32.totalorder %v8048_v15, 0  ;;  %v6174_v43 = vshrl.u32 %v6173_v0, 23  ;;  %v1365_v0 = vpop.f32.mrf.mxu0 }
 0x239   :  { %v5290_v18 = vadd.s32 %v10712_v52, %v10708_v35  ;;  %v5305_v8 = vsel %vm8049_vm13, 0, %v8048_v15  ;;  %v5393_v20 = vmul.u32 %v10744_v51, %v5377_v50  ;;  %vm5395_vm15 = vc.u32 %v10825_v48, %v10810_v42  ;;  %v8570_v10 = vpop.eup %8569 }
 0x23a   :  { %v5306_v56 = vsub.s32 32, %v5305_v8  ;;  %v5310_v40 = vsub.s32 4294967266, %v5305_v8  ;;  %v5323_v62 = vsel %vm10841_vm10, 0, %v5321_v9  ;;  %v5397_v12 = vsel %vm5395_vm15, %v5396_v41, %v10811_v29  ;;  %v8572_v59 = vpop.eup %8571 }
 0x23b   :  { %v4502_v5 = vxor.u32 2147483648, %v8570_v10  ;;  %v5398_v45 = vadd.s32 %v5397_v12, %v5393_v20  ;;  %v6170_v35 = vand.u32 2147483647, %v10760_v33  ;;  %v8082_v52 = vadd.s32 4294967169, %v6174_v43 }
 0x23c   :  { %v4499_v22 = vxor.u32 2147483648, %v8572_v59  ;;  %v5307_v51 = vshll.u32 %v10780_v30, %v5305_v8  ;;  %v5308_v25 = vshrl.u32 %v5290_v18, %v5306_v56  ;;  %v5311_v6 = vadd.s32 127, %v5310_v40 }
 0x23d   :  { %v4503_v11 = vsel %vm4501_vm12, %v4502_v5, %v8572_v59  ;;  %v5399_v17 = vadd.s32 536870912, %v5398_v45  ;;  %v6180_v60 = vadd.s32 1, %v8082_v52  ;;  %v10859_v46 = vadd.f32 %v1459_v47, %v1361_v58 }
 0x23e   :  { %vm4497_vm0 = vcmp.lt.s32.totalorder %v4496_v54, 2  ;;  %v4500_v29 = vsel %vm4498_vm11, %v8570_v10, %v4499_v22  ;;  %v5309_v44 = vor.u32 %v5308_v25, %v5307_v51  ;;  %v5312_v3 = vshll.u32 %v5311_v6, 23 }
 0x23f   :  { %v4504_v27 = vsel %vm4497_vm0, %v4500_v29, %v4503_v11  ;;  %v5327_v24 = vadd.s32 3, %v5323_v62  ;;  %v10862_v15 = vshrl.u32 %v5399_v17, 30  ;;  %vm6181_vm6 = vcmp.gt.s32.totalorder %v6180_v60, 0 }
 0x240   :  { %v4505_v30 = vsel %vm4494_vm9, nan, %v4504_v27  ;;  %v5313_v50 = vor.u32 4788187, %v5312_v3  ;;  %v6177_v36 = vand.u32 8388607, %v6170_v35  ;;  %v6182_v9 = vsel %vm6181_vm6, %v6180_v60, 0 }
 0x241   :  { %v1255_v58 = vadd.f32 %v10286_v14, %v1148_v21  ;;  %v7888_v54 = vsel %vm10830_vm7, %v10378_v55, %v4505_v30  ;;  %v5401_v41 = vshll.u32 %v10862_v15, 30  ;;  %v10875_v43 = vadd.f32 %v10385_v53, %v10859_v46 }
 0x242   :  { %7927 = vst [vmem:[#allocation5 + $0x18] sm:$0xff] %v7888_v54  ;;  %v5314_v19 = vand.u32 2147483647, %v5313_v50  ;;  %v5316_v18 = vcvt.s32.f32 %v5309_v44  ;;  %v6184_v8 = vand.u32 31, %v6182_v9  ;;  %v10879_v20 = vadd.f32 %v10296_v4, %v10816_v26 }
 0x243   :  { %v10881_v10 = vand.u32 3, %v5327_v24  ;;  %v10883_v14 = vsub.s32 %v5398_v45, %v5401_v41  ;;  %v10885_v21 = vadd.f32 %v1365_v0, %v1255_v58  ;;  %v5394_v56 = vadd.s32 %v10810_v42, %v10825_v48 }
 0x244   :  { %v5317_v55 = vmul.f32 %v5316_v18, %v5314_v19  ;;  %v6178_v40 = vor.u32 8388608, %v6177_v36  ;;  %v6185_v62 = vsub.s32 32, %v6184_v8  ;;  %v10890_v47 = vshrl.u32 %v6182_v9, 5 }
 0x245   :  { %v5404_v12 = vsub.s32 0, %v10883_v14  ;;  %v6187_v59 = vshll.u32 %v13693_v61, %v6184_v8  ;;  %v6277_v4 = vand.u32 2139095040, %v10875_v43  ;;  %v6190_v45 = vshll.u32 %v13689_v28, %v6184_v8 }
 0x246   :  { %v5318_v26 = vxor.u32 2147483648, %v5317_v55  ;;  %v6188_v5 = vshrl.u32 %v13689_v28, %v6185_v62  ;;  %v6191_v52 = vshrl.u32 %v13684_v32, %v6185_v62  ;;  %v6193_v42 = vshll.u32 %v13684_v32, %v6184_v8 }
 0x247   :  { %v8051_v22 = vmin.u32 %v5404_v12, %v10883_v14  ;;  %v6194_v48 = vshrl.u32 %v13685_v1, %v6185_v62  ;;  %v6196_v51 = vshll.u32 %v13685_v1, %v6184_v8  ;;  %v6197_v17 = vshrl.u32 %v13741_v7, %v6185_v62 }
 0x248   :  { %v5319_v25 = vsel %vm5236_vm8, %v5318_v26, %v5317_v55  ;;  %v6189_v6 = vor.u32 %v6188_v5, %v6187_v59  ;;  %v6192_v11 = vor.u32 %v6191_v52, %v6190_v45  ;;  %v10907_v44 = vshll.u32 %v6178_v40, 8 }
 0x249   :  { %v5322_v60 = vsel %vm10841_vm10, %v10447_v16, %v5319_v25  ;;  %v5406_v29 = vclz %v8051_v22  ;;  %v6278_v3 = vshrl.u32 %v6277_v4, 23  ;;  %v6195_v27 = vor.u32 %v6194_v48, %v6193_v42 }
 0x24a   :  { %8573 = vcosq.f32 %v5322_v60  ;;  %v6198_v24 = vor.u32 %v6197_v17, %v6196_v51  ;;  %vm6202_vm14 = vcmp.lt.s32.totalorder %v10890_v47, 1  ;;  %v6199_v50 = vshll.u32 %v13741_v7, %v6184_v8 }
 0x24b   :  { %8575 = vsinq.f32 %v5322_v60  ;;  %v8052_v30 = vadd.s32 4294967294, %v5406_v29  ;;  %v6200_v0 = vshrl.u32 %v13742_v23, %v6185_v62  ;;  %v6186_v36 = vshrl.u32 %v13693_v61, %v6185_v62 }
 0x24c   :  { %vm6204_vm2 = vcmp.lt.s32.totalorder %v10890_v47, 3  ;;  %vm6205_vm3 = vcmp.lt.s32.totalorder %v10890_v47, 4  ;;  %v6210_v13 = vsel %vm6202_vm14, %v6189_v6, %v6192_v11  ;;  %vm5340_vm4 = vcmp.lt.s32.totalorder %v10643_v49, 0 }
 0x24d   :  { %vm8053_vm5 = vcmp.lt.s32.totalorder %v8052_v30, 0  ;;  %v6201_v9 = vor.u32 %v6200_v0, %v6199_v50  ;;  %v6207_v58 = vsel %vm6205_vm3, %v6195_v27, 2102212464  ;;  %v6211_v54 = vsel %vm6205_vm3, %v6198_v24, 920167782 }
 0x24e   :  { %v5409_v41 = vsel %vm8053_vm5, 0, %v8052_v30  ;;  %v5424_v19 = vsub.s32 4, %v10862_v15  ;;  %vm6203_vm8 = vcmp.lt.s32.totalorder %v10890_v47, 2  ;;  %v6212_v18 = vsel %vm6204_vm2, %v6195_v27, %v6211_v54 }
 0x24f   :  { %v5410_v8 = vsub.s32 32, %v5409_v41  ;;  %v5414_v55 = vsub.s32 4294967266, %v5409_v41  ;;  %v6206_v40 = vsel %vm6202_vm14, %v6186_v36, %v6189_v6  ;;  %v6214_v62 = vsel %vm6202_vm14, %v6192_v11, %v6195_v27 }
 0x250   :  { %v13767_v12 = vand.u32 2147483647, %v10643_v49  ;;  %v6208_v4 = vsel %vm6204_vm2, %v6192_v11, %v6207_v58  ;;  %v6213_v26 = vsel %vm6203_vm8, %v6210_v13, %v6212_v18  ;;  %v6215_v5 = vsel %vm6205_vm3, %v6201_v9, 1326507024 }
 0x251   :  { %v8086_v45 = vadd.s32 4294967169, %v6278_v3  ;;  %v5411_v52 = vshll.u32 %v10883_v14, %v5409_v41  ;;  %v5412_v22 = vshrl.u32 %v5394_v56, %v5410_v8  ;;  %v5415_v42 = vadd.s32 127, %v5414_v55  ;;  %v1464_v14 = vpop.f32.mrf.mxu1 }
 0x252   :  { %vm10932_vm9 = vcmp.le.f32.partialorder %v13767_v12, 0.7853982  ;;  %v6216_v48 = vsel %vm6204_vm2, %v6198_v24, %v6215_v5  ;;  %v10948_v25 = vmul.u32.u64.low %v10907_v44, %v6213_v26  ;;  %v10949_v6 = vmul.u32.u64.high %v10907_v44, %v6213_v26, %v10948_v25 }
 0x253   :  { %v6217_v51 = vsel %vm6203_vm8, %v6214_v62, %v6216_v48  ;;  %v6284_v11 = vadd.s32 1, %v8086_v45  ;;  %v5413_v17 = vor.u32 %v5412_v22, %v5411_v52  ;;  %v5416_v60 = vshll.u32 %v5415_v42, 23 }
 0x254   :  { %v10953_v29 = vmul.u32.u64.low %v10907_v44, %v6217_v51  ;;  %v10954_v3 = vmul.u32.u64.high %v10907_v44, %v6217_v51, %v10953_v29  ;;  %vm5326_vm10 = vweird.f32 %v10447_v16  ;;  %vm5329_vm11 = vcmp.lt.s32.totalorder %v10881_v10, 2 }
 0x255   :  { %v6209_v56 = vsel %vm6203_vm8, %v6206_v40, %v6208_v4  ;;  %v13658_v27 = vand.u32 2147483647, %v10875_v43  ;;  %vm6285_vm12 = vcmp.gt.s32.totalorder %v6284_v11, 0  ;;  %vm5330_vm13 = vcmp.eq.s32.totalorder %v10881_v10, 0 }
 0x256   :  { %vm5333_vm15 = vcmp.eq.s32.totalorder %v10881_v10, 2  ;;  %v5417_v24 = vor.u32 4788187, %v5416_v60  ;;  %v6286_v30 = vsel %vm6285_vm12, %v6284_v11, 0  ;;  %v5425_v50 = vsel %vm5340_vm4, %v5424_v19, %v10862_v15 }
 0x257   :  { %v6228_v0 = vadd.s32 1, %v10949_v6  ;;  %v6288_v36 = vand.u32 31, %v6286_v30  ;;  %v10968_v13 = vadd.f32 %v1464_v14, %v10885_v21  ;;  %v8574_v47 = vpop.eup %8573  ;;  %v5420_v58 = vcvt.s32.f32 %v5413_v17 }
 0x258   :  { %v5418_v9 = vand.u32 2147483647, %v5417_v24  ;;  %v6225_v54 = vmul.u32 %v10907_v44, %v6209_v56  ;;  %vm6227_vm0 = vc.u32 %v10954_v3, %v10948_v25  ;;  %v8576_v41 = vpop.eup %8575  ;;  %v5334_v18 = vxor.u32 2147483648, %v8574_v47 }
 0x259   :  { %13770 = vst [vmem:[#allocation12_spill] sm:$0xff] %v10968_v13  ;;  %v6229_v8 = vsel %vm6227_vm0, %v6228_v0, %v10949_v6  ;;  %v6281_v15 = vand.u32 8388607, %v13658_v27  ;;  %v6289_v19 = vsub.s32 32, %v6288_v36  ;;  %v5331_v55 = vxor.u32 2147483648, %v8576_v41 }
 0x25a   :  { %v5421_v40 = vmul.f32 %v5420_v58, %v5418_v9  ;;  %v5427_v21 = vsel %vm10932_vm9, 0, %v5425_v50  ;;  %v6230_v62 = vadd.s32 %v6229_v8, %v6225_v54  ;;  %v5335_v44 = vsel %vm5333_vm15, %v5334_v18, %v8576_v41  ;;  %v11015_v58 = vpop.f32.mrf.mxu0 }
 0x25b   :  { %v10980_v12 = vshrl.u32 %v6286_v30, 5  ;;  %v6291_v4 = vshll.u32 %v13693_v61, %v6288_v36  ;;  %v6292_v26 = vshrl.u32 %v13689_v28, %v6289_v19  ;;  %v5332_v5 = vsel %vm5330_vm13, %v8574_v47, %v5331_v55 }
 0x25c   :  { %v5422_v45 = vxor.u32 2147483648, %v5421_v40  ;;  %v6231_v52 = vadd.s32 536870912, %v6230_v62  ;;  %v6295_v22 = vshrl.u32 %v13684_v32, %v6289_v19  ;;  %v5336_v42 = vsel %vm5329_vm11, %v5332_v5, %v5335_v44 }
 0x25d   :  { %v6294_v48 = vshll.u32 %v13689_v28, %v6288_v36  ;;  %v6297_v51 = vshll.u32 %v13684_v32, %v6288_v36  ;;  %v6298_v6 = vshrl.u32 %v13685_v1, %v6289_v19  ;;  %v5337_v11 = vsel %vm5326_vm10, nan, %v5336_v42 }
 0x25e   :  { %v5423_v17 = vsel %vm5340_vm4, %v5422_v45, %v5421_v40  ;;  %v10996_v60 = vshrl.u32 %v6231_v52, 30  ;;  %v6293_v29 = vor.u32 %v6292_v26, %v6291_v4  ;;  %v7896_v10 = vsel %vm10747_vm1, %v10424_v39, %v5337_v11  ;;  %v11036_v4 = vpop.f32.mrf.mxu0 }
 0x25f   :  { %v5426_v14 = vsel %vm10932_vm9, %v10643_v49, %v5423_v17  ;;  %v6300_v56 = vshll.u32 %v13685_v1, %v6288_v36  ;;  %v6301_v24 = vshrl.u32 %v13741_v7, %v6289_v19  ;;  %7936 = vst [vmem:[#allocation5 + $0x58] sm:$0xff] %v7896_v10  ;;  %v6296_v30 = vor.u32 %v6295_v22, %v6294_v48 }
 0x260   :  { %8577 = vcosq.f32 %v5426_v14  ;;  %v6233_v16 = vshll.u32 %v10996_v60, 30  ;;  %v6299_v50 = vor.u32 %v6298_v6, %v6297_v51  ;;  %v6303_v47 = vshll.u32 %v13741_v7, %v6288_v36 }
 0x261   :  { %8579 = vsinq.f32 %v5426_v14  ;;  %v6302_v0 = vor.u32 %v6301_v24, %v6300_v56  ;;  %v6304_v39 = vshrl.u32 %v13742_v23, %v6289_v19  ;;  %v11011_v59 = vadd.f32 %v10310_v31, %v10879_v20  ;;  %v11027_v20 = vpop.f32.mrf.mxu1  ;;  %v11065_v24 = vpop.f32.mrf.mxu0 }
 0x262   :  { %v11013_v9 = vsub.s32 %v6230_v62, %v6233_v16  ;;  %v6282_v54 = vor.u32 8388608, %v6281_v15  ;;  %v5431_v41 = vadd.s32 3, %v5427_v21  ;;  %vm6306_vm6 = vcmp.lt.s32.totalorder %v10980_v12, 1 }
 0x263   :  { %v6305_v18 = vor.u32 %v6304_v39, %v6303_v47  ;;  %v11020_v8 = vadd.f32 %v10363_v63, %v10968_v13  ;;  %vm6308_vm14 = vcmp.lt.s32.totalorder %v10980_v12, 3  ;;  %vm6309_vm2 = vcmp.lt.s32.totalorder %v10980_v12, 4  ;;  %v11052_v51 = vpop.f32.mrf.mxu1 }
 0x264   :  { %v6236_v36 = vsub.s32 0, %v11013_v9  ;;  %v6314_v31 = vsel %vm6306_vm6, %v6293_v29, %v6296_v30  ;;  %v6290_v15 = vshrl.u32 %v13693_v61, %v6289_v19  ;;  %v6311_v55 = vsel %vm6309_vm2, %v6299_v50, 2102212464 }
 0x265   :  { %v6315_v40 = vsel %vm6309_vm2, %v6302_v0, 920167782  ;;  %v6319_v21 = vsel %vm6309_vm2, %v6305_v18, 1326507024  ;;  %vm6307_vm3 = vcmp.lt.s32.totalorder %v10980_v12, 2  ;;  %v6318_v44 = vsel %vm6306_vm6, %v6296_v30, %v6299_v50 }
 0x266   :  { %v8083_v62 = vmin.u32 %v6236_v36, %v11013_v9  ;;  %v6316_v63 = vsel %vm6308_vm14, %v6299_v50, %v6315_v40  ;;  %v5432_v26 = vand.u32 3, %v5431_v41  ;;  %v6320_v19 = vsel %vm6308_vm14, %v6302_v0, %v6319_v21  ;;  %v11072_v0 = vpop.f32.mrf.mxu1 }
 0x267   :  { %v6317_v5 = vsel %vm6307_vm3, %v6314_v31, %v6316_v63  ;;  %v6322_v45 = vshll.u32 %v6282_v54, 8  ;;  %vm11044_vm4 = vcmp.le.f32.partialorder %v6170_v35, 0.7853982  ;;  %v6310_v42 = vsel %vm6306_vm6, %v6290_v15, %v6293_v29 }
 0x268   :  { %v6238_v22 = vclz %v8083_v62  ;;  %v6312_v48 = vsel %vm6308_vm14, %v6296_v30, %v6311_v55  ;;  %v6256_v6 = vsub.s32 4, %v10996_v60  ;;  %v6321_v11 = vsel %vm6307_vm3, %v6318_v44, %v6320_v19 }
 0x269   :  { %v11057_v17 = vmul.u32.u64.low %v6322_v45, %v6317_v5  ;;  %v11058_v10 = vmul.u32.u64.high %v6322_v45, %v6317_v5, %v11057_v17  ;;  %v11061_v14 = vmul.u32.u64.low %v6322_v45, %v6321_v11  ;;  %v11062_v56 = vmul.u32.u64.high %v6322_v45, %v6321_v11, %v11061_v14  ;;  %v11086_v5 = vpop.f32.mrf.mxu1 }
 0x26a   :  { %v8084_v35 = vadd.s32 4294967294, %v6238_v22  ;;  %v7109_v29 = vand.u32 2139095040, %v11020_v8  ;;  %vm5433_vm5 = vcmp.lt.s32.totalorder %v5432_v26, 2  ;;  %vm5434_vm8 = vcmp.eq.s32.totalorder %v5432_v26, 0 }
 0x26b   :  { %vm6172_vm9 = vcmp.lt.s32.totalorder %v10760_v33, 0  ;;  %v6313_v16 = vsel %vm6307_vm3, %v6310_v42, %v6312_v48  ;;  %vm5437_vm10 = vcmp.eq.s32.totalorder %v5432_v26, 2  ;;  %v6226_v30 = vadd.s32 %v10948_v25, %v10954_v3  ;;  %v11079_v25 = vpop.f32.mrf.mxu0 }
 0x26c   :  { %vm8085_vm11 = vcmp.lt.s32.totalorder %v8084_v35, 0  ;;  %v7110_v50 = vshrl.u32 %v7109_v29, 23  ;;  %v6257_v54 = vsel %vm6172_vm9, %v6256_v6, %v10996_v60  ;;  %v6332_v41 = vadd.s32 1, %v11058_v10 }
 0x26d   :  { %v8578_v47 = vpop.eup %8577  ;;  %v6241_v39 = vsel %vm8085_vm11, 0, %v8084_v35  ;;  %v13657_v18 = vand.u32 2147483647, %v11020_v8  ;;  %v6329_v55 = vmul.u32 %v6322_v45, %v6313_v16  ;;  %vm6331_vm12 = vc.u32 %v11062_v56, %v11057_v17  ;;  %v11093_v11 = vpop.f32.mrf.mxu0 }
 0x26e   :  { %v8580_v12 = vpop.eup %8579  ;;  %v5438_v36 = vxor.u32 2147483648, %v8578_v47  ;;  %v6242_v31 = vsub.s32 32, %v6241_v39  ;;  %v6246_v15 = vsub.s32 4294967266, %v6241_v39  ;;  %v6243_v40 = vshll.u32 %v11013_v9, %v6241_v39 }
 0x26f   :  { %v5435_v3 = vxor.u32 2147483648, %v8580_v12  ;;  %v8118_v21 = vadd.s32 4294967169, %v7110_v50  ;;  %v6333_v44 = vsel %vm6331_vm12, %v6332_v41, %v11058_v10  ;;  %v6259_v45 = vsel %vm11044_vm4, 0, %v6257_v54  ;;  %v11109_v41 = vpop.f32.mrf.mxu0 }
 0x270   :  { %v5439_v60 = vsel %vm5437_vm10, %v5438_v36, %v8580_v12  ;;  %v6244_v62 = vshrl.u32 %v6226_v30, %v6242_v31  ;;  %v6247_v63 = vadd.s32 127, %v6246_v15  ;;  %v6334_v22 = vadd.s32 %v6333_v44, %v6329_v55 }
 0x271   :  { %v5436_v19 = vsel %vm5434_vm8, %v8578_v47, %v5435_v3  ;;  %v7116_v42 = vadd.s32 1, %v8118_v21  ;;  %vm5430_vm13 = vweird.f32 %v10643_v49  ;;  %v1368_v10 = vadd.f32 %v11015_v58, %v11011_v59  ;;  %v11100_v49 = vpop.f32.mrf.mxu1  ;;  %v11126_v44 = vpop.f32.mrf.mxu0 }
 0x272   :  { %v5440_v9 = vsel %vm5433_vm5, %v5436_v19, %v5439_v60  ;;  %v6245_v48 = vor.u32 %v6244_v62, %v6243_v40  ;;  %v6248_v6 = vshll.u32 %v6247_v63, 23  ;;  %v6335_v14 = vadd.s32 536870912, %v6334_v22 }
 0x273   :  { %v5441_v35 = vsel %vm5430_vm13, nan, %v5440_v9  ;;  %vm7117_vm15 = vcmp.gt.s32.totalorder %v7116_v42, 0  ;;  %v6263_v30 = vadd.s32 3, %v6259_v45  ;;  %v7113_v47 = vand.u32 8388607, %v13657_v18  ;;  %v11114_v15 = vpop.f32.mrf.mxu1 }
 0x274   :  { %v7897_v29 = vsel %vm10830_vm7, %v10619_v34, %v5441_v35  ;;  %v6249_v16 = vor.u32 4788187, %v6248_v6  ;;  %v7118_v50 = vsel %vm7117_vm15, %v7116_v42, 0  ;;  %v11102_v26 = vshrl.u32 %v6335_v14, 30 }
 0x275   :  { %7937 = vst [vmem:[#allocation5 + $0x60] sm:$0xff] %v7897_v29  ;;  %v7120_v39 = vand.u32 31, %v7118_v50  ;;  %v11107_v59 = vadd.f32 %v11027_v20, %v1368_v10  ;;  %v6252_v54 = vcvt.s32.f32 %v6245_v48  ;;  %v11112_v31 = vand.u32 3, %v6263_v30  ;;  %v11135_v35 = vpop.f32.mrf.mxu1 }
 0x276   :  { %v6250_v58 = vand.u32 2147483647, %v6249_v16  ;;  %v6337_v34 = vshll.u32 %v11102_v26, 30  ;;  %v7114_v3 = vor.u32 8388608, %v7113_v47  ;;  %v7119_v9 = vshrl.u32 %v7118_v50, 5  ;;  %13774 = vst [vmem:[#allocation13_spill] sm:$0xff] %v11135_v35  ;;  %v11143_v50 = vpop.f32.mrf.mxu0 }
 0x277   :  { %13773 = vst [vmem:[#allocation16_spill] sm:$0xff] %v11107_v59  ;;  %v7121_v12 = vsub.s32 32, %v7120_v39  ;;  %v11121_v20 = vadd.f32 %v10385_v53, %v11107_v59  ;;  %v7123_v60 = vshll.u32 %v13693_v61, %v7120_v39  ;;  %v7126_v45 = vshll.u32 %v13689_v28, %v7120_v39 }
 0x278   :  { %v6253_v36 = vmul.f32 %v6252_v54, %v6250_v58  ;;  %v11116_v55 = vsub.s32 %v6334_v22, %v6337_v34  ;;  %v7129_v22 = vshll.u32 %v13684_v32, %v7120_v39  ;;  %v7132_v6 = vshll.u32 %v13685_v1, %v7120_v39 }
 0x279   :  { %v7124_v40 = vshrl.u32 %v13689_v28, %v7121_v12  ;;  %v7127_v62 = vshrl.u32 %v13684_v32, %v7121_v12  ;;  %v7130_v63 = vshrl.u32 %v13685_v1, %v7121_v12  ;;  %v7133_v42 = vshrl.u32 %v13741_v7, %v7121_v12 }
 0x27a   :  { %v6254_v21 = vxor.u32 2147483648, %v6253_v36  ;;  %v6340_v19 = vsub.s32 0, %v11116_v55  ;;  %v7135_v47 = vshll.u32 %v13741_v7, %v7120_v39  ;;  %v7136_v58 = vshrl.u32 %v13742_v23, %v7121_v12 }
 0x27b   :  { %v7125_v48 = vor.u32 %v7124_v40, %v7123_v60  ;;  %v7128_v29 = vor.u32 %v7127_v62, %v7126_v45  ;;  %v7131_v16 = vor.u32 %v7130_v63, %v7129_v22  ;;  %v7134_v30 = vor.u32 %v7133_v42, %v7132_v6  ;;  %v11151_v60 = vpop.f32.mrf.mxu1 }
 0x27c   :  { %v6255_v53 = vsel %vm6172_vm9, %v6254_v21, %v6253_v36  ;;  %v8087_v14 = vmin.u32 %v6340_v19, %v11116_v55  ;;  %v6330_v54 = vadd.s32 %v11057_v17, %v11062_v56  ;;  %v11147_v36 = vshll.u32 %v7114_v3, 8  ;;  %13775 = vst [vmem:[#allocation17_spill] sm:$0xff] %v11151_v60  ;;  %v11155_v3 = vpop.f32.mrf.mxu0 }
 0x27d   :  { %v6258_v10 = vsel %vm11044_vm4, %v10760_v33, %v6255_v53  ;;  %v7122_v52 = vshrl.u32 %v13693_v61, %v7121_v12  ;;  %v7137_v40 = vor.u32 %v7136_v58, %v7135_v47  ;;  %vm7138_vm0 = vcmp.lt.s32.totalorder %v7119_v9, 1  ;;  %13776 = vst [vmem:[#allocation18_spill] sm:$0xff] %v11155_v3 }
 0x27e   :  { %8581 = vcosq.f32 %v6258_v10  ;;  %v6342_v34 = vclz %v8087_v14  ;;  %v7213_v21 = vand.u32 2139095040, %v11121_v20  ;;  %vm7140_vm6 = vcmp.lt.s32.totalorder %v7119_v9, 3 }
 0x27f   :  { %8583 = vsinq.f32 %v6258_v10  ;;  %vm7141_vm14 = vcmp.lt.s32.totalorder %v7119_v9, 4  ;;  %v7146_v62 = vsel %vm7138_vm0, %v7125_v48, %v7128_v29  ;;  %v7150_v17 = vsel %vm7138_vm0, %v7128_v29, %v7131_v16  ;;  %v11162_v10 = vpop.f32.mrf.mxu1 }
 0x280   :  { %v8088_v39 = vadd.s32 4294967294, %v6342_v34  ;;  %v7143_v63 = vsel %vm7141_vm14, %v7131_v16, 2102212464  ;;  %v7147_v19 = vsel %vm7141_vm14, %v7134_v30, 920167782  ;;  %vm7139_vm3 = vcmp.lt.s32.totalorder %v7119_v9, 2 }
 0x281   :  { %v7151_v56 = vsel %vm7141_vm14, %v7137_v40, 1326507024  ;;  %v7148_v12 = vsel %vm7140_vm6, %v7131_v16, %v7147_v19  ;;  %v7142_v42 = vsel %vm7138_vm0, %v7122_v52, %v7125_v48  ;;  %13777 = vst [vmem:[#allocation14_spill] sm:$0xff] %v11162_v10  ;;  %v7144_v58 = vsel %vm7140_vm6, %v7128_v29, %v7143_v63  ;;  %v11174_v48 = vpop.f32.mrf.mxu0  ;;  %v13778_v29 = vld [vmem:[#allocation21_spill] sm:$0xff] }
 0x282   :  { %vm8089_vm2 = vcmp.lt.s32.totalorder %v8088_v39, 0  ;;  %v7152_v45 = vsel %vm7140_vm6, %v7134_v30, %v7151_v56  ;;  %v7149_v53 = vsel %vm7139_vm3, %v7146_v62, %v7148_v12  ;;  %v7214_v34 = vshrl.u32 %v7213_v21, 23 }
 0x283   :  { %v6345_v22 = vsel %vm8089_vm2, 0, %v8088_v39  ;;  %v7153_v6 = vsel %vm7139_vm3, %v7150_v17, %v7152_v45  ;;  %v11170_v16 = vmul.u32.u64.low %v11147_v36, %v7149_v53  ;;  %v11171_v30 = vmul.u32.u64.high %v11147_v36, %v7149_v53, %v11170_v16  ;;  %v11182_v17 = vpop.f32.mrf.mxu1 }
 0x284   :  { %v6346_v14 = vsub.s32 32, %v6345_v22  ;;  %v6350_v47 = vsub.s32 4294967266, %v6345_v22  ;;  %v11166_v40 = vmul.u32.u64.low %v11147_v36, %v7153_v6  ;;  %v11167_v18 = vmul.u32.u64.high %v11147_v36, %v7153_v6, %v11166_v40 }
 0x285   :  { %v6347_v52 = vshll.u32 %v11116_v55, %v6345_v22  ;;  %v8122_v19 = vadd.s32 4294967169, %v7214_v34  ;;  %vm6262_vm4 = vweird.f32 %v10760_v33  ;;  %v11179_v21 = vsub.s32 4, %v13778_v29  ;;  %v11192_v22 = vpop.f32.mrf.mxu0  ;;  %v11198_v40 = vpop.f32.mrf.mxu1 }
 0x286   :  { %v6348_v39 = vshrl.u32 %v6330_v54, %v6346_v14  ;;  %v6351_v62 = vadd.s32 127, %v6350_v47  ;;  %v7145_v63 = vsel %vm7139_vm3, %v7142_v42, %v7144_v58  ;;  %v11185_v45 = vsub.s32 5, %v13778_v29 }
 0x287   :  { %v7220_v53 = vadd.s32 1, %v8122_v19  ;;  %vm6276_vm5 = vcmp.lt.s32.totalorder %v10875_v43, 0  ;;  %v6360_v55 = vsub.s32 4, %v11102_v26  ;;  %vm7163_vm8 = vc.u32 %v11167_v18, %v11170_v16  ;;  %v11204_v29 = vpop.f32.mrf.mxu0 }
 0x288   :  { %v6349_v56 = vor.u32 %v6348_v39, %v6347_v52  ;;  %v6352_v12 = vshll.u32 %v6351_v62, 23  ;;  %v7164_v54 = vadd.s32 1, %v11171_v30  ;;  %vm6266_vm9 = vcmp.eq.s32.totalorder %v11112_v31, 0 }
 0x289   :  { %v7161_v6 = vmul.u32 %v11147_v36, %v7145_v63  ;;  %vm7221_vm10 = vcmp.gt.s32.totalorder %v7220_v53, 0  ;;  %vm6269_vm11 = vcmp.eq.s32.totalorder %v11112_v31, 2  ;;  %v13660_v36 = vand.u32 2147483647, %v11121_v20 }
 0x28a   :  { %v6353_v42 = vor.u32 4788187, %v6352_v12  ;;  %v7165_v58 = vsel %vm7163_vm8, %v7164_v54, %v11171_v30  ;;  %v7222_v34 = vsel %vm7221_vm10, %v7220_v53, 0  ;;  %v6356_v62 = vcvt.s32.f32 %v6349_v56 }
 0x28b   :  { %v8582_v9 = vpop.eup %8581  ;;  %v7166_v19 = vadd.s32 %v7165_v58, %v7161_v6  ;;  %v6361_v12 = vsel %vm6276_vm5, %v6360_v55, %v11102_v26  ;;  %v7224_v63 = vand.u32 31, %v7222_v34  ;;  %vm6265_vm12 = vcmp.lt.s32.totalorder %v11112_v31, 2  ;;  %v8679_v26 = vld [vmem:[%s13607_s2] sm:$0xff] }
 0x28c   :  { %v8584_v14 = vpop.eup %8583  ;;  %v6270_v47 = vxor.u32 2147483648, %v8582_v9  ;;  %v6354_v39 = vand.u32 2147483647, %v6353_v42  ;;  %v13779_v56 = vand.u32 2147483647, %v10875_v43  ;;  %v11219_v55 = vrot.slane %v8679_v26, %v11179_v21 }
 0x28d   :  { %v6267_v52 = vxor.u32 2147483648, %v8584_v14  ;;  %v7167_v54 = vadd.s32 536870912, %v7166_v19  ;;  %v7230_v10 = vshll.u32 %v13689_v28, %v7224_v63  ;;  %v7236_v59 = vshll.u32 %v13685_v1, %v7224_v63 }
 0x28e   :  { %v6271_v27 = vsel %vm6269_vm11, %v6270_v47, %v8584_v14  ;;  %v6357_v53 = vmul.f32 %v6356_v62, %v6354_v39  ;;  %vm11211_vm13 = vcmp.le.f32.partialorder %v13779_v56, 0.7853982  ;;  %v7225_v14 = vsub.s32 32, %v7224_v63  ;;  %v11221_v47 = vpop.f32.mrf.mxu1  ;;  %v11236_v56 = vpop.f32.mrf.mxu0 }
 0x28f   :  { %v6268_v30 = vsel %vm6266_vm9, %v8582_v9, %v6267_v52  ;;  %v6363_v9 = vsel %vm11211_vm13, 0, %v6361_v12  ;;  %v11227_v58 = vshrl.u32 %v7167_v54, 30  ;;  %v7217_v39 = vand.u32 8388607, %v13660_v36 }
 0x290   :  { %v6272_v42 = vsel %vm6265_vm12, %v6268_v30, %v6271_v27  ;;  %v6358_v27 = vxor.u32 2147483648, %v6357_v53  ;;  %v7228_v62 = vshrl.u32 %v13689_v28, %v7225_v14  ;;  %v7231_v30 = vshrl.u32 %v13684_v32, %v7225_v14  ;;  %v11247_v3 = vpop.f32.mrf.mxu1  ;;  %v11254_v6 = vpop.f32.mrf.mxu0 }
 0x291   :  { %v6273_v31 = vsel %vm6262_vm4, nan, %v6272_v42  ;;  %v7169_v12 = vshll.u32 %v11227_v58, 30  ;;  %v7227_v54 = vshll.u32 %v13693_v61, %v7224_v63  ;;  %v7234_v42 = vshrl.u32 %v13685_v1, %v7225_v14  ;;  %13782 = vst [vmem:[#allocation19_spill] sm:$0xff] %v11254_v6 }
 0x292   :  { %v7905_v52 = vsel %vm10747_vm1, %v10736_v2, %v6273_v31  ;;  %v6359_v33 = vsel %vm6276_vm5, %v6358_v27, %v6357_v53  ;;  %v6367_v31 = vadd.s32 3, %v6363_v9  ;;  %v7223_v36 = vshrl.u32 %v7222_v34, 5 }
 0x293   :  { %7945 = vst [vmem:[#allocation5 + $0xa0] sm:$0xff] %v7905_v52  ;;  %v6362_v2 = vsel %vm11211_vm13, %v10875_v43, %v6359_v33  ;;  %v11249_v52 = vsub.s32 %v7166_v19, %v7169_v12  ;;  %v7229_v53 = vor.u32 %v7228_v62, %v7227_v54  ;;  %v7233_v27 = vshll.u32 %v13684_v32, %v7224_v63  ;;  %v11264_v12 = vpop.f32.mrf.mxu1 }
 0x294   :  { %8585 = vcosq.f32 %v6362_v2  ;;  %v7232_v37 = vor.u32 %v7231_v30, %v7230_v10  ;;  %v7237_v60 = vshrl.u32 %v13741_v7, %v7225_v14  ;;  %v7239_v33 = vshll.u32 %v13741_v7, %v7224_v63  ;;  %13783 = vst [vmem:[#allocation20_spill] sm:$0xff] %v11264_v12 }
 0x295   :  { %8587 = vsinq.f32 %v6362_v2  ;;  %v7172_v34 = vsub.s32 0, %v11249_v52  ;;  %v7235_v9 = vor.u32 %v7234_v42, %v7233_v27  ;;  %v7240_v35 = vshrl.u32 %v13742_v23, %v7225_v14 }
 0x296   :  { %v1547_v19 = vadd.f32 %v11036_v4, %v11219_v55  ;;  %v11262_v62 = vrot.slane %v8679_v26, %v11185_v45  ;;  %v7218_v10 = vor.u32 8388608, %v7217_v39  ;;  %v7238_v30 = vor.u32 %v7237_v60, %v7236_v59  ;;  %v11271_v4 = vpop.f32.mrf.mxu0 }
 0x297   :  { %v8119_v54 = vmin.u32 %v7172_v34, %v11249_v52  ;;  %v7241_v2 = vor.u32 %v7240_v35, %v7239_v33  ;;  %vm7242_vm15 = vcmp.lt.s32.totalorder %v7223_v36, 1  ;;  %vm7245_vm0 = vcmp.lt.s32.totalorder %v7223_v36, 4  ;;  %13784 = vst [vmem:[#allocation11_spill] sm:$0xff] %v11271_v4  ;;  %v11274_v33 = vpop.f32.mrf.mxu1 }
 0x298   :  { %v11267_v42 = vand.u32 3, %v6367_v31  ;;  %v7226_v63 = vshrl.u32 %v13693_v61, %v7225_v14  ;;  %v7250_v27 = vsel %vm7242_vm15, %v7229_v53, %v7232_v37  ;;  %v7251_v6 = vsel %vm7245_vm0, %v7238_v30, 920167782  ;;  %v11283_v7 = vpop.f32.mrf.mxu0 }
 0x299   :  { %v7174_v26 = vclz %v8119_v54  ;;  %vm7244_vm6 = vcmp.lt.s32.totalorder %v7223_v36, 3  ;;  %v7247_v39 = vsel %vm7245_vm0, %v7235_v9, 2102212464  ;;  %v7254_v59 = vsel %vm7242_vm15, %v7232_v37, %v7235_v9 }
 0x29a   :  { %vm7243_vm14 = vcmp.lt.s32.totalorder %v7223_v36, 2  ;;  %v7252_v60 = vsel %vm7244_vm6, %v7235_v9, %v7251_v6  ;;  %v7255_v34 = vsel %vm7245_vm0, %v7241_v2, 1326507024  ;;  %v7258_v35 = vshll.u32 %v7218_v10, 8 }
 0x29b   :  { %v8120_v31 = vadd.s32 4294967294, %v7174_v26  ;;  %v7246_v12 = vsel %vm7242_vm15, %v7226_v63, %v7229_v53  ;;  %v7253_v14 = vsel %vm7243_vm14, %v7250_v27, %v7252_v60  ;;  %v7256_v38 = vsel %vm7244_vm6, %v7238_v30, %v7255_v34  ;;  %v11295_v30 = vpop.f32.mrf.mxu1 }
 0x29c   :  { %v7248_v13 = vsel %vm7244_vm6, %v7232_v37, %v7247_v39  ;;  %v7257_v4 = vsel %vm7243_vm14, %v7254_v59, %v7256_v38  ;;  %v11279_v54 = vmul.u32.u64.low %v7258_v35, %v7253_v14  ;;  %v11280_v23 = vmul.u32.u64.high %v7258_v35, %v7253_v14, %v11279_v54  ;;  %v11304_v39 = vpop.f32.mrf.mxu0 }
 0x29d   :  { %vm6366_vm2 = vweird.f32 %v10875_v43  ;;  %vm7108_vm3 = vcmp.lt.s32.totalorder %v11020_v8, 0  ;;  %vm8121_vm4 = vcmp.lt.s32.totalorder %v8120_v31, 0  ;;  %v1549_v37 = vadd.f32 %v11065_v24, %v11262_v62 }
 0x29e   :  { %v11287_v6 = vmul.u32.u64.low %v7258_v35, %v7257_v4  ;;  %v11288_v9 = vmul.u32.u64.high %v7258_v35, %v7257_v4, %v11287_v6  ;;  %v7177_v53 = vsel %vm8121_vm4, 0, %v8120_v31  ;;  %v1558_v38 = vadd.f32 %v11079_v25, %v11219_v55 }
 0x29f   :  { %v1682_v10 = vadd.f32 %v11052_v51, %v1547_v19  ;;  %v7162_v2 = vadd.s32 %v11170_v16, %v11167_v18  ;;  %v7178_v63 = vsub.s32 32, %v7177_v53  ;;  %v7182_v27 = vsub.s32 4294967266, %v7177_v53 }
 0x2a0   :  { %v7249_v26 = vsel %vm7243_vm14, %v7246_v12, %v7248_v13  ;;  %vm6370_vm5 = vcmp.eq.s32.totalorder %v11267_v42, 0  ;;  %vm6373_vm8 = vcmp.eq.s32.totalorder %v11267_v42, 2  ;;  %v7192_v24 = vsub.s32 4, %v11227_v58  ;;  %v11310_v12 = vpop.f32.mrf.mxu1 }
 0x2a1   :  { %v8586_v4 = vpop.eup %8585  ;;  %v7268_v25 = vadd.s32 1, %v11280_v23  ;;  %v7179_v59 = vshll.u32 %v11249_v52, %v7177_v53  ;;  %v7180_v18 = vshrl.u32 %v7162_v2, %v7178_v63  ;;  %v7183_v16 = vadd.s32 127, %v7182_v27  ;;  %v2008_v2 = vpop.f32.mrf.mxu0 }
 0x2a2   :  { %v8588_v51 = vpop.eup %8587  ;;  %v6374_v19 = vxor.u32 2147483648, %v8586_v4  ;;  %v7265_v36 = vmul.u32 %v7258_v35, %v7249_v26  ;;  %vm7267_vm9 = vc.u32 %v11288_v9, %v11279_v54  ;;  %v1788_v13 = vadd.f32 %v11174_v48, %v1682_v10 }
 0x2a3   :  { %v6371_v60 = vxor.u32 2147483648, %v8588_v51  ;;  %v7181_v31 = vor.u32 %v7180_v18, %v7179_v59  ;;  %v7184_v14 = vshll.u32 %v7183_v16, 23  ;;  %v7269_v6 = vsel %vm7267_vm9, %v7268_v25, %v11280_v23  ;;  %v2010_v59 = vpop.f32.mrf.mxu0 }
 0x2a4   :  { %v6375_v34 = vsel %vm6373_vm8, %v6374_v19, %v8588_v51  ;;  %vm6369_vm10 = vcmp.lt.s32.totalorder %v11267_v42, 2  ;;  %v7270_v53 = vadd.s32 %v7269_v6, %v7265_v36  ;;  %v1684_v35 = vadd.f32 %v11072_v0, %v1549_v37  ;;  %v2107_v37 = vpop.f32.mrf.mxu1 }
 0x2a5   :  { %v6372_v52 = vsel %vm6370_vm5, %v8586_v4, %v6371_v60  ;;  %v7185_v27 = vor.u32 4788187, %v7184_v14  ;;  %v7193_v48 = vsel %vm7108_vm3, %v7192_v24, %v11227_v58  ;;  %v1892_v10 = vadd.f32 %v11182_v17, %v1788_v13 }
 0x2a6   :  { %v6376_v63 = vsel %vm6369_vm10, %v6372_v52, %v6375_v34  ;;  %v13785_v26 = vand.u32 2147483647, %v11020_v8  ;;  %v7271_v4 = vadd.s32 536870912, %v7270_v53  ;;  %v1790_v0 = vadd.f32 %v11192_v22, %v1684_v35  ;;  %v2109_v34 = vpop.f32.mrf.mxu1  ;;  %v2015_v52 = vpop.f32.mrf.mxu0 }
 0x2a7   :  { %v6377_v23 = vsel %vm6366_vm2, nan, %v6376_v63  ;;  %v7186_v58 = vand.u32 2147483647, %v7185_v27  ;;  %v7188_v24 = vcvt.s32.f32 %v7181_v31  ;;  %v2009_v17 = vadd.f32 %v2008_v2, %v1892_v10 }
 0x2a8   :  { %vm11325_vm11 = vcmp.le.f32.partialorder %v13785_v26, 0.7853982  ;;  %v7906_v25 = vsel %vm10830_vm7, %v10859_v46, %v6377_v23  ;;  %v7272_v51 = vshrl.u32 %v7271_v4, 30  ;;  %v1689_v19 = vadd.f32 %v11086_v5, %v1558_v38  ;;  %v8680_v46 = vld [vmem:[%s13608_s3] sm:$0xff]  ;;  %v2114_v10 = vpop.f32.mrf.mxu1 }
 0x2a9   :  { %7946 = vst [vmem:[#allocation5 + $0xa8] sm:$0xff] %v7906_v25  ;;  %v7195_v43 = vsel %vm11325_vm11, 0, %v7193_v48  ;;  %v7189_v18 = vmul.f32 %v7188_v24, %v7186_v58  ;;  %v1894_v16 = vadd.f32 %v11198_v40, %v1790_v0  ;;  %v11337_v22 = vadd.f32 %v2107_v37, %v2009_v17 }
 0x2aa   :  { %v11343_v60 = vrot.slane %v8680_v46, %v11179_v21  ;;  %v7273_v36 = vshll.u32 %v7272_v51, 30  ;;  %v1796_v13 = vadd.f32 %v11204_v29, %v1689_v19  ;;  %v7199_v40 = vadd.s32 3, %v7195_v43 }
 0x2ab   :  { %v7190_v31 = vxor.u32 2147483648, %v7189_v18  ;;  %v2011_v14 = vadd.f32 %v2010_v59, %v1894_v16  ;;  %v11359_v29 = vrot.slane %v8680_v46, %v11185_v45  ;;  %v7296_v48 = vsub.s32 4, %v7272_v51 }
 0x2ac   :  { %v11348_v5 = vadd.f32 %v11343_v60, %v11337_v22  ;;  %v11350_v38 = vsub.s32 %v7270_v53, %v7273_v36  ;;  %v1901_v6 = vadd.f32 %v11221_v47, %v1796_v13  ;;  %vm7212_vm12 = vcmp.lt.s32.totalorder %v11121_v20, 0 }
 0x2ad   :  { %v7191_v35 = vsel %vm7108_vm3, %v7190_v31, %v7189_v18  ;;  %v11356_v63 = vadd.f32 %v2109_v34, %v2011_v14  ;;  %v1560_v4 = vadd.f32 %v11093_v11, %v11262_v62  ;;  %v1569_v42 = vadd.f32 %v11109_v41, %v11219_v55 }
 0x2ae   :  { %v4506_v2 = vand.u32 2147483647, %v11348_v5  ;;  %v7194_v27 = vsel %vm11325_vm11, %v11020_v8, %v7191_v35  ;;  %v7276_v53 = vsub.s32 0, %v11350_v38  ;;  %v4509_v47 = vand.u32 2139095040, %v11348_v5 }
 0x2af   :  { %8589 = vcosq.f32 %v7194_v27  ;;  %v2016_v23 = vadd.f32 %v2015_v52, %v1901_v6  ;;  %v11376_v25 = vadd.f32 %v11359_v29, %v11356_v63  ;;  %v11380_v24 = vand.u32 3, %v7199_v40 }
 0x2b0   :  { %8591 = vsinq.f32 %v7194_v27  ;;  %v8123_v26 = vmin.u32 %v7276_v53, %v11350_v38  ;;  %v4510_v0 = vshrl.u32 %v4509_v47, 23  ;;  %v4513_v37 = vand.u32 8388607, %v4506_v2 }
 0x2b1   :  { %v11378_v58 = vadd.f32 %v2114_v10, %v2016_v23  ;;  %v7297_v43 = vsel %vm7212_vm12, %v7296_v48, %v7272_v51  ;;  %v1691_v11 = vadd.f32 %v11100_v49, %v1560_v4  ;;  %v13788_v19 = vand.u32 2147483647, %v11121_v20 }
 0x2b2   :  { %v7278_v17 = vclz %v8123_v26  ;;  %v11393_v59 = vadd.f32 %v11126_v44, %v11262_v62  ;;  %v8018_v18 = vadd.s32 4294967169, %v4510_v0  ;;  %v11397_v46 = vadd.f32 %v11143_v50, %v11219_v55 }
 0x2b3   :  { %vm11387_vm13 = vcmp.le.f32.partialorder %v13788_v19, 0.7853982  ;;  %v1798_v51 = vadd.f32 %v11236_v56, %v1691_v11  ;;  %v4613_v49 = vand.u32 2139095040, %v11376_v25  ;;  %v4514_v13 = vor.u32 8388608, %v4513_v37 }
 0x2b4   :  { %v8124_v16 = vadd.s32 4294967294, %v7278_v17  ;;  %v7299_v36 = vsel %vm11387_vm13, 0, %v7297_v43  ;;  %v4516_v34 = vadd.s32 1, %v8018_v18  ;;  %v11405_v31 = vadd.f32 %v11343_v60, %v11378_v58 }
 0x2b5   :  { %vm7205_vm15 = vcmp.eq.s32.totalorder %v11380_v24, 2  ;;  %v7266_v44 = vadd.s32 %v11279_v54, %v11288_v9  ;;  %v11411_v50 = vadd.f32 %v11114_v15, %v1569_v42  ;;  %vm7202_vm6 = vcmp.eq.s32.totalorder %v11380_v24, 0 }
 0x2b6   :  { %vm8125_vm0 = vcmp.lt.s32.totalorder %v8124_v16, 0  ;;  %v11415_v56 = vadd.f32 %v11247_v3, %v1798_v51  ;;  %vm4517_vm14 = vcmp.gt.s32.totalorder %v4516_v34, 0  ;;  %v4614_v14 = vshrl.u32 %v4613_v49, 23 }
 0x2b7   :  { %v7281_v55 = vsel %vm8125_vm0, 0, %v8124_v16  ;;  %vm7201_vm2 = vcmp.lt.s32.totalorder %v11380_v24, 2  ;;  %v11418_v52 = vadd.s32 3, %v7299_v36  ;;  %v4518_v35 = vsel %vm4517_vm14, %v4516_v34, 0 }
 0x2b8   :  { %v7282_v40 = vsub.s32 32, %v7281_v55  ;;  %v7286_v6 = vsub.s32 4294967266, %v7281_v55  ;;  %vm7198_vm3 = vweird.f32 %v11020_v8  ;;  %v4520_v54 = vand.u32 31, %v4518_v35 }
 0x2b9   :  { %v11421_v15 = vshll.u32 %v4514_v13, 8  ;;  %v4610_v9 = vand.u32 2147483647, %v11376_v25  ;;  %v5445_v27 = vand.u32 2139095040, %v11405_v31  ;;  %v7283_v3 = vshll.u32 %v11350_v38, %v7281_v55 }
 0x2ba   :  { %v7284_v53 = vshrl.u32 %v7266_v44, %v7282_v40  ;;  %v7287_v48 = vadd.s32 127, %v7286_v6  ;;  %v4519_v47 = vshrl.u32 %v4518_v35, 5  ;;  %v4521_v10 = vsub.s32 32, %v4520_v54 }
 0x2bb   :  { %v4523_v23 = vshll.u32 %v13693_v61, %v4520_v54  ;;  %v4526_v26 = vshll.u32 %v13689_v28, %v4520_v54  ;;  %v8022_v4 = vadd.s32 4294967169, %v4614_v14  ;;  %v4529_v17 = vshll.u32 %v13684_v32, %v4520_v54 }
 0x2bc   :  { %v8590_v0 = vpop.eup %8589  ;;  %v7285_v42 = vor.u32 %v7284_v53, %v7283_v3  ;;  %v7288_v37 = vshll.u32 %v7287_v48, 23  ;;  %v4532_v43 = vshll.u32 %v13685_v1, %v4520_v54  ;;  %v4524_v38 = vshrl.u32 %v13689_v28, %v4521_v10 }
 0x2bd   :  { %v8592_v11 = vpop.eup %8591  ;;  %v7206_v19 = vxor.u32 2147483648, %v8590_v0  ;;  %v4527_v18 = vshrl.u32 %v13684_v32, %v4521_v10  ;;  %v13791_v16 = vmov 920167782   ;;  %v4530_v34 = vshrl.u32 %v13685_v1, %v4521_v10 }
 0x2be   :  { %v4535_v51 = vshll.u32 %v13791_v16, %v4520_v54  ;;  %v7203_v49 = vxor.u32 2147483648, %v8592_v11  ;;  %v7289_v36 = vor.u32 4788187, %v7288_v37  ;;  %v7292_v13 = vcvt.s32.f32 %v7285_v42 }
 0x2bf   :  { %v7207_v44 = vsel %vm7205_vm15, %v7206_v19, %v8592_v11  ;;  %v4525_v55 = vor.u32 %v4524_v38, %v4523_v23  ;;  %v4528_v14 = vor.u32 %v4527_v18, %v4526_v26  ;;  %v4533_v40 = vshrl.u32 %v13791_v16, %v4521_v10  ;;  %v13793_v19 = vld [vmem:[#allocation12_spill] sm:$0xff] }
 0x2c0   :  { %v7204_v6 = vsel %vm7202_vm6, %v8590_v0, %v7203_v49  ;;  %v7290_v35 = vand.u32 2147483647, %v7289_v36  ;;  %v4531_v3 = vor.u32 %v4530_v34, %v4529_v17  ;;  %v13792_v53 = vmov 1326507024  }
 0x2c1   :  { %v4536_v48 = vshrl.u32 %v13792_v53, %v4521_v10  ;;  %v7208_v54 = vsel %vm7201_vm2, %v7204_v6, %v7207_v44  ;;  %v4522_v42 = vshrl.u32 %v13693_v61, %v4521_v10  ;;  %v4534_v37 = vor.u32 %v4533_v40, %v4532_v43 }
 0x2c2   :  { %vm4538_vm4 = vcmp.lt.s32.totalorder %v4519_v47, 1  ;;  %v7209_v23 = vsel %vm7198_vm3, nan, %v7208_v54  ;;  %v7293_v26 = vmul.f32 %v7292_v13, %v7290_v35  ;;  %vm4539_vm5 = vcmp.lt.s32.totalorder %v4519_v47, 2 }
 0x2c3   :  { %v4537_v11 = vor.u32 %v4536_v48, %v4535_v51  ;;  %v7914_v0 = vsel %vm10747_vm1, %v13793_v19, %v7209_v23  ;;  %vm4540_vm8 = vcmp.lt.s32.totalorder %v4519_v47, 3  ;;  %vm4541_vm9 = vcmp.lt.s32.totalorder %v4519_v47, 4  ;;  %v13797_v19 = vld [vmem:[#allocation19_spill] sm:$0xff] }
 0x2c4   :  { %v4546_v17 = vsel %vm4538_vm4, %v4525_v55, %v4528_v14  ;;  %7954 = vst [vmem:[#allocation5 + $0xe8] sm:$0xff] %v7914_v0  ;;  %v7294_v24 = vxor.u32 2147483648, %v7293_v26  ;;  %v4543_v18 = vsel %vm4541_vm9, %v4531_v3, 2102212464  ;;  %v4547_v49 = vsel %vm4541_vm9, %v4534_v37, 920167782 }
 0x2c5   :  { %v4550_v10 = vsel %vm4538_vm4, %v4528_v14, %v4531_v3  ;;  %v4542_v43 = vsel %vm4538_vm4, %v4522_v42, %v4525_v55  ;;  %v4548_v36 = vsel %vm4540_vm8, %v4531_v3, %v4547_v49  ;;  %v4551_v34 = vsel %vm4541_vm9, %v4537_v11, 1326507024 }
 0x2c6   :  { %v4620_v8 = vadd.s32 1, %v8022_v4  ;;  %v7295_v51 = vsel %vm7212_vm12, %v7294_v24, %v7293_v26  ;;  %v4544_v13 = vsel %vm4540_vm8, %v4528_v14, %v4543_v18  ;;  %v4549_v44 = vsel %vm4539_vm5, %v4546_v17, %v4548_v36  ;;  %v2017_v14 = vpop.f32.mrf.mxu0  ;;  %v13796_v26 = vld [vmem:[#allocation17_spill] sm:$0xff] }
 0x2c7   :  { %v4552_v40 = vsel %vm4540_vm8, %v4534_v37, %v4551_v34  ;;  %v7298_v6 = vsel %vm11387_vm13, %v11121_v20, %v7295_v51  ;;  %v11456_v48 = vmul.u32.u64.low %v11421_v15, %v4549_v44  ;;  %v11457_v54 = vmul.u32.u64.high %v11421_v15, %v4549_v44, %v11456_v48  ;;  %v13795_v37 = vld [vmem:[#allocation13_spill] sm:$0xff] }
 0x2c8   :  { %v4553_v35 = vsel %vm4539_vm5, %v4550_v10, %v4552_v40  ;;  %8593 = vcosq.f32 %v7298_v6  ;;  %v4617_v3 = vand.u32 8388607, %v4610_v9  ;;  %v4545_v41 = vsel %vm4539_vm5, %v4542_v43, %v4544_v13 }
 0x2c9   :  { %v11461_v4 = vmul.u32.u64.low %v11421_v15, %v4553_v35  ;;  %v11462_v55 = vmul.u32.u64.high %v11421_v15, %v4553_v35, %v11461_v4  ;;  %8595 = vsinq.f32 %v7298_v6  ;;  %vm4621_vm1 = vcmp.gt.s32.totalorder %v4620_v8, 0 }
 0x2ca   :  { %v5446_v42 = vshrl.u32 %v5445_v27, 23  ;;  %v11471_v23 = vadd.f32 %v13795_v37, %v11393_v59  ;;  %v11475_v11 = vadd.f32 %v13796_v26, %v11397_v46  ;;  %v11479_v38 = vadd.f32 %v13797_v19, %v11411_v50 }
 0x2cb   :  { %v4622_v0 = vsel %vm4621_vm1, %v4620_v8, 0  ;;  %v11482_v47 = vand.u32 3, %v11418_v52  ;;  %v4564_v17 = vadd.s32 1, %v11457_v54  ;;  %v11486_v27 = vadd.f32 %v2017_v14, %v11415_v56 }
 0x2cc   :  { %v4624_v24 = vand.u32 31, %v4622_v0  ;;  %v4561_v59 = vmul.u32 %v11421_v15, %v4545_v41  ;;  %vm4563_vm10 = vc.u32 %v11462_v55, %v11456_v48  ;;  %v4618_v46 = vor.u32 8388608, %v4617_v3 }
 0x2cd   :  { %v5442_v18 = vand.u32 2147483647, %v11405_v31  ;;  %v4565_v50 = vsel %vm4563_vm10, %v4564_v17, %v11457_v54  ;;  %v11493_v49 = vshrl.u32 %v4622_v0, 5  ;;  %v8054_v10 = vadd.s32 4294967169, %v5446_v42 }
 0x2ce   :  { %v4625_v52 = vsub.s32 32, %v4624_v24  ;;  %v4566_v43 = vadd.s32 %v4565_v50, %v4561_v59  ;;  %v4627_v36 = vshll.u32 %v13693_v61, %v4624_v24  ;;  %v4630_v56 = vshll.u32 %v13689_v28, %v4624_v24 }
 0x2cf   :  { %v4633_v34 = vshll.u32 %v13684_v32, %v4624_v24  ;;  %vm7309_vm11 = vcmp.eq.s32.totalorder %v11482_v47, 2  ;;  %v4636_v13 = vshll.u32 %v13685_v1, %v4624_v24  ;;  %vm7306_vm12 = vcmp.eq.s32.totalorder %v11482_v47, 0 }
 0x2d0   :  { %v4628_v15 = vshrl.u32 %v13689_v28, %v4625_v52  ;;  %v4631_v8 = vshrl.u32 %v13684_v32, %v4625_v52  ;;  %v4634_v51 = vshrl.u32 %v13685_v1, %v4625_v52  ;;  %v4567_v44 = vadd.s32 536870912, %v4566_v43 }
 0x2d1   :  { %v4637_v40 = vshrl.u32 %v13791_v16, %v4625_v52  ;;  %v4639_v6 = vshll.u32 %v13791_v16, %v4624_v24  ;;  %v4640_v35 = vshrl.u32 %v13792_v53, %v4625_v52  ;;  %vm7305_vm13 = vcmp.lt.s32.totalorder %v11482_v47, 2 }
 0x2d2   :  { %v4629_v54 = vor.u32 %v4628_v15, %v4627_v36  ;;  %v4632_v4 = vor.u32 %v4631_v8, %v4630_v56  ;;  %v4635_v14 = vor.u32 %v4634_v51, %v4633_v34  ;;  %v11508_v3 = vshll.u32 %v4618_v46, 8  ;;  %v2116_v51 = vpop.f32.mrf.mxu1 }
 0x2d3   :  { %vm7302_vm15 = vweird.f32 %v11121_v20  ;;  %v4568_v41 = vshrl.u32 %v4567_v44, 30  ;;  %v4638_v42 = vor.u32 %v4637_v40, %v4636_v13  ;;  %v4641_v37 = vor.u32 %v4640_v35, %v4639_v6 }
 0x2d4   :  { %v11513_v26 = vand.u32 8388607, %v5442_v18  ;;  %v4626_v19 = vshrl.u32 %v13693_v61, %v4625_v52  ;;  %vm4642_vm0 = vcmp.lt.s32.totalorder %v11493_v49, 1  ;;  %vm4645_vm6 = vcmp.lt.s32.totalorder %v11493_v49, 4 }
 0x2d5   :  { %v5452_v0 = vadd.s32 1, %v8054_v10  ;;  %v4569_v17 = vshll.u32 %v4568_v41, 30  ;;  %vm4644_vm14 = vcmp.lt.s32.totalorder %v11493_v49, 3  ;;  %v4647_v24 = vsel %vm4645_vm6, %v4635_v14, 2102212464  ;;  %v8594_v46 = vpop.eup %8593 }
 0x2d6   :  { %v4651_v59 = vsel %vm4645_vm6, %v4638_v42, 920167782  ;;  %v4650_v50 = vsel %vm4642_vm0, %v4629_v54, %v4632_v4  ;;  %v4654_v52 = vsel %vm4642_vm0, %v4632_v4, %v4635_v14  ;;  %v4655_v56 = vsel %vm4645_vm6, %v4641_v37, 1326507024  ;;  %v8596_v34 = vpop.eup %8595 }
 0x2d7   :  { %v4652_v36 = vsel %vm4644_vm14, %v4635_v14, %v4651_v59  ;;  %v7310_v15 = vxor.u32 2147483648, %v8594_v46  ;;  %v11525_v8 = vsub.s32 %v4566_v43, %v4569_v17  ;;  %vm4643_vm2 = vcmp.lt.s32.totalorder %v11493_v49, 2 }
 0x2d8   :  { %v4646_v10 = vsel %vm4642_vm0, %v4626_v19, %v4629_v54  ;;  %v7307_v13 = vxor.u32 2147483648, %v8596_v34  ;;  %v4648_v44 = vsel %vm4644_vm14, %v4632_v4, %v4647_v24  ;;  %v4656_v40 = vsel %vm4644_vm14, %v4638_v42, %v4655_v56  ;;  %v13799_v56 = vld [vmem:[#allocation11_spill] sm:$0xff] }
 0x2d9   :  { %vm5453_vm3 = vcmp.gt.s32.totalorder %v5452_v0, 0  ;;  %v7311_v6 = vsel %vm7309_vm11, %v7310_v15, %v8596_v34  ;;  %v4572_v43 = vsub.s32 0, %v11525_v8  ;;  %v4653_v35 = vsel %vm4643_vm2, %v4650_v50, %v4652_v36 }
 0x2da   :  { %v4657_v54 = vsel %vm4643_vm2, %v4654_v52, %v4656_v40  ;;  %v7308_v14 = vsel %vm7306_vm12, %v8594_v46, %v7307_v13  ;;  %v11548_v42 = vadd.f32 %v2116_v51, %v11486_v27  ;;  %v4592_v24 = vsub.s32 4, %v4568_v41  ;;  %v13798_v27 = vld [vmem:[#allocation16_spill] sm:$0xff] }
 0x2db   :  { %v11544_v4 = vmul.u32.u64.low %v11508_v3, %v4657_v54  ;;  %v11545_v37 = vmul.u32.u64.high %v11508_v3, %v4657_v54, %v11544_v4  ;;  %v7312_v19 = vsel %vm7305_vm13, %v7308_v14, %v7311_v6  ;;  %v8019_v17 = vmin.u32 %v4572_v43, %v11525_v8 }
 0x2dc   :  { %v5454_v59 = vsel %vm5453_vm3, %v5452_v0, 0  ;;  %v7313_v50 = vsel %vm7302_vm15, nan, %v7312_v19  ;;  %v4649_v46 = vsel %vm4643_vm2, %v4646_v10, %v4648_v44  ;;  %v11567_v34 = vadd.f32 %v13799_v56, %v11471_v23 }
 0x2dd   :  { %v11558_v36 = vmul.u32.u64.low %v11508_v3, %v4653_v35  ;;  %v11559_v52 = vmul.u32.u64.high %v11508_v3, %v4653_v35, %v11558_v36  ;;  %v7915_v47 = vsel %vm10830_vm7, %v13798_v27, %v7313_v50  ;;  %vm4508_vm4 = vcmp.lt.s32.totalorder %v11348_v5, 0 }
 0x2de   :  { %v4574_v20 = vclz %v8019_v17  ;;  %7955 = vst [vmem:[#allocation5 + $0xf0] sm:$0xff] %v7915_v47  ;;  %v4562_v49 = vadd.s32 %v11456_v48, %v11462_v55  ;;  %v5450_v0 = vor.u32 8388608, %v11513_v26  ;;  %v5456_v15 = vand.u32 31, %v5454_v59 }
 0x2df   :  { %v11575_v10 = vadd.f32 %v11359_v29, %v11548_v42  ;;  %v11579_v51 = vsel %vm4508_vm4, %v4592_v24, %v4568_v41  ;;  %v4665_v23 = vmul.u32 %v11508_v3, %v4649_v46  ;;  %vm4667_vm7 = vc.u32 %v11545_v37, %v11558_v36 }
 0x2e0   :  { %v8020_v57 = vadd.s32 4294967294, %v4574_v20  ;;  %v4668_v13 = vadd.s32 1, %v11559_v52  ;;  %v11585_v48 = vshrl.u32 %v5454_v59, 5  ;;  %v5457_v55 = vsub.s32 32, %v5456_v15 }
 0x2e1   :  { %v5459_v26 = vshll.u32 %v13693_v61, %v5456_v15  ;;  %v5462_v44 = vshll.u32 %v13689_v28, %v5456_v15  ;;  %v5465_v40 = vshll.u32 %v13684_v32, %v5456_v15  ;;  %v5468_v41 = vshll.u32 %v13685_v1, %v5456_v15 }
 0x2e2   :  { %vm8021_vm5 = vcmp.lt.s32.totalorder %v8020_v57, 0  ;;  %v4669_v3 = vsel %vm4667_vm7, %v4668_v13, %v11559_v52  ;;  %v5460_v43 = vshrl.u32 %v13689_v28, %v5457_v55  ;;  %v5471_v35 = vshll.u32 %v13791_v16, %v5456_v15 }
 0x2e3   :  { %v4577_v6 = vsel %vm8021_vm5, 0, %v8020_v57  ;;  %v4670_v19 = vadd.s32 %v4669_v3, %v4665_v23  ;;  %v5463_v24 = vshrl.u32 %v13684_v32, %v5457_v55  ;;  %v5466_v59 = vshrl.u32 %v13685_v1, %v5457_v55 }
 0x2e4   :  { %v4578_v54 = vsub.s32 32, %v4577_v6  ;;  %v4579_v14 = vshll.u32 %v11525_v8, %v4577_v6  ;;  %v4582_v4 = vsub.s32 4294967266, %v4577_v6  ;;  %v5461_v17 = vor.u32 %v5460_v43, %v5459_v26 }
 0x2e5   :  { %v5469_v50 = vshrl.u32 %v13791_v16, %v5457_v55  ;;  %v4671_v47 = vadd.s32 536870912, %v4670_v19  ;;  %v5472_v52 = vshrl.u32 %v13792_v53, %v5457_v55  ;;  %v5464_v56 = vor.u32 %v5463_v24, %v5462_v44 }
 0x2e6   :  { %v4580_v46 = vshrl.u32 %v4562_v49, %v4578_v54  ;;  %v4583_v27 = vadd.s32 127, %v4582_v4  ;;  %v5467_v20 = vor.u32 %v5466_v59, %v5465_v40  ;;  %vm5477_vm8 = vcmp.lt.s32.totalorder %v11585_v48, 4 }
 0x2e7   :  { %v5470_v15 = vor.u32 %v5469_v50, %v5468_v41  ;;  %v4672_v23 = vshrl.u32 %v4671_v47, 30  ;;  %v5473_v13 = vor.u32 %v5472_v52, %v5471_v35  ;;  %vm5474_vm9 = vcmp.lt.s32.totalorder %v11585_v48, 1 }
 0x2e8   :  { %v4581_v8 = vor.u32 %v4580_v46, %v4579_v14  ;;  %v4584_v57 = vshll.u32 %v4583_v27, 23  ;;  %vm5475_vm1 = vcmp.lt.s32.totalorder %v11585_v48, 2  ;;  %vm5476_vm10 = vcmp.lt.s32.totalorder %v11585_v48, 3 }
 0x2e9   :  { %v5483_v49 = vsel %vm5477_vm8, %v5470_v15, 920167782  ;;  %v4673_v6 = vshll.u32 %v4672_v23, 30  ;;  %v5458_v44 = vshrl.u32 %v13693_v61, %v5457_v55  ;;  %v5482_v40 = vsel %vm5474_vm9, %v5461_v17, %v5464_v56 }
 0x2ea   :  { %v4585_v26 = vor.u32 4788187, %v4584_v57  ;;  %v5479_v41 = vsel %vm5477_vm8, %v5467_v20, 2102212464  ;;  %v5484_v3 = vsel %vm5476_vm10, %v5467_v20, %v5483_v49  ;;  %v5486_v43 = vsel %vm5474_vm9, %v5464_v56, %v5467_v20 }
 0x2eb   :  { %v5487_v35 = vsel %vm5477_vm8, %v5473_v13, 1326507024  ;;  %v4588_v14 = vcvt.s32.f32 %v4581_v8  ;;  %v11612_v4 = vsub.s32 %v4670_v19, %v4673_v6  ;;  %v5478_v24 = vsel %vm5474_vm9, %v5458_v44, %v5461_v17 }
 0x2ec   :  { %v4586_v54 = vand.u32 2147483647, %v4585_v26  ;;  %v4696_v59 = vsub.s32 4, %v4672_v23  ;;  %v5485_v55 = vsel %vm5475_vm1, %v5482_v40, %v5484_v3  ;;  %v5488_v50 = vsel %vm5476_vm10, %v5470_v15, %v5487_v35  ;;  %v2022_v40 = vpop.f32.mrf.mxu0 }
 0x2ed   :  { %v5490_v46 = vshll.u32 %v5450_v0, 8  ;;  %v4676_v47 = vsub.s32 0, %v11612_v4  ;;  %v5480_v52 = vsel %vm5476_vm10, %v5464_v56, %v5479_v41  ;;  %v5489_v20 = vsel %vm5475_vm1, %v5486_v43, %v5488_v50  ;;  %v13800_v0 = vld [vmem:[#allocation20_spill] sm:$0xff] }
 0x2ee   :  { %v4589_v27 = vmul.f32 %v4588_v14, %v4586_v54  ;;  %v11632_v15 = vadd.f32 %v11283_v7, %v11475_v11  ;;  %v1910_v13 = vadd.f32 %v13800_v0, %v11479_v38  ;;  %v1912_v26 = vadd.f32 %v11274_v33, %v11567_v34  ;;  %v2121_v54 = vpop.f32.mrf.mxu1  ;;  %v13805_v0 = vld [vmem:[#allocation23_spill] sm:$0xff] }
 0x2ef   :  { %v11623_v19 = vmul.u32.u64.low %v5490_v46, %v5489_v20  ;;  %v11624_v8 = vmul.u32.u64.high %v5490_v46, %v5489_v20, %v11623_v19  ;;  %v11626_v17 = vmul.u32.u64.low %v5490_v46, %v5485_v55  ;;  %v11627_v57 = vmul.u32.u64.high %v5490_v46, %v5485_v55, %v11626_v17 }
 0x2f0   :  { %v4590_v49 = vxor.u32 2147483648, %v4589_v27  ;;  %v8023_v56 = vmin.u32 %v4676_v47, %v11612_v4  ;;  %vm11641_vm11 = vcmp.le.f32.partialorder %v4506_v2, 0.7853982  ;;  %vm4612_vm12 = vcmp.lt.s32.totalorder %v11376_v25, 0 }
 0x2f1   :  { %v5549_v7 = vand.u32 2139095040, %v11575_v10  ;;  %v4595_v38 = vsel %vm11641_vm11, 0, %v11579_v51  ;;  %v5481_v33 = vsel %vm5475_vm1, %v5478_v24, %v5480_v52  ;;  %v4697_v34 = vsel %vm4612_vm12, %v4696_v59, %v4672_v23 }
 0x2f2   :  { %v4591_v11 = vsel %vm4508_vm4, %v4590_v49, %v4589_v27  ;;  %v4678_v44 = vclz %v8023_v56  ;;  %vm5499_vm13 = vc.u32 %v11624_v8, %v11626_v17  ;;  %v13667_v41 = vand.u32 2147483647, %v11575_v10 }
 0x2f3   :  { %v4594_v2 = vsel %vm11641_vm11, %v11348_v5, %v4591_v11  ;;  %vm11664_vm15 = vcmp.le.f32.partialorder %v4610_v9, 0.7853982  ;;  %v5500_v3 = vadd.s32 1, %v11627_v57  ;;  %v4599_v43 = vadd.s32 3, %v4595_v38  ;;  %v2024_v38 = vpop.f32.mrf.mxu0 }
 0x2f4   :  { %8597 = vcosq.f32 %v4594_v2  ;;  %v8024_v48 = vadd.s32 4294967294, %v4678_v44  ;;  %v5497_v35 = vmul.u32 %v5490_v46, %v5481_v33  ;;  %v5550_v23 = vshrl.u32 %v5549_v7, 23 }
 0x2f5   :  { %8599 = vsinq.f32 %v4594_v2  ;;  %v4699_v14 = vsel %vm11664_vm15, 0, %v4697_v34  ;;  %v2023_v24 = vadd.f32 %v2022_v40, %v1910_v13  ;;  %v5501_v59 = vsel %vm5499_vm13, %v5500_v3, %v11627_v57  ;;  %v2123_v40 = vpop.f32.mrf.mxu1 }
 0x2f6   :  { %vm8025_vm0 = vcmp.lt.s32.totalorder %v8024_v48, 0  ;;  %v5502_v9 = vadd.s32 %v5501_v59, %v5497_v35  ;;  %v8058_v50 = vadd.s32 4294967169, %v5550_v23  ;;  %v5553_v27 = vand.u32 8388607, %v13667_v41 }
 0x2f7   :  { %v4681_v55 = vsel %vm8025_vm0, 0, %v8024_v48  ;;  %v4666_v47 = vadd.s32 %v11558_v36, %v11545_v37  ;;  %v11676_v20 = vadd.f32 %v2121_v54, %v2023_v24  ;;  %v4600_v19 = vand.u32 3, %v4599_v43 }
 0x2f8   :  { %v4682_v52 = vsub.s32 32, %v4681_v55  ;;  %v4686_v46 = vsub.s32 4294967266, %v4681_v55  ;;  %v7859_v49 = vrot.slane %v13805_v0, %v11179_v21  ;;  %v5503_v13 = vadd.s32 536870912, %v5502_v9 }
 0x2f9   :  { %v5556_v56 = vadd.s32 1, %v8058_v50  ;;  %v4683_v57 = vshll.u32 %v11612_v4, %v4681_v55  ;;  %v4703_v11 = vadd.s32 3, %v4699_v14  ;;  %v7863_v44 = vrot.slane %v13805_v0, %v11185_v45 }
 0x2fa   :  { %v4684_v6 = vshrl.u32 %v4666_v47, %v4682_v52  ;;  %v4687_v7 = vadd.s32 127, %v4686_v46  ;;  %v11683_v37 = vshrl.u32 %v5503_v13, 30  ;;  %v5554_v36 = vor.u32 8388608, %v5553_v27 }
 0x2fb   :  { %vm5557_vm6 = vcmp.gt.s32.totalorder %v5556_v56, 0  ;;  %v11687_v21 = vadd.f32 %v11343_v60, %v11676_v20  ;;  %vm4601_vm14 = vcmp.lt.s32.totalorder %v4600_v19, 2  ;;  %vm11689_vm2 = vcmp.eq.s32.totalorder %v7859_v49, 1 }
 0x2fc   :  { %v4685_v33 = vor.u32 %v4684_v6, %v4683_v57  ;;  %v4688_v2 = vshll.u32 %v4687_v7, 23  ;;  %v5558_v34 = vsel %vm5557_vm6, %v5556_v56, 0  ;;  %v5505_v48 = vshll.u32 %v11683_v37, 30 }
 0x2fd   :  { %v2025_v3 = vadd.f32 %v2024_v38, %v1912_v26  ;;  %v5560_v43 = vand.u32 31, %v5558_v34  ;;  %vm4598_vm3 = vweird.f32 %v11348_v5  ;;  %vm4602_vm4 = vcmp.eq.s32.totalorder %v4600_v19, 0 }
 0x2fe   :  { %vm4605_vm7 = vcmp.eq.s32.totalorder %v4600_v19, 2  ;;  %v4689_v35 = vor.u32 4788187, %v4688_v2  ;;  %v11695_v23 = vand.u32 3, %v4703_v11  ;;  %v5498_v54 = vadd.s32 %v11626_v17, %v11624_v8 }
 0x2ff   :  { %v11699_v14 = vsub.s32 %v5502_v9, %v5505_v48  ;;  %v5561_v24 = vsub.s32 32, %v5560_v43  ;;  %v11701_v59 = vadd.f32 %v2123_v40, %v2025_v3  ;;  %v4692_v50 = vcvt.s32.f32 %v4685_v33 }
 0x300   :  { %v4690_v55 = vand.u32 2147483647, %v4689_v35  ;;  %v11703_v27 = vshll.u32 %v5554_v36, 8  ;;  %v5528_v46 = vsub.s32 4, %v11683_v37  ;;  %v6381_v8 = vand.u32 2139095040, %v11687_v21 }
 0x301   :  { %v8598_v47 = vpop.eup %8597  ;;  %v5508_v52 = vsub.s32 0, %v11699_v14  ;;  %v5564_v49 = vshrl.u32 %v13689_v28, %v5561_v24  ;;  %v5567_v56 = vshrl.u32 %v13684_v32, %v5561_v24  ;;  %v5570_v57 = vshrl.u32 %v13685_v1, %v5561_v24 }
 0x302   :  { %v8600_v17 = vpop.eup %8599  ;;  %v4606_v9 = vxor.u32 2147483648, %v8598_v47  ;;  %v4693_v13 = vmul.f32 %v4692_v50, %v4690_v55  ;;  %v5563_v11 = vshll.u32 %v13693_v61, %v5560_v43  ;;  %v5566_v38 = vshll.u32 %v13689_v28, %v5560_v43 }
 0x303   :  { %v4603_v6 = vxor.u32 2147483648, %v8600_v17  ;;  %v8055_v7 = vmin.u32 %v5508_v52, %v11699_v14  ;;  %v5559_v2 = vshrl.u32 %v5558_v34, 5  ;;  %v5569_v40 = vshll.u32 %v13684_v32, %v5560_v43 }
 0x304   :  { %v4607_v36 = vsel %vm4605_vm7, %v4606_v9, %v8600_v17  ;;  %v4694_v33 = vxor.u32 2147483648, %v4693_v13  ;;  %v5565_v35 = vor.u32 %v5564_v49, %v5563_v11  ;;  %v5568_v55 = vor.u32 %v5567_v56, %v5566_v38 }
 0x305   :  { %v4604_v48 = vsel %vm4602_vm4, %v8598_v47, %v4603_v6  ;;  %v5510_v3 = vclz %v8055_v7  ;;  %v5571_v41 = vor.u32 %v5570_v57, %v5569_v40  ;;  %v5572_v26 = vshll.u32 %v13685_v1, %v5560_v43 }
 0x306   :  { %v4608_v50 = vsel %vm4601_vm14, %v4604_v48, %v4607_v36  ;;  %v4695_v52 = vsel %vm4612_vm12, %v4694_v33, %v4693_v13  ;;  %v5573_v47 = vshrl.u32 %v13791_v16, %v5561_v24  ;;  %vm5444_vm5 = vcmp.lt.s32.totalorder %v11405_v31, 0 }
 0x307   :  { %v4609_v17 = vsel %vm4598_vm3, nan, %v4608_v50  ;;  %v4698_v34 = vsel %vm11664_vm15, %v11376_v25, %v4695_v52  ;;  %v8056_v9 = vadd.s32 4294967294, %v5510_v3  ;;  %v5575_v49 = vshll.u32 %v13791_v16, %v5560_v43 }
 0x308   :  { %v7889_v19 = vsel %vm11689_vm2, %v11337_v22, %v4609_v17  ;;  %8601 = vcosq.f32 %v4698_v34  ;;  %v5576_v13 = vshrl.u32 %v13792_v53, %v5561_v24  ;;  %v5574_v5 = vor.u32 %v5573_v47, %v5572_v26 }
 0x309   :  { %7928 = vst [vmem:[#allocation5 + $0x20] sm:$0xff] %v7889_v19  ;;  %8603 = vsinq.f32 %v4698_v34  ;;  %vm8057_vm8 = vcmp.lt.s32.totalorder %v8056_v9, 0  ;;  %v6382_v51 = vshrl.u32 %v6381_v8, 23  ;;  %v5562_v57 = vshrl.u32 %v13693_v61, %v5561_v24 }
 0x30a   :  { %v5513_v56 = vsel %vm8057_vm8, 0, %v8056_v9  ;;  %v5577_v6 = vor.u32 %v5576_v13, %v5575_v49  ;;  %vm5578_vm9 = vcmp.lt.s32.totalorder %v5559_v2, 1  ;;  %vm5579_vm1 = vcmp.lt.s32.totalorder %v5559_v2, 2 }
 0x30b   :  { %v5514_v7 = vsub.s32 32, %v5513_v56  ;;  %v5518_v11 = vsub.s32 4294967266, %v5513_v56  ;;  %vm5581_vm10 = vcmp.lt.s32.totalorder %v5559_v2, 4  ;;  %vm5580_vm11 = vcmp.lt.s32.totalorder %v5559_v2, 3 }
 0x30c   :  { %v5583_v22 = vsel %vm5581_vm10, %v5571_v41, 2102212464  ;;  %v5586_v38 = vsel %vm5578_vm9, %v5565_v35, %v5568_v55  ;;  %v5587_v43 = vsel %vm5581_vm10, %v5574_v5, 920167782  ;;  %v5515_v36 = vshll.u32 %v11699_v14, %v5513_v56 }
 0x30d   :  { %v5516_v33 = vshrl.u32 %v5498_v54, %v5514_v7  ;;  %v5519_v40 = vadd.s32 127, %v5518_v11  ;;  %v5588_v48 = vsel %vm5580_vm11, %v5571_v41, %v5587_v43  ;;  %v5582_v26 = vsel %vm5578_vm9, %v5562_v57, %v5565_v35 }
 0x30e   :  { %v5589_v8 = vsel %vm5579_vm1, %v5586_v38, %v5588_v48  ;;  %v5590_v3 = vsel %vm5578_vm9, %v5568_v55, %v5571_v41  ;;  %v5591_v24 = vsel %vm5581_vm10, %v5577_v6, 1326507024  ;;  %v5584_v17 = vsel %vm5580_vm11, %v5568_v55, %v5583_v22 }
 0x30f   :  { %v5517_v50 = vor.u32 %v5516_v33, %v5515_v36  ;;  %v5520_v52 = vshll.u32 %v5519_v40, 23  ;;  %v5592_v34 = vsel %vm5580_vm11, %v5574_v5, %v5591_v24  ;;  %v8090_v14 = vadd.s32 4294967169, %v6382_v51 }
 0x310   :  { %v5593_v9 = vsel %vm5579_vm1, %v5590_v3, %v5592_v34  ;;  %v11739_v47 = vmul.u32.u64.low %v11703_v27, %v5589_v8  ;;  %v11740_v19 = vmul.u32.u64.high %v11703_v27, %v5589_v8, %v11739_v47  ;;  %vm11746_vm12 = vcmp.eq.s32.totalorder %v7863_v44, 1 }
 0x311   :  { %v5521_v41 = vor.u32 4788187, %v5520_v52  ;;  %v5529_v35 = vsel %vm5444_vm5, %v5528_v46, %v11683_v37  ;;  %v11756_v55 = vmul.u32.u64.low %v11703_v27, %v5593_v9  ;;  %v11757_v49 = vmul.u32.u64.high %v11703_v27, %v5593_v9, %v11756_v55 }
 0x312   :  { %vm4702_vm13 = vweird.f32 %v11376_v25  ;;  %vm4705_vm15 = vcmp.lt.s32.totalorder %v11695_v23, 2  ;;  %vm11763_vm0 = vcmp.le.f32.partialorder %v5442_v18, 0.7853982  ;;  %v5585_v44 = vsel %vm5579_vm1, %v5582_v26, %v5584_v17 }
 0x313   :  { %v6388_v13 = vadd.s32 1, %v8090_v14  ;;  %vm4706_vm6 = vcmp.eq.s32.totalorder %v11695_v23, 0  ;;  %v5522_v37 = vand.u32 2147483647, %v5521_v41  ;;  %v5524_v46 = vcvt.s32.f32 %v5517_v50 }
 0x314   :  { %v11771_v5 = vadd.f32 %v11359_v29, %v11701_v59  ;;  %v5531_v51 = vsel %vm11763_vm0, 0, %v5529_v35  ;;  %v5604_v56 = vadd.s32 1, %v11740_v19  ;;  %v13812_v18 = vand.u32 2147483647, %v11687_v21 }
 0x315   :  { %vm6389_vm14 = vcmp.gt.s32.totalorder %v6388_v13, 0  ;;  %v8602_v2 = vpop.eup %8601  ;;  %v5525_v6 = vmul.f32 %v5524_v46, %v5522_v37  ;;  %v5601_v7 = vmul.u32 %v11703_v27, %v5585_v44  ;;  %vm5603_vm3 = vc.u32 %v11757_v49, %v11739_v47 }
 0x316   :  { %v6385_v57 = vand.u32 8388607, %v13812_v18  ;;  %v6390_v11 = vsel %vm6389_vm14, %v6388_v13, 0  ;;  %v8604_v22 = vpop.eup %8603  ;;  %vm4709_vm4 = vcmp.eq.s32.totalorder %v11695_v23, 2  ;;  %v4710_v38 = vxor.u32 2147483648, %v8602_v2 }
 0x317   :  { %v5605_v43 = vsel %vm5603_vm3, %v5604_v56, %v11740_v19  ;;  %v6392_v36 = vand.u32 31, %v6390_v11  ;;  %v4707_v33 = vxor.u32 2147483648, %v8604_v22  ;;  %v5526_v40 = vxor.u32 2147483648, %v5525_v6 }
 0x318   :  { %v5535_v48 = vadd.s32 3, %v5531_v51  ;;  %v5606_v26 = vadd.s32 %v5605_v43, %v5601_v7  ;;  %v4711_v8 = vsel %vm4709_vm4, %v4710_v38, %v8604_v22  ;;  %v6386_v3 = vor.u32 8388608, %v6385_v57 }
 0x319   :  { %v6393_v24 = vsub.s32 32, %v6392_v36  ;;  %v6485_v27 = vand.u32 2139095040, %v11771_v5  ;;  %v4708_v50 = vsel %vm4706_vm6, %v8602_v2, %v4707_v33  ;;  %v5527_v52 = vsel %vm5444_vm5, %v5526_v40, %v5525_v6 }
 0x31a   :  { %v5607_v17 = vadd.s32 536870912, %v5606_v26  ;;  %v6395_v34 = vshll.u32 %v13693_v61, %v6392_v36  ;;  %v4712_v9 = vsel %vm4705_vm15, %v4708_v50, %v4711_v8  ;;  %v5530_v19 = vsel %vm11763_vm0, %v11405_v31, %v5527_v52 }
 0x31b   :  { %v6396_v14 = vshrl.u32 %v13689_v28, %v6393_v24  ;;  %v6398_v41 = vshll.u32 %v13689_v28, %v6392_v36  ;;  %v4713_v35 = vsel %vm4702_vm13, nan, %v4712_v9  ;;  %8605 = vcosq.f32 %v5530_v19 }
 0x31c   :  { %v11798_v55 = vshrl.u32 %v5607_v17, 30  ;;  %v6399_v44 = vshrl.u32 %v13684_v32, %v6393_v24  ;;  %v7890_v23 = vsel %vm11746_vm12, %v11356_v63, %v4713_v35  ;;  %8607 = vsinq.f32 %v5530_v19  ;;  %v13813_v63 = vld [vmem:[#allocation18_spill] sm:$0xff] }
 0x31d   :  { %v6391_v13 = vshrl.u32 %v6390_v11, 5  ;;  %v6402_v45 = vshrl.u32 %v13685_v1, %v6393_v24  ;;  %7929 = vst [vmem:[#allocation5 + $0x28] sm:$0xff] %v7890_v23  ;;  %v6397_v46 = vor.u32 %v6396_v14, %v6395_v34  ;;  %v6401_v25 = vshll.u32 %v13684_v32, %v6392_v36 }
 0x31e   :  { %v5609_v37 = vshll.u32 %v11798_v55, 30  ;;  %v6400_v51 = vor.u32 %v6399_v44, %v6398_v41  ;;  %v6404_v56 = vshll.u32 %v13685_v1, %v6392_v36  ;;  %v6405_v18 = vshrl.u32 %v13791_v16, %v6393_v24 }
 0x31f   :  { %v6407_v57 = vshll.u32 %v13791_v16, %v6392_v36  ;;  %v6408_v2 = vshrl.u32 %v13792_v53, %v6393_v24  ;;  %v11813_v6 = vadd.f32 %v13813_v63, %v11262_v62  ;;  %v11817_v7 = vadd.f32 %v11295_v30, %v11632_v15 }
 0x320   :  { %v11819_v11 = vsub.s32 %v5606_v26, %v5609_v37  ;;  %v6403_v22 = vor.u32 %v6402_v45, %v6401_v25  ;;  %v5536_v38 = vand.u32 3, %v5535_v48  ;;  %v6406_v43 = vor.u32 %v6405_v18, %v6404_v56 }
 0x321   :  { %v6409_v33 = vor.u32 %v6408_v2, %v6407_v57  ;;  %v6486_v40 = vshrl.u32 %v6485_v27, 23  ;;  %vm6410_vm7 = vcmp.lt.s32.totalorder %v6391_v13, 1  ;;  %vm6413_vm5 = vcmp.lt.s32.totalorder %v6391_v13, 4 }
 0x322   :  { %v5612_v8 = vsub.s32 0, %v11819_v11  ;;  %v6426_v36 = vshll.u32 %v6386_v3, 8  ;;  %v6394_v50 = vshrl.u32 %v13693_v61, %v6393_v24  ;;  %vm6412_vm8 = vcmp.lt.s32.totalorder %v6391_v13, 3 }
 0x323   :  { %v6418_v62 = vsel %vm6410_vm7, %v6397_v46, %v6400_v51  ;;  %v6419_v52 = vsel %vm6413_vm5, %v6406_v43, 920167782  ;;  %vm6411_vm9 = vcmp.lt.s32.totalorder %v6391_v13, 2  ;;  %v6415_v15 = vsel %vm6413_vm5, %v6403_v22, 2102212464 }
 0x324   :  { %v8059_v30 = vmin.u32 %v5612_v8, %v11819_v11  ;;  %v6420_v48 = vsel %vm6412_vm8, %v6403_v22, %v6419_v52  ;;  %v6422_v27 = vsel %vm6410_vm7, %v6400_v51, %v6403_v22  ;;  %v6423_v17 = vsel %vm6413_vm5, %v6409_v33, 1326507024 }
 0x325   :  { %v6421_v26 = vsel %vm6411_vm9, %v6418_v62, %v6420_v48  ;;  %v8094_v34 = vadd.s32 4294967169, %v6486_v40  ;;  %vm5534_vm1 = vweird.f32 %v11405_v31  ;;  %vm5537_vm10 = vcmp.lt.s32.totalorder %v5536_v38, 2 }
 0x326   :  { %vm5538_vm11 = vcmp.eq.s32.totalorder %v5536_v38, 0  ;;  %vm5548_vm13 = vcmp.lt.s32.totalorder %v11575_v10, 0  ;;  %v5614_v3 = vclz %v8059_v30  ;;  %v6414_v24 = vsel %vm6410_vm7, %v6394_v50, %v6397_v46 }
 0x327   :  { %v6416_v9 = vsel %vm6412_vm8, %v6400_v51, %v6415_v15  ;;  %v6424_v19 = vsel %vm6412_vm8, %v6406_v43, %v6423_v17  ;;  %v11833_v14 = vmul.u32.u64.low %v6426_v36, %v6421_v26  ;;  %v11834_v41 = vmul.u32.u64.high %v6426_v36, %v6421_v26, %v11833_v14  ;;  %v2029_v15 = vpop.f32.mrf.mxu0 }
 0x328   :  { %vm5541_vm15 = vcmp.eq.s32.totalorder %v5536_v38, 2  ;;  %v8060_v35 = vadd.s32 4294967294, %v5614_v3  ;;  %v6425_v44 = vsel %vm6411_vm9, %v6422_v27, %v6424_v19  ;;  %v6492_v23 = vadd.s32 1, %v8094_v34  ;;  %v8606_v45 = vpop.eup %8605 }
 0x329   :  { %v5602_v37 = vadd.s32 %v11739_v47, %v11757_v49  ;;  %v11840_v25 = vmul.u32.u64.low %v6426_v36, %v6425_v44  ;;  %v11841_v56 = vmul.u32.u64.high %v6426_v36, %v6425_v44, %v11840_v25  ;;  %v6482_v46 = vand.u32 2147483647, %v11771_v5  ;;  %v8608_v51 = vpop.eup %8607 }
 0x32a   :  { %v5542_v18 = vxor.u32 2147483648, %v8606_v45  ;;  %vm8061_vm0 = vcmp.lt.s32.totalorder %v8060_v35, 0  ;;  %v6417_v57 = vsel %vm6411_vm9, %v6414_v24, %v6416_v9  ;;  %vm6493_vm6 = vcmp.gt.s32.totalorder %v6492_v23, 0 }
 0x32b   :  { %v5539_v2 = vxor.u32 2147483648, %v8608_v51  ;;  %v5617_v63 = vsel %vm8061_vm0, 0, %v8060_v35  ;;  %v5632_v22 = vsub.s32 4, %v11798_v55  ;;  %v6436_v43 = vadd.s32 1, %v11834_v41 }
 0x32c   :  { %v5543_v33 = vsel %vm5541_vm15, %v5542_v18, %v8608_v51  ;;  %v5618_v47 = vsub.s32 32, %v5617_v63  ;;  %v5622_v49 = vsub.s32 4294967266, %v5617_v63  ;;  %v6494_v40 = vsel %vm6493_vm6, %v6492_v23, 0 }
 0x32d   :  { %v5540_v8 = vsel %vm5538_vm11, %v8606_v45, %v5539_v2  ;;  %v5619_v50 = vshll.u32 %v11819_v11, %v5617_v63  ;;  %v6433_v62 = vmul.u32 %v6426_v36, %v6417_v57  ;;  %vm6435_vm14 = vc.u32 %v11841_v56, %v11833_v14  ;;  %v13814_v36 = vld [vmem:[#allocation14_spill] sm:$0xff] }
 0x32e   :  { %v5544_v13 = vsel %vm5537_vm10, %v5540_v8, %v5543_v33  ;;  %v5620_v52 = vshrl.u32 %v5602_v37, %v5618_v47  ;;  %v5623_v30 = vadd.s32 127, %v5622_v49  ;;  %v6437_v48 = vsel %vm6435_vm14, %v6436_v43, %v11834_v41  ;;  %v2128_v33 = vpop.f32.mrf.mxu1 }
 0x32f   :  { %v5545_v26 = vsel %vm5534_vm1, nan, %v5544_v13  ;;  %v5633_v27 = vsel %vm5548_vm13, %v5632_v22, %v11798_v55  ;;  %v6438_v17 = vadd.s32 %v6437_v48, %v6433_v62  ;;  %v6496_v11 = vand.u32 31, %v6494_v40  ;;  %v11894_v62 = vpop.f32.mrf.mxu0 }
 0x330   :  { %v11861_v34 = vadd.f32 %v13814_v36, %v11813_v6  ;;  %v7898_v38 = vsel %vm11689_vm2, %v11378_v58, %v5545_v26  ;;  %v5621_v3 = vor.u32 %v5620_v52, %v5619_v50  ;;  %v5624_v24 = vshll.u32 %v5623_v30, 23 }
 0x331   :  { %7938 = vst [vmem:[#allocation5 + $0x68] sm:$0xff] %v7898_v38  ;;  %v13815_v31 = vand.u32 2147483647, %v11575_v10  ;;  %v2030_v55 = vadd.f32 %v2029_v15, %v11817_v7  ;;  %v6439_v19 = vadd.s32 536870912, %v6438_v17  ;;  %v6497_v41 = vsub.s32 32, %v6496_v11 }
 0x332   :  { %v5625_v35 = vor.u32 4788187, %v5624_v24  ;;  %v6489_v58 = vand.u32 8388607, %v6482_v46  ;;  %v11877_v44 = vshrl.u32 %v6494_v40, 5  ;;  %v5628_v23 = vcvt.s32.f32 %v5621_v3 }
 0x333   :  { %vm11868_vm3 = vcmp.le.f32.partialorder %v13815_v31, 0.7853982  ;;  %v11879_v45 = vshrl.u32 %v6439_v19, 30  ;;  %v6500_v37 = vshrl.u32 %v13689_v28, %v6497_v41  ;;  %v6503_v25 = vshrl.u32 %v13684_v32, %v6497_v41 }
 0x334   :  { %v5635_v6 = vsel %vm11868_vm3, 0, %v5633_v27  ;;  %v5626_v51 = vand.u32 2147483647, %v5625_v35  ;;  %v6506_v7 = vshrl.u32 %v13685_v1, %v6497_v41  ;;  %v6508_v18 = vshll.u32 %v13685_v1, %v6496_v11 }
 0x335   :  { %v6509_v57 = vshrl.u32 %v13791_v16, %v6497_v41  ;;  %v6441_v2 = vshll.u32 %v11879_v45, 30  ;;  %v6499_v63 = vshll.u32 %v13693_v61, %v6496_v11  ;;  %v6502_v22 = vshll.u32 %v13689_v28, %v6496_v11 }
 0x336   :  { %v6505_v43 = vshll.u32 %v13684_v32, %v6496_v11  ;;  %v5629_v47 = vmul.f32 %v5628_v23, %v5626_v51  ;;  %v6511_v40 = vshll.u32 %v13791_v16, %v6496_v11  ;;  %v6512_v8 = vshrl.u32 %v13792_v53, %v6497_v41  ;;  %v11901_v11 = vpop.f32.mrf.mxu1 }
 0x337   :  { %v6510_v49 = vor.u32 %v6509_v57, %v6508_v18  ;;  %v11892_v50 = vsub.s32 %v6438_v17, %v6441_v2  ;;  %v6501_v13 = vor.u32 %v6500_v37, %v6499_v63  ;;  %v6504_v52 = vor.u32 %v6503_v25, %v6502_v22 }
 0x338   :  { %v6507_v30 = vor.u32 %v6506_v7, %v6505_v43  ;;  %v5630_v15 = vxor.u32 2147483648, %v5629_v47  ;;  %v5639_v48 = vadd.s32 3, %v5635_v6  ;;  %v6513_v26 = vor.u32 %v6512_v8, %v6511_v40  ;;  %v11913_v6 = vpop.f32.mrf.mxu0  ;;  %v11920_v25 = vpop.f32.mrf.mxu1 }
 0x339   :  { %v11896_v27 = vadd.f32 %v2128_v33, %v2030_v55  ;;  %v6444_v36 = vsub.s32 0, %v11892_v50  ;;  %v6490_v38 = vor.u32 8388608, %v6489_v58  ;;  %vm6514_vm4 = vcmp.lt.s32.totalorder %v11877_v44, 1 }
 0x33a   :  { %vm6517_vm7 = vcmp.lt.s32.totalorder %v11877_v44, 4  ;;  %v5631_v17 = vsel %vm5548_vm13, %v5630_v15, %v5629_v47  ;;  %v6498_v3 = vshrl.u32 %v13693_v61, %v6497_v41  ;;  %vm6516_vm5 = vcmp.lt.s32.totalorder %v11877_v44, 3  ;;  %v11936_v33 = vpop.f32.mrf.mxu0 }
 0x33b   :  { %v6523_v24 = vsel %vm6517_vm7, %v6510_v49, 920167782  ;;  %v5634_v31 = vsel %vm11868_vm3, %v11575_v10, %v5631_v17  ;;  %v8091_v55 = vmin.u32 %v6444_v36, %v11892_v50  ;;  %v6519_v19 = vsel %vm6517_vm7, %v6507_v30, 2102212464 }
 0x33c   :  { %v6522_v35 = vsel %vm6514_vm4, %v6501_v13, %v6504_v52  ;;  %8609 = vcosq.f32 %v5634_v31  ;;  %v6524_v58 = vsel %vm6516_vm5, %v6507_v30, %v6523_v24  ;;  %v6526_v41 = vsel %vm6514_vm4, %v6504_v52, %v6507_v30  ;;  %v11950_v30 = vpop.f32.mrf.mxu1 }
 0x33d   :  { %v6527_v23 = vsel %vm6517_vm7, %v6513_v26, 1326507024  ;;  %8611 = vsinq.f32 %v5634_v31  ;;  %v6446_v37 = vclz %v8091_v55  ;;  %vm6515_vm8 = vcmp.lt.s32.totalorder %v11877_v44, 2 }
 0x33e   :  { %v6530_v9 = vshll.u32 %v6490_v38, 8  ;;  %v6518_v51 = vsel %vm6514_vm4, %v6498_v3, %v6501_v13  ;;  %v6520_v7 = vsel %vm6516_vm5, %v6504_v52, %v6519_v19  ;;  %v6525_v18 = vsel %vm6515_vm8, %v6522_v35, %v6524_v58 }
 0x33f   :  { %v6528_v57 = vsel %vm6516_vm5, %v6510_v49, %v6527_v23  ;;  %v8092_v2 = vadd.s32 4294967294, %v6446_v37  ;;  %v6464_v47 = vsub.s32 4, %v11879_v45  ;;  %v11944_v13 = vadd.f32 %v11343_v60, %v11896_v27 }
 0x340   :  { %v6529_v63 = vsel %vm6515_vm8, %v6526_v41, %v6528_v57  ;;  %v11932_v22 = vmul.u32.u64.low %v6530_v9, %v6525_v18  ;;  %v11933_v43 = vmul.u32.u64.high %v6530_v9, %v6525_v18, %v11932_v22  ;;  %v1814_v49 = vadd.f32 %v11304_v39, %v11861_v34  ;;  %v11957_v39 = vpop.f32.mrf.mxu0 }
 0x341   :  { %v11939_v40 = vmul.u32.u64.low %v6530_v9, %v6529_v63  ;;  %v11940_v8 = vmul.u32.u64.high %v6530_v9, %v6529_v63, %v11939_v40  ;;  %vm8093_vm9 = vcmp.lt.s32.totalorder %v8092_v2, 0  ;;  %v6521_v52 = vsel %vm6515_vm8, %v6518_v51, %v6520_v7 }
 0x342   :  { %v5640_v15 = vand.u32 3, %v5639_v48  ;;  %vm6380_vm1 = vcmp.lt.s32.totalorder %v11687_v21, 0  ;;  %v6449_v26 = vsel %vm8093_vm9, 0, %v8092_v2  ;;  %v7317_v36 = vand.u32 2139095040, %v11944_v13 }
 0x343   :  { %v6434_v38 = vadd.s32 %v11833_v14, %v11841_v56  ;;  %v6450_v60 = vsub.s32 32, %v6449_v26  ;;  %v6454_v17 = vsub.s32 4294967266, %v6449_v26  ;;  %v6540_v3 = vadd.s32 1, %v11933_v43  ;;  %v11966_v56 = vpop.f32.mrf.mxu1 }
 0x344   :  { %v6465_v34 = vsel %vm6380_vm1, %v6464_v47, %v11879_v45  ;;  %v6537_v44 = vmul.u32 %v6530_v9, %v6521_v52  ;;  %vm6539_vm10 = vc.u32 %v11940_v8, %v11932_v22  ;;  %v7318_v48 = vshrl.u32 %v7317_v36, 23  ;;  %v11977_v9 = vpop.f32.mrf.mxu0 }
 0x345   :  { %v6451_v24 = vshll.u32 %v11892_v50, %v6449_v26  ;;  %v6452_v31 = vshrl.u32 %v6434_v38, %v6450_v60  ;;  %v6455_v55 = vadd.s32 127, %v6454_v17  ;;  %v6541_v14 = vsel %vm6539_vm10, %v6540_v3, %v11933_v43  ;;  %v11981_v43 = vpop.f32.mrf.mxu1 }
 0x346   :  { %v13818_v19 = vand.u32 2147483647, %v11687_v21  ;;  %v6542_v45 = vadd.s32 %v6541_v14, %v6537_v44  ;;  %v8126_v58 = vadd.s32 4294967169, %v7318_v48  ;;  %v1921_v41 = vadd.f32 %v11310_v12, %v1814_v49  ;;  %v11985_v60 = vpop.f32.mrf.mxu0 }
 0x347   :  { %v6453_v23 = vor.u32 %v6452_v31, %v6451_v24  ;;  %v6456_v37 = vshll.u32 %v6455_v55, 23  ;;  %v13668_v7 = vand.u32 2147483647, %v11944_v13  ;;  %vm5641_vm13 = vcmp.lt.s32.totalorder %v5640_v15, 2  ;;  %v11993_v31 = vpop.f32.mrf.mxu1 }
 0x348   :  { %vm11970_vm11 = vcmp.le.f32.partialorder %v13818_v19, 0.7853982  ;;  %v6543_v51 = vadd.s32 536870912, %v6542_v45  ;;  %v7324_v18 = vadd.s32 1, %v8126_v58  ;;  %vm5645_vm15 = vcmp.eq.s32.totalorder %v5640_v15, 2  ;;  %v13822_v19 = vld [vmem:[#allocation21_spill] sm:$0xff] }
 0x349   :  { %v6467_v50 = vsel %vm11970_vm11, 0, %v6465_v34  ;;  %v8610_v57 = vpop.eup %8609  ;;  %v6457_v2 = vor.u32 4788187, %v6456_v37  ;;  %v2032_v63 = vadd.f32 %v11894_v62, %v1921_v41  ;;  %v6460_v36 = vcvt.s32.f32 %v6453_v23 }
 0x34a   :  { %v8612_v12 = vpop.eup %8611  ;;  %v5646_v47 = vxor.u32 2147483648, %v8610_v57  ;;  %v6471_v40 = vadd.s32 3, %v6467_v50  ;;  %v11983_v49 = vshrl.u32 %v6543_v51, 30  ;;  %vm7325_vm0 = vcmp.gt.s32.totalorder %v7324_v18, 0  ;;  %v12004_v51 = vpop.f32.mrf.mxu0 }
 0x34b   :  { %v5643_v52 = vxor.u32 2147483648, %v8612_v12  ;;  %v6458_v26 = vand.u32 2147483647, %v6457_v2  ;;  %v7326_v38 = vsel %vm7325_vm0, %v7324_v18, 0  ;;  %vm5642_vm6 = vcmp.eq.s32.totalorder %v5640_v15, 0 }
 0x34c   :  { %v5647_v17 = vsel %vm5645_vm15, %v5646_v47, %v8612_v12  ;;  %v6545_v3 = vshll.u32 %v11983_v49, 30  ;;  %v7321_v62 = vand.u32 8388607, %v13668_v7  ;;  %v7328_v48 = vand.u32 31, %v7326_v38  ;;  %v12021_v12 = vpop.f32.mrf.mxu1 }
 0x34d   :  { %v5644_v34 = vsel %vm5642_vm6, %v8610_v57, %v5643_v52  ;;  %v6461_v44 = vmul.f32 %v6460_v36, %v6458_v26  ;;  %v11991_v24 = vadd.f32 %v11901_v11, %v2032_v63  ;;  %vm5638_vm14 = vweird.f32 %v11575_v10  ;;  %13823 = vst [vmem:[#allocation26_spill] sm:$0xff] %v12021_v12  ;;  %v12032_v26 = vpop.f32.mrf.mxu0 }
 0x34e   :  { %v5648_v55 = vsel %vm5641_vm13, %v5644_v34, %v5647_v17  ;;  %v11997_v14 = vsub.s32 %v6542_v45, %v6545_v3  ;;  %v12000_v58 = vsub.s32 6, %v13822_v19  ;;  %v12002_v37 = vand.u32 3, %v6471_v40 }
 0x34f   :  { %13821 = vst [vmem:[#allocation24_spill] sm:$0xff] %v11991_v24  ;;  %v5649_v41 = vsel %vm5638_vm14, nan, %v5648_v55  ;;  %v6462_v23 = vxor.u32 2147483648, %v6461_v44  ;;  %v7329_v50 = vsub.s32 32, %v7328_v48  ;;  %v6538_v10 = vadd.s32 %v11932_v22, %v11940_v8 }
 0x350   :  { %v7899_v11 = vsel %vm11746_vm12, %v11548_v42, %v5649_v41  ;;  %v6548_v15 = vsub.s32 0, %v11997_v14  ;;  %v7322_v45 = vor.u32 8388608, %v7321_v62  ;;  %v12014_v57 = vshrl.u32 %v7326_v38, 5 }
 0x351   :  { %7939 = vst [vmem:[#allocation5 + $0x70] sm:$0xff] %v7899_v11  ;;  %v6463_v18 = vsel %vm6380_vm1, %v6462_v23, %v6461_v44  ;;  %v7332_v2 = vshrl.u32 %v13689_v28, %v7329_v50  ;;  %v12019_v63 = vadd.f32 %v11359_v29, %v11991_v24  ;;  %v7331_v8 = vshll.u32 %v13693_v61, %v7328_v48  ;;  %v12038_v44 = vpop.f32.mrf.mxu1 }
 0x352   :  { %v6466_v42 = vsel %vm11970_vm11, %v11687_v21, %v6463_v18  ;;  %v8095_v22 = vmin.u32 %v6548_v15, %v11997_v14  ;;  %v7335_v47 = vshrl.u32 %v13684_v32, %v7329_v50  ;;  %v7334_v40 = vshll.u32 %v13689_v28, %v7328_v48  ;;  %13824 = vst [vmem:[#allocation34_spill] sm:$0xff] %v12038_v44  ;;  %v12047_v18 = vpop.f32.mrf.mxu0 }
 0x353   :  { %8613 = vcosq.f32 %v6466_v42  ;;  %v7337_v52 = vshll.u32 %v13684_v32, %v7328_v48  ;;  %v7338_v29 = vshrl.u32 %v13685_v1, %v7329_v50  ;;  %v6568_v35 = vsub.s32 4, %v11983_v49  ;;  %13825 = vst [vmem:[#allocation25_spill] sm:$0xff] %v12047_v18 }
 0x354   :  { %8615 = vsinq.f32 %v6466_v42  ;;  %v6550_v36 = vclz %v8095_v22  ;;  %v12035_v38 = vshll.u32 %v7322_v45, 8  ;;  %v7333_v17 = vor.u32 %v7332_v2, %v7331_v8  ;;  %v12054_v8 = vpop.f32.mrf.mxu1 }
 0x355   :  { %v7336_v3 = vor.u32 %v7335_v47, %v7334_v40  ;;  %v7339_v62 = vor.u32 %v7338_v29, %v7337_v52  ;;  %v7340_v34 = vshll.u32 %v13685_v1, %v7328_v48  ;;  %v7341_v41 = vshrl.u32 %v13791_v16, %v7329_v50  ;;  %13826 = vst [vmem:[#allocation27_spill] sm:$0xff] %v12054_v8 }
 0x356   :  { %v8096_v55 = vadd.s32 4294967294, %v6550_v36  ;;  %v7343_v23 = vshll.u32 %v13791_v16, %v7328_v48  ;;  %v7344_v11 = vshrl.u32 %v13792_v53, %v7329_v50  ;;  %v7330_v15 = vshrl.u32 %v13693_v61, %v7329_v50 }
 0x357   :  { %vm7346_vm3 = vcmp.lt.s32.totalorder %v12014_v57, 1  ;;  %vm7347_vm4 = vcmp.lt.s32.totalorder %v12014_v57, 2  ;;  %v7421_v45 = vand.u32 2139095040, %v12019_v63  ;;  %vm6484_vm7 = vcmp.lt.s32.totalorder %v11771_v5, 0 }
 0x358   :  { %vm8097_vm5 = vcmp.lt.s32.totalorder %v8096_v55, 0  ;;  %v7342_v2 = vor.u32 %v7341_v41, %v7340_v34  ;;  %v7345_v42 = vor.u32 %v7344_v11, %v7343_v23  ;;  %vm7349_vm8 = vcmp.lt.s32.totalorder %v12014_v57, 4  ;;  %v12061_v23 = vpop.f32.mrf.mxu0 }
 0x359   :  { %v6553_v48 = vsel %vm8097_vm5, 0, %v8096_v55  ;;  %vm7348_vm9 = vcmp.lt.s32.totalorder %v12014_v57, 3  ;;  %v7350_v50 = vsel %vm7346_vm3, %v7330_v15, %v7333_v17  ;;  %v7351_v22 = vsel %vm7349_vm8, %v7339_v62, 2102212464 }
 0x35a   :  { %v6554_v47 = vsub.s32 32, %v6553_v48  ;;  %v6558_v40 = vsub.s32 4294967266, %v6553_v48  ;;  %v7354_v52 = vsel %vm7346_vm3, %v7333_v17, %v7336_v3  ;;  %v7358_v29 = vsel %vm7346_vm3, %v7336_v3, %v7339_v62 }
 0x35b   :  { %v6555_v36 = vshll.u32 %v11997_v14, %v6553_v48  ;;  %v7355_v34 = vsel %vm7349_vm8, %v7342_v2, 920167782  ;;  %v7359_v55 = vsel %vm7349_vm8, %v7345_v42, 1326507024  ;;  %v7422_v41 = vshrl.u32 %v7421_v45, 23 }
 0x35c   :  { %vm12065_vm1 = vcmp.le.f32.partialorder %v6482_v46, 0.7853982  ;;  %v6556_v15 = vshrl.u32 %v6538_v10, %v6554_v47  ;;  %v6559_v7 = vadd.s32 127, %v6558_v40  ;;  %v7356_v17 = vsel %vm7348_vm9, %v7339_v62, %v7355_v34  ;;  %v12080_v10 = vpop.f32.mrf.mxu1 }
 0x35d   :  { %v7360_v0 = vsel %vm7348_vm9, %v7342_v2, %v7359_v55  ;;  %vm6470_vm10 = vweird.f32 %v11687_v21  ;;  %v7352_v14 = vsel %vm7348_vm9, %v7336_v3, %v7351_v22  ;;  %v7357_v45 = vsel %vm7347_vm4, %v7354_v52, %v7356_v17  ;;  %v12092_v52 = vpop.f32.mrf.mxu0 }
 0x35e   :  { %v7361_v46 = vsel %vm7347_vm4, %v7358_v29, %v7360_v0  ;;  %v8130_v42 = vadd.s32 4294967169, %v7422_v41  ;;  %v6557_v48 = vor.u32 %v6556_v15, %v6555_v36  ;;  %v6560_v47 = vshll.u32 %v6559_v7, 23  ;;  %v12104_v15 = vpop.f32.mrf.mxu1 }
 0x35f   :  { %v12083_v62 = vmul.u32.u64.low %v12035_v38, %v7361_v46  ;;  %v12084_v40 = vmul.u32.u64.high %v12035_v38, %v7361_v46, %v12083_v62  ;;  %v12087_v2 = vmul.u32.u64.low %v12035_v38, %v7357_v45  ;;  %v12088_v34 = vmul.u32.u64.high %v12035_v38, %v7357_v45, %v12087_v2 }
 0x360   :  { %v13670_v3 = vand.u32 2147483647, %v12019_v63  ;;  %v7428_v22 = vadd.s32 1, %v8130_v42  ;;  %v8614_v0 = vpop.eup %8613  ;;  %vm6473_vm11 = vcmp.lt.s32.totalorder %v12002_v37, 2  ;;  %vm6474_vm13 = vcmp.eq.s32.totalorder %v12002_v37, 0 }
 0x361   :  { %vm6477_vm15 = vcmp.eq.s32.totalorder %v12002_v37, 2  ;;  %v6561_v7 = vor.u32 4788187, %v6560_v47  ;;  %v8616_v29 = vpop.eup %8615  ;;  %v6478_v36 = vxor.u32 2147483648, %v8614_v0  ;;  %v12100_v55 = vsel %vm6484_vm7, %v6568_v35, %v11983_v49  ;;  %v12111_v35 = vpop.f32.mrf.mxu0 }
 0x362   :  { %v7353_v41 = vsel %vm7347_vm4, %v7350_v50, %v7352_v14  ;;  %vm7429_vm0 = vcmp.gt.s32.totalorder %v7428_v22, 0  ;;  %v6475_v17 = vxor.u32 2147483648, %v8616_v29  ;;  %v6564_v46 = vcvt.s32.f32 %v6557_v48 }
 0x363   :  { %v6562_v45 = vand.u32 2147483647, %v6561_v7  ;;  %vm7371_vm6 = vc.u32 %v12084_v40, %v12087_v2  ;;  %v6479_v42 = vsel %vm6477_vm15, %v6478_v36, %v8616_v29  ;;  %v7372_v47 = vadd.s32 1, %v12088_v34 }
 0x364   :  { %v7425_v62 = vand.u32 8388607, %v13670_v3  ;;  %v7430_v49 = vsel %vm7429_vm0, %v7428_v22, 0  ;;  %v6476_v57 = vsel %vm6474_vm13, %v8614_v0, %v6475_v17  ;;  %v7369_v14 = vmul.u32 %v12035_v38, %v7353_v41  ;;  %v8681_v22 = vld [vmem:[%s13607_s2] sm:$0xff]  ;;  %v12128_v17 = vpop.f32.mrf.mxu1  ;;  %v12138_v3 = vpop.f32.mrf.mxu0 }
 0x365   :  { %v6565_v50 = vmul.f32 %v6564_v46, %v6562_v45  ;;  %v7432_v7 = vand.u32 31, %v7430_v49  ;;  %v6480_v48 = vsel %vm6473_vm11, %v6476_v57, %v6479_v42  ;;  %v6571_v29 = vsel %vm12065_vm1, 0, %v12100_v55  ;;  %13829 = vst [vmem:[#allocation28_spill] sm:$0xff] %v12138_v3 }
 0x366   :  { %v12125_v36 = vrot.slane %v8681_v22, %v12000_v58  ;;  %v7373_v0 = vsel %vm7371_vm6, %v7372_v47, %v12088_v34  ;;  %v6481_v38 = vsel %vm6470_vm10, nan, %v6480_v48  ;;  %v7426_v46 = vor.u32 8388608, %v7425_v62 }
 0x367   :  { %v6566_v37 = vxor.u32 2147483648, %v6565_v50  ;;  %v7374_v41 = vadd.s32 %v7373_v0, %v7369_v14  ;;  %v7433_v45 = vsub.s32 32, %v7432_v7  ;;  %v7907_v55 = vsel %vm11689_vm2, %v11676_v20, %v6481_v38  ;;  %v12150_v0 = vpop.f32.mrf.mxu1 }
 0x368   :  { %v12135_v42 = vshrl.u32 %v7430_v49, 5  ;;  %v7435_v57 = vshll.u32 %v13693_v61, %v7432_v7  ;;  %7947 = vst [vmem:[#allocation5 + $0xb0] sm:$0xff] %v7907_v55  ;;  %v7438_v14 = vshll.u32 %v13689_v28, %v7432_v7  ;;  %v7441_v49 = vshll.u32 %v13684_v32, %v7432_v7  ;;  %13830 = vst [vmem:[#allocation30_spill] sm:$0xff] %v12150_v0 }
 0x369   :  { %v6567_v34 = vsel %vm6484_vm7, %v6566_v37, %v6565_v50  ;;  %v7375_v21 = vadd.s32 536870912, %v7374_v41  ;;  %v7436_v47 = vshrl.u32 %v13689_v28, %v7433_v45  ;;  %v7439_v62 = vshrl.u32 %v13684_v32, %v7433_v45  ;;  %v12166_v3 = vpop.f32.mrf.mxu1 }
 0x36a   :  { %v6570_v20 = vsel %vm12065_vm1, %v11771_v5, %v6567_v34  ;;  %v7442_v48 = vshrl.u32 %v13685_v1, %v7433_v45  ;;  %v7444_v50 = vshll.u32 %v13685_v1, %v7432_v7  ;;  %v7445_v37 = vshrl.u32 %v13791_v16, %v7433_v45  ;;  %v12156_v34 = vpop.f32.mrf.mxu0  ;;  %13831 = vst [vmem:[#allocation32_spill] sm:$0xff] %v12166_v3 }
 0x36b   :  { %8617 = vcosq.f32 %v6570_v20  ;;  %v12152_v38 = vshrl.u32 %v7375_v21, 30  ;;  %v7437_v55 = vor.u32 %v7436_v47, %v7435_v57  ;;  %v7440_v24 = vor.u32 %v7439_v62, %v7438_v14 }
 0x36c   :  { %8619 = vsinq.f32 %v6570_v20  ;;  %v7443_v11 = vor.u32 %v7442_v48, %v7441_v49  ;;  %v7446_v44 = vor.u32 %v7445_v37, %v7444_v50  ;;  %v7447_v12 = vshll.u32 %v13791_v16, %v7432_v7  ;;  %v12185_v48 = vpop.f32.mrf.mxu1 }
 0x36d   :  { %v7377_v8 = vshll.u32 %v12152_v38, 30  ;;  %v7448_v0 = vshrl.u32 %v13792_v53, %v7433_v45  ;;  %v2211_v21 = vadd.f32 %v11913_v6, %v12125_v36  ;;  %v12164_v18 = vsub.s32 7, %v13822_v19  ;;  %v12175_v6 = vpop.f32.mrf.mxu0  ;;  %13833 = vst [vmem:[#allocation31_spill] sm:$0xff] %v12185_v48 }
 0x36e   :  { %vm7450_vm14 = vcmp.lt.s32.totalorder %v12135_v42, 1  ;;  %vm7453_vm3 = vcmp.lt.s32.totalorder %v12135_v42, 4  ;;  %v6575_v14 = vadd.s32 3, %v6571_v29  ;;  %vm7452_vm4 = vcmp.lt.s32.totalorder %v12135_v42, 3  ;;  %13832 = vst [vmem:[#allocation29_spill] sm:$0xff] %v12175_v6 }
 0x36f   :  { %v12168_v57 = vsub.s32 %v7374_v41, %v7377_v8  ;;  %v7449_v47 = vor.u32 %v7448_v0, %v7447_v12  ;;  %v7458_v7 = vsel %vm7450_vm14, %v7437_v55, %v7440_v24  ;;  %v7459_v20 = vsel %vm7453_vm3, %v7446_v44, 920167782 }
 0x370   :  { %vm7451_vm7 = vcmp.lt.s32.totalorder %v12135_v42, 2  ;;  %v7460_v12 = vsel %vm7452_vm4, %v7443_v11, %v7459_v20  ;;  %v7466_v8 = vshll.u32 %v7426_v46, 8  ;;  %v7455_v41 = vsel %vm7453_vm3, %v7443_v11, 2102212464 }
 0x371   :  { %v7380_v19 = vsub.s32 0, %v12168_v57  ;;  %v7461_v29 = vsel %vm7451_vm7, %v7458_v7, %v7460_v12  ;;  %v7462_v62 = vsel %vm7450_vm14, %v7440_v24, %v7443_v11  ;;  %v7463_v49 = vsel %vm7453_vm3, %v7449_v47, 1326507024  ;;  %v12200_v11 = vpop.f32.mrf.mxu0 }
 0x372   :  { %v12189_v50 = vrot.slane %v8681_v22, %v12164_v18  ;;  %v7434_v37 = vshrl.u32 %v13693_v61, %v7433_v45  ;;  %v7464_v46 = vsel %vm7452_vm4, %v7446_v44, %v7463_v49  ;;  %v6576_v20 = vand.u32 3, %v6575_v14  ;;  %13834 = vst [vmem:[#allocation33_spill] sm:$0xff] %v12200_v11  ;;  %v12209_v44 = vpop.f32.mrf.mxu1 }
 0x373   :  { %v8127_v0 = vmin.u32 %v7380_v19, %v12168_v57  ;;  %v7465_v7 = vsel %vm7451_vm7, %v7462_v62, %v7464_v46  ;;  %v12196_v12 = vmul.u32.u64.low %v7466_v8, %v7461_v29  ;;  %v12197_v3 = vmul.u32.u64.high %v7466_v8, %v7461_v29, %v12196_v12  ;;  %13835 = vst [vmem:[#allocation12_spill] sm:$0xff] %v12209_v44 }
 0x374   :  { %v7454_v22 = vsel %vm7450_vm14, %v7434_v37, %v7437_v55  ;;  %v7456_v45 = vsel %vm7452_vm4, %v7440_v24, %v7455_v41  ;;  %v12206_v19 = vmul.u32.u64.low %v7466_v8, %v7465_v7  ;;  %v12207_v48 = vmul.u32.u64.high %v7466_v8, %v7465_v7, %v12206_v19  ;;  %v12218_v41 = vpop.f32.mrf.mxu0  ;;  %v12224_v42 = vpop.f32.mrf.mxu1 }
 0x375   :  { %v7382_v47 = vclz %v8127_v0  ;;  %vm6574_vm5 = vweird.f32 %v11771_v5  ;;  %v2213_v29 = vadd.f32 %v11936_v33, %v12189_v50  ;;  %vm6577_vm8 = vcmp.lt.s32.totalorder %v6576_v20, 2  ;;  %13836 = vst [vmem:[#allocation15_spill] sm:$0xff] %v12218_v41  ;;  %13837 = vst [vmem:[#allocation13_spill] sm:$0xff] %v12224_v42 }
 0x376   :  { %v7457_v49 = vsel %vm7451_vm7, %v7454_v22, %v7456_v45  ;;  %v7476_v55 = vadd.s32 1, %v12197_v3  ;;  %v2346_v24 = vadd.f32 %v11920_v25, %v2211_v21  ;;  %vm6578_vm9 = vcmp.eq.s32.totalorder %v6576_v20, 0  ;;  %v2672_v11 = vpop.f32.mrf.mxu0 }
 0x377   :  { %v8128_v14 = vadd.s32 4294967294, %v7382_v47  ;;  %vm6581_vm1 = vcmp.eq.s32.totalorder %v6576_v20, 2  ;;  %v7370_v33 = vadd.s32 %v12087_v2, %v12084_v40  ;;  %vm7475_vm11 = vc.u32 %v12207_v48, %v12196_v12 }
 0x378   :  { %v8618_v62 = vpop.eup %8617  ;;  %v7473_v21 = vmul.u32 %v7466_v8, %v7457_v49  ;;  %v7477_v44 = vsel %vm7475_vm11, %v7476_v55, %v12197_v3  ;;  %v2348_v41 = vadd.f32 %v11950_v30, %v2213_v29  ;;  %v2452_v8 = vadd.f32 %v12061_v23, %v2346_v24  ;;  %v2674_v49 = vpop.f32.mrf.mxu0 }
 0x379   :  { %v8620_v0 = vpop.eup %8619  ;;  %v6582_v37 = vxor.u32 2147483648, %v8618_v62  ;;  %vm8129_vm10 = vcmp.lt.s32.totalorder %v8128_v14, 0  ;;  %vm7316_vm13 = vcmp.lt.s32.totalorder %v11944_v13, 0  ;;  %vm7420_vm0 = vcmp.lt.s32.totalorder %v12019_v63, 0  ;;  %v13852_v54 = vld [vmem:[#allocation33_spill] sm:$0xff] }
 0x37a   :  { %v6579_v46 = vxor.u32 2147483648, %v8620_v0  ;;  %v7385_v7 = vsel %vm8129_vm10, 0, %v8128_v14  ;;  %v7478_v6 = vadd.s32 %v7477_v44, %v7473_v21  ;;  %v2556_v44 = vadd.f32 %v12080_v10, %v2452_v8  ;;  %v8682_v10 = vld [vmem:[%s13608_s3] sm:$0xff] }
 0x37b   :  { %v6583_v47 = vsel %vm6581_vm1, %v6582_v37, %v8620_v0  ;;  %v7386_v22 = vsub.s32 32, %v7385_v7  ;;  %v7390_v25 = vsub.s32 4294967266, %v7385_v7  ;;  %v7387_v19 = vshll.u32 %v12168_v57, %v7385_v7  ;;  %v2771_v57 = vpop.f32.mrf.mxu1 }
 0x37c   :  { %v6580_v45 = vsel %vm6578_vm9, %v8618_v62, %v6579_v46  ;;  %v7400_v0 = vsub.s32 4, %v12152_v38  ;;  %v2454_v62 = vadd.f32 %v12092_v52, %v2348_v41  ;;  %v7479_v29 = vadd.s32 536870912, %v7478_v6 }
 0x37d   :  { %v6584_v40 = vsel %vm6577_vm8, %v6580_v45, %v6583_v47  ;;  %v7388_v2 = vshrl.u32 %v7370_v33, %v7386_v22  ;;  %v7391_v14 = vadd.s32 127, %v7390_v25  ;;  %v2673_v24 = vadd.f32 %v2672_v11, %v2556_v44  ;;  %v2773_v41 = vpop.f32.mrf.mxu1 }
 0x37e   :  { %v6585_v42 = vsel %vm6574_vm5, nan, %v6584_v40  ;;  %v7480_v55 = vshrl.u32 %v7479_v29, 30  ;;  %v2558_v23 = vadd.f32 %v12104_v15, %v2454_v62  ;;  %v7401_v52 = vsel %vm7316_vm13, %v7400_v0, %v12152_v38 }
 0x37f   :  { %v7908_v30 = vsel %vm11746_vm12, %v11701_v59, %v6585_v42  ;;  %v7389_v3 = vor.u32 %v7388_v2, %v7387_v19  ;;  %v7392_v20 = vshll.u32 %v7391_v14, 23  ;;  %v12244_v7 = vadd.f32 %v2771_v57, %v2673_v24  ;;  %v13844_v14 = vld [vmem:[#allocation28_spill] sm:$0xff] }
 0x380   :  { %7948 = vst [vmem:[#allocation5 + $0xb8] sm:$0xff] %v7908_v30  ;;  %v7481_v46 = vshll.u32 %v7480_v55, 30  ;;  %v2675_v33 = vadd.f32 %v2674_v49, %v2558_v23  ;;  %v12250_v42 = vrot.slane %v8682_v10, %v12000_v58  ;;  %v13838_v15 = vand.u32 2147483647, %v11944_v13 }
 0x381   :  { %v7393_v5 = vor.u32 4788187, %v7392_v20  ;;  %v7396_v37 = vcvt.s32.f32 %v7389_v3  ;;  %v12269_v45 = vrot.slane %v8682_v10, %v12164_v18  ;;  %v13841_v2 = vand.u32 2147483647, %v12019_v63 }
 0x382   :  { %vm12254_vm15 = vcmp.le.f32.partialorder %v13838_v15, 0.7853982  ;;  %v12258_v11 = vsub.s32 %v7478_v6, %v7481_v46  ;;  %v12260_v22 = vadd.f32 %v2773_v41, %v2675_v33  ;;  %v12266_v21 = vadd.f32 %v12250_v42, %v12244_v7 }
 0x383   :  { %v7394_v59 = vand.u32 2147483647, %v7393_v5  ;;  %v7403_v25 = vsel %vm12254_vm15, 0, %v7401_v52  ;;  %v2222_v6 = vadd.f32 %v11957_v39, %v12125_v36  ;;  %vm12277_vm6 = vcmp.le.f32.partialorder %v13841_v2, 0.7853982 }
 0x384   :  { %v7484_v40 = vsub.s32 0, %v12258_v11  ;;  %v7504_v0 = vsub.s32 4, %v7480_v55  ;;  %v4714_v8 = vand.u32 2147483647, %v12266_v21  ;;  %v4717_v62 = vand.u32 2139095040, %v12266_v21 }
 0x385   :  { %v7397_v38 = vmul.f32 %v7396_v37, %v7394_v59  ;;  %v7407_v30 = vadd.s32 3, %v7403_v25  ;;  %v12288_v39 = vadd.f32 %v12269_v45, %v12260_v22  ;;  %v2224_v29 = vadd.f32 %v11977_v9, %v12189_v50 }
 0x386   :  { %v8131_v3 = vmin.u32 %v7484_v40, %v12258_v11  ;;  %v4718_v44 = vshrl.u32 %v4717_v62, 23  ;;  %v4721_v49 = vand.u32 8388607, %v4714_v8  ;;  %v12299_v23 = vadd.f32 %v11985_v60, %v12125_v36 }
 0x387   :  { %v7398_v19 = vxor.u32 2147483648, %v7397_v38  ;;  %v2353_v52 = vadd.f32 %v11966_v56, %v2222_v6  ;;  %v7505_v24 = vsel %vm7420_vm0, %v7504_v0, %v7480_v55  ;;  %v12306_v41 = vadd.f32 %v12004_v51, %v12189_v50  ;;  %v2679_v56 = vpop.f32.mrf.mxu0 }
 0x388   :  { %v7486_v5 = vclz %v8131_v3  ;;  %v8026_v9 = vadd.s32 4294967169, %v4718_v44  ;;  %v12308_v59 = vand.u32 3, %v7407_v30  ;;  %v4821_v33 = vand.u32 2139095040, %v12288_v39 }
 0x389   :  { %v7399_v57 = vsel %vm7316_vm13, %v7398_v19, %v7397_v38  ;;  %v2460_v46 = vadd.f32 %v12111_v35, %v2353_v52  ;;  %v12313_v60 = vadd.f32 %v11981_v43, %v2224_v29  ;;  %v4722_v10 = vor.u32 8388608, %v4721_v49  ;;  %v2778_v19 = vpop.f32.mrf.mxu1 }
 0x38a   :  { %v7402_v20 = vsel %vm12254_vm15, %v11944_v13, %v7399_v57  ;;  %v8132_v37 = vadd.s32 4294967294, %v7486_v5  ;;  %v4724_v15 = vadd.s32 1, %v8026_v9  ;;  %v4818_v55 = vand.u32 2147483647, %v12288_v39 }
 0x38b   :  { %8621 = vcosq.f32 %v7402_v20  ;;  %v7507_v51 = vsel %vm12277_vm6, 0, %v7505_v24  ;;  %v12320_v47 = vadd.f32 %v12032_v26, %v12125_v36  ;;  %v2565_v35 = vadd.f32 %v12128_v17, %v2460_v46 }
 0x38c   :  { %8623 = vsinq.f32 %v7402_v20  ;;  %vm8133_vm14 = vcmp.lt.s32.totalorder %v8132_v37, 0  ;;  %v7474_v38 = vadd.s32 %v12196_v12, %v12207_v48  ;;  %vm4725_vm3 = vcmp.gt.s32.totalorder %v4724_v15, 0 }
 0x38d   :  { %v7489_v43 = vsel %vm8133_vm14, 0, %v8132_v37  ;;  %v4822_v25 = vshrl.u32 %v4821_v33, 23  ;;  %v2680_v2 = vadd.f32 %v2679_v56, %v2565_v35  ;;  %v4726_v0 = vsel %vm4725_vm3, %v4724_v15, 0 }
 0x38e   :  { %v7490_v40 = vsub.s32 32, %v7489_v43  ;;  %v7494_v6 = vsub.s32 4294967266, %v7489_v43  ;;  %vm7413_vm4 = vcmp.eq.s32.totalorder %v12308_v59, 2  ;;  %v12326_v62 = vadd.s32 3, %v7507_v51 }
 0x38f   :  { %v4728_v57 = vand.u32 31, %v4726_v0  ;;  %v12328_v26 = vshll.u32 %v4722_v10, 8  ;;  %v12332_v36 = vand.u32 8388607, %v4818_v55  ;;  %vm7410_vm7 = vcmp.eq.s32.totalorder %v12308_v59, 0 }
 0x390   :  { %v7491_v17 = vshll.u32 %v12258_v11, %v7489_v43  ;;  %v7492_v48 = vshrl.u32 %v7474_v38, %v7490_v40  ;;  %v7495_v12 = vadd.s32 127, %v7494_v6  ;;  %v12336_v30 = vadd.f32 %v2778_v19, %v2680_v2 }
 0x391   :  { %vm7409_vm5 = vcmp.lt.s32.totalorder %v12308_v59, 2  ;;  %v12339_v3 = vshrl.u32 %v4726_v0, 5  ;;  %v4729_v20 = vsub.s32 32, %v4728_v57  ;;  %v4731_v29 = vshll.u32 %v13693_v61, %v4728_v57 }
 0x392   :  { %v8030_v44 = vadd.s32 4294967169, %v4822_v25  ;;  %vm7406_vm8 = vweird.f32 %v11944_v13  ;;  %v7493_v49 = vor.u32 %v7492_v48, %v7491_v17  ;;  %v7496_v5 = vshll.u32 %v7495_v12, 23 }
 0x393   :  { %v4734_v52 = vshll.u32 %v13689_v28, %v4728_v57  ;;  %v4737_v11 = vshll.u32 %v13684_v32, %v4728_v57  ;;  %v4732_v24 = vshrl.u32 %v13689_v28, %v4729_v20  ;;  %v4735_v9 = vshrl.u32 %v13684_v32, %v4729_v20 }
 0x394   :  { %v4738_v37 = vshrl.u32 %v13685_v1, %v4729_v20  ;;  %v4740_v46 = vshll.u32 %v13685_v1, %v4728_v57  ;;  %v7497_v33 = vor.u32 4788187, %v7496_v5  ;;  %v4741_v56 = vshrl.u32 %v13791_v16, %v4729_v20 }
 0x395   :  { %v4743_v10 = vshll.u32 %v13791_v16, %v4728_v57  ;;  %v4744_v15 = vshrl.u32 %v13792_v53, %v4729_v20  ;;  %v4730_v35 = vshrl.u32 %v13693_v61, %v4729_v20  ;;  %v4733_v38 = vor.u32 %v4732_v24, %v4731_v29 }
 0x396   :  { %v4736_v43 = vor.u32 %v4735_v9, %v4734_v52  ;;  %v4739_v25 = vor.u32 %v4738_v37, %v4737_v11  ;;  %v7498_v6 = vand.u32 2147483647, %v7497_v33  ;;  %v7500_v2 = vcvt.s32.f32 %v7493_v49 }
 0x397   :  { %v4742_v0 = vor.u32 %v4741_v56, %v4740_v46  ;;  %v4745_v48 = vor.u32 %v4744_v15, %v4743_v10  ;;  %vm4746_vm9 = vcmp.lt.s32.totalorder %v12339_v3, 1  ;;  %vm4747_vm1 = vcmp.lt.s32.totalorder %v12339_v3, 2 }
 0x398   :  { %v8622_v51 = vpop.eup %8621  ;;  %v7501_v12 = vmul.f32 %v7500_v2, %v7498_v6  ;;  %vm4748_vm10 = vcmp.lt.s32.totalorder %v12339_v3, 3  ;;  %vm4749_vm11 = vcmp.lt.s32.totalorder %v12339_v3, 4  ;;  %v4754_v49 = vsel %vm4746_vm9, %v4733_v38, %v4736_v43  ;;  %v13845_v2 = vld [vmem:[#allocation25_spill] sm:$0xff] }
 0x399   :  { %v8624_v19 = vpop.eup %8623  ;;  %v7414_v40 = vxor.u32 2147483648, %v8622_v51  ;;  %v4751_v29 = vsel %vm4749_vm11, %v4739_v25, 2102212464  ;;  %v4755_v5 = vsel %vm4749_vm11, %v4742_v0, 920167782  ;;  %v4750_v24 = vsel %vm4746_vm9, %v4730_v35, %v4733_v38 }
 0x39a   :  { %v7411_v17 = vxor.u32 2147483648, %v8624_v19  ;;  %v7502_v11 = vxor.u32 2147483648, %v7501_v12  ;;  %v4756_v9 = vsel %vm4748_vm10, %v4739_v25, %v4755_v5  ;;  %v4758_v33 = vsel %vm4746_vm9, %v4736_v43, %v4739_v25 }
 0x39b   :  { %v7415_v57 = vsel %vm7413_vm4, %v7414_v40, %v8624_v19  ;;  %v4757_v46 = vsel %vm4747_vm1, %v4754_v49, %v4756_v9  ;;  %v4759_v56 = vsel %vm4749_vm11, %v4745_v48, 1326507024  ;;  %v4752_v15 = vsel %vm4748_vm10, %v4736_v43, %v4751_v29  ;;  %v13848_v29 = vld [vmem:[#allocation34_spill] sm:$0xff] }
 0x39c   :  { %v7412_v20 = vsel %vm7410_vm7, %v8622_v51, %v7411_v17  ;;  %v7503_v10 = vsel %vm7420_vm0, %v7502_v11, %v7501_v12  ;;  %v4760_v13 = vsel %vm4748_vm10, %v4742_v0, %v4759_v56  ;;  %v4828_v25 = vadd.s32 1, %v8030_v44  ;;  %v2681_v17 = vpop.f32.mrf.mxu0  ;;  %v13847_v12 = vld [vmem:[#allocation26_spill] sm:$0xff] }
 0x39d   :  { %v7416_v52 = vsel %vm7409_vm5, %v7412_v20, %v7415_v57  ;;  %v7506_v51 = vsel %vm12277_vm6, %v12019_v63, %v7503_v10  ;;  %v4761_v35 = vsel %vm4747_vm1, %v4758_v33, %v4760_v13  ;;  %v12400_v19 = vadd.f32 %v11993_v31, %v12299_v23  ;;  %v13846_v23 = vld [vmem:[#allocation30_spill] sm:$0xff] }
 0x39e   :  { %v7417_v37 = vsel %vm7406_vm8, nan, %v7416_v52  ;;  %8625 = vcosq.f32 %v7506_v51  ;;  %v12395_v38 = vmul.u32.u64.low %v12328_v26, %v4761_v35  ;;  %v12396_v43 = vmul.u32.u64.high %v12328_v26, %v4761_v35, %v12395_v38 }
 0x39f   :  { %v7916_v59 = vsel %vm11689_vm2, %v11896_v27, %v7417_v37  ;;  %v12390_v4 = vmul.u32.u64.low %v12328_v26, %v4757_v46  ;;  %v12391_v27 = vmul.u32.u64.high %v12328_v26, %v4757_v46, %v12390_v4  ;;  %8627 = vsinq.f32 %v7506_v51 }
 0x3a0   :  { %7956 = vst [vmem:[#allocation5 + $0xf8] sm:$0xff] %v7916_v59  ;;  %v2462_v40 = vadd.f32 %v13844_v14, %v12313_v60  ;;  %v4753_v6 = vsel %vm4747_vm1, %v4750_v24, %v4752_v15  ;;  %v2246_v0 = vadd.f32 %v13845_v2, %v12189_v50  ;;  %v4826_v48 = vor.u32 8388608, %v12332_v36 }
 0x3a1   :  { %vm4829_vm2 = vcmp.gt.s32.totalorder %v4828_v25, 0  ;;  %v12411_v44 = vadd.f32 %v12250_v42, %v12336_v30  ;;  %v12414_v31 = vand.u32 3, %v12326_v62  ;;  %v4772_v60 = vadd.s32 1, %v12391_v27  ;;  %v13849_v62 = vld [vmem:[#allocation27_spill] sm:$0xff] }
 0x3a2   :  { %v2567_v57 = vadd.f32 %v13846_v23, %v2462_v40  ;;  %v4830_v3 = vsel %vm4829_vm2, %v4828_v25, 0  ;;  %v12420_v20 = vadd.f32 %v13847_v12, %v12306_v41  ;;  %v4769_v50 = vmul.u32 %v12328_v26, %v4753_v6 }
 0x3a3   :  { %vm4771_vm13 = vc.u32 %v12396_v43, %v12390_v4  ;;  %v4832_v36 = vand.u32 31, %v4830_v3  ;;  %v12427_v49 = vadd.f32 %v13848_v29, %v12320_v47  ;;  %v12430_v5 = vadd.f32 %v13849_v62, %v2246_v0 }
 0x3a4   :  { %v4773_v52 = vsel %vm4771_vm13, %v4772_v60, %v12391_v27  ;;  %v2682_v11 = vadd.f32 %v2681_v17, %v2567_v57  ;;  %v12433_v41 = vshll.u32 %v4826_v48, 8  ;;  %v5653_v26 = vand.u32 2139095040, %v12411_v44 }
 0x3a5   :  { %v4774_v24 = vadd.s32 %v4773_v52, %v4769_v50  ;;  %v4833_v9 = vsub.s32 32, %v4832_v36  ;;  %vm7517_vm15 = vcmp.eq.s32.totalorder %v12414_v31, 2  ;;  %v4831_v37 = vshrl.u32 %v4830_v3, 5 }
 0x3a6   :  { %v4835_v46 = vshll.u32 %v13693_v61, %v4832_v36  ;;  %v4838_v47 = vshll.u32 %v13689_v28, %v4832_v36  ;;  %v4841_v33 = vshll.u32 %v13684_v32, %v4832_v36  ;;  %vm7514_vm0 = vcmp.eq.s32.totalorder %v12414_v31, 0 }
 0x3a7   :  { %v4775_v56 = vadd.s32 536870912, %v4774_v24  ;;  %v4836_v59 = vshrl.u32 %v13689_v28, %v4833_v9  ;;  %v4839_v10 = vshrl.u32 %v13684_v32, %v4833_v9  ;;  %v4844_v15 = vshll.u32 %v13685_v1, %v4832_v36 }
 0x3a8   :  { %vm7513_vm6 = vcmp.lt.s32.totalorder %v12414_v31, 2  ;;  %v4842_v13 = vshrl.u32 %v13685_v1, %v4833_v9  ;;  %v4845_v51 = vshrl.u32 %v13791_v16, %v4833_v9  ;;  %v4847_v35 = vshll.u32 %v13791_v16, %v4832_v36 }
 0x3a9   :  { %v4848_v27 = vshrl.u32 %v13792_v53, %v4833_v9  ;;  %vm7510_vm14 = vweird.f32 %v12019_v63  ;;  %v4776_v38 = vshrl.u32 %v4775_v56, 30  ;;  %v4837_v25 = vor.u32 %v4836_v59, %v4835_v46 }
 0x3aa   :  { %v4840_v14 = vor.u32 %v4839_v10, %v4838_v47  ;;  %v5650_v40 = vand.u32 2147483647, %v12411_v44  ;;  %v4843_v6 = vor.u32 %v4842_v13, %v4841_v33  ;;  %v4846_v2 = vor.u32 %v4845_v51, %v4844_v15  ;;  %v2780_v33 = vpop.f32.mrf.mxu1 }
 0x3ab   :  { %v4849_v0 = vor.u32 %v4848_v27, %v4847_v35  ;;  %v5654_v17 = vshrl.u32 %v5653_v26, 23  ;;  %v4777_v48 = vshll.u32 %v4776_v38, 30  ;;  %v4834_v23 = vshrl.u32 %v13693_v61, %v4833_v9  ;;  %v8626_v57 = vpop.eup %8625 }
 0x3ac   :  { %vm4850_vm3 = vcmp.lt.s32.totalorder %v4831_v37, 1  ;;  %vm4853_vm4 = vcmp.lt.s32.totalorder %v4831_v37, 4  ;;  %vm4851_vm7 = vcmp.lt.s32.totalorder %v4831_v37, 2  ;;  %v8628_v50 = vpop.eup %8627  ;;  %v7518_v36 = vxor.u32 2147483648, %v8626_v57 }
 0x3ad   :  { %v4855_v60 = vsel %vm4853_vm4, %v4843_v6, 2102212464  ;;  %v4858_v3 = vsel %vm4850_vm3, %v4837_v25, %v4840_v14  ;;  %v4859_v12 = vsel %vm4853_vm4, %v4846_v2, 920167782  ;;  %v12452_v29 = vsub.s32 %v4774_v24, %v4777_v48 }
 0x3ae   :  { %vm4852_vm5 = vcmp.lt.s32.totalorder %v4831_v37, 3  ;;  %v4863_v62 = vsel %vm4853_vm4, %v4849_v0, 1326507024  ;;  %v7515_v52 = vxor.u32 2147483648, %v8628_v50  ;;  %v4854_v46 = vsel %vm4850_vm3, %v4834_v23, %v4837_v25  ;;  %v13850_v23 = vld [vmem:[#allocation24_spill] sm:$0xff] }
 0x3af   :  { %v4860_v47 = vsel %vm4852_vm5, %v4843_v6, %v4859_v12  ;;  %v4862_v26 = vsel %vm4850_vm3, %v4840_v14, %v4843_v6  ;;  %v7519_v9 = vsel %vm7517_vm15, %v7518_v36, %v8628_v50  ;;  %v4780_v56 = vsub.s32 0, %v12452_v29 }
 0x3b0   :  { %v4856_v59 = vsel %vm4852_vm5, %v4840_v14, %v4855_v60  ;;  %v4861_v10 = vsel %vm4851_vm7, %v4858_v3, %v4860_v47  ;;  %v7516_v15 = vsel %vm7514_vm0, %v8626_v57, %v7515_v52  ;;  %v4864_v24 = vsel %vm4852_vm5, %v4846_v2, %v4863_v62 }
 0x3b1   :  { %v12461_v13 = vmul.u32.u64.low %v12433_v41, %v4861_v10  ;;  %v12462_v51 = vmul.u32.u64.high %v12433_v41, %v4861_v10, %v12461_v13  ;;  %v7520_v35 = vsel %vm7513_vm6, %v7516_v15, %v7519_v9  ;;  %v8027_v27 = vmin.u32 %v4780_v56, %v12452_v29  ;;  %v2686_v56 = vpop.f32.mrf.mxu0 }
 0x3b2   :  { %v4865_v25 = vsel %vm4851_vm7, %v4862_v26, %v4864_v24  ;;  %v12469_v6 = vadd.f32 %v2780_v33, %v2682_v11  ;;  %v7521_v14 = vsel %vm7510_vm14, nan, %v7520_v35  ;;  %v4800_v0 = vsub.s32 4, %v4776_v38  ;;  %v13851_v11 = vld [vmem:[#allocation29_spill] sm:$0xff] }
 0x3b3   :  { %v12474_v2 = vmul.u32.u64.low %v12433_v41, %v4865_v25  ;;  %v12475_v48 = vmul.u32.u64.high %v12433_v41, %v4865_v25, %v12474_v2  ;;  %v7917_v57 = vsel %vm11746_vm12, %v13850_v23, %v7521_v14  ;;  %v2468_v31 = vadd.f32 %v12156_v34, %v12400_v19 }
 0x3b4   :  { %v4782_v60 = vclz %v8027_v27  ;;  %v4857_v3 = vsel %vm4851_vm7, %v4854_v46, %v4856_v59  ;;  %7957 = vst [vmem:[#allocation5 + $0x100] sm:$0xff] %v7917_v57  ;;  %v12485_v63 = vadd.f32 %v13851_v11, %v12420_v20  ;;  %v4876_v12 = vadd.s32 1, %v12462_v51  ;;  %v13855_v59 = vld [vmem:[#allocation32_spill] sm:$0xff]  ;;  %v13856_v27 = vld [vmem:[#allocation23_spill] sm:$0xff] }
 0x3b5   :  { %v8062_v50 = vadd.s32 4294967169, %v5654_v17  ;;  %v5657_v36 = vand.u32 8388607, %v5650_v40  ;;  %v12492_v62 = vadd.f32 %v13852_v54, %v12427_v49  ;;  %vm4716_vm12 = vcmp.lt.s32.totalorder %v12266_v21, 0 }
 0x3b6   :  { %v8028_v34 = vadd.s32 4294967294, %v4782_v60  ;;  %v12497_v19 = vadd.f32 %v12269_v45, %v12469_v6  ;;  %v4801_v20 = vsel %vm4716_vm12, %v4800_v0, %v4776_v38  ;;  %v4873_v37 = vmul.u32 %v12433_v41, %v4857_v3 }
 0x3b7   :  { %vm4875_vm8 = vc.u32 %v12475_v48, %v12461_v13  ;;  %v5660_v17 = vadd.s32 1, %v8062_v50  ;;  %vm12506_vm9 = vcmp.le.f32.partialorder %v4714_v8, 0.7853982  ;;  %v4770_v52 = vadd.s32 %v12390_v4, %v12396_v43 }
 0x3b8   :  { %vm8029_vm1 = vcmp.lt.s32.totalorder %v8028_v34, 0  ;;  %v4877_v46 = vsel %vm4875_vm8, %v4876_v12, %v12462_v51  ;;  %v5658_v26 = vor.u32 8388608, %v5657_v36  ;;  %v4803_v9 = vsel %vm12506_vm9, 0, %v4801_v20 }
 0x3b9   :  { %v4785_v47 = vsel %vm8029_vm1, 0, %v8028_v34  ;;  %v4878_v38 = vadd.s32 %v4877_v46, %v4873_v37  ;;  %vm5661_vm10 = vcmp.gt.s32.totalorder %v5660_v17, 0  ;;  %v2574_v10 = vadd.f32 %v13855_v59, %v2468_v31 }
 0x3ba   :  { %v4786_v41 = vsub.s32 32, %v4785_v47  ;;  %v4790_v33 = vsub.s32 4294967266, %v4785_v47  ;;  %v5662_v8 = vsel %vm5661_vm10, %v5660_v17, 0  ;;  %v5757_v4 = vand.u32 2139095040, %v12497_v19 }
 0x3bb   :  { %v4879_v15 = vadd.s32 536870912, %v4878_v38  ;;  %v5664_v24 = vand.u32 31, %v5662_v8  ;;  %v4787_v43 = vshll.u32 %v12452_v29, %v4785_v47  ;;  %v7867_v25 = vrot.slane %v13856_v27, %v12000_v58 }
 0x3bc   :  { %v4788_v51 = vshrl.u32 %v4770_v52, %v4786_v41  ;;  %v4791_v35 = vadd.s32 127, %v4790_v33  ;;  %v12520_v14 = vadd.s32 3, %v4803_v9  ;;  %vm4820_vm11 = vcmp.lt.s32.totalorder %v12288_v39, 0 }
 0x3bd   :  { %v4880_v0 = vshrl.u32 %v4879_v15, 30  ;;  %v12523_v2 = vadd.f32 %v2686_v56, %v2574_v10  ;;  %v5665_v23 = vsub.s32 32, %v5664_v24  ;;  %v12525_v60 = vshll.u32 %v5658_v26, 8 }
 0x3be   :  { %v4789_v57 = vor.u32 %v4788_v51, %v4787_v43  ;;  %v4792_v31 = vshll.u32 %v4791_v35, 23  ;;  %v5754_v3 = vand.u32 2147483647, %v12497_v19  ;;  %v5663_v11 = vshrl.u32 %v5662_v8, 5 }
 0x3bf   :  { %v4881_v29 = vshll.u32 %v4880_v0, 30  ;;  %v5668_v12 = vshrl.u32 %v13689_v28, %v5665_v23  ;;  %v5758_v50 = vshrl.u32 %v5757_v4, 23  ;;  %v5667_v54 = vshll.u32 %v13693_v61, %v5664_v24 }
 0x3c0   :  { %v4793_v36 = vor.u32 4788187, %v4792_v31  ;;  %v5671_v34 = vshrl.u32 %v13684_v32, %v5665_v23  ;;  %v5674_v20 = vshrl.u32 %v13685_v1, %v5665_v23  ;;  %v5670_v17 = vshll.u32 %v13689_v28, %v5664_v24 }
 0x3c1   :  { %v12532_v37 = vsub.s32 %v4878_v38, %v4881_v29  ;;  %v5673_v52 = vshll.u32 %v13684_v32, %v5664_v24  ;;  %v5677_v46 = vshrl.u32 %v13791_v16, %v5665_v23  ;;  %v4796_v26 = vcvt.s32.f32 %v4789_v57  ;;  %v2688_v38 = vpop.f32.mrf.mxu0 }
 0x3c2   :  { %v4794_v47 = vand.u32 2147483647, %v4793_v36  ;;  %v4904_v41 = vsub.s32 4, %v4880_v0  ;;  %v5676_v33 = vshll.u32 %v13685_v1, %v5664_v24  ;;  %v5669_v56 = vor.u32 %v5668_v12, %v5667_v54 }
 0x3c3   :  { %v4884_v9 = vsub.s32 0, %v12532_v37  ;;  %v5672_v8 = vor.u32 %v5671_v34, %v5670_v17  ;;  %v5675_v59 = vor.u32 %v5674_v20, %v5673_v52  ;;  %vm12541_vm2 = vcmp.le.f32.partialorder %v4818_v55, 0.7853982 }
 0x3c4   :  { %v4797_v10 = vmul.f32 %v4796_v26, %v4794_v47  ;;  %v5678_v15 = vor.u32 %v5677_v46, %v5676_v33  ;;  %v5679_v4 = vshll.u32 %v13791_v16, %v5664_v24  ;;  %v5680_v43 = vshrl.u32 %v13792_v53, %v5665_v23 }
 0x3c5   :  { %v4874_v51 = vadd.s32 %v12461_v13, %v12475_v48  ;;  %v8031_v35 = vmin.u32 %v4884_v9, %v12532_v37  ;;  %v5666_v57 = vshrl.u32 %v13693_v61, %v5665_v23  ;;  %v8066_v31 = vadd.s32 4294967169, %v5758_v50 }
 0x3c6   :  { %v4798_v29 = vxor.u32 2147483648, %v4797_v10  ;;  %v4905_v55 = vsel %vm4820_vm11, %v4904_v41, %v4880_v0  ;;  %v5681_v12 = vor.u32 %v5680_v43, %v5679_v4  ;;  %vm5682_vm13 = vcmp.lt.s32.totalorder %v5663_v11, 1 }
 0x3c7   :  { %v4886_v36 = vclz %v8031_v35  ;;  %vm5683_vm15 = vcmp.lt.s32.totalorder %v5663_v11, 2  ;;  %vm5684_vm0 = vcmp.lt.s32.totalorder %v5663_v11, 3  ;;  %vm5685_vm6 = vcmp.lt.s32.totalorder %v5663_v11, 4  ;;  %v2785_v35 = vpop.f32.mrf.mxu1 }
 0x3c8   :  { %v4799_v24 = vsel %vm4716_vm12, %v4798_v29, %v4797_v10  ;;  %v5687_v54 = vsel %vm5685_vm6, %v5675_v59, 2102212464  ;;  %v5690_v13 = vsel %vm5682_vm13, %v5669_v56, %v5672_v8  ;;  %v5691_v48 = vsel %vm5685_vm6, %v5678_v15, 920167782 }
 0x3c9   :  { %v4802_v23 = vsel %vm12506_vm9, %v12266_v21, %v4799_v24  ;;  %v8032_v50 = vadd.s32 4294967294, %v4886_v36  ;;  %v5686_v34 = vsel %vm5682_vm13, %v5666_v57, %v5669_v56  ;;  %v5692_v0 = vsel %vm5684_vm0, %v5675_v59, %v5691_v48  ;;  %v13859_v48 = vld [vmem:[#allocation31_spill] sm:$0xff] }
 0x3ca   :  { %8629 = vcosq.f32 %v4802_v23  ;;  %v5693_v20 = vsel %vm5683_vm15, %v5690_v13, %v5692_v0  ;;  %v5694_v17 = vsel %vm5682_vm13, %v5672_v8, %v5675_v59  ;;  %v5695_v52 = vsel %vm5685_vm6, %v5681_v12, 1326507024 }
 0x3cb   :  { %8631 = vsinq.f32 %v4802_v23  ;;  %vm8033_vm14 = vcmp.lt.s32.totalorder %v8032_v50, 0  ;;  %v5688_v46 = vsel %vm5684_vm0, %v5672_v8, %v5687_v54  ;;  %v5696_v47 = vsel %vm5684_vm0, %v5678_v15, %v5695_v52 }
 0x3cc   :  { %v4889_v26 = vsel %vm8033_vm14, 0, %v8032_v50  ;;  %v5697_v41 = vsel %vm5683_vm15, %v5694_v17, %v5696_v47  ;;  %v12564_v49 = vmul.u32.u64.low %v12525_v60, %v5693_v20  ;;  %v12565_v33 = vmul.u32.u64.high %v12525_v60, %v5693_v20, %v12564_v49 }
 0x3cd   :  { %v4890_v9 = vsub.s32 32, %v4889_v26  ;;  %v4894_v56 = vsub.s32 4294967266, %v4889_v26  ;;  %v4907_v59 = vsel %vm12541_vm2, 0, %v4905_v55  ;;  %v5764_v10 = vadd.s32 1, %v8066_v31 }
 0x3ce   :  { %v12571_v4 = vand.u32 3, %v12520_v14  ;;  %v5689_v8 = vsel %vm5683_vm15, %v5686_v34, %v5688_v46  ;;  %v12575_v15 = vmul.u32.u64.low %v12525_v60, %v5697_v41  ;;  %v12576_v43 = vmul.u32.u64.high %v12525_v60, %v5697_v41, %v12575_v15 }
 0x3cf   :  { %v4891_v57 = vshll.u32 %v12532_v37, %v4889_v26  ;;  %v4892_v29 = vshrl.u32 %v4874_v51, %v4890_v9  ;;  %v4895_v12 = vadd.s32 127, %v4894_v56  ;;  %vm5765_vm3 = vcmp.gt.s32.totalorder %v5764_v10, 0 }
 0x3d0   :  { %v4911_v36 = vadd.s32 3, %v4907_v59  ;;  %v5708_v24 = vadd.s32 1, %v12565_v33  ;;  %v12582_v31 = vand.u32 8388607, %v5754_v3  ;;  %v5766_v14 = vsel %vm5765_vm3, %v5764_v10, 0 }
 0x3d1   :  { %v4893_v11 = vor.u32 %v4892_v29, %v4891_v57  ;;  %v4896_v55 = vshll.u32 %v4895_v12, 23  ;;  %v5768_v54 = vand.u32 31, %v5766_v14  ;;  %v12585_v13 = vadd.f32 %v2785_v35, %v12523_v2 }
 0x3d2   :  { %v12589_v37 = vadd.f32 %v13859_v48, %v12485_v63  ;;  %v7871_v51 = vrot.slane %v13856_v27, %v12164_v18  ;;  %v5705_v23 = vmul.u32 %v12525_v60, %v5689_v8  ;;  %vm5707_vm4 = vc.u32 %v12576_v43, %v12564_v49 }
 0x3d3   :  { %vm4809_vm7 = vcmp.lt.s32.totalorder %v12571_v4, 2  ;;  %vm12600_vm5 = vcmp.eq.s32.totalorder %v7867_v25, 1  ;;  %v4897_v50 = vor.u32 4788187, %v4896_v55  ;;  %v5709_v63 = vsel %vm5707_vm4, %v5708_v24, %v12565_v33 }
 0x3d4   :  { %v5769_v34 = vsub.s32 32, %v5768_v54  ;;  %vm4806_vm12 = vweird.f32 %v12266_v21  ;;  %vm4810_vm8 = vcmp.eq.s32.totalorder %v12571_v4, 0  ;;  %vm4813_vm9 = vcmp.eq.s32.totalorder %v12571_v4, 2 }
 0x3d5   :  { %v5710_v60 = vadd.s32 %v5709_v63, %v5705_v23  ;;  %v5762_v0 = vor.u32 8388608, %v12582_v31  ;;  %v4898_v20 = vand.u32 2147483647, %v4897_v50  ;;  %v4900_v17 = vcvt.s32.f32 %v4893_v11 }
 0x3d6   :  { %v12609_v58 = vand.u32 3, %v4911_v36  ;;  %v12613_v25 = vadd.f32 %v12250_v42, %v12585_v13  ;;  %v12615_v46 = vshrl.u32 %v5766_v14, 5  ;;  %v5772_v47 = vshrl.u32 %v13689_v28, %v5769_v34 }
 0x3d7   :  { %v5711_v52 = vadd.s32 536870912, %v5710_v60  ;;  %v5775_v26 = vshrl.u32 %v13684_v32, %v5769_v34  ;;  %v8630_v41 = vpop.eup %8629  ;;  %v4901_v33 = vmul.f32 %v4900_v17, %v4898_v20  ;;  %v5771_v9 = vshll.u32 %v13693_v61, %v5768_v54 }
 0x3d8   :  { %v5774_v56 = vshll.u32 %v13689_v28, %v5768_v54  ;;  %v5781_v59 = vshrl.u32 %v13791_v16, %v5769_v34  ;;  %v8632_v10 = vpop.eup %8631  ;;  %v4814_v8 = vxor.u32 2147483648, %v8630_v41  ;;  %v5777_v35 = vshll.u32 %v13684_v32, %v5768_v54 }
 0x3d9   :  { %v12622_v15 = vshrl.u32 %v5711_v52, 30  ;;  %v5778_v57 = vshrl.u32 %v13685_v1, %v5769_v34  ;;  %v4811_v29 = vxor.u32 2147483648, %v8632_v10  ;;  %v4902_v12 = vxor.u32 2147483648, %v4901_v33 }
 0x3da   :  { %v5780_v36 = vshll.u32 %v13685_v1, %v5768_v54  ;;  %v5784_v24 = vshrl.u32 %v13792_v53, %v5769_v34  ;;  %v4815_v31 = vsel %vm4813_vm9, %v4814_v8, %v8632_v10  ;;  %v5773_v11 = vor.u32 %v5772_v47, %v5771_v9 }
 0x3db   :  { %v5713_v14 = vshll.u32 %v12622_v15, 30  ;;  %v5776_v55 = vor.u32 %v5775_v26, %v5774_v56  ;;  %v4812_v48 = vsel %vm4810_vm8, %v8630_v41, %v4811_v29  ;;  %v4903_v23 = vsel %vm4820_vm11, %v4902_v12, %v4901_v33 }
 0x3dc   :  { %v5782_v50 = vor.u32 %v5781_v59, %v5780_v36  ;;  %v5783_v63 = vshll.u32 %v13791_v16, %v5768_v54  ;;  %v4816_v20 = vsel %vm4809_vm7, %v4812_v48, %v4815_v31  ;;  %v4906_v17 = vsel %vm12541_vm2, %v12288_v39, %v4903_v23 }
 0x3dd   :  { %v12641_v52 = vsub.s32 %v5710_v60, %v5713_v14  ;;  %v5779_v47 = vor.u32 %v5778_v57, %v5777_v35  ;;  %v4817_v26 = vsel %vm4806_vm12, nan, %v4816_v20  ;;  %8633 = vcosq.f32 %v4906_v17  ;;  %v2787_v20 = vpop.f32.mrf.mxu1 }
 0x3de   :  { %v5785_v41 = vor.u32 %v5784_v24, %v5783_v63  ;;  %vm5786_vm1 = vcmp.lt.s32.totalorder %v12615_v46, 1  ;;  %v7891_v54 = vsel %vm12600_vm5, %v12244_v7, %v4817_v26  ;;  %8635 = vsinq.f32 %v4906_v17 }
 0x3df   :  { %v5716_v4 = vsub.s32 0, %v12641_v52  ;;  %vm5789_vm10 = vcmp.lt.s32.totalorder %v12615_v46, 4  ;;  %7930 = vst [vmem:[#allocation5 + $0x30] sm:$0xff] %v7891_v54  ;;  %v5770_v60 = vshrl.u32 %v13693_v61, %v5769_v34  ;;  %vm5788_vm11 = vcmp.lt.s32.totalorder %v12615_v46, 3 }
 0x3e0   :  { %v5794_v21 = vsel %vm5786_vm1, %v5773_v11, %v5776_v55  ;;  %v5795_v33 = vsel %vm5789_vm10, %v5782_v50, 920167782  ;;  %vm5787_vm2 = vcmp.lt.s32.totalorder %v12615_v46, 2  ;;  %v5791_v7 = vsel %vm5789_vm10, %v5779_v47, 2102212464 }
 0x3e1   :  { %v8063_v9 = vmin.u32 %v5716_v4, %v12641_v52  ;;  %v5796_v56 = vsel %vm5788_vm11, %v5779_v47, %v5795_v33  ;;  %v5798_v34 = vsel %vm5786_vm1, %v5776_v55, %v5779_v47  ;;  %v5799_v10 = vsel %vm5789_vm10, %v5785_v41, 1326507024 }
 0x3e2   :  { %v5797_v59 = vsel %vm5787_vm2, %v5794_v21, %v5796_v56  ;;  %v5802_v8 = vshll.u32 %v5762_v0, 8  ;;  %vm5652_vm13 = vcmp.lt.s32.totalorder %v12411_v44, 0  ;;  %v2689_v57 = vadd.f32 %v2688_v38, %v12589_v37 }
 0x3e3   :  { %v5718_v35 = vclz %v8063_v9  ;;  %v5790_v29 = vsel %vm5786_vm1, %v5770_v60, %v5773_v11  ;;  %v5792_v12 = vsel %vm5788_vm11, %v5776_v55, %v5791_v7  ;;  %v5800_v36 = vsel %vm5788_vm11, %v5782_v50, %v5799_v10 }
 0x3e4   :  { %v12671_v24 = vmul.u32.u64.low %v5802_v8, %v5797_v59  ;;  %v12672_v31 = vmul.u32.u64.high %v5802_v8, %v5797_v59, %v12671_v24  ;;  %v5736_v0 = vsub.s32 4, %v12622_v15  ;;  %v5801_v48 = vsel %vm5787_vm2, %v5798_v34, %v5800_v36 }
 0x3e5   :  { %v8064_v14 = vadd.s32 4294967294, %v5718_v35  ;;  %v6589_v37 = vand.u32 2139095040, %v12613_v25  ;;  %vm4914_vm15 = vcmp.eq.s32.totalorder %v12609_v58, 0  ;;  %vm12682_vm0 = vcmp.le.f32.partialorder %v5650_v40, 0.7853982 }
 0x3e6   :  { %v12686_v55 = vmul.u32.u64.low %v5802_v8, %v5801_v48  ;;  %v12687_v23 = vmul.u32.u64.high %v5802_v8, %v5801_v48, %v12686_v55  ;;  %vm4917_vm6 = vcmp.eq.s32.totalorder %v12609_v58, 2  ;;  %vm12693_vm14 = vcmp.eq.s32.totalorder %v7871_v51, 1 }
 0x3e7   :  { %vm8065_vm3 = vcmp.lt.s32.totalorder %v8064_v14, 0  ;;  %v5793_v63 = vsel %vm5787_vm2, %v5790_v29, %v5792_v12  ;;  %v6590_v40 = vshrl.u32 %v6589_v37, 23  ;;  %vm4910_vm4 = vweird.f32 %v12288_v39  ;;  %v13866_v55 = vld [vmem:[#allocation15_spill] sm:$0xff] }
 0x3e8   :  { %v5706_v17 = vadd.s32 %v12564_v49, %v12576_v43  ;;  %v5721_v47 = vsel %vm8065_vm3, 0, %v8064_v14  ;;  %v5812_v26 = vadd.s32 1, %v12672_v31  ;;  %v6586_v18 = vand.u32 2147483647, %v12613_v25 }
 0x3e9   :  { %v5722_v27 = vsub.s32 32, %v5721_v47  ;;  %v5726_v51 = vsub.s32 4294967266, %v5721_v47  ;;  %v5737_v41 = vsel %vm5652_vm13, %v5736_v0, %v12622_v15  ;;  %v8098_v46 = vadd.s32 4294967169, %v6590_v40 }
 0x3ea   :  { %v5723_v54 = vshll.u32 %v12641_v52, %v5721_v47  ;;  %v5809_v4 = vmul.u32 %v5802_v8, %v5793_v63  ;;  %vm5811_vm7 = vc.u32 %v12687_v23, %v12671_v24  ;;  %v12710_v38 = vadd.f32 %v2787_v20, %v2689_v57  ;;  %v8634_v49 = vpop.eup %8633 }
 0x3eb   :  { %v5724_v43 = vshrl.u32 %v5706_v17, %v5722_v27  ;;  %v5727_v60 = vadd.s32 127, %v5726_v51  ;;  %v5813_v21 = vsel %vm5811_vm7, %v5812_v26, %v12672_v31  ;;  %v6596_v33 = vadd.s32 1, %v8098_v46  ;;  %v8636_v9 = vpop.eup %8635  ;;  %v13867_v51 = vld [vmem:[#allocation12_spill] sm:$0xff]  ;;  %v13868_v46 = vld [vmem:[#allocation13_spill] sm:$0xff] }
 0x3ec   :  { %v4918_v7 = vxor.u32 2147483648, %v8634_v49  ;;  %v5739_v15 = vsel %vm12682_vm0, 0, %v5737_v41  ;;  %v5814_v56 = vadd.s32 %v5813_v21, %v5809_v4  ;;  %v6593_v52 = vand.u32 8388607, %v6586_v18 }
 0x3ed   :  { %v4915_v59 = vxor.u32 2147483648, %v8636_v9  ;;  %v5725_v34 = vor.u32 %v5724_v43, %v5723_v54  ;;  %v5728_v10 = vshll.u32 %v5727_v60, 23  ;;  %vm6597_vm12 = vcmp.gt.s32.totalorder %v6596_v33, 0 }
 0x3ee   :  { %v4919_v8 = vsel %vm4917_vm6, %v4918_v7, %v8636_v9  ;;  %v5815_v35 = vadd.s32 536870912, %v5814_v56  ;;  %v6598_v57 = vsel %vm6597_vm12, %v6596_v33, 0  ;;  %v12721_v29 = vadd.f32 %v12269_v45, %v12710_v38 }
 0x3ef   :  { %vm4913_vm8 = vcmp.lt.s32.totalorder %v12609_v58, 2  ;;  %v4916_v12 = vsel %vm4914_vm15, %v8634_v49, %v4915_v59  ;;  %v5729_v36 = vor.u32 4788187, %v5728_v10  ;;  %v5743_v31 = vadd.s32 3, %v5739_v15 }
 0x3f0   :  { %v4920_v14 = vsel %vm4913_vm8, %v4916_v12, %v4919_v8  ;;  %v12726_v0 = vshrl.u32 %v5815_v35, 30  ;;  %v6594_v48 = vor.u32 8388608, %v6593_v52  ;;  %v6600_v37 = vand.u32 31, %v6598_v57 }
 0x3f1   :  { %v2478_v63 = vadd.f32 %v13866_v55, %v12430_v5  ;;  %v4921_v40 = vsel %vm4910_vm4, nan, %v4920_v14  ;;  %v5730_v20 = vand.u32 2147483647, %v5729_v36  ;;  %v5732_v17 = vcvt.s32.f32 %v5725_v34 }
 0x3f2   :  { %v7892_v58 = vsel %vm12693_vm14, %v12260_v22, %v4921_v40  ;;  %v5817_v47 = vshll.u32 %v12726_v0, 30  ;;  %v6601_v26 = vsub.s32 32, %v6600_v37  ;;  %v6693_v27 = vand.u32 2139095040, %v12721_v29 }
 0x3f3   :  { %v12739_v41 = vadd.f32 %v13867_v51, %v12492_v62  ;;  %v12742_v5 = vadd.f32 %v13868_v46, %v2478_v63  ;;  %7931 = vst [vmem:[#allocation5 + $0x38] sm:$0xff] %v7892_v58  ;;  %v5733_v39 = vmul.f32 %v5732_v17, %v5730_v20  ;;  %v12744_v54 = vand.u32 3, %v5743_v31 }
 0x3f4   :  { %v12746_v4 = vsub.s32 %v5814_v56, %v5817_v47  ;;  %v6599_v49 = vshrl.u32 %v6598_v57, 5  ;;  %v6604_v22 = vshrl.u32 %v13689_v28, %v6601_v26  ;;  %v12749_v43 = vshll.u32 %v6594_v48, 8 }
 0x3f5   :  { %v5734_v60 = vxor.u32 2147483648, %v5733_v39  ;;  %v6603_v21 = vshll.u32 %v13693_v61, %v6600_v37  ;;  %v6607_v62 = vshrl.u32 %v13684_v32, %v6601_v26  ;;  %v6610_v33 = vshrl.u32 %v13685_v1, %v6601_v26 }
 0x3f6   :  { %v5820_v9 = vsub.s32 0, %v12746_v4  ;;  %v6606_v7 = vshll.u32 %v13689_v28, %v6600_v37  ;;  %v6609_v15 = vshll.u32 %v13684_v32, %v6600_v37  ;;  %v6694_v56 = vshrl.u32 %v6693_v27, 23 }
 0x3f7   :  { %v5735_v52 = vsel %vm5652_vm13, %v5734_v60, %v5733_v39  ;;  %v6605_v59 = vor.u32 %v6604_v22, %v6603_v21  ;;  %v6612_v34 = vshll.u32 %v13685_v1, %v6600_v37  ;;  %v6613_v10 = vshrl.u32 %v13791_v16, %v6601_v26 }
 0x3f8   :  { %v5738_v8 = vsel %vm12682_vm0, %v12411_v44, %v5735_v52  ;;  %v8067_v35 = vmin.u32 %v5820_v9, %v12746_v4  ;;  %v6608_v57 = vor.u32 %v6607_v62, %v6606_v7  ;;  %v6611_v12 = vor.u32 %v6610_v33, %v6609_v15  ;;  %v2693_v15 = vpop.f32.mrf.mxu0 }
 0x3f9   :  { %8637 = vcosq.f32 %v5738_v8  ;;  %v6614_v36 = vor.u32 %v6613_v10, %v6612_v34  ;;  %v6615_v31 = vshll.u32 %v13791_v16, %v6600_v37  ;;  %v6616_v14 = vshrl.u32 %v13792_v53, %v6601_v26 }
 0x3fa   :  { %8639 = vsinq.f32 %v5738_v8  ;;  %v5822_v48 = vclz %v8067_v35  ;;  %vm6618_vm9 = vcmp.lt.s32.totalorder %v6599_v49, 1  ;;  %vm6619_vm1 = vcmp.lt.s32.totalorder %v6599_v49, 2 }
 0x3fb   :  { %v6602_v55 = vshrl.u32 %v13693_v61, %v6601_v26  ;;  %v6617_v63 = vor.u32 %v6616_v14, %v6615_v31  ;;  %vm6620_vm10 = vcmp.lt.s32.totalorder %v6599_v49, 3  ;;  %vm6621_vm11 = vcmp.lt.s32.totalorder %v6599_v49, 4 }
 0x3fc   :  { %vm5756_vm2 = vcmp.lt.s32.totalorder %v12497_v19, 0  ;;  %v8068_v11 = vadd.s32 4294967294, %v5822_v48  ;;  %v6623_v40 = vsel %vm6621_vm11, %v6611_v12, 2102212464  ;;  %v6626_v20 = vsel %vm6618_vm9, %v6605_v59, %v6608_v57 }
 0x3fd   :  { %v6627_v17 = vsel %vm6621_vm11, %v6614_v36, 920167782  ;;  %v6622_v58 = vsel %vm6618_vm9, %v6602_v55, %v6605_v59  ;;  %v6630_v37 = vsel %vm6618_vm9, %v6608_v57, %v6611_v12  ;;  %v6631_v27 = vsel %vm6621_vm11, %v6617_v63, 1326507024 }
 0x3fe   :  { %v6628_v47 = vsel %vm6620_vm10, %v6611_v12, %v6627_v17  ;;  %vm8069_vm13 = vcmp.lt.s32.totalorder %v8068_v11, 0  ;;  %v6624_v51 = vsel %vm6620_vm10, %v6608_v57, %v6623_v40  ;;  %v6632_v39 = vsel %vm6620_vm10, %v6614_v36, %v6631_v27  ;;  %v2792_v36 = vpop.f32.mrf.mxu1 }
 0x3ff   :  { %v6629_v46 = vsel %vm6619_vm1, %v6626_v20, %v6628_v47  ;;  %v5825_v22 = vsel %vm8069_vm13, 0, %v8068_v11  ;;  %v6633_v26 = vsel %vm6619_vm1, %v6630_v37, %v6632_v39  ;;  %vm12778_vm15 = vcmp.le.f32.partialorder %v5754_v3, 0.7853982 }
 0x400   :  { %v12772_v60 = vmul.u32.u64.low %v12749_v43, %v6629_v46  ;;  %v12773_v21 = vmul.u32.u64.high %v12749_v43, %v6629_v46, %v12772_v60  ;;  %v5810_v33 = vadd.s32 %v12671_v24, %v12687_v23  ;;  %v5826_v9 = vsub.s32 32, %v5825_v22 }
 0x401   :  { %v5830_v7 = vsub.s32 4294967266, %v5825_v22  ;;  %v5840_v52 = vsub.s32 4, %v12726_v0  ;;  %v12786_v59 = vmul.u32.u64.low %v12749_v43, %v6633_v26  ;;  %v12787_v34 = vmul.u32.u64.high %v12749_v43, %v6633_v26, %v12786_v59 }
 0x402   :  { %v8102_v10 = vadd.s32 4294967169, %v6694_v56  ;;  %v5827_v8 = vshll.u32 %v12746_v4, %v5825_v22  ;;  %v5828_v35 = vshrl.u32 %v5810_v33, %v5826_v9  ;;  %v6625_v57 = vsel %vm6619_vm1, %v6622_v58, %v6624_v51 }
 0x403   :  { %v5831_v3 = vadd.s32 127, %v5830_v7  ;;  %vm5742_vm0 = vweird.f32 %v12411_v44  ;;  %vm5745_vm6 = vcmp.lt.s32.totalorder %v12744_v54, 2  ;;  %v2694_v24 = vadd.f32 %v2693_v15, %v12739_v41 }
 0x404   :  { %v6644_v23 = vadd.s32 1, %v12773_v21  ;;  %v6700_v12 = vadd.s32 1, %v8102_v10  ;;  %vm5746_vm3 = vcmp.eq.s32.totalorder %v12744_v54, 0  ;;  %v5829_v31 = vor.u32 %v5828_v35, %v5827_v8 }
 0x405   :  { %v5832_v56 = vshll.u32 %v5831_v3, 23  ;;  %v6690_v4 = vand.u32 2147483647, %v12721_v29  ;;  %v5841_v49 = vsel %vm5756_vm2, %v5840_v52, %v12726_v0  ;;  %v6641_v14 = vmul.u32 %v12749_v43, %v6625_v57 }
 0x406   :  { %vm6643_vm4 = vc.u32 %v12787_v34, %v12772_v60  ;;  %vm6701_vm7 = vcmp.gt.s32.totalorder %v6700_v12, 0  ;;  %v8638_v41 = vpop.eup %8637  ;;  %v12804_v11 = vadd.f32 %v2792_v36, %v2694_v24  ;;  %vm5749_vm12 = vcmp.eq.s32.totalorder %v12744_v54, 2 }
 0x407   :  { %v5833_v48 = vor.u32 4788187, %v5832_v56  ;;  %v6645_v55 = vsel %vm6643_vm4, %v6644_v23, %v12773_v21  ;;  %v6702_v63 = vsel %vm6701_vm7, %v6700_v12, 0  ;;  %v8640_v40 = vpop.eup %8639  ;;  %v5750_v20 = vxor.u32 2147483648, %v8638_v41  ;;  %v2695_v23 = vpop.f32.mrf.mxu0 }
 0x408   :  { %v6646_v17 = vadd.s32 %v6645_v55, %v6641_v14  ;;  %v6704_v58 = vand.u32 31, %v6702_v63  ;;  %v5747_v0 = vxor.u32 2147483648, %v8640_v40  ;;  %v5836_v43 = vcvt.s32.f32 %v5829_v31 }
 0x409   :  { %v5834_v47 = vand.u32 2147483647, %v5833_v48  ;;  %v5843_v37 = vsel %vm12778_vm15, 0, %v5841_v49  ;;  %v5751_v27 = vsel %vm5749_vm12, %v5750_v20, %v8640_v40  ;;  %v6697_v46 = vand.u32 8388607, %v6690_v4 }
 0x40a   :  { %v6647_v51 = vadd.s32 536870912, %v6646_v17  ;;  %v6705_v39 = vsub.s32 32, %v6704_v58  ;;  %v5748_v22 = vsel %vm5746_vm3, %v8638_v41, %v5747_v0  ;;  %v6707_v21 = vshll.u32 %v13693_v61, %v6704_v58 }
 0x40b   :  { %v5837_v26 = vmul.f32 %v5836_v43, %v5834_v47  ;;  %v12816_v33 = vadd.f32 %v12250_v42, %v12804_v11  ;;  %v5752_v9 = vsel %vm5745_vm6, %v5748_v22, %v5751_v27  ;;  %v6710_v52 = vshll.u32 %v13689_v28, %v6704_v58 }
 0x40c   :  { %v12820_v7 = vshrl.u32 %v6647_v51, 30  ;;  %v6708_v15 = vshrl.u32 %v13689_v28, %v6705_v39  ;;  %v5753_v59 = vsel %vm5742_vm0, nan, %v5752_v9  ;;  %v6711_v8 = vshrl.u32 %v13684_v32, %v6705_v39 }
 0x40d   :  { %v5838_v10 = vxor.u32 2147483648, %v5837_v26  ;;  %v6714_v35 = vshrl.u32 %v13685_v1, %v6705_v39  ;;  %v7900_v42 = vsel %vm12600_vm5, %v12336_v30, %v5753_v59  ;;  %v6698_v3 = vor.u32 8388608, %v6697_v46 }
 0x40e   :  { %v6649_v54 = vshll.u32 %v12820_v7, 30  ;;  %v6703_v57 = vshrl.u32 %v6702_v63, 5  ;;  %7940 = vst [vmem:[#allocation5 + $0x78] sm:$0xff] %v7900_v42  ;;  %v6709_v44 = vor.u32 %v6708_v15, %v6707_v21  ;;  %v6712_v12 = vor.u32 %v6711_v8, %v6710_v52 }
 0x40f   :  { %v5839_v24 = vsel %vm5756_vm2, %v5838_v10, %v5837_v26  ;;  %v6713_v36 = vshll.u32 %v13684_v32, %v6704_v58  ;;  %v6716_v30 = vshll.u32 %v13685_v1, %v6704_v58  ;;  %v6717_v49 = vshrl.u32 %v13791_v16, %v6705_v39 }
 0x410   :  { %v5842_v31 = vsel %vm12778_vm15, %v12497_v19, %v5839_v24  ;;  %v12838_v56 = vsub.s32 %v6646_v17, %v6649_v54  ;;  %v6719_v41 = vshll.u32 %v13791_v16, %v6704_v58  ;;  %v6720_v48 = vshrl.u32 %v13792_v53, %v6705_v39 }
 0x411   :  { %8641 = vcosq.f32 %v5842_v31  ;;  %v6715_v14 = vor.u32 %v6714_v35, %v6713_v36  ;;  %v12846_v63 = vadd.f32 %v2695_v23, %v12742_v5  ;;  %v6718_v62 = vor.u32 %v6717_v49, %v6716_v30 }
 0x412   :  { %8643 = vsinq.f32 %v5842_v31  ;;  %v6652_v55 = vsub.s32 0, %v12838_v56  ;;  %v5847_v40 = vadd.s32 3, %v5843_v37  ;;  %v6721_v20 = vor.u32 %v6720_v48, %v6719_v41 }
 0x413   :  { %v6738_v17 = vshll.u32 %v6698_v3, 8  ;;  %v7525_v0 = vand.u32 2139095040, %v12816_v33  ;;  %v6706_v43 = vshrl.u32 %v13693_v61, %v6705_v39  ;;  %vm6722_vm8 = vcmp.lt.s32.totalorder %v6703_v57, 1 }
 0x414   :  { %v8099_v47 = vmin.u32 %v6652_v55, %v12838_v56  ;;  %vm6725_vm9 = vcmp.lt.s32.totalorder %v6703_v57, 4  ;;  %vm6723_vm1 = vcmp.lt.s32.totalorder %v6703_v57, 2  ;;  %v6730_v27 = vsel %vm6722_vm8, %v6709_v44, %v6712_v12 }
 0x415   :  { %v6727_v58 = vsel %vm6725_vm9, %v6715_v14, 2102212464  ;;  %v6731_v51 = vsel %vm6725_vm9, %v6718_v62, 920167782  ;;  %vm6724_vm10 = vcmp.lt.s32.totalorder %v6703_v57, 3  ;;  %v6726_v5 = vsel %vm6722_vm8, %v6706_v43, %v6709_v44 }
 0x416   :  { %v6654_v46 = vclz %v8099_v47  ;;  %v6734_v22 = vsel %vm6722_vm8, %v6712_v12, %v6715_v14  ;;  %v6728_v26 = vsel %vm6724_vm10, %v6712_v12, %v6727_v58  ;;  %v6732_v37 = vsel %vm6724_vm10, %v6715_v14, %v6731_v51  ;;  %v2794_v58 = vpop.f32.mrf.mxu1 }
 0x417   :  { %v6735_v21 = vsel %vm6725_vm9, %v6721_v20, 1326507024  ;;  %v7526_v9 = vshrl.u32 %v7525_v0, 23  ;;  %v5848_v15 = vand.u32 3, %v5847_v40  ;;  %v6733_v59 = vsel %vm6723_vm1, %v6730_v27, %v6732_v37 }
 0x418   :  { %v8100_v52 = vadd.s32 4294967294, %v6654_v46  ;;  %v6736_v10 = vsel %vm6724_vm10, %v6718_v62, %v6735_v21  ;;  %v6729_v39 = vsel %vm6723_vm1, %v6726_v5, %v6728_v26  ;;  %vm5846_vm2 = vweird.f32 %v12497_v19 }
 0x419   :  { %v6737_v8 = vsel %vm6723_vm1, %v6734_v22, %v6736_v10  ;;  %v12854_v35 = vmul.u32.u64.low %v6738_v17, %v6733_v59  ;;  %v12855_v42 = vmul.u32.u64.high %v6738_v17, %v6733_v59, %v12854_v35  ;;  %v8134_v24 = vadd.s32 4294967169, %v7526_v9 }
 0x41a   :  { %vm8101_vm11 = vcmp.lt.s32.totalorder %v8100_v52, 0  ;;  %v12858_v54 = vmul.u32.u64.low %v6738_v17, %v6737_v8  ;;  %v12859_v3 = vmul.u32.u64.high %v6738_v17, %v6737_v8, %v12858_v54  ;;  %vm12864_vm13 = vcmp.le.f32.partialorder %v6586_v18, 0.7853982 }
 0x41b   :  { %vm6588_vm15 = vcmp.lt.s32.totalorder %v12613_v25, 0  ;;  %v6657_v57 = vsel %vm8101_vm11, 0, %v8100_v52  ;;  %v6672_v44 = vsub.s32 4, %v12820_v7  ;;  %v6642_v12 = vadd.s32 %v12772_v60, %v12787_v34 }
 0x41c   :  { %v6658_v36 = vsub.s32 32, %v6657_v57  ;;  %v6662_v31 = vsub.s32 4294967266, %v6657_v57  ;;  %v7532_v30 = vadd.s32 1, %v8134_v24  ;;  %vm5853_vm0 = vcmp.eq.s32.totalorder %v5848_v15, 2 }
 0x41d   :  { %v6745_v49 = vmul.u32 %v6738_v17, %v6729_v39  ;;  %v6748_v14 = vadd.s32 1, %v12855_v42  ;;  %v7522_v18 = vand.u32 2147483647, %v12816_v33  ;;  %v6659_v48 = vshll.u32 %v12838_v56, %v6657_v57 }
 0x41e   :  { %v8642_v41 = vpop.eup %8641  ;;  %v6660_v55 = vshrl.u32 %v6642_v12, %v6658_v36  ;;  %v6663_v62 = vadd.s32 127, %v6662_v31  ;;  %vm6747_vm6 = vc.u32 %v12859_v3, %v12854_v35  ;;  %v6673_v60 = vsel %vm6588_vm15, %v6672_v44, %v12820_v7 }
 0x41f   :  { %v8644_v40 = vpop.eup %8643  ;;  %v5854_v20 = vxor.u32 2147483648, %v8642_v41  ;;  %v6749_v34 = vsel %vm6747_vm6, %v6748_v14, %v12855_v42  ;;  %vm7533_vm3 = vcmp.gt.s32.totalorder %v7532_v30, 0  ;;  %vm5849_vm4 = vcmp.lt.s32.totalorder %v5848_v15, 2 }
 0x420   :  { %v5851_v17 = vxor.u32 2147483648, %v8644_v40  ;;  %v6661_v0 = vor.u32 %v6660_v55, %v6659_v48  ;;  %v6664_v47 = vshll.u32 %v6663_v62, 23  ;;  %v6750_v43 = vadd.s32 %v6749_v34, %v6745_v49 }
 0x421   :  { %vm5850_vm7 = vcmp.eq.s32.totalorder %v5848_v15, 0  ;;  %v5855_v56 = vsel %vm5853_vm0, %v5854_v20, %v8644_v40  ;;  %v7534_v27 = vsel %vm7533_vm3, %v7532_v30, 0  ;;  %v6675_v5 = vsel %vm12864_vm13, 0, %v6673_v60 }
 0x422   :  { %v5852_v51 = vsel %vm5850_vm7, %v8642_v41, %v5851_v17  ;;  %v6665_v46 = vor.u32 4788187, %v6664_v47  ;;  %v6751_v22 = vadd.s32 536870912, %v6750_v43  ;;  %v7529_v26 = vand.u32 8388607, %v7522_v18  ;;  %v12920_v47 = vpop.f32.mrf.mxu0 }
 0x423   :  { %v5856_v7 = vsel %vm5849_vm4, %v5852_v51, %v5855_v56  ;;  %v7536_v37 = vand.u32 31, %v7534_v27  ;;  %v12887_v21 = vadd.f32 %v2794_v58, %v12846_v63  ;;  %v6668_v52 = vcvt.s32.f32 %v6661_v0 }
 0x424   :  { %v5857_v9 = vsel %vm5846_vm2, nan, %v5856_v7  ;;  %v6666_v15 = vand.u32 2147483647, %v6665_v46  ;;  %v12891_v59 = vshrl.u32 %v6751_v22, 30  ;;  %v6679_v42 = vadd.s32 3, %v6675_v5  ;;  %v12927_v5 = vpop.f32.mrf.mxu1 }
 0x425   :  { %v7901_v10 = vsel %vm12693_vm14, %v12469_v6, %v5857_v9  ;;  %v7537_v39 = vsub.s32 32, %v7536_v37  ;;  %v7530_v24 = vor.u32 8388608, %v7529_v26  ;;  %v12901_v57 = vadd.f32 %v12269_v45, %v12887_v21 }
 0x426   :  { %7941 = vst [vmem:[#allocation5 + $0x80] sm:$0xff] %v7901_v10  ;;  %v6669_v8 = vmul.f32 %v6668_v52, %v6666_v15  ;;  %v6753_v54 = vshll.u32 %v12891_v59, 30  ;;  %v7539_v6 = vshll.u32 %v13693_v61, %v7536_v37  ;;  %v7535_v31 = vshrl.u32 %v7534_v27, 5  ;;  %v12930_v10 = vpop.f32.mrf.mxu0 }
 0x427   :  { %v7540_v63 = vshrl.u32 %v13689_v28, %v7537_v39  ;;  %v7543_v19 = vshrl.u32 %v13684_v32, %v7537_v39  ;;  %v7546_v36 = vshrl.u32 %v13685_v1, %v7537_v39  ;;  %v7542_v30 = vshll.u32 %v13689_v28, %v7536_v37 }
 0x428   :  { %v6670_v44 = vxor.u32 2147483648, %v6669_v8  ;;  %v12903_v12 = vsub.s32 %v6750_v43, %v6753_v54  ;;  %v7545_v49 = vshll.u32 %v13684_v32, %v7536_v37  ;;  %v7548_v14 = vshll.u32 %v13685_v1, %v7536_v37 }
 0x429   :  { %v7541_v48 = vor.u32 %v7540_v63, %v7539_v6  ;;  %v7549_v55 = vshrl.u32 %v13791_v16, %v7537_v39  ;;  %v7544_v40 = vor.u32 %v7543_v19, %v7542_v30  ;;  %v7551_v20 = vshll.u32 %v13791_v16, %v7536_v37 }
 0x42a   :  { %v6671_v41 = vsel %vm6588_vm15, %v6670_v44, %v6669_v8  ;;  %v6756_v45 = vsub.s32 0, %v12903_v12  ;;  %v7552_v60 = vshrl.u32 %v13792_v53, %v7537_v39  ;;  %v7547_v17 = vor.u32 %v7546_v36, %v7545_v49  ;;  %v12941_v36 = vpop.f32.mrf.mxu1 }
 0x42b   :  { %v6674_v62 = vsel %vm12864_vm13, %v12613_v25, %v6671_v41  ;;  %v7550_v0 = vor.u32 %v7549_v55, %v7548_v14  ;;  %v12922_v58 = vshll.u32 %v7530_v24, 8  ;;  %v7629_v56 = vand.u32 2139095040, %v12901_v57 }
 0x42c   :  { %8645 = vcosq.f32 %v6674_v62  ;;  %v8103_v34 = vmin.u32 %v6756_v45, %v12903_v12  ;;  %v7553_v43 = vor.u32 %v7552_v60, %v7551_v20  ;;  %v6776_v27 = vsub.s32 4, %v12891_v59 }
 0x42d   :  { %8647 = vsinq.f32 %v6674_v62  ;;  %v7538_v51 = vshrl.u32 %v13693_v61, %v7537_v39  ;;  %vm7554_vm12 = vcmp.lt.s32.totalorder %v7535_v31, 1  ;;  %vm7555_vm8 = vcmp.lt.s32.totalorder %v7535_v31, 2  ;;  %v12950_v62 = vpop.f32.mrf.mxu0 }
 0x42e   :  { %v6758_v23 = vclz %v8103_v34  ;;  %vm7556_vm9 = vcmp.lt.s32.totalorder %v7535_v31, 3  ;;  %vm7557_vm1 = vcmp.lt.s32.totalorder %v7535_v31, 4  ;;  %v7562_v46 = vsel %vm7554_vm12, %v7541_v48, %v7544_v40 }
 0x42f   :  { %v7559_v7 = vsel %vm7557_vm1, %v7547_v17, 2102212464  ;;  %v7563_v26 = vsel %vm7557_vm1, %v7550_v0, 920167782  ;;  %v7566_v37 = vsel %vm7554_vm12, %v7544_v40, %v7547_v17  ;;  %v7558_v9 = vsel %vm7554_vm12, %v7538_v51, %v7541_v48 }
 0x430   :  { %v8104_v22 = vadd.s32 4294967294, %v6758_v23  ;;  %v7564_v15 = vsel %vm7556_vm9, %v7547_v17, %v7563_v26  ;;  %v7567_v52 = vsel %vm7557_vm1, %v7553_v43, 1326507024  ;;  %v7630_v8 = vshrl.u32 %v7629_v56, 23  ;;  %v12970_v23 = vpop.f32.mrf.mxu0  ;;  %v12978_v26 = vld [vmem:[%s13607_s2 + $0x8] ss:$0 sm:$0xff] }
 0x431   :  { %v7560_v39 = vsel %vm7556_vm9, %v7544_v40, %v7559_v7  ;;  %v7565_v54 = vsel %vm7555_vm8, %v7562_v46, %v7564_v15  ;;  %v7568_v24 = vsel %vm7556_vm9, %v7550_v0, %v7567_v52  ;;  %v6680_v30 = vand.u32 3, %v6679_v42  ;;  %v12959_v0 = vpop.f32.mrf.mxu1 }
 0x432   :  { %vm8105_vm10 = vcmp.lt.s32.totalorder %v8104_v22, 0  ;;  %v7569_v19 = vsel %vm7555_vm8, %v7566_v37, %v7568_v24  ;;  %v12937_v44 = vmul.u32.u64.low %v12922_v58, %v7565_v54  ;;  %v12938_v6 = vmul.u32.u64.high %v12922_v58, %v7565_v54, %v12937_v44 }
 0x433   :  { %v6761_v63 = vsel %vm8105_vm10, 0, %v8104_v22  ;;  %v6746_v49 = vadd.s32 %v12854_v35, %v12859_v3  ;;  %vm6692_vm11 = vcmp.lt.s32.totalorder %v12721_v29, 0  ;;  %v8138_v55 = vadd.s32 4294967169, %v7630_v8  ;;  %v12982_v15 = vpop.f32.mrf.mxu1 }
 0x434   :  { %v6762_v14 = vsub.s32 32, %v6761_v63  ;;  %v6766_v41 = vsub.s32 4294967266, %v6761_v63  ;;  %v12947_v45 = vmul.u32.u64.low %v12922_v58, %v7569_v19  ;;  %v12948_v48 = vmul.u32.u64.high %v12922_v58, %v7569_v19, %v12947_v45  ;;  %v12987_v19 = vpop.f32.mrf.mxu0 }
 0x435   :  { %v6763_v40 = vshll.u32 %v12903_v12, %v6761_v63  ;;  %v7561_v42 = vsel %vm7555_vm8, %v7558_v9, %v7560_v39  ;;  %v6777_v35 = vsel %vm6692_vm11, %v6776_v27, %v12891_v59  ;;  %v7580_v3 = vadd.s32 1, %v12938_v6 }
 0x436   :  { %v6764_v20 = vshrl.u32 %v6746_v49, %v6762_v14  ;;  %v6767_v60 = vadd.s32 127, %v6766_v41  ;;  %v7626_v34 = vand.u32 2147483647, %v12901_v57  ;;  %v7636_v17 = vadd.s32 1, %v8138_v55 }
 0x437   :  { %vm6682_vm2 = vcmp.eq.s32.totalorder %v6680_v30, 0  ;;  %vm12963_vm13 = vcmp.le.f32.partialorder %v6690_v4, 0.7853982  ;;  %vm6685_vm15 = vcmp.eq.s32.totalorder %v6680_v30, 2  ;;  %v7577_v59 = vmul.u32 %v12922_v58, %v7561_v42 }
 0x438   :  { %v6765_v31 = vor.u32 %v6764_v20, %v6763_v40  ;;  %v6768_v43 = vshll.u32 %v6767_v60, 23  ;;  %vm7579_vm0 = vc.u32 %v12948_v48, %v12937_v44  ;;  %vm7637_vm6 = vcmp.gt.s32.totalorder %v7636_v17, 0  ;;  %v8274_v60 = vpop.f32.mrf.mxu1 }
 0x439   :  { %v8646_v56 = vpop.eup %8645  ;;  %v6779_v4 = vsel %vm12963_vm13, 0, %v6777_v35  ;;  %v7581_v22 = vsel %vm7579_vm0, %v7580_v3, %v12938_v6  ;;  %v7633_v37 = vand.u32 8388607, %v7626_v34  ;;  %v7638_v9 = vsel %vm7637_vm6, %v7636_v17, 0 }
 0x43a   :  { %v8648_v27 = vpop.eup %8647  ;;  %v6686_v51 = vxor.u32 2147483648, %v8646_v56  ;;  %v6769_v46 = vor.u32 4788187, %v6768_v43  ;;  %v7582_v58 = vadd.s32 %v7581_v22, %v7577_v59  ;;  %v6772_v39 = vcvt.s32.f32 %v6765_v31  ;;  %v13002_v43 = vpop.f32.mrf.mxu0 }
 0x43b   :  { %v6683_v7 = vxor.u32 2147483648, %v8648_v27  ;;  %v7640_v54 = vand.u32 31, %v7638_v9  ;;  %vm6678_vm3 = vweird.f32 %v12613_v25  ;;  %vm6681_vm4 = vcmp.lt.s32.totalorder %v6680_v30, 2 }
 0x43c   :  { %v6687_v52 = vsel %vm6685_vm15, %v6686_v51, %v8648_v27  ;;  %v6770_v8 = vand.u32 2147483647, %v6769_v46  ;;  %v7583_v63 = vadd.s32 536870912, %v7582_v58  ;;  %v2882_v14 = vadd.f32 %v12920_v47, %v12978_v26  ;;  %v13021_v12 = vpop.f32.mrf.mxu0 }
 0x43d   :  { %v6684_v24 = vsel %vm6682_vm2, %v8646_v56, %v6683_v7  ;;  %v7641_v41 = vsub.s32 32, %v7640_v54  ;;  %v6783_v55 = vadd.s32 3, %v6779_v4  ;;  %v7634_v20 = vor.u32 8388608, %v7633_v37  ;;  %v13014_v7 = vpop.f32.mrf.mxu1 }
 0x43e   :  { %v6688_v6 = vsel %vm6681_vm4, %v6684_v24, %v6687_v52  ;;  %v6773_v49 = vmul.f32 %v6772_v39, %v6770_v8  ;;  %v12991_v40 = vshrl.u32 %v7583_v63, 30  ;;  %v7643_v42 = vshll.u32 %v13693_v61, %v7640_v54 }
 0x43f   :  { %v6689_v45 = vsel %vm6678_vm3, nan, %v6688_v6  ;;  %v7644_v35 = vshrl.u32 %v13689_v28, %v7641_v41  ;;  %v7646_v47 = vshll.u32 %v13689_v28, %v7640_v54  ;;  %v7647_v17 = vshrl.u32 %v13684_v32, %v7641_v41 }
 0x440   :  { %v7909_v25 = vsel %vm12600_vm5, %v12585_v13, %v6689_v45  ;;  %v6774_v30 = vxor.u32 2147483648, %v6773_v49  ;;  %v7585_v3 = vshll.u32 %v12991_v40, 30  ;;  %v7650_v31 = vshrl.u32 %v13685_v1, %v7641_v41 }
 0x441   :  { %7949 = vst [vmem:[#allocation5 + $0xc0] sm:$0xff] %v7909_v25  ;;  %v7649_v13 = vshll.u32 %v13684_v32, %v7640_v54  ;;  %v7652_v59 = vshll.u32 %v13685_v1, %v7640_v54  ;;  %v7653_v27 = vshrl.u32 %v13791_v16, %v7641_v41  ;;  %v7639_v4 = vshrl.u32 %v7638_v9, 5  ;;  %v13030_v25 = vpop.f32.mrf.mxu1 }
 0x442   :  { %v6775_v56 = vsel %vm6692_vm11, %v6774_v30, %v6773_v49  ;;  %v13012_v46 = vsub.s32 %v7582_v58, %v7585_v3  ;;  %v7645_v22 = vor.u32 %v7644_v35, %v7643_v42  ;;  %v7648_v37 = vor.u32 %v7647_v17, %v7646_v47 }
 0x443   :  { %v6778_v51 = vsel %vm12963_vm13, %v12721_v29, %v6775_v56  ;;  %v7651_v52 = vor.u32 %v7650_v31, %v7649_v13  ;;  %v7654_v8 = vor.u32 %v7653_v27, %v7652_v59  ;;  %v13016_v39 = vand.u32 3, %v6783_v55  ;;  %v13035_v59 = vpop.f32.mrf.mxu1 }
 0x444   :  { %8649 = vcosq.f32 %v6778_v51  ;;  %v7588_v24 = vsub.s32 0, %v13012_v46  ;;  %v2872_v63 = vadd.f32 %v12978_v26, %v12930_v10  ;;  %v7655_v58 = vshll.u32 %v13791_v16, %v7640_v54 }
 0x445   :  { %8651 = vsinq.f32 %v6778_v51  ;;  %v7656_v9 = vshrl.u32 %v13792_v53, %v7641_v41  ;;  %v13025_v6 = vshll.u32 %v7634_v20, 8  ;;  %v2994_v49 = vadd.f32 %v12927_v5, %v2882_v14  ;;  %v13032_v20 = vpop.f32.mrf.mxu0 }
 0x446   :  { %v8135_v45 = vmin.u32 %v7588_v24, %v13012_v46  ;;  %v7642_v55 = vshrl.u32 %v13693_v61, %v7641_v41  ;;  %vm7658_vm7 = vcmp.lt.s32.totalorder %v7639_v4, 1  ;;  %vm7661_vm12 = vcmp.lt.s32.totalorder %v7639_v4, 4 }
 0x447   :  { %v7657_v30 = vor.u32 %v7656_v9, %v7655_v58  ;;  %v7663_v10 = vsel %vm7661_vm12, %v7651_v52, 2102212464  ;;  %v7666_v42 = vsel %vm7658_vm7, %v7645_v22, %v7648_v37  ;;  %v7667_v35 = vsel %vm7661_vm12, %v7654_v8, 920167782 }
 0x448   :  { %v7590_v3 = vclz %v8135_v45  ;;  %vm7659_vm8 = vcmp.lt.s32.totalorder %v7639_v4, 2  ;;  %vm7660_vm9 = vcmp.lt.s32.totalorder %v7639_v4, 3  ;;  %v7662_v54 = vsel %vm7658_vm7, %v7642_v55, %v7645_v22  ;;  %v8298_v55 = vpop.f32.mrf.mxu1 }
 0x449   :  { %v7664_v47 = vsel %vm7660_vm9, %v7648_v37, %v7663_v10  ;;  %v7668_v5 = vsel %vm7660_vm9, %v7651_v52, %v7667_v35  ;;  %v7670_v14 = vsel %vm7658_vm7, %v7648_v37, %v7651_v52  ;;  %v7671_v17 = vsel %vm7661_vm12, %v7657_v30, 1326507024  ;;  %v8286_v52 = vpop.f32.mrf.mxu0 }
 0x44a   :  { %v8136_v31 = vadd.s32 4294967294, %v7590_v3  ;;  %v7669_v41 = vsel %vm7659_vm8, %v7666_v42, %v7668_v5  ;;  %v7672_v56 = vsel %vm7660_vm9, %v7654_v8, %v7671_v17  ;;  %v3091_v13 = vadd.f32 %v12987_v19, %v2994_v49 }
 0x44b   :  { %v7665_v27 = vsel %vm7659_vm8, %v7662_v54, %v7664_v47  ;;  %v7673_v51 = vsel %vm7659_vm8, %v7670_v14, %v7672_v56  ;;  %v13038_v24 = vmul.u32.u64.low %v13025_v6, %v7669_v41  ;;  %v13039_v58 = vmul.u32.u64.high %v13025_v6, %v7669_v41, %v13038_v24 }
 0x44c   :  { %vm8137_vm1 = vcmp.lt.s32.totalorder %v8136_v31, 0  ;;  %v13043_v4 = vmul.u32.u64.low %v13025_v6, %v7673_v51  ;;  %v13044_v22 = vmul.u32.u64.high %v13025_v6, %v7673_v51, %v13043_v4  ;;  %v3189_v37 = vadd.f32 %v8274_v60, %v3091_v13 }
 0x44d   :  { %vm6782_vm10 = vweird.f32 %v12721_v29  ;;  %vm6785_vm11 = vcmp.lt.s32.totalorder %v13016_v39, 2  ;;  %vm7524_vm2 = vcmp.lt.s32.totalorder %v12816_v33, 0  ;;  %v7593_v19 = vsel %vm8137_vm1, 0, %v8136_v31 }
 0x44e   :  { %v2902_v8 = vadd.f32 %v12950_v62, %v12978_v26  ;;  %vm6789_vm13 = vcmp.eq.s32.totalorder %v13016_v39, 2  ;;  %v7578_v9 = vadd.s32 %v12937_v44, %v12948_v48  ;;  %v7594_v49 = vsub.s32 32, %v7593_v19  ;;  %v13063_v44 = vld [vmem:[%s13608_s3 + $0x8] ss:$0 sm:$0xff] }
 0x44f   :  { %v7598_v45 = vsub.s32 4294967266, %v7593_v19  ;;  %v7681_v60 = vmul.u32 %v13025_v6, %v7665_v27  ;;  %v7684_v30 = vadd.s32 1, %v13039_v58  ;;  %v2988_v10 = vadd.f32 %v12941_v36, %v2872_v63 }
 0x450   :  { %v3291_v42 = vadd.f32 %v8286_v52, %v3189_v37  ;;  %v7595_v3 = vshll.u32 %v13012_v46, %v7593_v19  ;;  %v7596_v54 = vshrl.u32 %v7578_v9, %v7594_v49  ;;  %vm7683_vm15 = vc.u32 %v13044_v22, %v13038_v24 }
 0x451   :  { %v8650_v35 = vpop.eup %8649  ;;  %v7599_v62 = vadd.s32 127, %v7598_v45  ;;  %v7608_v47 = vsub.s32 4, %v12991_v40  ;;  %v7685_v36 = vsel %vm7683_vm15, %v7684_v30, %v13039_v58  ;;  %vm6786_vm0 = vcmp.eq.s32.totalorder %v13016_v39, 0  ;;  %v3284_v30 = vpop.f32.mrf.mxu0 }
 0x452   :  { %v8652_v48 = vpop.eup %8651  ;;  %v6790_v6 = vxor.u32 2147483648, %v8650_v35  ;;  %v13067_v63 = vadd.f32 %v8298_v55, %v3291_v42  ;;  %v7597_v46 = vor.u32 %v7596_v54, %v7595_v3  ;;  %v7686_v17 = vadd.s32 %v7685_v36, %v7681_v60 }
 0x453   :  { %v6787_v5 = vxor.u32 2147483648, %v8652_v48  ;;  %v7600_v14 = vshll.u32 %v7599_v62, 23  ;;  %v3006_v41 = vadd.f32 %v12959_v0, %v2902_v8  ;;  %v3084_v58 = vadd.f32 %v13002_v43, %v2988_v10 }
 0x454   :  { %v6791_v31 = vsel %vm6789_vm13, %v6790_v6, %v8652_v48  ;;  %v13075_v56 = vadd.f32 %v13063_v44, %v13067_v63  ;;  %v7687_v51 = vadd.s32 536870912, %v7686_v17  ;;  %v7609_v37 = vsel %vm7524_vm2, %v7608_v47, %v12991_v40 }
 0x455   :  { %v6788_v13 = vsel %vm6786_vm0, %v8650_v35, %v6787_v5  ;;  %v7601_v27 = vor.u32 4788187, %v7600_v14  ;;  %v7604_v9 = vcvt.s32.f32 %v7597_v46  ;;  %vm13092_vm6 = vcmp.le.f32.partialorder %v7522_v18, 0.7853982  ;;  %v8289_v5 = vpop.f32.mrf.mxu0 }
 0x456   :  { %v6792_v4 = vsel %vm6785_vm11, %v6788_v13, %v6791_v31  ;;  %v5858_v52 = vand.u32 2147483647, %v13075_v56  ;;  %v5861_v0 = vand.u32 2139095040, %v13075_v56  ;;  %v7688_v49 = vshrl.u32 %v7687_v51, 30 }
 0x457   :  { %v6793_v19 = vsel %vm6782_vm10, nan, %v6792_v4  ;;  %v7602_v8 = vand.u32 2147483647, %v7601_v27  ;;  %v3181_v40 = vadd.f32 %v13014_v7, %v3084_v58  ;;  %v7611_v29 = vsel %vm13092_vm6, 0, %v7609_v37  ;;  %v3376_v7 = vpop.f32.mrf.mxu1  ;;  %v3296_v2 = vpop.f32.mrf.mxu0 }
 0x458   :  { %v7910_v43 = vsel %vm12693_vm14, %v12710_v38, %v6793_v19  ;;  %v5862_v45 = vshrl.u32 %v5861_v0, 23  ;;  %v7689_v60 = vshll.u32 %v7688_v49, 30  ;;  %v3105_v10 = vadd.f32 %v13021_v12, %v3006_v41 }
 0x459   :  { %7950 = vst [vmem:[#allocation5 + $0xc8] sm:$0xff] %v7910_v43  ;;  %v7605_v55 = vmul.f32 %v7604_v9, %v7602_v8  ;;  %v5865_v38 = vand.u32 8388607, %v5858_v52  ;;  %vm7628_vm3 = vcmp.lt.s32.totalorder %v12901_v57, 0  ;;  %v7615_v3 = vadd.s32 3, %v7611_v29 }
 0x45a   :  { %v8070_v42 = vadd.s32 4294967169, %v5862_v45  ;;  %v13103_v35 = vsub.s32 %v7686_v17, %v7689_v60  ;;  %v3205_v54 = vadd.f32 %v13030_v25, %v3105_v10  ;;  %v3285_v62 = vadd.f32 %v3284_v30, %v3181_v40 }
 0x45b   :  { %v7606_v18 = vxor.u32 2147483648, %v7605_v55  ;;  %v7712_v47 = vsub.s32 4, %v7688_v49  ;;  %v2892_v36 = vadd.f32 %v12978_v26, %v12970_v23  ;;  %v5866_v14 = vor.u32 8388608, %v5865_v38 }
 0x45c   :  { %v5868_v48 = vadd.s32 1, %v8070_v42  ;;  %v7692_v12 = vsub.s32 0, %v13103_v35  ;;  %v13114_v17 = vadd.f32 %v3376_v7, %v3285_v62  ;;  %v13120_v13 = vand.u32 3, %v7615_v3 }
 0x45d   :  { %v7607_v6 = vsel %vm7524_vm2, %v7606_v18, %v7605_v55  ;;  %v13118_v31 = vadd.f32 %v12982_v15, %v2892_v36  ;;  %v13122_v23 = vadd.f32 %v8289_v5, %v3205_v54  ;;  %v7682_v27 = vadd.s32 %v13038_v24, %v13044_v22 }
 0x45e   :  { %v7610_v46 = vsel %vm13092_vm6, %v12816_v33, %v7607_v6  ;;  %vm5869_vm4 = vcmp.gt.s32.totalorder %v5868_v48, 0  ;;  %v8139_v25 = vmin.u32 %v7692_v12, %v13103_v35  ;;  %v13128_v58 = vsel %vm7628_vm3, %v7712_v47, %v7688_v49 }
 0x45f   :  { %8653 = vcosq.f32 %v7610_v46  ;;  %v5870_v41 = vsel %vm5869_vm4, %v5868_v48, 0  ;;  %v13133_v0 = vshll.u32 %v5866_v14, 8  ;;  %v13137_v19 = vadd.f32 %v13063_v44, %v13114_v17 }
 0x460   :  { %8655 = vsinq.f32 %v7610_v46  ;;  %v5872_v26 = vand.u32 31, %v5870_v41  ;;  %v7694_v51 = vclz %v8139_v25  ;;  %v13130_v4 = vshrl.u32 %v5870_v41, 5 }
 0x461   :  { %vm7621_vm8 = vcmp.eq.s32.totalorder %v13120_v13, 2  ;;  %vm7618_vm9 = vcmp.eq.s32.totalorder %v13120_v13, 0  ;;  %vm13153_vm1 = vcmp.le.f32.partialorder %v7626_v34, 0.7853982  ;;  %vm7617_vm10 = vcmp.lt.s32.totalorder %v13120_v13, 2 }
 0x462   :  { %v5873_v37 = vsub.s32 32, %v5872_v26  ;;  %v5875_v15 = vshll.u32 %v13693_v61, %v5872_v26  ;;  %v8140_v8 = vadd.s32 4294967294, %v7694_v51  ;;  %v5878_v9 = vshll.u32 %v13689_v28, %v5872_v26 }
 0x463   :  { %v5881_v24 = vshll.u32 %v13684_v32, %v5872_v26  ;;  %v5884_v22 = vshll.u32 %v13685_v1, %v5872_v26  ;;  %v5887_v40 = vshll.u32 %v13791_v16, %v5872_v26  ;;  %vm5890_vm12 = vcmp.lt.s32.totalorder %v13130_v4, 1 }
 0x464   :  { %v5876_v49 = vshrl.u32 %v13689_v28, %v5873_v37  ;;  %v5879_v43 = vshrl.u32 %v13684_v32, %v5873_v37  ;;  %v5882_v39 = vshrl.u32 %v13685_v1, %v5873_v37  ;;  %vm8141_vm7 = vcmp.lt.s32.totalorder %v8140_v8, 0 }
 0x465   :  { %v5885_v45 = vshrl.u32 %v13791_v16, %v5873_v37  ;;  %v5888_v55 = vshrl.u32 %v13792_v53, %v5873_v37  ;;  %v7697_v29 = vsel %vm8141_vm7, 0, %v8140_v8  ;;  %v5874_v7 = vshrl.u32 %v13693_v61, %v5873_v37 }
 0x466   :  { %v5877_v60 = vor.u32 %v5876_v49, %v5875_v15  ;;  %v5880_v30 = vor.u32 %v5879_v43, %v5878_v9  ;;  %v5883_v10 = vor.u32 %v5882_v39, %v5881_v24  ;;  %v7698_v38 = vsub.s32 32, %v7697_v29 }
 0x467   :  { %v7702_v18 = vsub.s32 4294967266, %v7697_v29  ;;  %v5886_v3 = vor.u32 %v5885_v45, %v5884_v22  ;;  %v7699_v54 = vshll.u32 %v13103_v35, %v7697_v29  ;;  %v5889_v62 = vor.u32 %v5888_v55, %v5887_v40  ;;  %v8301_v45 = vpop.f32.mrf.mxu1 }
 0x468   :  { %vm5891_vm11 = vcmp.lt.s32.totalorder %v13130_v4, 2  ;;  %vm5893_vm2 = vcmp.lt.s32.totalorder %v13130_v4, 4  ;;  %vm7614_vm13 = vweird.f32 %v12816_v33  ;;  %v7700_v34 = vshrl.u32 %v7682_v27, %v7698_v38 }
 0x469   :  { %v7703_v48 = vadd.s32 127, %v7702_v18  ;;  %v5895_v6 = vsel %vm5893_vm2, %v5883_v10, 2102212464  ;;  %v5898_v12 = vsel %vm5890_vm12, %v5877_v60, %v5880_v30  ;;  %vm5892_vm15 = vcmp.lt.s32.totalorder %v13130_v4, 3 }
 0x46a   :  { %v5899_v47 = vsel %vm5893_vm2, %v5886_v3, 920167782  ;;  %v5902_v36 = vsel %vm5890_vm12, %v5880_v30, %v5883_v10  ;;  %v5903_v35 = vsel %vm5893_vm2, %v5889_v62, 1326507024  ;;  %v7701_v5 = vor.u32 %v7700_v34, %v7699_v54 }
 0x46b   :  { %v7704_v46 = vshll.u32 %v7703_v48, 23  ;;  %v5894_v14 = vsel %vm5890_vm12, %v5874_v7, %v5877_v60  ;;  %v5900_v25 = vsel %vm5892_vm15, %v5883_v10, %v5899_v47  ;;  %v5896_v26 = vsel %vm5892_vm15, %v5880_v30, %v5895_v6 }
 0x46c   :  { %v8654_v41 = vpop.eup %8653  ;;  %v5901_v27 = vsel %vm5891_vm11, %v5898_v12, %v5900_v25  ;;  %v5904_v51 = vsel %vm5892_vm15, %v5886_v3, %v5903_v35  ;;  %v4925_v37 = vand.u32 2139095040, %v13137_v19  ;;  %v7708_v24 = vcvt.s32.f32 %v7701_v5 }
 0x46d   :  { %v8656_v15 = vpop.eup %8655  ;;  %v7622_v8 = vxor.u32 2147483648, %v8654_v41  ;;  %v7705_v9 = vor.u32 4788187, %v7704_v46  ;;  %v5905_v22 = vsel %vm5891_vm11, %v5902_v36, %v5904_v51  ;;  %v7715_v38 = vsel %vm13153_vm1, 0, %v13128_v58 }
 0x46e   :  { %v7619_v49 = vxor.u32 2147483648, %v8656_v15  ;;  %v13176_v43 = vmul.u32.u64.low %v13133_v0, %v5905_v22  ;;  %v13177_v39 = vmul.u32.u64.high %v13133_v0, %v5905_v22, %v13176_v43  ;;  %v4926_v40 = vshrl.u32 %v4925_v37, 23 }
 0x46f   :  { %v7623_v55 = vsel %vm7621_vm8, %v7622_v8, %v8656_v15  ;;  %v7706_v29 = vand.u32 2147483647, %v7705_v9  ;;  %v13182_v60 = vmul.u32.u64.low %v13133_v0, %v5901_v27  ;;  %v13183_v30 = vmul.u32.u64.high %v13133_v0, %v5901_v27, %v13182_v60  ;;  %v3388_v43 = vpop.f32.mrf.mxu1 }
 0x470   :  { %v7620_v10 = vsel %vm7618_vm9, %v8654_v41, %v7619_v49  ;;  %v4922_v18 = vand.u32 2147483647, %v13137_v19  ;;  %v8034_v7 = vadd.s32 4294967169, %v4926_v40  ;;  %v5897_v62 = vsel %vm5891_vm11, %v5894_v14, %v5896_v26 }
 0x471   :  { %v7624_v3 = vsel %vm7617_vm10, %v7620_v10, %v7623_v55  ;;  %v7709_v54 = vmul.f32 %v7708_v24, %v7706_v29  ;;  %v13197_v34 = vadd.f32 %v8301_v45, %v13122_v23  ;;  %v3098_v6 = vadd.f32 %v13032_v20, %v13118_v31 }
 0x472   :  { %v7625_v48 = vsel %vm7614_vm13, nan, %v7624_v3  ;;  %vm5915_vm0 = vc.u32 %v13177_v39, %v13182_v60  ;;  %v5916_v4 = vadd.s32 1, %v13183_v30  ;;  %v4932_v12 = vadd.s32 1, %v8034_v7  ;;  %v13245_v3 = vld [vmem:[%s13609_s4 + $0x8] sm:$0x1] }
 0x473   :  { %v7918_v13 = vsel %vm12600_vm5, %v12804_v11, %v7625_v48  ;;  %v7710_v58 = vxor.u32 2147483648, %v7709_v54  ;;  %v7719_v23 = vadd.s32 3, %v7715_v38  ;;  %v3197_v47 = vadd.f32 %v13035_v59, %v3098_v6 }
 0x474   :  { %7958 = vst [vmem:[#allocation5 + $0x108] sm:$0xff] %v7918_v13  ;;  %v5913_v33 = vmul.u32 %v13133_v0, %v5897_v62  ;;  %v4929_v20 = vand.u32 8388607, %v4922_v18  ;;  %v5917_v36 = vsel %vm5915_vm0, %v5916_v4, %v13183_v30  ;;  %vm4933_vm5 = vcmp.gt.s32.totalorder %v4932_v12, 0 }
 0x475   :  { %v7711_v31 = vsel %vm7628_vm3, %v7710_v58, %v7709_v54  ;;  %v13218_v11 = vadd.f32 %v13063_v44, %v13197_v34  ;;  %v4934_v0 = vsel %vm4933_vm5, %v4932_v12, 0  ;;  %v13223_v46 = vand.u32 3, %v7719_v23 }
 0x476   :  { %v7714_v59 = vsel %vm13153_vm1, %v12901_v57, %v7711_v31  ;;  %v5918_v35 = vadd.s32 %v5917_v36, %v5913_v33  ;;  %v4936_v5 = vand.u32 31, %v4934_v0  ;;  %v3297_v25 = vadd.f32 %v3296_v2, %v3197_v47 }
 0x477   :  { %8657 = vcosq.f32 %v7714_v59  ;;  %v4930_v41 = vor.u32 8388608, %v4929_v20  ;;  %v13225_v26 = vshrl.u32 %v4934_v0, 5  ;;  %v7733_v51 = vand.u32 2139095040, %v13218_v11 }
 0x478   :  { %8659 = vsinq.f32 %v7714_v59  ;;  %v5919_v14 = vadd.s32 536870912, %v5918_v35  ;;  %v4937_v27 = vsub.s32 32, %v4936_v5  ;;  %v4939_v15 = vshll.u32 %v13693_v61, %v4936_v5 }
 0x479   :  { %v4942_v42 = vshll.u32 %v13689_v28, %v4936_v5  ;;  %v4945_v8 = vshll.u32 %v13684_v32, %v4936_v5  ;;  %v4948_v49 = vshll.u32 %v13685_v1, %v4936_v5  ;;  %v4951_v55 = vshll.u32 %v13791_v16, %v4936_v5 }
 0x47a   :  { %v5920_v37 = vshrl.u32 %v5919_v14, 30  ;;  %v4940_v9 = vshrl.u32 %v13689_v28, %v4937_v27  ;;  %v4943_v24 = vshrl.u32 %v13684_v32, %v4937_v27  ;;  %v4946_v22 = vshrl.u32 %v13685_v1, %v4937_v27 }
 0x47b   :  { %v4949_v45 = vshrl.u32 %v13791_v16, %v4937_v27  ;;  %v4952_v29 = vshrl.u32 %v13792_v53, %v4937_v27  ;;  %vm7725_vm6 = vcmp.eq.s32.totalorder %v13223_v46, 2  ;;  %vm5860_vm3 = vcmp.lt.s32.totalorder %v13075_v56, 0 }
 0x47c   :  { %v5921_v40 = vshll.u32 %v5920_v37, 30  ;;  %v4941_v30 = vor.u32 %v4940_v9, %v4939_v15  ;;  %v4944_v10 = vor.u32 %v4943_v24, %v4942_v42  ;;  %v4947_v38 = vor.u32 %v4946_v22, %v4945_v8 }
 0x47d   :  { %v4950_v54 = vor.u32 %v4949_v45, %v4948_v49  ;;  %v4953_v62 = vor.u32 %v4952_v29, %v4951_v55  ;;  %v13247_v48 = vadd.f32 %v3388_v43, %v3297_v25  ;;  %vm7722_vm4 = vcmp.eq.s32.totalorder %v13223_v46, 0 }
 0x47e   :  { %v13240_v7 = vsub.s32 %v5918_v35, %v5921_v40  ;;  %vm4954_vm7 = vcmp.lt.s32.totalorder %v13225_v26, 1  ;;  %v13251_v6 = vshll.u32 %v4930_v41, 8  ;;  %v7730_v13 = vand.u32 2147483647, %v13218_v11 }
 0x47f   :  { %v7734_v58 = vshrl.u32 %v7733_v51, 23  ;;  %vm7721_vm12 = vcmp.lt.s32.totalorder %v13223_v46, 2  ;;  %vm4956_vm8 = vcmp.lt.s32.totalorder %v13225_v26, 3  ;;  %vm4957_vm9 = vcmp.lt.s32.totalorder %v13225_v26, 4 }
 0x480   :  { %v5924_v4 = vsub.s32 0, %v13240_v7  ;;  %v4962_v12 = vsel %vm4954_vm7, %v4941_v30, %v4944_v10  ;;  %vm7718_vm1 = vweird.f32 %v12901_v57  ;;  %vm13263_vm10 = vcmp.le.f32.partialorder %v5858_v52, 0.7853982 }
 0x481   :  { %v4938_v47 = vshrl.u32 %v13693_v61, %v4937_v27  ;;  %v4959_v33 = vsel %vm4957_vm9, %v4947_v38, 2102212464  ;;  %v4963_v20 = vsel %vm4957_vm9, %v4950_v54, 920167782  ;;  %v4967_v31 = vsel %vm4957_vm9, %v4953_v62, 1326507024 }
 0x482   :  { %v8071_v36 = vmin.u32 %v5924_v4, %v13240_v7  ;;  %vm7837_vm11 = vcmp.gt.f32.partialorder %v13245_v3, 0.5  ;;  %vm4955_vm2 = vcmp.lt.s32.totalorder %v13225_v26, 2  ;;  %v4964_v2 = vsel %vm4956_vm8, %v4947_v38, %v4963_v20 }
 0x483   :  { %v4966_v52 = vsel %vm4954_vm7, %v4944_v10, %v4947_v38  ;;  %v5944_v59 = vsub.s32 4, %v5920_v37  ;;  %v4965_v35 = vsel %vm4955_vm2, %v4962_v12, %v4964_v2  ;;  %v4968_v0 = vsel %vm4956_vm8, %v4950_v54, %v4967_v31 }
 0x484   :  { %v8142_v5 = vadd.s32 4294967169, %v7734_v58  ;;  %v8658_v14 = vpop.eup %8657  ;;  %v5914_v25 = vadd.s32 %v13182_v60, %v13177_v39  ;;  %v5926_v41 = vclz %v8071_v36  ;;  %v4958_v27 = vsel %vm4954_vm7, %v4938_v47, %v4941_v30 }
 0x485   :  { %v4960_v51 = vsel %vm4956_vm8, %v4944_v10, %v4959_v33  ;;  %v8660_v15 = vpop.eup %8659  ;;  %v7726_v42 = vxor.u32 2147483648, %v8658_v14  ;;  %v4969_v8 = vsel %vm4955_vm2, %v4966_v52, %v4968_v0  ;;  %v5945_v40 = vsel %vm5860_vm3, %v5944_v59, %v5920_v37 }
 0x486   :  { %v13288_v9 = vmul.u32.u64.low %v13251_v6, %v4965_v35  ;;  %v13289_v24 = vmul.u32.u64.high %v13251_v6, %v4965_v35, %v13288_v9  ;;  %v7723_v22 = vxor.u32 2147483648, %v8660_v15  ;;  %v8072_v49 = vadd.s32 4294967294, %v5926_v41 }
 0x487   :  { %v13293_v39 = vmul.u32.u64.low %v13251_v6, %v4969_v8  ;;  %v13294_v60 = vmul.u32.u64.high %v13251_v6, %v4969_v8, %v13293_v39  ;;  %v7727_v43 = vsel %vm7725_vm6, %v7726_v42, %v8660_v15  ;;  %v7737_v45 = vand.u32 8388607, %v7730_v13  ;;  %v13341_v8 = vpop.f32.mrf.mxu0 }
 0x488   :  { %v7740_v55 = vadd.s32 1, %v8142_v5  ;;  %v7724_v29 = vsel %vm7722_vm4, %v8658_v14, %v7723_v22  ;;  %vm8073_vm13 = vcmp.lt.s32.totalorder %v8072_v49, 0  ;;  %v4961_v30 = vsel %vm4955_vm2, %v4958_v27, %v4960_v51 }
 0x489   :  { %v13308_v10 = vadd.f32 %v13063_v44, %v13247_v48  ;;  %v7728_v38 = vsel %vm7721_vm12, %v7724_v29, %v7727_v43  ;;  %v5929_v54 = vsel %vm8073_vm13, 0, %v8072_v49  ;;  %v4980_v37 = vadd.s32 1, %v13289_v24 }
 0x48a   :  { %vm7741_vm15 = vcmp.gt.s32.totalorder %v7740_v55, 0  ;;  %v7729_v62 = vsel %vm7718_vm1, nan, %v7728_v38  ;;  %v5930_v58 = vsub.s32 32, %v5929_v54  ;;  %v5934_v4 = vsub.s32 4294967266, %v5929_v54 }
 0x48b   :  { %v5947_v26 = vsel %vm13263_vm10, 0, %v5945_v40  ;;  %v7919_v44 = vsel %vm12693_vm14, %v12887_v21, %v7729_v62  ;;  %v4977_v12 = vmul.u32 %v13251_v6, %v4961_v30  ;;  %vm4979_vm0 = vc.u32 %v13294_v60, %v13288_v9  ;;  %v13353_v30 = vpop.f32.mrf.mxu1 }
 0x48c   :  { %v7742_v46 = vsel %vm7741_vm15, %v7740_v55, 0  ;;  %7959 = vst [vmem:[#allocation5 + $0x110] sm:$0xff] %v7919_v44  ;;  %v5931_v47 = vshll.u32 %v13240_v7, %v5929_v54  ;;  %v5932_v57 = vshrl.u32 %v5914_v25, %v5930_v58  ;;  %v5935_v33 = vadd.s32 127, %v5934_v4  ;;  %v13361_v44 = vpop.f32.mrf.mxu0 }
 0x48d   :  { %v4981_v20 = vsel %vm4979_vm0, %v4980_v37, %v13289_v24  ;;  %v13881_v31 = vmov 0   ;;  %v7744_v21 = vand.u32 31, %v7742_v46  ;;  %v13330_v52 = vadd.s32 3, %v5947_v26 }
 0x48e   :  { %v13328_v36 = vsel %vm7837_vm11, 1, %v13881_v31  ;;  %v4982_v50 = vadd.s32 %v4981_v20, %v4977_v12  ;;  %v5933_v2 = vor.u32 %v5932_v57, %v5931_v47  ;;  %v5936_v6 = vshll.u32 %v5935_v33, 23  ;;  %v13371_v31 = vpop.f32.mrf.mxu1 }
 0x48f   :  { %vm4924_vm14 = vcmp.lt.s32.totalorder %v13137_v19, 0  ;;  %v7738_v59 = vor.u32 8388608, %v7737_v45  ;;  %v13333_v7 = vshrl.u32 %v7742_v46, 5  ;;  %v7745_v0 = vsub.s32 32, %v7744_v21 }
 0x490   :  { %v4983_v35 = vadd.s32 536870912, %v4982_v50  ;;  %v6794_v5 = vand.u32 2147483647, %v13308_v10  ;;  %v5937_v14 = vor.u32 4788187, %v5936_v6  ;;  %v5940_v25 = vcvt.s32.f32 %v5933_v2 }
 0x491   :  { %v7747_v3 = vshll.u32 %v13693_v61, %v7744_v21  ;;  %v7750_v41 = vshll.u32 %v13689_v28, %v7744_v21  ;;  %v7748_v51 = vshrl.u32 %v13689_v28, %v7745_v0  ;;  %v7751_v15 = vshrl.u32 %v13684_v32, %v7745_v0 }
 0x492   :  { %v4984_v27 = vshrl.u32 %v4983_v35, 30  ;;  %v7753_v42 = vshll.u32 %v13684_v32, %v7744_v21  ;;  %v5938_v24 = vand.u32 2147483647, %v5937_v14  ;;  %vm13345_vm5 = vcmp.le.f32.partialorder %v4922_v18, 0.7853982  ;;  %v13384_v14 = vpop.f32.mrf.mxu0 }
 0x493   :  { %v7754_v49 = vshrl.u32 %v13685_v1, %v7745_v0  ;;  %v7756_v39 = vshll.u32 %v13685_v1, %v7744_v21  ;;  %v7757_v43 = vshrl.u32 %v13791_v16, %v7745_v0  ;;  %v7749_v55 = vor.u32 %v7748_v51, %v7747_v3  ;;  %v13393_v51 = vpop.f32.mrf.mxu1 }
 0x494   :  { %v4985_v40 = vshll.u32 %v4984_v27, 30  ;;  %v5008_v45 = vsub.s32 4, %v4984_v27  ;;  %v7759_v29 = vshll.u32 %v13791_v16, %v7744_v21  ;;  %v5941_v38 = vmul.f32 %v5940_v25, %v5938_v24 }
 0x495   :  { %v7755_v54 = vor.u32 %v7754_v49, %v7753_v42  ;;  %v7758_v37 = vor.u32 %v7757_v43, %v7756_v39  ;;  %v7760_v18 = vshrl.u32 %v13792_v53, %v7745_v0  ;;  %v7752_v58 = vor.u32 %v7751_v15, %v7750_v41 }
 0x496   :  { %v13356_v62 = vsub.s32 %v4982_v50, %v4985_v40  ;;  %v13358_v4 = vshll.u32 %v7738_v59, 8  ;;  %v6797_v26 = vand.u32 2139095040, %v13308_v10  ;;  %v5942_v12 = vxor.u32 2147483648, %v5941_v38 }
 0x497   :  { %v7746_v46 = vshrl.u32 %v13693_v61, %v7745_v0  ;;  %v7761_v47 = vor.u32 %v7760_v18, %v7759_v29  ;;  %vm7765_vm6 = vcmp.lt.s32.totalorder %v13333_v7, 4  ;;  %v5009_v33 = vsel %vm4924_vm14, %v5008_v45, %v4984_v27 }
 0x498   :  { %v4988_v57 = vsub.s32 0, %v13356_v62  ;;  %vm7762_vm4 = vcmp.lt.s32.totalorder %v13333_v7, 1  ;;  %v7767_v20 = vsel %vm7765_vm6, %v7755_v54, 2102212464  ;;  %v5943_v50 = vsel %vm5860_vm3, %v5942_v12, %v5941_v38 }
 0x499   :  { %vm7764_vm7 = vcmp.lt.s32.totalorder %v13333_v7, 3  ;;  %v7766_v21 = vsel %vm7762_vm4, %v7746_v46, %v7749_v55  ;;  %v7771_v2 = vsel %vm7765_vm6, %v7758_v37, 920167782  ;;  %v5946_v6 = vsel %vm13263_vm10, %v13075_v56, %v5943_v50 }
 0x49a   :  { %v8035_v59 = vmin.u32 %v4988_v57, %v13356_v62  ;;  %v7768_v35 = vsel %vm7764_vm7, %v7752_v58, %v7767_v20  ;;  %v7770_v0 = vsel %vm7762_vm4, %v7749_v55, %v7752_v58  ;;  %8661 = vcosq.f32 %v5946_v6  ;;  %v13401_v55 = vpop.f32.mrf.mxu0 }
 0x49b   :  { %v7772_v25 = vsel %vm7764_vm7, %v7755_v54, %v7771_v2  ;;  %v7774_v3 = vsel %vm7762_vm4, %v7752_v58, %v7755_v54  ;;  %v7775_v41 = vsel %vm7765_vm6, %v7761_v47, 1326507024  ;;  %8663 = vsinq.f32 %v5946_v6 }
 0x49c   :  { %v4990_v27 = vclz %v8035_v59  ;;  %v5011_v23 = vsel %vm13345_vm5, 0, %v5009_v33  ;;  %vm7763_vm3 = vcmp.lt.s32.totalorder %v13333_v7, 2  ;;  %v7776_v24 = vsel %vm7764_vm7, %v7758_v37, %v7775_v41  ;;  %v13884_v37 = vld [vmem:[#allocation22_spill] sm:$0xff] }
 0x49d   :  { %v7769_v15 = vsel %vm7763_vm3, %v7766_v21, %v7768_v35  ;;  %v7773_v42 = vsel %vm7763_vm3, %v7770_v0, %v7772_v25  ;;  %v6798_v49 = vshrl.u32 %v6797_v26, 23  ;;  %v7777_v43 = vsel %vm7763_vm3, %v7774_v3, %v7776_v24  ;;  %v13414_v26 = vpop.f32.mrf.mxu1 }
 0x49e   :  { %v8036_v39 = vadd.s32 4294967294, %v4990_v27  ;;  %v13398_v40 = vmul.u32.u64.low %v13358_v4, %v7773_v42  ;;  %v13399_v45 = vmul.u32.u64.high %v13358_v4, %v7773_v42, %v13398_v40  ;;  %v6801_v18 = vand.u32 8388607, %v6794_v5 }
 0x49f   :  { %v13404_v29 = vmul.u32.u64.low %v13358_v4, %v7777_v43  ;;  %v13405_v38 = vmul.u32.u64.high %v13358_v4, %v7777_v43, %v13404_v29  ;;  %v8106_v54 = vadd.s32 4294967169, %v6798_v49  ;;  %v13410_v7 = vand.u32 3, %v13330_v52  ;;  %v13423_v52 = vld [vmem:[%s13611_s6] ss:$0 sm:$0xff]  ;;  %v13434_v0 = vpop.f32.mrf.mxu1  ;;  %s8760_s6 = smov [#allocation6]  }
 0x4a0   :  { %v7875_v58 = vrot.slane %v13328_v36, %v13884_v37  ;;  %vm8037_vm12 = vcmp.lt.s32.totalorder %v8036_v39, 0  ;;  %v4978_v12 = vadd.s32 %v13288_v9, %v13294_v60  ;;  %v5015_v47 = vadd.s32 3, %v5011_v23  ;;  %v13425_v36 = vpop.f32.mrf.mxu0  ;;  %s7983_s24 = sshll.u32 %s8760_s6, 4  ;;  %s7984_s24 = int_to_ptr.vmem [resolvable:$true] %s7983_s24 }
 0x4a1   :  { %v4993_v46 = vsel %vm8037_vm12, 0, %v8036_v39  ;;  %v6804_v57 = vadd.s32 1, %v8106_v54  ;;  %v7785_v50 = vmul.u32 %v13358_v4, %v7769_v15  ;;  %v7788_v21 = vadd.s32 1, %v13399_v45  ;;  %v13459_v54 = vpop.f32.mrf.mxu1  ;;  %s8703_s25 = scalar_lea.vmem %s7984_s24, 512  ;;  %p8708_p6 = scmp.lt.s32.totalorder %s7984_s24, %s7984_s24 }
 0x4a2   :  { %v4994_v33 = vsub.s32 32, %v4993_v46  ;;  %v4998_v20 = vsub.s32 4294967266, %v4993_v46  ;;  %v4995_v2 = vshll.u32 %v13356_v62, %v4993_v46  ;;  %vm7787_vm8 = vc.u32 %v13405_v38, %v13398_v40  ;;  %v13442_v23 = vpop.f32.mrf.mxu0  ;;  %p8704_p5 = scmp.ne.s32.totalorder %s7984_s24, %s8703_s25  ;;  %p8709_p7 = scmp.lt.s32.totalorder %s8703_s25, %s8703_s25 }
 0x4a3   :  { %v6802_v9 = vor.u32 8388608, %v6801_v18  ;;  %vm6805_vm9 = vcmp.gt.s32.totalorder %v6804_v57, 0  ;;  %vm13429_vm1 = vcmp.eq.s32.totalorder %v7875_v58, 1  ;;  %v7789_v59 = vsel %vm7787_vm8, %v7788_v21, %v13399_v45 }
 0x4a4   :  { %v4996_v4 = vshrl.u32 %v4978_v12, %v4994_v33  ;;  %v4999_v6 = vadd.s32 127, %v4998_v20  ;;  %v6806_v35 = vsel %vm6805_vm9, %v6804_v57, 0  ;;  %vm5950_vm10 = vweird.f32 %v13075_v56  ;;  %v13469_v57 = vpop.f32.mrf.mxu0  ;;  %p8710_p8 = por %p8709_p7, %p8708_p6 }
 0x4a5   :  { %vm5953_vm11 = vcmp.lt.s32.totalorder %v13410_v7, 2  ;;  %vm7932_vm2 = vcmask 457728   ;;  %v7790_v62 = vadd.s32 %v7789_v59, %v7785_v50  ;;  %v6808_v25 = vand.u32 31, %v6806_v35 }
 0x4a6   :  { %v3489_v3 = vadd.f32 %v13341_v8, %v13423_v52  ;;  %vm5954_vm13 = vcmp.eq.s32.totalorder %v13410_v7, 0  ;;  %vm5957_vm15 = vcmp.eq.s32.totalorder %v13410_v7, 2  ;;  %v4997_v41 = vor.u32 %v4996_v4, %v4995_v2  ;;  %v13480_v4 = vpop.f32.mrf.mxu1  ;;  %p8711_p9 = pnand %p8710_p8, %p8704_p5 }
 0x4a7   :  { %v5000_v27 = vshll.u32 %v4999_v6, 23  ;;  %v13444_v15 = vand.u32 3, %v5015_v47  ;;  %v7791_v42 = vadd.s32 536870912, %v7790_v62  ;;  %v6809_v24 = vsub.s32 32, %v6808_v25  ;;  %v8662_v39 = vpop.eup %8661 }
 0x4a8   :  { %v13448_v49 = vadd.f32 %v13423_v52, %v13361_v44  ;;  %v13451_v8 = vadd.s32 %v13398_v40, %v13405_v38  ;;  %v13453_v45 = vshll.u32 %v6802_v9, 8  ;;  %v13457_v29 = vadd.f32 %v13384_v14, %v13423_v52  ;;  %v8664_v18 = vpop.eup %8663 }
 0x4a9   :  { %v5001_v43 = vor.u32 4788187, %v5000_v27  ;;  %v5958_v37 = vxor.u32 2147483648, %v8662_v39  ;;  %v13461_v58 = vshrl.u32 %v7791_v42, 30  ;;  %v13463_v12 = vshrl.u32 %v6806_v35, 5 }
 0x4aa   :  { %v13466_v44 = vadd.f32 %v13353_v30, %v3489_v3  ;;  %v5955_v46 = vxor.u32 2147483648, %v8664_v18  ;;  %v5004_v38 = vcvt.s32.f32 %v4997_v41  ;;  %v6812_v47 = vshrl.u32 %v13689_v28, %v6809_v24 }
 0x4ab   :  { %v5002_v40 = vand.u32 2147483647, %v5001_v43  ;;  %v5959_v14 = vsel %vm5957_vm15, %v5958_v37, %v8664_v18  ;;  %v7793_v33 = vshll.u32 %v13461_v58, 30  ;;  %v6815_v20 = vshrl.u32 %v13684_v32, %v6809_v24  ;;  %v3704_v43 = vpop.f32.mrf.mxu0 }
 0x4ac   :  { %v6818_v50 = vshrl.u32 %v13685_v1, %v6809_v24  ;;  %v5956_v30 = vsel %vm5954_vm13, %v8662_v39, %v5955_v46  ;;  %v6811_v2 = vshll.u32 %v13693_v61, %v6808_v25  ;;  %v6814_v9 = vshll.u32 %v13689_v28, %v6808_v25 }
 0x4ad   :  { %v5005_v21 = vmul.f32 %v5004_v38, %v5002_v40  ;;  %v5960_v6 = vsel %vm5953_vm11, %v5956_v30, %v5959_v14  ;;  %v13484_v59 = vsub.s32 %v7790_v62, %v7793_v33  ;;  %v6817_v35 = vshll.u32 %v13684_v32, %v6808_v25 }
 0x4ae   :  { %v6821_v3 = vshrl.u32 %v13791_v16, %v6809_v24  ;;  %v5961_v41 = vsel %vm5950_vm10, nan, %v5960_v6  ;;  %v6813_v42 = vor.u32 %v6812_v47, %v6811_v2  ;;  %v6820_v39 = vshll.u32 %v13685_v1, %v6808_v25  ;;  %v3803_v1 = vpop.f32.mrf.mxu1 }
 0x4af   :  { %v5006_v27 = vxor.u32 2147483648, %v5005_v21  ;;  %v7902_v28 = vsel %vm13429_vm1, %v13067_v63, %v5961_v41  ;;  %v7796_v7 = vsub.s32 0, %v13484_v59  ;;  %v6816_v62 = vor.u32 %v6815_v20, %v6814_v9 }
 0x4b0   :  { %v6819_v18 = vor.u32 %v6818_v50, %v6817_v35  ;;  %7942 = vst.msk [vmem:[#allocation5 + $0x88] sm:$0xff] %vm7932_vm2, %v7902_v28  ;;  %v6822_v56 = vor.u32 %v6821_v3, %v6820_v39  ;;  %v6823_v37 = vshll.u32 %v13791_v16, %v6808_v25  ;;  %v6824_v46 = vshrl.u32 %v13792_v53, %v6809_v24  ;;  %v8358_v16 = vpop.f32.mrf.mxu0 }
 0x4b1   :  { %v5007_v32 = vsel %vm4924_vm14, %v5006_v27, %v5005_v21  ;;  %v8143_v63 = vmin.u32 %v7796_v7, %v13484_v59  ;;  %v6810_v38 = vshrl.u32 %v13693_v61, %v6809_v24  ;;  %v3499_v47 = vadd.f32 %v13423_v52, %v13401_v55  ;;  %v8370_v24 = vpop.f32.mrf.mxu1 }
 0x4b2   :  { %v5010_v40 = vsel %vm13345_vm5, %v13137_v19, %v5007_v32  ;;  %v6825_v14 = vor.u32 %v6824_v46, %v6823_v37  ;;  %vm6826_vm0 = vcmp.lt.s32.totalorder %v13463_v12, 1  ;;  %vm6827_vm14 = vcmp.lt.s32.totalorder %v13463_v12, 2  ;;  %v3891_v6 = vpop.f32.mrf.mxu0 }
 0x4b3   :  { %8665 = vcosq.f32 %v5010_v40  ;;  %v7798_v53 = vclz %v8143_v63  ;;  %vm6828_vm6 = vcmp.lt.s32.totalorder %v13463_v12, 3  ;;  %vm6829_vm5 = vcmp.lt.s32.totalorder %v13463_v12, 4 }
 0x4b4   :  { %8667 = vsinq.f32 %v5010_v40  ;;  %v6830_v22 = vsel %vm6826_vm0, %v6810_v38, %v6813_v42  ;;  %v6831_v25 = vsel %vm6829_vm5, %v6819_v18, 2102212464  ;;  %v6834_v33 = vsel %vm6826_vm0, %v6813_v42, %v6816_v62  ;;  %v8361_v12 = vpop.f32.mrf.mxu0 }
 0x4b5   :  { %v6835_v61 = vsel %vm6829_vm5, %v6822_v56, 920167782  ;;  %v8144_v20 = vadd.s32 4294967294, %v7798_v53  ;;  %v6832_v55 = vsel %vm6828_vm6, %v6816_v62, %v6831_v25  ;;  %v6838_v50 = vsel %vm6826_vm0, %v6816_v62, %v6819_v18 }
 0x4b6   :  { %v6836_v52 = vsel %vm6828_vm6, %v6819_v18, %v6835_v61  ;;  %v6839_v21 = vsel %vm6829_vm5, %v6825_v14, 1326507024  ;;  %v3595_v2 = vadd.f32 %v13371_v31, %v13448_v49  ;;  %v3613_v9 = vadd.f32 %v13393_v51, %v13457_v29  ;;  %v3983_v51 = vpop.f32.mrf.mxu1  ;;  %v3903_v53 = vpop.f32.mrf.mxu0 }
 0x4b7   :  { %v6837_v30 = vsel %vm6827_vm14, %v6834_v33, %v6836_v52  ;;  %vm8145_vm4 = vcmp.lt.s32.totalorder %v8144_v20, 0  ;;  %v6840_v35 = vsel %vm6828_vm6, %v6822_v56, %v6839_v21  ;;  %v6833_v42 = vsel %vm6827_vm14, %v6830_v22, %v6832_v55 }
 0x4b8   :  { %v13524_v3 = vmul.u32.u64.low %v13453_v45, %v6837_v30  ;;  %v13525_v41 = vmul.u32.u64.high %v13453_v45, %v6837_v30, %v13524_v3  ;;  %v7801_v27 = vsel %vm8145_vm4, 0, %v8144_v20  ;;  %v6841_v31 = vsel %vm6827_vm14, %v6838_v50, %v6840_v35 }
 0x4b9   :  { %v3607_v49 = vadd.f32 %v13414_v26, %v3499_v47  ;;  %v7802_v29 = vsub.s32 32, %v7801_v27  ;;  %v7803_v39 = vshll.u32 %v13484_v59, %v7801_v27  ;;  %v7806_v28 = vsub.s32 4294967266, %v7801_v27 }
 0x4ba   :  { %v3698_v7 = vadd.f32 %v13425_v36, %v13466_v44  ;;  %v13537_v62 = vmul.u32.u64.low %v13453_v45, %v6841_v31  ;;  %v13538_v18 = vmul.u32.u64.high %v13453_v45, %v6841_v31, %v13537_v62  ;;  %v3691_v32 = vadd.f32 %v13442_v23, %v3595_v2  ;;  %v8373_v44 = vpop.f32.mrf.mxu1 }
 0x4bb   :  { %v3712_v56 = vadd.f32 %v13469_v57, %v3613_v9  ;;  %v7804_v37 = vshrl.u32 %v13451_v8, %v7802_v29  ;;  %v7807_v26 = vadd.s32 127, %v7806_v28  ;;  %v6852_v46 = vadd.s32 1, %v13525_v41 }
 0x4bc   :  { %v3796_v59 = vadd.f32 %v13434_v0, %v3698_v7  ;;  %v3788_v40 = vadd.f32 %v13459_v54, %v3691_v32  ;;  %v3705_v63 = vadd.f32 %v3704_v43, %v3607_v49  ;;  %v6849_v23 = vmul.u32 %v13453_v45, %v6833_v42  ;;  %v3995_v61 = vpop.f32.mrf.mxu1 }
 0x4bd   :  { %v3812_v36 = vadd.f32 %v13480_v4, %v3712_v56  ;;  %v7805_v38 = vor.u32 %v7804_v37, %v7803_v39  ;;  %v7808_v47 = vshll.u32 %v7807_v26, 23  ;;  %vm6851_vm7 = vc.u32 %v13538_v18, %v13524_v3 }
 0x4be   :  { %v3898_v14 = vadd.f32 %v8358_v16, %v3796_v59  ;;  %v3804_v8 = vadd.f32 %v3803_v1, %v3705_v63  ;;  %v3892_v57 = vadd.f32 %v3891_v6, %v3788_v40  ;;  %vm7961_vm3 = vcmask 982016  }
 0x4bf   :  { %vm5021_vm12 = vcmp.eq.s32.totalorder %v13444_v15, 2  ;;  %v7809_v0 = vor.u32 4788187, %v7808_v47  ;;  %v6853_v54 = vsel %vm6851_vm7, %v6852_v46, %v13525_v41  ;;  %v3910_v16 = vadd.f32 %v8361_v12, %v3812_v36 }
 0x4c0   :  { %v8666_v22 = vpop.eup %8665  ;;  %v3990_v4 = vadd.f32 %v8370_v24, %v3898_v14  ;;  %v6854_v45 = vadd.s32 %v6853_v54, %v6849_v23  ;;  %v3984_v33 = vadd.f32 %v3983_v51, %v3892_v57  ;;  %v7812_v55 = vcvt.s32.f32 %v7805_v38 }
 0x4c1   :  { %v8668_v43 = vpop.eup %8667  ;;  %v5022_v25 = vxor.u32 2147483648, %v8666_v22  ;;  %v7810_v1 = vand.u32 2147483647, %v7809_v0  ;;  %v3904_v52 = vadd.f32 %v3903_v53, %v3804_v8  ;;  %vm5018_vm8 = vcmp.eq.s32.totalorder %v13444_v15, 0 }
 0x4c2   :  { %v5019_v20 = vxor.u32 2147483648, %v8668_v43  ;;  %7963 = vst.msk [vmem:[#allocation6 + $0x8] sm:$0xff] %vm7961_vm3, %v3990_v4  ;;  %v6855_v24 = vadd.s32 536870912, %v6854_v45  ;;  %7962 = vst.msk [vmem:[#allocation6] sm:$0xff] %vm7961_vm3, %v3984_v33  ;;  %v4002_v30 = vadd.f32 %v8373_v44, %v3910_v16  ;;  %vm5017_vm9 = vcmp.lt.s32.totalorder %v13444_v15, 2 }
 0x4c3   :  { %v5023_v50 = vsel %vm5021_vm12, %v5022_v25, %v8668_v43  ;;  %v7813_v2 = vmul.f32 %v7812_v55, %v7810_v1  ;;  %v3996_v9 = vadd.f32 %v3995_v61, %v3904_v52  ;;  %vm5014_vm10 = vweird.f32 %v13137_v19 }
 0x4c4   :  { %v5020_v21 = vsel %vm5018_vm8, %v8666_v22, %v5019_v20  ;;  %v13559_v35 = vshrl.u32 %v6855_v24, 30  ;;  %7965 = vst.msk [vmem:[#allocation6 + $0x18] sm:$0xff] %vm7961_vm3, %v4002_v30  ;;  %vm7732_vm11 = vcmp.lt.s32.totalorder %v13218_v11, 0  ;;  %v7816_v15 = vsub.s32 4, %v13461_v58 }
 0x4c5   :  { %v5024_v6 = vsel %vm5017_vm9, %v5020_v21, %v5023_v50  ;;  %v7814_v27 = vxor.u32 2147483648, %v7813_v2  ;;  %7964 = vst.msk [vmem:[#allocation6 + $0x10] sm:$0xff] %vm7961_vm3, %v3996_v9 }
 0x4c6   :  { %v5025_v41 = vsel %vm5014_vm10, nan, %v5024_v6  ;;  %v6857_v31 = vshll.u32 %v13559_v35, 30 }
 0x4c7   :  { %v7893_v42 = vsel %vm13429_vm1, %v13114_v17, %v5025_v41 }
 0x4c8   :  { %8714 = shalt.err (!%p8711_p9)
}
 0x4c9   :  { %s8761_s26 = smov 128   ;;  %s8762_s27 = smov 8   ;;  %7933 = vst.msk [vmem:[#allocation5 + $0x40] sm:$0xff] %vm7932_vm2, %v7893_v42  ;;  %vm7731_vm13 = vcmp.le.f32.partialorder %v7730_v13, 0.7853982  ;;  %v7815_v17 = vsel %vm7732_vm11, %v7814_v27, %v7813_v2  ;;  %v6858_v49 = vsub.s32 %v6854_v45, %v6857_v31  ;;  %v7817_v51 = vsel %vm7732_vm11, %v7816_v15, %v13461_v58 }
 0x4ca   :  { %7989 = dma.vmem_to_hbm [thread:$0]  %s7984_s24, 512, %s13613_s8, [#allocation7], %s8761_s26, %s8761_s26, %s8762_s27   ;;  %v7818_v19 = vsel %vm7731_vm13, %v13218_v11, %v7815_v17  ;;  %v7819_v28 = vsel %vm7731_vm13, 0, %v7817_v51  ;;  %v6850_v12 = vadd.s32 %v13524_v3, %v13538_v18  ;;  %vm7822_vm5 = vweird.f32 %v13218_v11 }
 0x4cb   :  { %8669 = vcosq.f32 %v7818_v19  ;;  %v6860_v29 = vsub.s32 0, %v6858_v49  ;;  %v7823_v62 = vadd.s32 3, %v7819_v28  ;;  %vm6796_vm4 = vcmp.lt.s32.totalorder %v13308_v10, 0  ;;  %s8763_s8 = smov [#allocation5]  }
 0x4cc   :  { %8671 = vsinq.f32 %v7818_v19  ;;  %v6880_v4 = vsub.s32 4, %v13559_v35  ;;  %vm6795_vm7 = vcmp.le.f32.partialorder %v6794_v5, 0.7853982  ;;  %s7971_s10 = sshll.u32 %s8763_s8, 4  ;;  %vm6886_vm9 = vweird.f32 %v13308_v10  ;;  %s7972_s10 = int_to_ptr.vmem [resolvable:$true] %s7971_s10 }
 0x4cd   :  { %v8107_v39 = vmin.u32 %v6860_v29, %v6858_v49  ;;  %v7824_v56 = vand.u32 3, %v7823_v62  ;;  %s8723_s11 = scalar_lea.vmem %s7972_s10, 4608  ;;  %p8728_p11 = scmp.lt.s32.totalorder %s7972_s10, %s7972_s10 }
 0x4ce   :  { %v6881_v25 = vsel %vm6796_vm4, %v6880_v4, %v13559_v35  ;;  %p8724_p10 = scmp.ne.s32.totalorder %s7972_s10, %s8723_s11  ;;  %p8729_p12 = scmp.lt.s32.totalorder %s8723_s11, %s8723_s11 }
 0x4cf   :  { %v6862_v7 = vclz %v8107_v39  ;;  %vm7829_vm0 = vcmp.eq.s32.totalorder %v7824_v56, 2  ;;  %vm7826_vm14 = vcmp.eq.s32.totalorder %v7824_v56, 0  ;;  %vm7825_vm6 = vcmp.lt.s32.totalorder %v7824_v56, 2 }
 0x4d0   :  { %v6883_v45 = vsel %vm6795_vm7, 0, %v6881_v25  ;;  %p8730_p13 = por %p8729_p12, %p8728_p11 }
 0x4d1   :  { %v8108_v32 = vadd.s32 4294967294, %v6862_v7 }
 0x4d2   :  { %p8731_p0 = pnand %p8730_p13, %p8724_p10 }
 0x4d3   :  { %vm8109_vm15 = vcmp.lt.s32.totalorder %v8108_v32, 0 }
 0x4d4   :  { %v6865_v13 = vsel %vm8109_vm15, 0, %v8108_v32 }
 0x4d5   :  { %v6866_v37 = vsub.s32 32, %v6865_v13  ;;  %v6870_v26 = vsub.s32 4294967266, %v6865_v13  ;;  %v6867_v59 = vshll.u32 %v6858_v49, %v6865_v13 }
 0x4d7   :  { %v6868_v40 = vshrl.u32 %v6850_v12, %v6866_v37  ;;  %v6871_v63 = vadd.s32 127, %v6870_v26 }
 0x4d8   :  { %v8670_v46 = vpop.eup %8669 }
 0x4d9   :  { %v8672_v58 = vpop.eup %8671  ;;  %v7830_v36 = vxor.u32 2147483648, %v8670_v46  ;;  %v6869_v38 = vor.u32 %v6868_v40, %v6867_v59  ;;  %v6872_v47 = vshll.u32 %v6871_v63, 23 }
 0x4da   :  { %v7827_v44 = vxor.u32 2147483648, %v8672_v58 }
 0x4db   :  { %v7831_v23 = vsel %vm7829_vm0, %v7830_v36, %v8672_v58  ;;  %v6873_v8 = vor.u32 4788187, %v6872_v47  ;;  %v6876_v53 = vcvt.s32.f32 %v6869_v38 }
 0x4dc   :  { %v7828_v14 = vsel %vm7826_vm14, %v8670_v46, %v7827_v44 }
 0x4dd   :  { %v7832_v3 = vsel %vm7825_vm6, %v7828_v14, %v7831_v23  ;;  %v6874_v57 = vand.u32 2147483647, %v6873_v8 }
 0x4de   :  { %v7833_v18 = vsel %vm7822_vm5, nan, %v7832_v3 }
 0x4df   :  { %v7920_v22 = vsel %vm13429_vm1, %v13197_v34, %v7833_v18  ;;  %v6877_v0 = vmul.f32 %v6876_v53, %v6874_v57  ;;  %v6887_v34 = vadd.s32 3, %v6883_v45 }
 0x4e0   :  { %7960 = vst.msk [vmem:[#allocation5 + $0x118] sm:$0xff] %vm7932_vm2, %v7920_v22 }
 0x4e1   :  { %v6878_v54 = vxor.u32 2147483648, %v6877_v0  ;;  %v6888_v16 = vand.u32 3, %v6887_v34 }
 0x4e3   :  { %v6879_v11 = vsel %vm6796_vm4, %v6878_v54, %v6877_v0  ;;  %vm6893_vm3 = vcmp.eq.s32.totalorder %v6888_v16, 2  ;;  %vm6890_vm12 = vcmp.eq.s32.totalorder %v6888_v16, 0  ;;  %vm6889_vm8 = vcmp.lt.s32.totalorder %v6888_v16, 2 }
 0x4e4   :  { %v6882_v43 = vsel %vm6795_vm7, %v13308_v10, %v6879_v11 }
 0x4e5   :  { %8673 = vcosq.f32 %v6882_v43 }
 0x4e6   :  { %8675 = vsinq.f32 %v6882_v43 }
 0x4f2   :  { %v8674_v33 = vpop.eup %8673 }
 0x4f3   :  { %v8676_v61 = vpop.eup %8675  ;;  %v6894_v20 = vxor.u32 2147483648, %v8674_v33 }
 0x4f4   :  { %v6891_v1 = vxor.u32 2147483648, %v8676_v61 }
 0x4f5   :  { %v6895_v55 = vsel %vm6893_vm3, %v6894_v20, %v8676_v61 }
 0x4f6   :  { %v6892_v5 = vsel %vm6890_vm12, %v8674_v33, %v6891_v1 }
 0x4f7   :  { %v6896_v52 = vsel %vm6889_vm8, %v6892_v5, %v6895_v55 }
 0x4f8   :  { %v6897_v50 = vsel %vm6886_vm9, nan, %v6896_v52 }
 0x4f9   :  { %v7911_v24 = vsel %vm13429_vm1, %v13247_v48, %v6897_v50 }
 0x4fa   :  { %7951 = vst.msk [vmem:[#allocation5 + $0xd0] sm:$0xff] %vm7932_vm2, %v7911_v24 }
 0x4fb   :  { %8734 = shalt.err (!%p8731_p0)
}
 0x4fc   :  { %7977 = dma.vmem_to_hbm [thread:$0]  %s7972_s10, 4608, %s13612_s7, [#allocation4], %s8750_s30, %s8750_s30, %s8751_s9  }
 0x4fd   :  { %8745 = dma.done.wait [#allocation4], 4608  }
 0x4fe   :  { %8746 = vsyncadd [#allocation4], 4294962688 }
 0x4ff   :  { %8747 = dma.done.wait [#allocation7], 512  }
 0x500   :  { %8748 = vsyncadd [#allocation7], 4294966784 }
 0x501   :  { %7996 = vsyncpa [#allocation3], 1 }
 0x502   :  { %7997 = vsyncpa [#allocation4], 1 }
 0x503   :  { %7998 = vsyncpa [#allocation7], 1 }

</bundles_post_ra>
